<compile_context>
chip_gen: v7x
topology: tpu7x:2x2x1
jax: 0.10.0
libtpu: 0.0.40
codegen_flags: <defaults>
</compile_context>

<pallas_src>
import functools

import numpy as np
import jax
import jax.numpy as jnp
from jax import lax
from jax.experimental import pallas as pl
from jax.experimental.pallas import tpu as pltpu

LANE = 128


# ----------------------------------------------------------------------------
# Structured matrices: convs / pooling / upsample expressed as lane-space
# matmuls on (rows, W*C)-shaped slabs.  Row-space work is done in-kernel with
# sublane shifts, so only lane-side matrices are built here.
# ----------------------------------------------------------------------------
def _round_up(n, m):
    return ((n + m - 1) // m) * m


def _pad_cols(a, tgt):
    return np.pad(a, ((0, 0), (0, tgt - a.shape[1])))


def _pad_rows(a, tgt):
    return np.pad(a, ((0, tgt - a.shape[0]), (0, 0)))


def conv_row_mats(k, win):
    """k: (3,3,Cin,Cout) HWIO -> (3, win*Cin, win*Cout), one matrix per dy tap.

    The dx taps and the zero 'SAME' padding along W are folded into each
    matrix; the dy taps are combined in-kernel with sublane shifts.
    """
    _, _, cin, cout = k.shape
    mats = np.zeros((3, win * cin, win * cout), np.float32)
    for dy in range(3):
        for wo in range(win):
            for dx in range(3):
                wi = wo + dx - 1
                if 0 <= wi < win:
                    mats[dy, wi * cin:(wi + 1) * cin,
                         wo * cout:(wo + 1) * cout] = k[dy, dx]
    return mats


def pool_col_sel(w, parity):
    m = np.zeros((w, w // 2), np.float32)
    m[2 * np.arange(w // 2) + parity, np.arange(w // 2)] = 1.0
    return m


def up_col_mat(w):
    m = np.zeros((w // 2, w), np.float32)
    m[np.arange(w) // 2, np.arange(w)] = 1.0
    return m


def build_params(k1, b1, k2, b2, k3, b3, h, w, c, f):
    k1, k2, k3 = (np.asarray(a, np.float32) for a in (k1, k2, k3))
    b1, b2, b3 = (np.asarray(a, np.float32) for a in (b1, b2, b3))
    w2 = w // 2

    wc_p = _round_up(w * c, LANE)          # padded residual lane width
    enc_p = _round_up(w * f, LANE)         # padded encoder lane width
    dwn_p = _round_up(w2 * f, LANE)        # padded column-pooled lane width
    mid_p = _round_up(w2 * 2 * f, LANE)    # padded bottleneck lane width
    up_p = _round_up(w * 2 * f, LANE)      # padded upsampled lane width

    # encoder conv: dy taps fused along N, K padded to the residual lane width
    m1 = conv_row_mats(k1, w)                                    # (3, w*c, w*f)
    w1f = np.concatenate([_pad_cols(m1[d], enc_p) for d in range(3)], axis=1)
    w1f = _pad_rows(w1f, wc_p)                                   # (wc_p, 3*enc_p)
    b1r = _pad_cols(np.tile(b1, w)[None, :], enc_p)              # (1, enc_p)

    # 2x2 max-pool along lanes: even/odd column selections fused along N
    eye_f = np.eye(f, dtype=np.float32)
    pc = [_pad_cols(np.kron(pool_col_sel(w, p), eye_f), dwn_p) for p in (0, 1)]
    poolcf = _pad_rows(np.concatenate(pc, axis=1), enc_p)        # (enc_p, 2*dwn_p)

    # bottleneck conv (runs on the row-replicated pooled map)
    m2 = conv_row_mats(k2, w2)                                   # (3, w2*f, w2*2f)
    w2f = np.concatenate([_pad_cols(m2[d], mid_p) for d in range(3)], axis=1)
    w2f = _pad_rows(w2f, dwn_p)                                  # (dwn_p, 3*mid_p)
    b2r = _pad_cols(np.tile(b2, w2)[None, :], mid_p)             # (1, mid_p)

    # nearest 2x upsample along lanes
    rw = np.kron(up_col_mat(w), np.eye(2 * f, dtype=np.float32))  # (w2*2f, w*2f)
    rw = _pad_cols(_pad_rows(rw, mid_p), up_p)                   # (mid_p, up_p)

    # decoder conv on concat([enc, up]): skip split fused along K (linearity),
    # dy taps fused along N, each dy block padded to a 128-lane boundary
    m3a = conv_row_mats(k3[:, :, :f, :], w)                      # (3, w*f,  w*c)
    m3b = conv_row_mats(k3[:, :, f:, :], w)                      # (3, w*2f, w*c)
    blocks = []
    for d in range(3):
        blk = np.concatenate([_pad_rows(m3a[d], enc_p),
                              _pad_rows(m3b[d], up_p)], axis=0)
        blocks.append(_pad_cols(blk, wc_p))
    w3f = np.concatenate(blocks, axis=1)                         # (enc_p+up_p, 3*wc_p)
    b3r = _pad_cols(np.tile(b3, w)[None, :], wc_p)               # (1, wc_p)

    arrs = (w1f, poolcf, w2f, rw, w3f, b1r, b2r, b3r)
    return [jnp.asarray(a, jnp.float32) for a in arrs]


# ----------------------------------------------------------------------------
# Pallas kernel: full repeated-residual UNet, Bt images per grid step stacked
# along sublanes (rows = Bt*H), lane-dense 128-wide residual slab.
# ----------------------------------------------------------------------------
def _unet_kernel(x_ref, w1_ref, poolc_ref, w2_ref, rw_ref, w3_ref,
                 b1_ref, b2_ref, b3_ref, o_ref, stage_ref,
                 *, num_layers, img_h):
    f32 = jnp.float32
    m = x_ref.shape[0]                      # Bt * H rows
    dwn_p = poolc_ref.shape[1] // 2         # padded column-pooled lane width

    # Kernel is latency/overhead bound at these sizes, not MXU-pass bound, so
    # full-accuracy f32 GEMMs are kept (precision is explicit, not global).
    prec = lax.Precision.HIGHEST

    def mm(a, b):
        return jnp.dot(a, b, preferred_element_type=f32, precision=prec)

    # Row-index masks (hoisted): zero rows whose shifted source would belong to
    # a different image of the sublane-stacked block.
    row = lax.broadcasted_iota(jnp.int32, (m, 1), 0)
    rmod = row % img_h
    top1 = jnp.where(rmod >= 1, 1.0, 0.0)
    bot1 = jnp.where(rmod <= img_h - 2, 1.0, 0.0)
    top2 = jnp.where(rmod >= 2, 1.0, 0.0)
    bot2 = jnp.where(rmod <= img_h - 3, 1.0, 0.0)
    even = jnp.where(rmod % 2 == 0, 1.0, 0.0)
    odd = 1.0 - even

    # Staging buffer with 2 zero pad rows on top/bottom; only rows [2, 2+m) are
    # ever written, so the pads stay zero and give 'SAME' padding for free.
    stage_ref[...] = jnp.zeros(stage_ref.shape, f32)

    def shifted(lane_off, width, row_shift, mask):
        # out[h] = staged[h - row_shift]; pads give zeros, mask handles
        # internal image boundaries within the stacked block.
        v = stage_ref[pl.ds(2 - row_shift, m), pl.ds(lane_off, width)]
        return v * mask

    def conv3x3(inp, w_ref, bias, shift, mtop, mbot):
        # one fused GEMM over the 3 dy taps, then sublane shifts + add (VPU/XLU
        # + load/store slots; no permutation matmuls on the MXU)
        t = mm(inp, w_ref[...])                       # (m, 3*nb)
        nb = w_ref.shape[1] // 3
        stage_ref[pl.ds(2, m), pl.ds(0, 3 * nb)] = t
        return (t[:, nb:2 * nb]                       # dy = 1 (no shift)
                + shifted(0, nb, shift, mtop)         # dy = 0
                + shifted(2 * nb, nb, -shift, mbot)   # dy = 2
                + bias)

    b1 = b1_ref[...]
    b2 = b2_ref[...]
    b3 = b3_ref[...]

    def layer(_, x):
        # encoder conv + relu
        enc = jnp.maximum(conv3x3(x, w1_ref, b1, 1, top1, bot1), 0.0)
        # 2x2 max-pool: columns via one fused GEMM + aligned lane-split max,
        # rows via a sublane pair-max that leaves rows replicated in pairs
        cm = mm(enc, poolc_ref[...])
        cmx = jnp.maximum(cm[:, :dwn_p], cm[:, dwn_p:])
        stage_ref[pl.ds(2, m), pl.ds(0, dwn_p)] = cmx
        nxt = stage_ref[pl.ds(3, m), pl.ds(0, dwn_p)]        # cmx[h+1]
        prv = stage_ref[pl.ds(1, m), pl.ds(0, dwn_p)]        # cmx[h-1]
        down = even * jnp.maximum(cmx, nxt) + odd * jnp.maximum(cmx, prv)
        # bottleneck conv + relu on the row-replicated map: the dy taps become
        # +/-2-row shifts and the later row-upsample is a no-op
        mid = jnp.maximum(conv3x3(down, w2_ref, b2, 2, top2, bot2), 0.0)
        # nearest 2x upsample: rows already replicated, lanes via one GEMM
        up = mm(mid, rw_ref[...])
        # decoder conv on concat([enc, up]) (skip split + dy taps fused in w3)
        dec = conv3x3(jnp.concatenate([enc, up], axis=1), w3_ref, b3,
                      1, top1, bot1)
        # residual wrapper: x = base(x) + x
        return x + dec

    # fori_loop keeps vreg live ranges bounded if num_layers grows
    o_ref[...] = lax.fori_loop(0, num_layers, layer, x_ref[...])


def unet_forward_nchw(x_nchw, k1, b1, k2, b2, k3, b3, num_layers):
    b, c, h, w = x_nchw.shape
    f = k1.shape[-1]
    assert h % 2 == 0 and w % 2 == 0

    params = build_params(k1, b1, k2, b2, k3, b3, h, w, c, f)
    w1f, poolcf, w2f, rw, w3f, b1r, b2r, b3r = params
    wc = w * c
    wc_p = b3r.shape[1]                       # padded (lane-dense) slab width
    stage_w = max(w1f.shape[1], w2f.shape[1], w3f.shape[1],
                  poolcf.shape[1] // 2)

    # Images per grid step, stacked along sublanes so M = bt*h fills MXU rows.
    bt = max(1, min(b, 256 // h))
    while b % bt:
        bt -= 1
    rows = bt * h

    # NCHW -> (B*H, W*C) slabs (lane = w*C + c), zero-padded to 128 lanes so
    # the residual/output slab is lane-dense (full vregs, unmasked stores).
    x2d = (jnp.transpose(x_nchw, (0, 2, 3, 1))
           .reshape(b * h, wc).astype(jnp.float32))
    x2d = jnp.pad(x2d, ((0, 0), (0, wc_p - wc)))

    kern = functools.partial(_unet_kernel, num_layers=num_layers, img_h=h)
    # Whole-array VMEM refs for the fixed weights: no pointless double buffer.
    vmem_spec = pl.BlockSpec(memory_space=pltpu.MemorySpace.VMEM)

    out = pl.pallas_call(
        kern,
        out_shape=jax.ShapeDtypeStruct((b * h, wc_p), jnp.float32),
        grid=(b // bt,),
        in_specs=[pl.BlockSpec((rows, wc_p), lambda i: (i, 0))]
                 + [vmem_spec] * 8,
        out_specs=pl.BlockSpec((rows, wc_p), lambda i: (i, 0)),
        scratch_shapes=[pltpu.VMEM((rows + 4, stage_w), jnp.float32)],
        compiler_params=pltpu.CompilerParams(
            dimension_semantics=("parallel",)),
    )(x2d, *params)

    out = out[:, :wc].reshape(b, h, w, c)
    return jnp.transpose(out, (0, 3, 1, 2))


# ----------------------------------------------------------------------------
# Pure-JAX reference (NHWC convs) for correctness checking.
# ----------------------------------------------------------------------------
def _conv_ref(x, k, bias):
    y = lax.conv_general_dilated(x, k, (1, 1), "SAME",
                                 dimension_numbers=("NHWC", "HWIO", "NHWC"),
                                 precision=lax.Precision.HIGHEST)
    return y + bias


def ref_forward_nchw(x_nchw, k1, b1, k2, b2, k3, b3, num_layers):
    x = jnp.transpose(x_nchw, (0, 2, 3, 1))

    def base(x):
        enc = jax.nn.relu(_conv_ref(x, k1, b1))
        down = lax.reduce_window(enc, -jnp.inf, lax.max,
                                 (1, 2, 2, 1), (1, 2, 2, 1), "VALID")
        mid = jax.nn.relu(_conv_ref(down, k2, b2))
        up = jnp.repeat(jnp.repeat(mid, 2, axis=1), 2, axis=2)
        cat = jnp.concatenate([enc, up], axis=-1)
        return _conv_ref(cat, k3, b3)

    for _ in range(num_layers):
        x = base(x) + x
    return jnp.transpose(x, (0, 3, 1, 2))


# ----------------------------------------------------------------------------
if __name__ == "__main__":
    key = jax.random.PRNGKey(0)
    B, C, H, W = 2, 4, 16, 16
    F = 8
    NUM_LAYERS = 3

    ks = jax.random.split(key, 7)
    x = jax.random.normal(ks[0], (B, C, H, W), jnp.float32)           # NCHW input
    k1 = jax.random.normal(ks[1], (3, 3, C, F), jnp.float32) * 0.1
    b1 = jax.random.normal(ks[2], (F,), jnp.float32) * 0.1
    k2 = jax.random.normal(ks[3], (3, 3, F, 2 * F), jnp.float32) * 0.1
    b2 = jax.random.normal(ks[4], (2 * F,), jnp.float32) * 0.1
    k3 = jax.random.normal(ks[5], (3, 3, 3 * F, C), jnp.float32) * 0.1
    b3 = jax.random.normal(ks[6], (C,), jnp.float32) * 0.1

    out = unet_forward_nchw(x, k1, b1, k2, b2, k3, b3, NUM_LAYERS)
    out = jax.block_until_ready(out)

    ref = jax.block_until_ready(
        ref_forward_nchw(x, k1, b1, k2, b2, k3, b3, NUM_LAYERS))

    np.testing.assert_allclose(np.asarray(out), np.asarray(ref),
                               rtol=2e-3, atol=2e-3)
    assert out.shape == (B, C, H, W) and out.dtype == jnp.float32
    print("KERNEL_OK")
</pallas_src>

<mosaic_0001>
module attributes {stable_mosaic.version = 11 : i64} {
  func.func @_unet_kernel(%arg0: i32, %arg1: memref<32x128xf32, #tpu.memory_space<vmem>>, %arg2: memref<128x384xf32, #tpu.memory_space<vmem>>, %arg3: memref<128x256xf32, #tpu.memory_space<vmem>>, %arg4: memref<128x384xf32, #tpu.memory_space<vmem>>, %arg5: memref<128x256xf32, #tpu.memory_space<vmem>>, %arg6: memref<384x384xf32, #tpu.memory_space<vmem>>, %arg7: memref<1x128xf32, #tpu.memory_space<vmem>>, %arg8: memref<1x128xf32, #tpu.memory_space<vmem>>, %arg9: memref<1x128xf32, #tpu.memory_space<vmem>>, %arg10: memref<32x128xf32, #tpu.memory_space<vmem>>, %arg11: memref<36x384xf32, #tpu.memory_space<vmem>>) attributes {dimension_semantics = [#tpu.dimension_semantics<parallel>], iteration_bounds = array<i64: 1>, scalar_prefetch = 0 : i64, scratch_operands = 1 : i64, tpu.core_type = #tpu.core_type<tc>, window_params = [{transform_indices = @transform_0, window_bounds = array<i64: 32, 128>}, {pipeline_mode = #tpu.pipeline_mode<synchronous>, transform_indices = @transform_1, window_bounds = array<i64: 128, 384>}, {pipeline_mode = #tpu.pipeline_mode<synchronous>, transform_indices = @transform_2, window_bounds = array<i64: 128, 256>}, {pipeline_mode = #tpu.pipeline_mode<synchronous>, transform_indices = @transform_3, window_bounds = array<i64: 128, 384>}, {pipeline_mode = #tpu.pipeline_mode<synchronous>, transform_indices = @transform_4, window_bounds = array<i64: 128, 256>}, {pipeline_mode = #tpu.pipeline_mode<synchronous>, transform_indices = @transform_5, window_bounds = array<i64: 384, 384>}, {pipeline_mode = #tpu.pipeline_mode<synchronous>, transform_indices = @transform_6, window_bounds = array<i64: 1, 128>}, {pipeline_mode = #tpu.pipeline_mode<synchronous>, transform_indices = @transform_7, window_bounds = array<i64: 1, 128>}, {pipeline_mode = #tpu.pipeline_mode<synchronous>, transform_indices = @transform_8, window_bounds = array<i64: 1, 128>}, {transform_indices = @transform_9, window_bounds = array<i64: 32, 128>}]} {
    %0 = tpu.iota {dimensions = array<i32: 0>} : vector<32x1xi32>
    %c16_i32 = arith.constant 16 : i32
    %c0_i32 = arith.constant 0 : i32
    %1 = arith.cmpi eq, %c16_i32, %c0_i32 : i32
    %c1_i32 = arith.constant 1 : i32
    %2 = arith.select %1, %c1_i32, %c16_i32 : i32
    %3 = vector.broadcast %2 : i32 to vector<32x1xi32>
    %4 = arith.remsi %0, %3 : vector<32x1xi32>
    %c0_i32_0 = arith.constant 0 : i32
    %5 = vector.broadcast %c0_i32_0 : i32 to vector<32x1xi32>
    %6 = arith.cmpi ne, %4, %5 : vector<32x1xi32>
    %c0_i32_1 = arith.constant 0 : i32
    %7 = vector.broadcast %c0_i32_1 : i32 to vector<32x1xi32>
    %8 = arith.cmpi slt, %4, %7 : vector<32x1xi32>
    %c0_i32_2 = arith.constant 0 : i32
    %9 = arith.cmpi slt, %2, %c0_i32_2 : i32
    %10 = vector.broadcast %9 : i1 to vector<32x1xi1>
    %11 = vector.broadcast %10 : vector<32x1xi1> to vector<32x1xi1>
    %12 = arith.xori %8, %11 : vector<32x1xi1>
    %13 = arith.andi %12, %6 : vector<32x1xi1>
    %14 = vector.broadcast %2 : i32 to vector<32x1xi32>
    %15 = arith.addi %4, %14 : vector<32x1xi32>
    %16 = arith.select %13, %15, %4 : vector<32x1xi1>, vector<32x1xi32>
    %c1_i32_3 = arith.constant 1 : i32
    %17 = vector.broadcast %c1_i32_3 : i32 to vector<32x1xi32>
    %18 = arith.cmpi sge, %16, %17 : vector<32x1xi32>
    %cst = arith.constant 1.000000e+00 : f32
    %cst_4 = arith.constant 0.000000e+00 : f32
    %19 = vector.broadcast %cst : f32 to vector<32x1xf32>
    %20 = vector.broadcast %cst_4 : f32 to vector<32x1xf32>
    %21 = arith.select %18, %19, %20 : vector<32x1xi1>, vector<32x1xf32>
    %c14_i32 = arith.constant 14 : i32
    %22 = vector.broadcast %c14_i32 : i32 to vector<32x1xi32>
    %23 = arith.cmpi sle, %16, %22 : vector<32x1xi32>
    %cst_5 = arith.constant 1.000000e+00 : f32
    %cst_6 = arith.constant 0.000000e+00 : f32
    %24 = vector.broadcast %cst_5 : f32 to vector<32x1xf32>
    %25 = vector.broadcast %cst_6 : f32 to vector<32x1xf32>
    %26 = arith.select %23, %24, %25 : vector<32x1xi1>, vector<32x1xf32>
    %c2_i32 = arith.constant 2 : i32
    %27 = vector.broadcast %c2_i32 : i32 to vector<32x1xi32>
    %28 = arith.cmpi sge, %16, %27 : vector<32x1xi32>
    %cst_7 = arith.constant 1.000000e+00 : f32
    %cst_8 = arith.constant 0.000000e+00 : f32
    %29 = vector.broadcast %cst_7 : f32 to vector<32x1xf32>
    %30 = vector.broadcast %cst_8 : f32 to vector<32x1xf32>
    %31 = arith.select %28, %29, %30 : vector<32x1xi1>, vector<32x1xf32>
    %c13_i32 = arith.constant 13 : i32
    %32 = vector.broadcast %c13_i32 : i32 to vector<32x1xi32>
    %33 = arith.cmpi sle, %16, %32 : vector<32x1xi32>
    %cst_9 = arith.constant 1.000000e+00 : f32
    %cst_10 = arith.constant 0.000000e+00 : f32
    %34 = vector.broadcast %cst_9 : f32 to vector<32x1xf32>
    %35 = vector.broadcast %cst_10 : f32 to vector<32x1xf32>
    %36 = arith.select %33, %34, %35 : vector<32x1xi1>, vector<32x1xf32>
    %c2_i32_11 = arith.constant 2 : i32
    %c0_i32_12 = arith.constant 0 : i32
    %37 = arith.cmpi eq, %c2_i32_11, %c0_i32_12 : i32
    %c1_i32_13 = arith.constant 1 : i32
    %38 = arith.select %37, %c1_i32_13, %c2_i32_11 : i32
    %39 = vector.broadcast %38 : i32 to vector<32x1xi32>
    %40 = arith.remsi %16, %39 : vector<32x1xi32>
    %c0_i32_14 = arith.constant 0 : i32
    %41 = vector.broadcast %c0_i32_14 : i32 to vector<32x1xi32>
    %42 = arith.cmpi ne, %40, %41 : vector<32x1xi32>
    %c0_i32_15 = arith.constant 0 : i32
    %43 = vector.broadcast %c0_i32_15 : i32 to vector<32x1xi32>
    %44 = arith.cmpi slt, %40, %43 : vector<32x1xi32>
    %c0_i32_16 = arith.constant 0 : i32
    %45 = arith.cmpi slt, %38, %c0_i32_16 : i32
    %46 = vector.broadcast %45 : i1 to vector<32x1xi1>
    %47 = vector.broadcast %46 : vector<32x1xi1> to vector<32x1xi1>
    %48 = arith.xori %44, %47 : vector<32x1xi1>
    %49 = arith.andi %48, %42 : vector<32x1xi1>
    %50 = vector.broadcast %38 : i32 to vector<32x1xi32>
    %51 = arith.addi %40, %50 : vector<32x1xi32>
    %52 = arith.select %49, %51, %40 : vector<32x1xi1>, vector<32x1xi32>
    %c0_i32_17 = arith.constant 0 : i32
    %53 = vector.broadcast %c0_i32_17 : i32 to vector<32x1xi32>
    %54 = arith.cmpi eq, %52, %53 : vector<32x1xi32>
    %cst_18 = arith.constant 1.000000e+00 : f32
    %cst_19 = arith.constant 0.000000e+00 : f32
    %55 = vector.broadcast %cst_18 : f32 to vector<32x1xf32>
    %56 = vector.broadcast %cst_19 : f32 to vector<32x1xf32>
    %57 = arith.select %54, %55, %56 : vector<32x1xi1>, vector<32x1xf32>
    %cst_20 = arith.constant 1.000000e+00 : f32
    %58 = vector.broadcast %cst_20 : f32 to vector<32x1xf32>
    %59 = arith.subf %58, %57 : vector<32x1xf32>
    %cst_21 = arith.constant 0.000000e+00 : f32
    %60 = vector.broadcast %cst_21 : f32 to vector<36x384xf32>
    %c0 = arith.constant 0 : index
    %c0_22 = arith.constant 0 : index
    %61 = vector.load %arg11[%c0, %c0_22] : memref<36x384xf32, #tpu.memory_space<vmem>>, vector<36x384xf32>
    tpu.vector_store %arg11[%c0, %c0_22], %60 {strides = array<i32>} : memref<36x384xf32, #tpu.memory_space<vmem>>, vector<36x384xf32>,
    %c0_23 = arith.constant 0 : index
    %c0_24 = arith.constant 0 : index
    %62 = vector.load %arg7[%c0_23, %c0_24] : memref<1x128xf32, #tpu.memory_space<vmem>>, vector<1x128xf32>
    %c0_25 = arith.constant 0 : index
    %c0_26 = arith.constant 0 : index
    %63 = vector.load %arg8[%c0_25, %c0_26] : memref<1x128xf32, #tpu.memory_space<vmem>>, vector<1x128xf32>
    %c0_27 = arith.constant 0 : index
    %c0_28 = arith.constant 0 : index
    %64 = vector.load %arg9[%c0_27, %c0_28] : memref<1x128xf32, #tpu.memory_space<vmem>>, vector<1x128xf32>
    %c0_29 = arith.constant 0 : index
    %c0_30 = arith.constant 0 : index
    %65 = vector.load %arg1[%c0_29, %c0_30] : memref<32x128xf32, #tpu.memory_space<vmem>>, vector<32x128xf32>
    %c0_i32_31 = arith.constant 0 : i32
    %c3_i32 = arith.constant 3 : i32
    %66 = arith.addi %c0_i32_31, %c3_i32 : i32
    %c1_i32_32 = arith.constant 1 : i32
    %67 = scf.for %arg12 = %c0_i32_31 to %66 step %c1_i32_32 iter_args(%arg13 = %65) -> (vector<32x128xf32>)  : i32 {
      %c0_35 = arith.constant 0 : index
      %c0_36 = arith.constant 0 : index
      %69 = vector.load %arg2[%c0_35, %c0_36] : memref<128x384xf32, #tpu.memory_space<vmem>>, vector<128x384xf32>
      %cst_37 = arith.constant dense<0.000000e+00> : vector<32x384xf32>
      %70 = tpu.matmul %arg13, %69, %cst_37 {dimension_numbers = #tpu.dot_dimension_numbers<[1], [0], [0], [1], [0, 0, 1, 1], [], []>, precision = #tpu.contract_precision<fp32>} : vector<32x128xf32>, vector<128x384xf32>, vector<32x384xf32> -> vector<32x384xf32>
      %c2 = arith.constant 2 : index
      %c0_38 = arith.constant 0 : index
      %71 = vector.load %arg11[%c2, %c0_38] : memref<36x384xf32, #tpu.memory_space<vmem>>, vector<32x384xf32>
      tpu.vector_store %arg11[%c2, %c0_38], %70 {strides = array<i32>} : memref<36x384xf32, #tpu.memory_space<vmem>>, vector<32x384xf32>,
      %72 = vector.extract_strided_slice %70 {offsets = [0, 128], sizes = [32, 128], strides = [1, 1]} : vector<32x384xf32> to vector<32x128xf32>
      %c1 = arith.constant 1 : index
      %c0_39 = arith.constant 0 : index
      %73 = vector.load %arg11[%c1, %c0_39] : memref<36x384xf32, #tpu.memory_space<vmem>>, vector<32x128xf32>
      %74 = vector.broadcast %21 : vector<32x1xf32> to vector<32x128xf32>
      %75 = arith.mulf %73, %74 : vector<32x128xf32>
      %76 = arith.addf %72, %75 : vector<32x128xf32>
      %c3 = arith.constant 3 : index
      %c256 = arith.constant 256 : index
      %77 = vector.load %arg11[%c3, %c256] : memref<36x384xf32, #tpu.memory_space<vmem>>, vector<32x128xf32>
      %78 = vector.broadcast %26 : vector<32x1xf32> to vector<32x128xf32>
      %79 = arith.mulf %77, %78 : vector<32x128xf32>
      %80 = arith.addf %76, %79 : vector<32x128xf32>
      %81 = vector.broadcast %62 : vector<1x128xf32> to vector<32x128xf32>
      %82 = arith.addf %80, %81 : vector<32x128xf32>
      %cst_40 = arith.constant 0.000000e+00 : f32
      %83 = vector.broadcast %cst_40 : f32 to vector<32x128xf32>
      %84 = arith.maximumf %82, %83 : vector<32x128xf32>
      %c0_41 = arith.constant 0 : index
      %c0_42 = arith.constant 0 : index
      %85 = vector.load %arg3[%c0_41, %c0_42] : memref<128x256xf32, #tpu.memory_space<vmem>>, vector<128x256xf32>
      %cst_43 = arith.constant dense<0.000000e+00> : vector<32x256xf32>
      %86 = tpu.matmul %84, %85, %cst_43 {dimension_numbers = #tpu.dot_dimension_numbers<[1], [0], [0], [1], [0, 0, 1, 1], [], []>, precision = #tpu.contract_precision<fp32>} : vector<32x128xf32>, vector<128x256xf32>, vector<32x256xf32> -> vector<32x256xf32>
      %87 = vector.extract_strided_slice %86 {offsets = [0, 0], sizes = [32, 128], strides = [1, 1]} : vector<32x256xf32> to vector<32x128xf32>
      %88 = vector.extract_strided_slice %86 {offsets = [0, 128], sizes = [32, 128], strides = [1, 1]} : vector<32x256xf32> to vector<32x128xf32>
      %89 = arith.maximumf %87, %88 : vector<32x128xf32>
      %c2_44 = arith.constant 2 : index
      %c0_45 = arith.constant 0 : index
      %90 = vector.load %arg11[%c2_44, %c0_45] : memref<36x384xf32, #tpu.memory_space<vmem>>, vector<32x128xf32>
      tpu.vector_store %arg11[%c2_44, %c0_45], %89 {strides = array<i32>} : memref<36x384xf32, #tpu.memory_space<vmem>>, vector<32x128xf32>,
      %c3_46 = arith.constant 3 : index
      %c0_47 = arith.constant 0 : index
      %91 = vector.load %arg11[%c3_46, %c0_47] : memref<36x384xf32, #tpu.memory_space<vmem>>, vector<32x128xf32>
      %c1_48 = arith.constant 1 : index
      %c0_49 = arith.constant 0 : index
      %92 = vector.load %arg11[%c1_48, %c0_49] : memref<36x384xf32, #tpu.memory_space<vmem>>, vector<32x128xf32>
      %93 = arith.maximumf %89, %91 : vector<32x128xf32>
      %94 = vector.broadcast %57 : vector<32x1xf32> to vector<32x128xf32>
      %95 = arith.mulf %94, %93 : vector<32x128xf32>
      %96 = arith.maximumf %89, %92 : vector<32x128xf32>
      %97 = vector.broadcast %59 : vector<32x1xf32> to vector<32x128xf32>
      %98 = arith.mulf %97, %96 : vector<32x128xf32>
      %99 = arith.addf %95, %98 : vector<32x128xf32>
      %c0_50 = arith.constant 0 : index
      %c0_51 = arith.constant 0 : index
      %100 = vector.load %arg4[%c0_50, %c0_51] : memref<128x384xf32, #tpu.memory_space<vmem>>, vector<128x384xf32>
      %cst_52 = arith.constant dense<0.000000e+00> : vector<32x384xf32>
      %101 = tpu.matmul %99, %100, %cst_52 {dimension_numbers = #tpu.dot_dimension_numbers<[1], [0], [0], [1], [0, 0, 1, 1], [], []>, precision = #tpu.contract_precision<fp32>} : vector<32x128xf32>, vector<128x384xf32>, vector<32x384xf32> -> vector<32x384xf32>
      %c2_53 = arith.constant 2 : index
      %c0_54 = arith.constant 0 : index
      %102 = vector.load %arg11[%c2_53, %c0_54] : memref<36x384xf32, #tpu.memory_space<vmem>>, vector<32x384xf32>
      tpu.vector_store %arg11[%c2_53, %c0_54], %101 {strides = array<i32>} : memref<36x384xf32, #tpu.memory_space<vmem>>, vector<32x384xf32>,
      %103 = vector.extract_strided_slice %101 {offsets = [0, 128], sizes = [32, 128], strides = [1, 1]} : vector<32x384xf32> to vector<32x128xf32>
      %c0_55 = arith.constant 0 : index
      %c0_56 = arith.constant 0 : index
      %104 = vector.load %arg11[%c0_55, %c0_56] : memref<36x384xf32, #tpu.memory_space<vmem>>, vector<32x128xf32>
      %105 = vector.broadcast %31 : vector<32x1xf32> to vector<32x128xf32>
      %106 = arith.mulf %104, %105 : vector<32x128xf32>
      %107 = arith.addf %103, %106 : vector<32x128xf32>
      %c4 = arith.constant 4 : index
      %c256_57 = arith.constant 256 : index
      %108 = vector.load %arg11[%c4, %c256_57] : memref<36x384xf32, #tpu.memory_space<vmem>>, vector<32x128xf32>
      %109 = vector.broadcast %36 : vector<32x1xf32> to vector<32x128xf32>
      %110 = arith.mulf %108, %109 : vector<32x128xf32>
      %111 = arith.addf %107, %110 : vector<32x128xf32>
      %112 = vector.broadcast %63 : vector<1x128xf32> to vector<32x128xf32>
      %113 = arith.addf %111, %112 : vector<32x128xf32>
      %cst_58 = arith.constant 0.000000e+00 : f32
      %114 = vector.broadcast %cst_58 : f32 to vector<32x128xf32>
      %115 = arith.maximumf %113, %114 : vector<32x128xf32>
      %c0_59 = arith.constant 0 : index
      %c0_60 = arith.constant 0 : index
      %116 = vector.load %arg5[%c0_59, %c0_60] : memref<128x256xf32, #tpu.memory_space<vmem>>, vector<128x256xf32>
      %cst_61 = arith.constant dense<0.000000e+00> : vector<32x256xf32>
      %117 = tpu.matmul %115, %116, %cst_61 {dimension_numbers = #tpu.dot_dimension_numbers<[1], [0], [0], [1], [0, 0, 1, 1], [], []>, precision = #tpu.contract_precision<fp32>} : vector<32x128xf32>, vector<128x256xf32>, vector<32x256xf32> -> vector<32x256xf32>
      %118 = tpu.concatenate %84, %117 in 1 : vector<32x128xf32>, vector<32x256xf32> -> vector<32x384xf32>
      %c0_62 = arith.constant 0 : index
      %c0_63 = arith.constant 0 : index
      %119 = vector.load %arg6[%c0_62, %c0_63] : memref<384x384xf32, #tpu.memory_space<vmem>>, vector<384x384xf32>
      %cst_64 = arith.constant dense<0.000000e+00> : vector<32x384xf32>
      %120 = tpu.matmul %118, %119, %cst_64 {dimension_numbers = #tpu.dot_dimension_numbers<[1], [0], [0], [1], [0, 0, 1, 1], [], []>, precision = #tpu.contract_precision<fp32>} : vector<32x384xf32>, vector<384x384xf32>, vector<32x384xf32> -> vector<32x384xf32>
      %c2_65 = arith.constant 2 : index
      %c0_66 = arith.constant 0 : index
      %121 = vector.load %arg11[%c2_65, %c0_66] : memref<36x384xf32, #tpu.memory_space<vmem>>, vector<32x384xf32>
      tpu.vector_store %arg11[%c2_65, %c0_66], %120 {strides = array<i32>} : memref<36x384xf32, #tpu.memory_space<vmem>>, vector<32x384xf32>,
      %122 = vector.extract_strided_slice %120 {offsets = [0, 128], sizes = [32, 128], strides = [1, 1]} : vector<32x384xf32> to vector<32x128xf32>
      %c1_67 = arith.constant 1 : index
      %c0_68 = arith.constant 0 : index
      %123 = vector.load %arg11[%c1_67, %c0_68] : memref<36x384xf32, #tpu.memory_space<vmem>>, vector<32x128xf32>
      %124 = vector.broadcast %21 : vector<32x1xf32> to vector<32x128xf32>
      %125 = arith.mulf %123, %124 : vector<32x128xf32>
      %126 = arith.addf %122, %125 : vector<32x128xf32>
      %c3_69 = arith.constant 3 : index
      %c256_70 = arith.constant 256 : index
      %127 = vector.load %arg11[%c3_69, %c256_70] : memref<36x384xf32, #tpu.memory_space<vmem>>, vector<32x128xf32>
      %128 = vector.broadcast %26 : vector<32x1xf32> to vector<32x128xf32>
      %129 = arith.mulf %127, %128 : vector<32x128xf32>
      %130 = arith.addf %126, %129 : vector<32x128xf32>
      %131 = vector.broadcast %64 : vector<1x128xf32> to vector<32x128xf32>
      %132 = arith.addf %130, %131 : vector<32x128xf32>
      %133 = arith.addf %arg13, %132 : vector<32x128xf32>
      scf.yield %133 : vector<32x128xf32>
    }
    %c0_33 = arith.constant 0 : index
    %c0_34 = arith.constant 0 : index
    %68 = vector.load %arg10[%c0_33, %c0_34] : memref<32x128xf32, #tpu.memory_space<vmem>>, vector<32x128xf32>
    tpu.vector_store %arg10[%c0_33, %c0_34], %67 {strides = array<i32>} : memref<32x128xf32, #tpu.memory_space<vmem>>, vector<32x128xf32>,
    return
  }
  func.func @transform_0(%arg0: i32) -> (i32, i32) {
    %c0_i32 = arith.constant 0 : i32
    %c0_i32_0 = arith.constant 0 : i32
    return %arg0, %c0_i32 : i32, i32
  }
  func.func @transform_1(%arg0: i32) -> (i32, i32) {
    %c0_i32 = arith.constant 0 : i32
    %c0_i32_0 = arith.constant 0 : i32
    %c0_i32_1 = arith.constant 0 : i32
    return %c0_i32, %c0_i32_0 : i32, i32
  }
  func.func @transform_2(%arg0: i32) -> (i32, i32) {
    %c0_i32 = arith.constant 0 : i32
    %c0_i32_0 = arith.constant 0 : i32
    %c0_i32_1 = arith.constant 0 : i32
    return %c0_i32, %c0_i32_0 : i32, i32
  }
  func.func @transform_3(%arg0: i32) -> (i32, i32) {
    %c0_i32 = arith.constant 0 : i32
    %c0_i32_0 = arith.constant 0 : i32
    %c0_i32_1 = arith.constant 0 : i32
    return %c0_i32, %c0_i32_0 : i32, i32
  }
  func.func @transform_4(%arg0: i32) -> (i32, i32) {
    %c0_i32 = arith.constant 0 : i32
    %c0_i32_0 = arith.constant 0 : i32
    %c0_i32_1 = arith.constant 0 : i32
    return %c0_i32, %c0_i32_0 : i32, i32
  }
  func.func @transform_5(%arg0: i32) -> (i32, i32) {
    %c0_i32 = arith.constant 0 : i32
    %c0_i32_0 = arith.constant 0 : i32
    %c0_i32_1 = arith.constant 0 : i32
    return %c0_i32, %c0_i32_0 : i32, i32
  }
  func.func @transform_6(%arg0: i32) -> (i32, i32) {
    %c0_i32 = arith.constant 0 : i32
    %c0_i32_0 = arith.constant 0 : i32
    %c0_i32_1 = arith.constant 0 : i32
    return %c0_i32, %c0_i32_0 : i32, i32
  }
  func.func @transform_7(%arg0: i32) -> (i32, i32) {
    %c0_i32 = arith.constant 0 : i32
    %c0_i32_0 = arith.constant 0 : i32
    %c0_i32_1 = arith.constant 0 : i32
    return %c0_i32, %c0_i32_0 : i32, i32
  }
  func.func @transform_8(%arg0: i32) -> (i32, i32) {
    %c0_i32 = arith.constant 0 : i32
    %c0_i32_0 = arith.constant 0 : i32
    %c0_i32_1 = arith.constant 0 : i32
    return %c0_i32, %c0_i32_0 : i32, i32
  }
  func.func @transform_9(%arg0: i32) -> (i32, i32) {
    %c0_i32 = arith.constant 0 : i32
    %c0_i32_0 = arith.constant 0 : i32
    return %arg0, %c0_i32 : i32, i32
  }
}

</mosaic_0001>

<bundles_post_ra>
// kernel: tpu_custom_call.1
= control target key start
LH: loop header
LB: loop body
LE: loop exit
PB: predicated region body
PF: predicated region fallthrough
CT: control target
= control target key end

     0   :  { %14 = vsyncpa [#allocation4], 0  ;;  %s21267_s0 = inlined_call_operand.hbm [shape: f32[32,128], index: 0, kind: input, shape index: {}]   ;;  %s21268_s1 = inlined_call_operand.hbm [shape: f32[128,384], index: 1, kind: input, shape index: {}]   ;;  %s21269_s2 = inlined_call_operand.hbm [shape: f32[128,256], index: 2, kind: input, shape index: {}]   ;;  %s21270_s3 = inlined_call_operand.hbm [shape: f32[128,384], index: 3, kind: input, shape index: {}]   ;;  %s21271_s4 = inlined_call_operand.hbm [shape: f32[128,256], index: 4, kind: input, shape index: {}]   ;;  %s21272_s5 = inlined_call_operand.hbm [shape: f32[384,384], index: 5, kind: input, shape index: {}]   ;;  %s21273_s6 = inlined_call_operand.vmem [shape: f32[1,128], index: 6, kind: input, shape index: {}]   ;;  %s21274_s7 = inlined_call_operand.vmem [shape: f32[1,128], index: 7, kind: input, shape index: {}]   ;;  %s21275_s8 = inlined_call_operand.vmem [shape: f32[1,128], index: 8, kind: input, shape index: {}]   ;;  %s21276_s9 = inlined_call_operand.hbm [shape: f32[32,128], index: 9, kind: output, shape index: {}]  }
   0x1   :  { %15 = vsyncpa [#allocation7], 0 }
   0x2   :  { %16 = vsyncpa [#allocation10], 0 }
   0x3   :  { %17 = vsyncpa [#allocation13], 0 }
   0x4   :  { %18 = vsyncpa [#allocation5], 0  ;;  %s14994_s30 = smov [#allocation6]   ;;  %s14790_s13 = scalar_lea.hbm %s21268_s1, 6144 }
   0x5   :  { %s36_s10 = sshll.u32 %s14994_s30, 4  ;;  %p14791_p0 = scmp.ne.s32.totalorder %s21268_s1, %s14790_s13  ;;  %s37_s10 = int_to_ptr.vmem [resolvable:$true] %s36_s10 }
   0x6   :  { %p14794_p1 = scmp.lt.u32.totalorder %s14790_s13, %s21268_s1 }
   0x8   :  { %p14796_p2 = pnand %p14794_p1, %p14791_p0 }
   0xa   :  { %14799 = shalt.err (!%p14796_p2)
}
   0xb   :  { %s14800_s18 = scalar_lea.vmem %s37_s10, 6144  ;;  %p14805_p4 = scmp.lt.s32.totalorder %s37_s10, %s37_s10 }
   0xc   :  { %p14801_p3 = scmp.ne.s32.totalorder %s37_s10, %s14800_s18  ;;  %p14806_p5 = scmp.lt.s32.totalorder %s14800_s18, %s14800_s18 }
   0xe   :  { %p14807_p6 = por %p14806_p5, %p14805_p4 }
  0x10   :  { %p14808_p7 = pnand %p14807_p6, %p14801_p3 }
  0x12   :  { %14811 = shalt.err (!%p14808_p7)
}
  0x13   :  { %s14995_s19 = smov 384   ;;  %s14996_s20 = smov 24  }
  0x14   :  { %42 = dma.hbm_to_vmem [thread:$0]  %s21268_s1, 6144, %s37_s10, [#allocation7], %s14995_s19, %s14995_s19, %s14996_s20  }
  0x15   :  { %s14997_s23 = smov [#allocation9]   ;;  %s14998_s25 = smov [#allocation3]  }
  0x16   :  { %s60_s24 = sshll.u32 %s14997_s23, 4  ;;  %s24_s26 = sshll.u32 %s14998_s25, 4  ;;  %s61_s24 = int_to_ptr.vmem [resolvable:$true] %s60_s24  ;;  %s25_s26 = int_to_ptr.vmem [resolvable:$true] %s24_s26 }
  0x17   :  { %s14812_s29 = scalar_lea.hbm %s21270_s3, 6144 }
  0x18   :  { %p14813_p8 = scmp.ne.s32.totalorder %s21270_s3, %s14812_s29  ;;  %p14816_p9 = scmp.lt.u32.totalorder %s14812_s29, %s21270_s3 }
  0x1a   :  { %p14818_p10 = pnand %p14816_p9, %p14813_p8 }
  0x1c   :  { %14821 = shalt.err (!%p14818_p10)
}
  0x1d   :  { %s14822_s1 = scalar_lea.vmem %s61_s24, 6144  ;;  %p14827_p12 = scmp.lt.s32.totalorder %s61_s24, %s61_s24 }
  0x1e   :  { %p14823_p11 = scmp.ne.s32.totalorder %s61_s24, %s14822_s1  ;;  %p14828_p13 = scmp.lt.s32.totalorder %s14822_s1, %s14822_s1 }
  0x20   :  { %p14829_p0 = por %p14828_p13, %p14827_p12 }
  0x22   :  { %p14830_p1 = pnand %p14829_p0, %p14823_p11 }
  0x24   :  { %14833 = shalt.err (!%p14830_p1)
}
  0x25   :  { %66 = dma.hbm_to_vmem [thread:$0]  %s21270_s3, 6144, %s61_s24, [#allocation10], %s14995_s19, %s14995_s19, %s14996_s20  }
  0x26   :  { %s14834_s17 = scalar_lea.hbm %s21267_s0, 512 }
  0x27   :  { %p14835_p2 = scmp.ne.s32.totalorder %s21267_s0, %s14834_s17  ;;  %p14838_p3 = scmp.lt.u32.totalorder %s14834_s17, %s21267_s0 }
  0x29   :  { %p14840_p4 = pnand %p14838_p3, %p14835_p2 }
  0x2b   :  { %14843 = shalt.err (!%p14840_p4)
}
  0x2c   :  { %s14844_s25 = scalar_lea.vmem %s25_s26, 512  ;;  %p14849_p6 = scmp.lt.s32.totalorder %s25_s26, %s25_s26 }
  0x2d   :  { %p14845_p5 = scmp.ne.s32.totalorder %s25_s26, %s14844_s25  ;;  %p14850_p7 = scmp.lt.s32.totalorder %s14844_s25, %s14844_s25 }
  0x2f   :  { %p14851_p8 = por %p14850_p7, %p14849_p6 }
  0x31   :  { %p14852_p9 = pnand %p14851_p8, %p14845_p5 }
  0x33   :  { %14855 = shalt.err (!%p14852_p9)
}
  0x34   :  { %s14999_s3 = smov 128   ;;  %s15000_s24 = smov 8  }
  0x35   :  { %30 = dma.hbm_to_vmem [thread:$0]  %s21267_s0, 512, %s25_s26, [#allocation4], %s14999_s3, %s14999_s3, %s15000_s24  }
  0x36   :  { %s15001_s29 = smov [#allocation8]   ;;  %s14856_s13 = scalar_lea.hbm %s21269_s2, 4096 }
  0x37   :  { %s48_s30 = sshll.u32 %s15001_s29, 4  ;;  %p14857_p10 = scmp.ne.s32.totalorder %s21269_s2, %s14856_s13  ;;  %s49_s30 = int_to_ptr.vmem [resolvable:$true] %s48_s30 }
  0x38   :  { %p14860_p11 = scmp.lt.u32.totalorder %s14856_s13, %s21269_s2 }
  0x3a   :  { %p14862_p12 = pnand %p14860_p11, %p14857_p10 }
  0x3c   :  { %14865 = shalt.err (!%p14862_p12)
}
  0x3d   :  { %s14866_s16 = scalar_lea.vmem %s49_s30, 4096  ;;  %p14871_p0 = scmp.lt.s32.totalorder %s49_s30, %s49_s30 }
  0x3e   :  { %p14867_p13 = scmp.ne.s32.totalorder %s49_s30, %s14866_s16  ;;  %p14872_p1 = scmp.lt.s32.totalorder %s14866_s16, %s14866_s16 }
  0x40   :  { %p14873_p2 = por %p14872_p1, %p14871_p0 }
  0x42   :  { %p14874_p3 = pnand %p14873_p2, %p14867_p13 }
  0x44   :  { %14877 = shalt.err (!%p14874_p3)
}
  0x45   :  { %s15002_s0 = smov 256   ;;  %s15003_s26 = smov 16  }
  0x46   :  { %54 = dma.hbm_to_vmem [thread:$0]  %s21269_s2, 4096, %s49_s30, [#allocation7], %s15002_s0, %s15002_s0, %s15003_s26  }
  0x47   :  { %s15004_s21 = smov [#allocation11]   ;;  %s15005_s23 = smov [#allocation12]  }
  0x48   :  { %s72_s22 = sshll.u32 %s15004_s21, 4  ;;  %s84_s25 = sshll.u32 %s15005_s23, 4  ;;  %s73_s22 = int_to_ptr.vmem [resolvable:$true] %s72_s22  ;;  %s15117_s25 = int_to_ptr.vmem [resolvable:$true] %s84_s25 }
  0x49   :  { %s14878_s29 = scalar_lea.hbm %s21271_s4, 4096 }
  0x4a   :  { %p14879_p4 = scmp.ne.s32.totalorder %s21271_s4, %s14878_s29  ;;  %p14882_p5 = scmp.lt.u32.totalorder %s14878_s29, %s21271_s4 }
  0x4c   :  { %p14884_p6 = pnand %p14882_p5, %p14879_p4 }
  0x4e   :  { %14887 = shalt.err (!%p14884_p6)
}
  0x4f   :  { %s14888_s2 = scalar_lea.vmem %s73_s22, 4096  ;;  %p14893_p8 = scmp.lt.s32.totalorder %s73_s22, %s73_s22 }
  0x50   :  { %p14889_p7 = scmp.ne.s32.totalorder %s73_s22, %s14888_s2  ;;  %p14894_p9 = scmp.lt.s32.totalorder %s14888_s2, %s14888_s2 }
  0x52   :  { %p14895_p10 = por %p14894_p9, %p14893_p8 }
  0x54   :  { %p14896_p11 = pnand %p14895_p10, %p14889_p7 }
  0x56   :  { %14899 = shalt.err (!%p14896_p11)
}
  0x57   :  { %78 = dma.hbm_to_vmem [thread:$0]  %s21271_s4, 4096, %s73_s22, [#allocation10], %s15002_s0, %s15002_s0, %s15003_s26  }
  0x58   :  { %s14900_s16 = scalar_lea.hbm %s21272_s5, 18432 }
  0x59   :  { %p14901_p12 = scmp.ne.s32.totalorder %s21272_s5, %s14900_s16  ;;  %p14904_p13 = scmp.lt.u32.totalorder %s14900_s16, %s21272_s5 }
  0x5b   :  { %p14906_p0 = pnand %p14904_p13, %p14901_p12 }
  0x5d   :  { %14909 = shalt.err (!%p14906_p0)
}
  0x5e   :  { %s14910_s27 = scalar_lea.vmem %s15117_s25, 18432  ;;  %p14915_p2 = scmp.lt.s32.totalorder %s15117_s25, %s15117_s25 }
  0x5f   :  { %p14911_p1 = scmp.ne.s32.totalorder %s15117_s25, %s14910_s27  ;;  %p14916_p3 = scmp.lt.s32.totalorder %s14910_s27, %s14910_s27 }
  0x61   :  { %p14917_p4 = por %p14916_p3, %p14915_p2 }
  0x63   :  { %p14918_p5 = pnand %p14917_p4, %p14911_p1 }
  0x65   :  { %14921 = shalt.err (!%p14918_p5)
}
  0x66   :  { %90 = dma.hbm_to_vmem [thread:$0]  %s21272_s5, 18432, %s15117_s25, [#allocation13], %s14995_s19, %s14995_s19, %s14996_s20  }
  0x67   :  { %14964 = dma.done.wait [#allocation4], 512  }
  0x68   :  { %14965 = vsyncadd [#allocation4], 4294966784 }
  0x69   :  { %14966 = dma.done.wait [#allocation7], 10240  }
  0x6a   :  { %14967 = vsyncadd [#allocation7], 4294957056 }
  0x6b   :  { %14968 = dma.done.wait [#allocation10], 10240  }
  0x6c   :  { %14969 = vsyncadd [#allocation10], 4294957056 }
  0x6d   :  { %14970 = dma.done.wait [#allocation13], 18432  }
  0x6e   :  { %14971 = vsyncadd [#allocation13], 4294948864  ;;  %v115_v0 = vlaneseq  ;;  %v15006_v1 = vmov 0.0   ;;  %v15154_v10 = vld [vmem:[%s21273_s6] ss:$0 sm:$0xff]  ;;  %v278_v13 = vld [vmem:[#allocation3] sm:$0xff]  }
  0x6f   :  { %260 = vst [vmem:[#allocation2] sm:$0xff] %v15006_v1  ;;  %262 = vst [vmem:[#allocation2 + $0x10] sm:$0xff] %v15006_v1  ;;  %v15159_v11 = vld [vmem:[%s21274_s7] ss:$0 sm:$0xff]  ;;  %v280_v15 = vld [vmem:[#allocation3 + $0x10] sm:$0xff]   ;;  %s15202_s6 = smov 0  }
  0x70   :  { %272 = vst [vmem:[#allocation2 + $0x60] sm:$0xf] %v15006_v1  ;;  %274 = vst [vmem:[#allocation2 + $0x70] sm:$0xf] %v15006_v1  ;;  %v116_v2 = vshrl.u32 %v115_v0, 7  ;;  %v279_v14 = vld [vmem:[#allocation3 + $0x8] sm:$0xff]  }
  0x71   :  { %22252 = vst [vmem:[#allocation20_spill] sm:$0xff] %v15154_v10  ;;  %22253 = vst [vmem:[#allocation21_spill] sm:$0xff] %v15159_v11  ;;  %v15164_v12 = vld [vmem:[%s21275_s8] ss:$0 sm:$0xff]  ;;  %v281_v17 = vld [vmem:[#allocation3 + $0x18] sm:$0xff]  }
  0x72   :  { %v117_v3 = vadd.s32 8, %v116_v2  ;;  %v118_v4 = vadd.s32 16, %v116_v2  ;;  %v119_v5 = vadd.s32 24, %v116_v2  ;;  %v124_v6 = vand.u32 15, %v116_v2  ;;  %22254 = vst [vmem:[#allocation22_spill] sm:$0xff] %v15164_v12 }
  0x74   :  { %v131_v7 = vand.u32 15, %v117_v3  ;;  %v138_v8 = vand.u32 15, %v118_v4  ;;  %v145_v9 = vand.u32 15, %v119_v5  ;;  %vm168_vm0 = vcmp.ge.s32.totalorder %v124_v6, 1 }
  0x75   :  { %v15166_v16 = vsel %vm168_vm0, 1.0, %v15006_v1  ;;  %vm184_vm4 = vcmp.ge.s32.totalorder %v124_v6, 2  ;;  %v204_v24 = vand.u32 1, %v124_v6 }
  0x76   :  { %vm170_vm1 = vcmp.ge.s32.totalorder %v138_v8, 1  ;;  %22255 = vst [vmem:[#allocation23_spill] sm:$0xff] %v15166_v16  ;;  %vm177_vm2 = vcmp.le.s32.totalorder %v131_v7, 14  ;;  %vm179_vm3 = vcmp.le.s32.totalorder %v145_v9, 14  ;;  %vm186_vm5 = vcmp.ge.s32.totalorder %v138_v8, 2 }
  0x77   :  { %v15168_v18 = vsel %vm170_vm1, 1.0, %v15006_v1  ;;  %v15170_v19 = vsel %vm177_vm2, 1.0, %v15006_v1  ;;  %v15172_v20 = vsel %vm179_vm3, 1.0, %v15006_v1  ;;  %v15174_v21 = vsel %vm184_vm4, 1.0, %v15006_v1 }
  0x78   :  { %22256 = vst [vmem:[#allocation24_spill] sm:$0xff] %v15168_v18  ;;  %22257 = vst [vmem:[#allocation25_spill] sm:$0xff] %v15170_v19  ;;  %vm193_vm6 = vcmp.le.s32.totalorder %v131_v7, 13  ;;  %v15176_v22 = vsel %vm186_vm5, 1.0, %v15006_v1  ;;  %vm195_vm7 = vcmp.le.s32.totalorder %v145_v9, 13  ;;  %v211_v26 = vand.u32 1, %v131_v7 }
  0x79   :  { %22258 = vst [vmem:[#allocation26_spill] sm:$0xff] %v15172_v20  ;;  %22259 = vst [vmem:[#allocation27_spill] sm:$0xff] %v15174_v21  ;;  %v15178_v23 = vsel %vm193_vm6, 1.0, %v15006_v1  ;;  %v15180_v25 = vsel %vm195_vm7, 1.0, %v15006_v1  ;;  %v218_v27 = vand.u32 1, %v138_v8  ;;  %v225_v28 = vand.u32 1, %v145_v9 }
  0x7a   :  { %22260 = vst [vmem:[#allocation28_spill] sm:$0xff] %v15176_v22  ;;  %22261 = vst [vmem:[#allocation29_spill] sm:$0xff] %v15178_v23  ;;  %vm248_vm8 = vcmp.eq.s32.totalorder %v204_v24, 0  ;;  %vm249_vm9 = vcmp.eq.s32.totalorder %v211_v26, 0 }
  0x7b   :  { %22262 = vst [vmem:[#allocation30_spill] sm:$0xff] %v15180_v25  ;;  %vm250_vm10 = vcmp.eq.s32.totalorder %v218_v27, 0  ;;  %vm251_vm11 = vcmp.eq.s32.totalorder %v225_v28, 0  ;;  %v15182_v29 = vsel %vm248_vm8, 1.0, %v15006_v1  ;;  %v15184_v30 = vsel %vm249_vm9, 1.0, %v15006_v1 }
  0x7c   :  { %22263 = vst [vmem:[#allocation31_spill] sm:$0xff] %v15182_v29  ;;  %22264 = vst [vmem:[#allocation32_spill] sm:$0xff] %v15184_v30  ;;  %v15186_v31 = vsel %vm250_vm10, 1.0, %v15006_v1  ;;  %v15188_v32 = vsel %vm251_vm11, 1.0, %v15006_v1 }
  0x7d   :  { %22265 = vst [vmem:[#allocation33_spill] sm:$0xff] %v15186_v31  ;;  %22266 = vst [vmem:[#allocation34_spill] sm:$0xff] %v15188_v32 }
  0x7e LB: > { %22267 = vst [vmem:[#allocation35_spill] sm:$0xff] %v14976_v17  ;;  %22268 = vst [vmem:[#allocation36_spill] sm:$0xff] %v14980_v15  ;;  %v293_v37 = vld [vmem:[#allocation6 + $0x8] sm:$0xff]  ;;  %v296_v38 = vld [vmem:[#allocation6 + $0x20] sm:$0xff]  ;;  %v21285_v46 = vmov 0.0   ;;  %vm2185_vm12 = vcmask 1040384   ;;  %s14992_s6 = sphi %s15202_s6, %s287_s6   ;;  %v14988_v13 = vphi %v278_v13, %v23808_v13   ;;  %v14984_v14 = vphi %v279_v14, %v23807_v14   ;;  %v14980_v15 = vphi %v280_v15, %v23806_v15   ;;  %v14976_v17 = vphi %v281_v17, %v23805_v17  }
  0x7f   : > { %22269 = vst [vmem:[#allocation37_spill] sm:$0xff] %v14984_v14  ;;  %22270 = vst [vmem:[#allocation38_spill] sm:$0xff] %v14988_v13  ;;  %v292_v39 = vld [vmem:[#allocation6] sm:$0xff]  ;;  %v340_v40 = vand.u32 4294901760, %v293_v37  ;;  %v344_v41 = vand.u32 4294901760, %v296_v38  ;;  %v295_v42 = vld [vmem:[#allocation6 + $0x18] sm:$0xff]  ;;  %436 = vmatprep.mubr.f32.mxu1 %v21285_v46  ;;  %705 = vmatprep.mubr.f32.mxu0 %v21285_v46 }
  0x80   : > { %v342_v43 = vand.u32 4294901760, %v292_v39  ;;  %v299_v44 = vld [vmem:[#allocation6 + $0x38] sm:$0xff]  ;;  %v302_v45 = vld [vmem:[#allocation6 + $0x50] sm:$0xff]  ;;  %v346_v47 = vand.u32 4294901760, %v295_v42  ;;  %v301_v51 = vld [vmem:[#allocation6 + $0x48] sm:$0xff]  ;;  %vm2124_vm13 = vcmask 1041408  }
  0x81   : > { %v348_v48 = vand.u32 4294901760, %v299_v44  ;;  %v352_v49 = vand.u32 4294901760, %v302_v45  ;;  %v298_v50 = vld [vmem:[#allocation6 + $0x30] sm:$0xff]  ;;  %v15221_v52 = vpack.c.bf16 %v344_v41, %v340_v40  ;;  %v354_v55 = vand.u32 4294901760, %v301_v51  ;;  %v305_v56 = vld [vmem:[#allocation6 + $0x68] sm:$0xff]  ;;  %v308_v57 = vld [vmem:[#allocation6 + $0x80] sm:$0xff] }
  0x82   : > { %v15223_v53 = vsub.f32 %v292_v39, %v342_v43  ;;  %v350_v54 = vand.u32 4294901760, %v298_v50  ;;  %v15225_v58 = vpack.c.bf16 %v346_v47, %v342_v43  ;;  %v15227_v59 = vsub.f32 %v295_v42, %v346_v47  ;;  %v304_v62 = vld [vmem:[#allocation6 + $0x60] sm:$0xff]  ;;  %v307_v63 = vld [vmem:[#allocation6 + $0x78] sm:$0xff]  ;;  %v326_v12 = vld [vmem:[#allocation6 + $0x110] sm:$0xff]  ;;  %s287_s6 = sadd.s32 1, %s14992_s6  }
  0x83   : > { %v15229_v60 = vpack.c.bf16 %v352_v49, %v348_v48  ;;  %v15231_v61 = vsub.f32 %v299_v44, %v348_v48  ;;  %12311 = vmatprep.subr.bf16.mxu1 %v15221_v52  ;;  %v15234_v0 = vsub.f32 %v302_v45, %v352_v49  ;;  %v15240_v3 = vsub.f32 %v301_v51, %v354_v55  ;;  %v311_v27 = vld [vmem:[#allocation6 + $0x98] sm:$0xff]  ;;  %v320_v33 = vld [vmem:[#allocation6 + $0xe0] sm:$0xff]  ;;  %v325_v21 = vld [vmem:[#allocation6 + $0x108] sm:$0xff]  ;;  %p284_p6 = scmp.ge.s32.totalorder %s287_s6, 3  }
  0x84   : > { %22271 = vst [vmem:[#allocation39_spill] sm:$0xff] %v15223_v53  ;;  %22272 = vst [vmem:[#allocation40_spill] sm:$0xff] %v15225_v58  ;;  %v15236_v1 = vpack.c.bf16 %v354_v55, %v350_v54  ;;  %v15238_v2 = vsub.f32 %v298_v50, %v350_v54  ;;  %12313 = vmatpush1.bf16.msra.mxu1 %v15225_v58  ;;  %v356_v4 = vand.u32 4294901760, %v305_v56  ;;  %v360_v5 = vand.u32 4294901760, %v308_v57  ;;  %v323_v46 = vld [vmem:[#allocation6 + $0xf8] sm:$0xff]  ;;  %v329_v23 = vld [vmem:[#allocation6 + $0x128] sm:$0xff] }
  0x85   : > { %22273 = vst [vmem:[#allocation41_spill] sm:$0xff] %v15227_v59  ;;  %22274 = vst [vmem:[#allocation42_spill] sm:$0xff] %v15229_v60  ;;  %v15243_v6 = vsub.f32 %v293_v37, %v340_v40  ;;  %v15245_v7 = vsub.f32 %v296_v38, %v344_v41  ;;  %12315 = vmatprep.subr.bf16.mxu1 %v15229_v60  ;;  %v358_v8 = vand.u32 4294901760, %v304_v62  ;;  %v362_v9 = vand.u32 4294901760, %v307_v63  ;;  %v314_v40 = vld [vmem:[#allocation6 + $0xb0] sm:$0xff]  ;;  %v332_v32 = vld [vmem:[#allocation6 + $0x140] sm:$0xff] }
  0x86   : > { %22275 = vst [vmem:[#allocation43_spill] sm:$0xff] %v15231_v61  ;;  %22276 = vst [vmem:[#allocation44_spill] sm:$0xff] %v15234_v0  ;;  %v21279_v24 = vand.u32 4294901760, %v15223_v53  ;;  %v21278_v26 = vand.u32 4294901760, %v15227_v59  ;;  %v15250_v28 = vpack.c.bf16 %v360_v5, %v356_v4  ;;  %v15252_v39 = vsub.f32 %v305_v56, %v356_v4  ;;  %v310_v56 = vld [vmem:[#allocation6 + $0x90] sm:$0xff]  ;;  %v331_v30 = vld [vmem:[#allocation6 + $0x138] sm:$0xff] }
  0x87   : > { %22277 = vst [vmem:[#allocation45_spill] sm:$0xff] %v15236_v1  ;;  %22278 = vst [vmem:[#allocation46_spill] sm:$0xff] %v15238_v2  ;;  %v15254_v42 = vsub.f32 %v308_v57, %v360_v5  ;;  %v21282_v37 = vand.u32 4294901760, %v15243_v6  ;;  %v21281_v38 = vand.u32 4294901760, %v15245_v7  ;;  %v15258_v41 = vpack.c.bf16 %v362_v9, %v358_v8  ;;  %v313_v57 = vld [vmem:[#allocation6 + $0xa8] sm:$0xff]  ;;  %v335_v20 = vld [vmem:[#allocation6 + $0x158] sm:$0xff] }
  0x88   : > { %22279 = vst [vmem:[#allocation47_spill] sm:$0xff] %v15240_v3  ;;  %22280 = vst [vmem:[#allocation48_spill] sm:$0xff] %v15243_v6  ;;  %v15260_v43 = vsub.f32 %v304_v62, %v358_v8  ;;  %v15262_v44 = vsub.f32 %v307_v63, %v362_v9  ;;  %12317 = vmatpush1.bf16.msra.mxu1 %v15236_v1  ;;  %v490_v47 = vsub.f32 %v15223_v53, %v21279_v24  ;;  %v338_v19 = vld [vmem:[#allocation6 + $0x170] sm:$0xff]  ;;  %v337_v16 = vld [vmem:[#allocation6 + $0x168] sm:$0xff]  ;;  %vm2208_vm14 = vcmask 1046528   ;;  %s15009_s7 = smov (%p284_p6), [#allocation14]  }
  0x89   : > { %22281 = vst [vmem:[#allocation49_spill] sm:$0xff] %v15245_v7  ;;  %22282 = vst [vmem:[#allocation50_spill] sm:$0xff] %v15250_v28  ;;  %v484_v45 = vsub.f32 %v15243_v6, %v21282_v37  ;;  %v502_v48 = vsub.f32 %v15227_v59, %v21278_v26  ;;  %v364_v49 = vand.u32 4294901760, %v311_v27  ;;  %12319 = vmatprep.subr.bf16.mxu1 %v15250_v28  ;;  %v368_v51 = vand.u32 4294901760, %v314_v40  ;;  %v15500_v1 = vld [vmem:[#allocation6 + $0xb8] sm:$0xff]  ;;  %s10967_s8 = sshll.u32 (%p284_p6), %s15009_s7, 4  ;;  %s10968_s8 = int_to_ptr.vmem [resolvable:$true] %s10967_s8 }
  0x8a   : > { %22283 = vst [vmem:[#allocation51_spill] sm:$0xff] %v15252_v39  ;;  %22284 = vst [vmem:[#allocation52_spill] sm:$0xff] %v15254_v42  ;;  %v496_v50 = vsub.f32 %v15245_v7, %v21281_v38  ;;  %v21277_v54 = vand.u32 4294901760, %v15231_v61  ;;  %v21280_v55 = vand.u32 4294901760, %v15234_v0  ;;  %v491_v63 = vand.u32 4294901760, %v490_v47  ;;  %v319_v38 = vld [vmem:[#allocation6 + $0xd8] sm:$0xff]  ;;  %p14927_p8 = scmp.lt.s32.totalorder (%p284_p6), %s10968_s8, %s10968_s8 }
  0x8b   : > { %22285 = vst [vmem:[#allocation53_spill] sm:$0xff] %v15258_v41  ;;  %v485_v62 = vand.u32 4294901760, %v484_v45  ;;  %v503_v4 = vand.u32 4294901760, %v502_v48  ;;  %v15280_v5 = vsub.f32 %v311_v27, %v364_v49  ;;  %v15282_v9 = vpack.c.bf16 %v368_v51, %v364_v49  ;;  %v317_v27 = vld [vmem:[#allocation6 + $0xc8] sm:$0xff]  ;;  %s14922_s28 = scalar_lea.vmem (%p284_p6), %s10968_s8, 512 }
  0x8c   : > { %v497_v8 = vand.u32 4294901760, %v496_v50  ;;  %v15284_v36 = vsub.f32 %v314_v40, %v368_v51  ;;  %v508_v35 = vsub.f32 %v15231_v61, %v21277_v54  ;;  %12321 = vmatpush1.bf16.msra.mxu1 %v15258_v41  ;;  %v520_v45 = vsub.f32 %v15234_v0, %v21280_v55  ;;  %v316_v54 = vld [vmem:[#allocation6 + $0xc0] sm:$0xff]  ;;  %v15484_v41 = vld [vmem:[#allocation6 + $0x70] sm:$0xff]  ;;  %p14923_p7 = scmp.ne.s32.totalorder (%p284_p6), %s10968_s8, %s14922_s28  ;;  %p14928_p9 = scmp.lt.s32.totalorder (%p284_p6), %s14922_s28, %s14922_s28 }
  0x8d   : > { %22286 = vst [vmem:[#allocation54_spill] sm:$0xff] %v15282_v9  ;;  %v12344_v34 = vpack.c.bf16 %v503_v4, %v491_v63  ;;  %v366_v47 = vand.u32 4294901760, %v310_v56  ;;  %v370_v48 = vand.u32 4294901760, %v313_v57  ;;  %12323 = vmatprep.subr.bf16.mxu1 %v15282_v9  ;;  %v21283_v49 = vand.u32 4294901760, %v15238_v2 }
  0x8e   : > { %v12342_v50 = vpack.c.bf16 %v497_v8, %v485_v62  ;;  %v509_v40 = vand.u32 4294901760, %v508_v35  ;;  %v21284_v51 = vand.u32 4294901760, %v15240_v3  ;;  %v521_v26 = vand.u32 4294901760, %v520_v45  ;;  %p14929_p10 = por (%p284_p6), %p14928_p9, %p14927_p8 }
  0x8f   : > { %v15296_v24 = vpack.c.bf16 %v370_v48, %v366_v47  ;;  %v15298_v63 = vsub.f32 %v310_v56, %v366_v47  ;;  %v15300_v4 = vsub.f32 %v313_v57, %v370_v48  ;;  %v514_v62 = vsub.f32 %v15238_v2, %v21283_v49 }
  0x90   : > { %12343 = vmatprep.subr.bf16.mxu0 %v12342_v50  ;;  %v526_v35 = vsub.f32 %v15240_v3, %v21284_v51  ;;  %v372_v8 = vand.u32 4294901760, %v317_v27  ;;  %v376_v55 = vand.u32 4294901760, %v320_v33  ;;  %v12346_v45 = vpack.c.bf16 %v521_v26, %v509_v40  ;;  %p14930_p11 = pnand (%p284_p6), %p14929_p10, %p14923_p7 }
  0x91   : > { %22287 = vst [vmem:[#allocation55_spill] sm:$0xff] %v15296_v24  ;;  %12345 = vmatpush1.bf16.msra.mxu0 %v12344_v34  ;;  %12325 = vmatpush1.bf16.msra.mxu1 %v15296_v24  ;;  %v21288_v56 = vand.u32 4294901760, %v15252_v39  ;;  %v21290_v57 = vand.u32 4294901760, %v15254_v42  ;;  %v374_v47 = vand.u32 4294901760, %v316_v54  ;;  %v515_v48 = vand.u32 4294901760, %v514_v62 }
  0x92   : > { %v527_v50 = vand.u32 4294901760, %v526_v35  ;;  %v15311_v37 = vpack.c.bf16 %v376_v55, %v372_v8  ;;  %v15313_v49 = vsub.f32 %v317_v27, %v372_v8  ;;  %12347 = vmatprep.subr.bf16.mxu0 %v12346_v45  ;;  %v15315_v51 = vsub.f32 %v320_v33, %v376_v55  ;;  %v322_v55 = vld [vmem:[#allocation6 + $0xf0] sm:$0xff] }
  0x93   : > { %v532_v34 = vsub.f32 %v15252_v39, %v21288_v56  ;;  %v544_v26 = vsub.f32 %v15254_v42, %v21290_v57  ;;  %v378_v40 = vand.u32 4294901760, %v319_v38  ;;  %v15324_v35 = vsub.f32 %v316_v54, %v374_v47 }
  0x94   : > { %22288 = vst [vmem:[#allocation56_spill] sm:$0xff] %v15311_v37  ;;  %v12348_v62 = vpack.c.bf16 %v527_v50, %v515_v48  ;;  %12327 = vmatprep.subr.bf16.mxu1 %v15311_v37  ;;  %v21291_v27 = vand.u32 4294901760, %v15260_v43  ;;  %v21292_v33 = vand.u32 4294901760, %v15262_v44  ;;  %v380_v50 = vand.u32 4294901760, %v323_v46 }
  0x95   : > { %v533_v8 = vand.u32 4294901760, %v532_v34  ;;  %v545_v45 = vand.u32 4294901760, %v544_v26  ;;  %v15328_v56 = vpack.c.bf16 %v378_v40, %v374_v47  ;;  %v15330_v11 = vsub.f32 %v319_v38, %v378_v40 }
  0x96   : > { %12349 = vmatpush1.bf16.msra.mxu0 %v12348_v62  ;;  %v538_v48 = vsub.f32 %v15260_v43, %v21291_v27  ;;  %v550_v54 = vsub.f32 %v15262_v44, %v21292_v33  ;;  %v384_v57 = vand.u32 4294901760, %v326_v12  ;;  %v21295_v47 = vand.u32 4294901760, %v15280_v5 }
  0x97   : > { %22289 = vst [vmem:[#allocation57_spill] sm:$0xff] %v15328_v56  ;;  %v12350_v22 = vpack.c.bf16 %v545_v45, %v533_v8  ;;  %12329 = vmatpush1.bf16.msra.mxu1 %v15328_v56  ;;  %v21298_v38 = vand.u32 4294901760, %v15284_v36  ;;  %v382_v34 = vand.u32 4294901760, %v322_v55  ;;  %v15343_v27 = vsub.f32 %v323_v46, %v380_v50  ;;  %v328_v46 = vld [vmem:[#allocation6 + $0x120] sm:$0xff] }
  0x98   : > { %v539_v26 = vand.u32 4294901760, %v538_v48  ;;  %v551_v40 = vand.u32 4294901760, %v550_v54  ;;  %v15341_v62 = vpack.c.bf16 %v384_v57, %v380_v50  ;;  %v15345_v25 = vsub.f32 %v326_v12, %v384_v57 }
  0x99   : > { %12351 = vmatprep.subr.bf16.mxu0 %v12350_v22  ;;  %v556_v8 = vsub.f32 %v15280_v5, %v21295_v47  ;;  %v568_v45 = vsub.f32 %v15284_v36, %v21298_v38  ;;  %v386_v33 = vand.u32 4294901760, %v325_v21  ;;  %v15354_v54 = vsub.f32 %v322_v55, %v382_v34 }
  0x9a   : > { %22290 = vst [vmem:[#allocation58_spill] sm:$0xff] %v15341_v62  ;;  %v12352_v48 = vpack.c.bf16 %v551_v40, %v539_v26  ;;  %12331 = vmatprep.subr.bf16.mxu1 %v15341_v62  ;;  %v21303_v22 = vand.u32 4294901760, %v15298_v63  ;;  %v21305_v12 = vand.u32 4294901760, %v15300_v4  ;;  %v388_v40 = vand.u32 4294901760, %v329_v23 }
  0x9b   : > { %v557_v57 = vand.u32 4294901760, %v556_v8  ;;  %v569_v50 = vand.u32 4294901760, %v568_v45  ;;  %v15358_v47 = vpack.c.bf16 %v386_v33, %v382_v34  ;;  %v15360_v31 = vsub.f32 %v325_v21, %v386_v33 }
  0x9c   : > { %12353 = vmatpush1.bf16.msra.mxu0 %v12352_v48  ;;  %v562_v26 = vsub.f32 %v15298_v63, %v21303_v22  ;;  %v574_v55 = vsub.f32 %v15300_v4, %v21305_v12  ;;  %v392_v38 = vand.u32 4294901760, %v332_v32  ;;  %v21306_v34 = vand.u32 4294901760, %v15313_v49 }
  0x9d   : > { %22291 = vst [vmem:[#allocation59_spill] sm:$0xff] %v15358_v47  ;;  %v12354_v29 = vpack.c.bf16 %v569_v50, %v557_v57  ;;  %12333 = vmatpush1.bf16.msra.mxu1 %v15358_v47  ;;  %v21307_v21 = vand.u32 4294901760, %v15315_v51  ;;  %v390_v33 = vand.u32 4294901760, %v328_v46  ;;  %v15373_v22 = vsub.f32 %v329_v23, %v388_v40 }
  0x9e   : > { %v563_v8 = vand.u32 4294901760, %v562_v26  ;;  %v575_v45 = vand.u32 4294901760, %v574_v55  ;;  %v15371_v48 = vpack.c.bf16 %v392_v38, %v388_v40  ;;  %v15375_v10 = vsub.f32 %v332_v32, %v392_v38  ;;  %v334_v32 = vld [vmem:[#allocation6 + $0x150] sm:$0xff] }
  0x9f   : > { %12355 = vmatprep.subr.bf16.mxu0 %v12354_v29  ;;  %v580_v57 = vsub.f32 %v15313_v49, %v21306_v34  ;;  %v592_v50 = vsub.f32 %v15315_v51, %v21307_v21  ;;  %v394_v12 = vand.u32 4294901760, %v331_v30  ;;  %v15384_v55 = vsub.f32 %v328_v46, %v390_v33 }
  0xa0   : > { %22292 = vst [vmem:[#allocation60_spill] sm:$0xff] %v15371_v48  ;;  %v12356_v26 = vpack.c.bf16 %v575_v45, %v563_v8  ;;  %12335 = vmatprep.subr.bf16.mxu1 %v15371_v48  ;;  %v21310_v23 = vand.u32 4294901760, %v15324_v35  ;;  %v21313_v29 = vand.u32 4294901760, %v15330_v11  ;;  %v396_v45 = vand.u32 4294901760, %v335_v20 }
  0xa1   : > { %v581_v38 = vand.u32 4294901760, %v580_v57  ;;  %v593_v40 = vand.u32 4294901760, %v592_v50  ;;  %v15388_v34 = vpack.c.bf16 %v394_v12, %v390_v33  ;;  %v15390_v18 = vsub.f32 %v331_v30, %v394_v12 }
  0xa2   : > { %12357 = vmatpush1.bf16.msra.mxu0 %v12356_v26  ;;  %v586_v8 = vsub.f32 %v15324_v35, %v21310_v23  ;;  %v598_v46 = vsub.f32 %v15330_v11, %v21313_v29  ;;  %v400_v21 = vand.u32 4294901760, %v338_v19  ;;  %v21316_v33 = vand.u32 4294901760, %v15343_v27 }
  0xa3   : > { %22293 = vst [vmem:[#allocation61_spill] sm:$0xff] %v15388_v34  ;;  %v12358_v48 = vpack.c.bf16 %v593_v40, %v581_v38  ;;  %12337 = vmatpush1.bf16.msra.mxu1 %v15388_v34  ;;  %v21319_v30 = vand.u32 4294901760, %v15345_v25  ;;  %v398_v12 = vand.u32 4294901760, %v334_v32  ;;  %v15403_v23 = vsub.f32 %v335_v20, %v396_v45 }
  0xa4   : > { %v587_v57 = vand.u32 4294901760, %v586_v8  ;;  %v599_v50 = vand.u32 4294901760, %v598_v46  ;;  %v15401_v26 = vpack.c.bf16 %v400_v21, %v396_v45  ;;  %v15405_v47 = vsub.f32 %v338_v19, %v400_v21  ;;  %v15418_v19 = vld [vmem:[#allocation6 + $0x10] sm:$0xff]  ;;  %v15420_v21 = vld [vmem:[#allocation6 + $0x28] sm:$0xff] }
  0xa5   : > { %12359 = vmatprep.subr.bf16.mxu0 %v12358_v48  ;;  %v604_v38 = vsub.f32 %v15343_v27, %v21316_v33  ;;  %v616_v40 = vsub.f32 %v15345_v25, %v21319_v30  ;;  %v402_v29 = vand.u32 4294901760, %v337_v16  ;;  %v15414_v8 = vsub.f32 %v334_v32, %v398_v12 }
  0xa6   : > { %22294 = vst [vmem:[#allocation62_spill] sm:$0xff] %v15401_v26  ;;  %v12360_v34 = vpack.c.bf16 %v599_v50, %v587_v57  ;;  %12339 = vmatprep.subr.bf16.mxu1 %v15401_v26  ;;  %v21320_v20 = vand.u32 4294901760, %v15354_v54  ;;  %v21321_v48 = vand.u32 4294901760, %v15360_v31  ;;  %v15433_v50 = vand.u32 4294901760, %v14988_v13 }
  0xa7   : > { %v605_v46 = vand.u32 4294901760, %v604_v38  ;;  %v617_v45 = vand.u32 4294901760, %v616_v40  ;;  %v15422_v33 = vpack.c.bf16 %v402_v29, %v398_v12  ;;  %v15424_v62 = vsub.f32 %v337_v16, %v402_v29 }
  0xa8   : > { %12361 = vmatpush1.bf16.msra.mxu0 %v12360_v34  ;;  %v610_v32 = vsub.f32 %v15354_v54, %v21320_v20  ;;  %v622_v57 = vsub.f32 %v15360_v31, %v21321_v48  ;;  %v21325_v30 = vand.u32 4294901760, %v15373_v22  ;;  %v21328_v16 = vand.u32 4294901760, %v15375_v10 }
  0xa9   : > { %22295 = vst [vmem:[#allocation63_spill] sm:$0xff] %v15422_v33  ;;  %v12362_v38 = vpack.c.bf16 %v617_v45, %v605_v46  ;;  %12341 = vmatpush1.bf16.msra.mxu1 %v15422_v33  ;;  %v21332_v34 = vand.u32 4294901760, %v15418_v19  ;;  %v21331_v29 = vand.u32 4294901760, %v15420_v21  ;;  %v15442_v20 = vsub.f32 %v14988_v13, %v15433_v50  ;;  %v15458_v13 = vld [vmem:[#allocation6 + $0x40] sm:$0xff]  ;;  %v15460_v33 = vld [vmem:[#allocation6 + $0x58] sm:$0xff] }
  0xaa   : > { %v611_v12 = vand.u32 4294901760, %v610_v32  ;;  %v623_v40 = vand.u32 4294901760, %v622_v57  ;;  %v628_v48 = vsub.f32 %v15373_v22, %v21325_v30  ;;  %v640_v46 = vsub.f32 %v15375_v10, %v21328_v16 }
  0xab   : > { %22296 = vst [vmem:[#allocation64_spill] sm:$0xff] %v15442_v20  ;;  %12363 = vmatprep.subr.bf16.mxu0 %v12362_v38  ;;  %v15454_v45 = vpack.c.bf16 %v21331_v29, %v21332_v34  ;;  %v21337_v32 = vand.u32 4294901760, %v15384_v55  ;;  %v21340_v57 = vand.u32 4294901760, %v15390_v18  ;;  %v15463_v38 = vand.u32 4294901760, %v15442_v20 }
  0xac   : > { %v12364_v30 = vpack.c.bf16 %v623_v40, %v611_v12  ;;  %v629_v26 = vand.u32 4294901760, %v628_v48  ;;  %v21347_v16 = vand.u32 4294901760, %v15403_v23  ;;  %v641_v56 = vand.u32 4294901760, %v640_v46 }
  0xad   : > { %22297 = vst [vmem:[#allocation65_spill] sm:$0xff] %v15454_v45  ;;  %22298 = vst [vmem:[#allocation66_spill] sm:$0xff] %v15463_v38  ;;  %12503 = vmatprep.subr.bf16.mxu1 %v15454_v45  ;;  %v634_v29 = vsub.f32 %v15384_v55, %v21337_v32  ;;  %v646_v34 = vsub.f32 %v15390_v18, %v21340_v57  ;;  %v21348_v37 = vand.u32 4294901760, %v15405_v47  ;;  %v21353_v40 = vand.u32 4294901760, %v15458_v13 }
  0xae   : > { %12365 = vmatpush1.bf16.msra.mxu0 %v12364_v30  ;;  %v440_v12 = vsub.f32 %v15442_v20, %v15463_v38  ;;  %v652_v48 = vsub.f32 %v15403_v23, %v21347_v16  ;;  %v21351_v46 = vand.u32 4294901760, %v15460_v33  ;;  %v12366_v24 = vpack.c.bf16 %v641_v56, %v629_v26  ;;  %v15486_v30 = vld [vmem:[#allocation6 + $0x88] sm:$0xff] }
  0xaf   : > { %v635_v32 = vand.u32 4294901760, %v634_v29  ;;  %v647_v9 = vand.u32 4294901760, %v646_v34  ;;  %v664_v57 = vsub.f32 %v15405_v47, %v21348_v37  ;;  %v21352_v56 = vand.u32 4294901760, %v15414_v8  ;;  %v15498_v37 = vld [vmem:[#allocation6 + $0xa0] sm:$0xff] }
  0xb0   : > { %v15488_v38 = vand.u32 4294901760, %v440_v12  ;;  %v653_v28 = vand.u32 4294901760, %v652_v48  ;;  %v15494_v16 = vpack.c.bf16 %v21351_v46, %v21353_v40  ;;  %12367 = vmatprep.subr.bf16.mxu0 %v12366_v24  ;;  %v21354_v29 = vand.u32 4294901760, %v15424_v62  ;;  %v15521_v40 = vld [vmem:[#allocation6 + $0xd0] sm:$0xff] }
  0xb1   : > { %v12368_v26 = vpack.c.bf16 %v647_v9, %v635_v32  ;;  %v665_v34 = vand.u32 4294901760, %v664_v57  ;;  %v658_v12 = vsub.f32 %v15414_v8, %v21352_v56  ;;  %v21358_v48 = vand.u32 4294901760, %v15484_v41  ;;  %v15535_v56 = vld [vmem:[#allocation6 + $0x118] sm:$0xff] }
  0xb2   : > { %22299 = vst [vmem:[#allocation67_spill] sm:$0xff] %v15494_v16  ;;  %442 = vmatmul.mubr.f32.vlgmr.msra.gmra.mrb[0].mxu1 %v15488_v38  ;;  %v21357_v46 = vand.u32 4294901760, %v15486_v30  ;;  %v670_v9 = vsub.f32 %v15424_v62, %v21354_v29  ;;  %v15524_v29 = vld [vmem:[#allocation6 + $0xe8] sm:$0xff]  ;;  %vm2235_vm15 = vcmask 1042432   ;;  %vm2258_vm0 = vcmask 1044480  }
  0xb3   : > { %12369 = vmatpush1.bf16.msra.mxu0 %v12368_v26  ;;  %12505 = vmatpush3.bf16.msra.mxu1 %v15454_v45  ;;  %v12370_v24 = vpack.c.bf16 %v665_v34, %v653_v28  ;;  %v659_v32 = vand.u32 4294901760, %v658_v12  ;;  %v22301_v28 = vmov 0.0   ;;  %v12374_v12 = vpack.c.bf16 %v15245_v7, %v15243_v6  ;;  %v15533_v26 = vld [vmem:[#allocation6 + $0x100] sm:$0xff]  ;;  %v15576_v7 = vld [vmem:[#allocation6 + $0x130] sm:$0xff] }
  0xb4   : > { %12507 = vmatprep.subr.bf16.mxu1 %v15494_v16  ;;  %v15517_v57 = vpack.c.bf16 %v21357_v46, %v21358_v48  ;;  %447 = vmatprep.mubr.f32.mxu1 %v22301_v28  ;;  %v671_v34 = vand.u32 4294901760, %v670_v9  ;;  %v15529_v45 = vand.u32 4294901760, %v14984_v14  ;;  %v22304_v9 = vand.u32 4294901760, %v15500_v1 }
  0xb5   : > { %12371 = vmatprep.subr.bf16.mxu0 %v12370_v24  ;;  %v22303_v24 = vand.u32 4294901760, %v15498_v37  ;;  %v12378_v48 = vpack.c.bf16 %v15234_v0, %v15231_v61  ;;  %v22318_v6 = vand.u32 4294901760, %v15535_v56  ;;  %v22348_v58 = vand.u32 4294901760, %v15576_v7 }
  0xb6   : > { %22300 = vst [vmem:[#allocation68_spill] sm:$0xff] %v15517_v57  ;;  %22302 = vst [vmem:[#allocation69_spill] sm:$0xff] %v15529_v45  ;;  %v12372_v46 = vpack.c.bf16 %v671_v34, %v659_v32  ;;  %v15547_v32 = vsub.f32 %v14984_v14, %v15529_v45  ;;  %v12376_v34 = vpack.c.bf16 %v15227_v59, %v15223_v53  ;;  %v22310_v14 = vand.u32 4294901760, %v15521_v40  ;;  %v15586_v59 = vld [vmem:[#allocation6 + $0x148] sm:$0xff] }
  0xb7   : > { %12509 = vmatpush3.bf16.msra.mxu1 %v15494_v16  ;;  %v15542_v60 = vpack.c.bf16 %v22304_v9, %v22303_v24  ;;  %v15554_v16 = vand.u32 4294901760, %v14980_v15  ;;  %v15772_v20 = vsub.f32 %v15576_v7, %v22348_v58  ;;  %vm5313_vm1 = vcmask 1043456  }
  0xb8   : > { %12511 = vmatprep.subr.bf16.mxu1 %v15517_v57  ;;  %22306 = vst [vmem:[#allocation71_spill] sm:$0xff] %v15547_v32  ;;  %12373 = vmatpush1.bf16.msra.mxu0 %v12372_v46  ;;  %v15557_v24 = vand.u32 4294901760, %v15547_v32 }
  0xb9   : > { %22305 = vst [vmem:[#allocation70_spill] sm:$0xff] %v15542_v60  ;;  %22307 = vst [vmem:[#allocation72_spill] sm:$0xff] %v15554_v16  ;;  %12375 = vmatprep.subr.bf16.mxu0 %v12374_v12  ;;  %v15564_v46 = vsub.f32 %v14980_v15, %v15554_v16  ;;  %v22311_v12 = vand.u32 4294901760, %v15524_v29  ;;  %v12380_v15 = vpack.c.bf16 %v15240_v3, %v15238_v2  ;;  %v22317_v2 = vand.u32 4294901760, %v15533_v26 }
  0xba   : > { %22308 = vst [vmem:[#allocation73_spill] sm:$0xff] %v15557_v24  ;;  %v451_v9 = vsub.f32 %v15547_v32, %v15557_v24  ;;  %v22316_v24 = vand.u32 4294901760, %v15420_v21 }
  0xbb   : > { %12513 = vmatpush3.bf16.msra.mxu1 %v15517_v57  ;;  %22309 = vst [vmem:[#allocation74_spill] sm:$0xff] %v15564_v46  ;;  %707 = vmatmul.mubr.f32.vlgmr.msra.gmra.mrb[0].mxu0 %v15433_v50  ;;  %v15572_v0 = vpack.c.bf16 %v22311_v12, %v22310_v14  ;;  %v15579_v57 = vand.u32 4294901760, %v14976_v17  ;;  %v15584_v61 = vand.u32 4294901760, %v15564_v46  ;;  %v22315_v14 = vand.u32 4294901760, %v15418_v19 }
  0xbc   : > { %12515 = vmatprep.subr.bf16.mxu1 %v15542_v60  ;;  %12377 = vmatpush1.bf16.msra.mxu0 %v12376_v34  ;;  %v15597_v53 = vsub.f32 %v15420_v21, %v22316_v24  ;;  %v12382_v34 = vpack.c.bf16 %v15254_v42, %v15252_v39  ;;  %v15601_v3 = vand.u32 4294901760, %v451_v9  ;;  %v15607_v32 = vpack.c.bf16 %v22318_v6, %v22317_v2  ;;  %v15617_v24 = vld [vmem:[#allocation6 + $0x160] sm:$0xff]  ;;  %v15619_v9 = vld [vmem:[#allocation6 + $0x178] sm:$0xff] }
  0xbd   : > { %22312 = vst [vmem:[#allocation75_spill] sm:$0xff] %v15572_v0  ;;  %22313 = vst [vmem:[#allocation76_spill] sm:$0xff] %v15579_v57  ;;  %712 = vmatprep.mubr.f32.mxu0 %v22301_v28  ;;  %v15592_v12 = vsub.f32 %v15418_v19, %v22315_v14  ;;  %12379 = vmatprep.subr.bf16.mxu0 %v12378_v48  ;;  %v15611_v19 = vsub.f32 %v14976_v17, %v15579_v57 }
  0xbe   : > { %22314 = vst [vmem:[#allocation77_spill] sm:$0xff] %v15584_v61  ;;  %22319 = vst [vmem:[#allocation78_spill] sm:$0xff] %v15607_v32  ;;  %v462_v21 = vsub.f32 %v15564_v46, %v15584_v61  ;;  %453 = vmatmul.mubr.f32.gmra.mrb[2].mxu1 %v15601_v3  ;;  %v22323_v61 = vand.u32 4294901760, %v15460_v33  ;;  %v12384_v2 = vpack.c.bf16 %v15262_v44, %v15260_v43 }
  0xbf   : > { %22320 = vst [vmem:[#allocation79_spill] sm:$0xff] %v15611_v19  ;;  %12517 = vmatpush3.bf16.msra.mxu1 %v15542_v60  ;;  %v15627_v17 = vand.u32 4294901760, %v15611_v19  ;;  %v22322_v60 = vand.u32 4294901760, %v15458_v13  ;;  %v12386_v6 = vpack.c.bf16 %v15284_v36, %v15280_v5  ;;  %458 = vmatprep.mubr.f32.mxu1 %v22301_v28 }
  0xc0   : > { %12519 = vmatprep.subr.bf16.mxu1 %v15572_v0  ;;  %v15637_v14 = vsub.f32 %v15460_v33, %v22323_v61  ;;  %12381 = vmatpush1.bf16.msra.mxu0 %v12380_v15  ;;  %v15644_v42 = vand.u32 4294901760, %v462_v21  ;;  %v22324_v15 = vand.u32 4294901760, %v15592_v12  ;;  %v22325_v21 = vand.u32 4294901760, %v15597_v53 }
  0xc1   : > { %22321 = vst [vmem:[#allocation80_spill] sm:$0xff] %v15627_v17  ;;  %v15632_v48 = vsub.f32 %v15458_v13, %v22322_v60  ;;  %12383 = vmatprep.subr.bf16.mxu0 %v12382_v34  ;;  %v473_v13 = vsub.f32 %v15611_v19, %v15627_v17  ;;  %714 = vmatmul.mubr.f32.gmra.mrb[2].mxu0 %v15529_v45  ;;  %v22326_v17 = vand.u32 4294901760, %v15484_v41  ;;  %v22327_v61 = vand.u32 4294901760, %v15486_v30 }
  0xc2   : > { %v1467_v33 = vsub.f32 %v15592_v12, %v22324_v15  ;;  %719 = vmatprep.mubr.f32.mxu0 %v22301_v28  ;;  %v1474_v34 = vsub.f32 %v15597_v53, %v22325_v21  ;;  %464 = vmatmul.mubr.f32.gmra.mrb[4].mxu1 %v15644_v42  ;;  %v22328_v15 = vand.u32 4294901760, %v15576_v7  ;;  %v22349_v7 = vand.u32 4294901760, %v15586_v59 }
  0xc3   : > { %12521 = vmatpush3.bf16.msra.mxu1 %v15572_v0  ;;  %v15662_v60 = vsub.f32 %v15484_v41, %v22326_v17  ;;  %v15667_v39 = vsub.f32 %v15486_v30, %v22327_v61  ;;  %v22329_v0 = vand.u32 4294901760, %v15586_v59  ;;  %v15677_v21 = vand.u32 4294901760, %v473_v13  ;;  %469 = vmatprep.mubr.f32.mxu1 %v22301_v28 }
  0xc4   : > { %12523 = vmatprep.subr.bf16.mxu1 %v15607_v32  ;;  %12385 = vmatpush1.bf16.msra.mxu0 %v12384_v2  ;;  %v12388_v30 = vpack.c.bf16 %v15300_v4, %v15298_v63  ;;  %v22331_v61 = vand.u32 4294901760, %v15498_v37  ;;  %v22333_v2 = vand.u32 4294901760, %v15617_v24  ;;  %v22334_v41 = vand.u32 4294901760, %v15619_v9 }
  0xc5   : > { %v15675_v45 = vpack.c.bf16 %v22329_v0, %v22328_v15  ;;  %v22332_v0 = vand.u32 4294901760, %v15500_v1  ;;  %12387 = vmatprep.subr.bf16.mxu0 %v12386_v6  ;;  %v12390_v15 = vpack.c.bf16 %v15315_v51, %v15313_v49  ;;  %721 = vmatmul.mubr.f32.gmra.mrb[4].mxu0 %v15554_v16  ;;  %v12392_v6 = vpack.c.bf16 %v15330_v11, %v15324_v35 }
  0xc6   : > { %v15687_v19 = vsub.f32 %v15498_v37, %v22331_v61  ;;  %v15700_v17 = vpack.c.bf16 %v22334_v41, %v22333_v2  ;;  %v1468_v37 = vand.u32 4294901760, %v1467_v33  ;;  %v1475_v61 = vand.u32 4294901760, %v1474_v34  ;;  %726 = vmatprep.mubr.f32.mxu0 %v22301_v28  ;;  %475 = vmatmul.mubr.f32.gmra.mrb[6].mxu1 %v15677_v21 }
  0xc7   : > { %22330 = vst [vmem:[#allocation81_spill] sm:$0xff] %v15675_v45  ;;  %v15692_v13 = vsub.f32 %v15500_v1, %v22332_v0  ;;  %12525 = vmatpush3.bf16.msra.mxu1 %v15607_v32  ;;  %v22336_v0 = vand.u32 4294901760, %v15632_v48  ;;  %v22337_v2 = vand.u32 4294901760, %v15637_v14  ;;  %v22338_v33 = vand.u32 4294901760, %v15521_v40  ;;  %11658 = vmatprep.mubr.f32.mxu1 %v15488_v38 }
  0xc8   : > { %22335 = vst [vmem:[#allocation82_spill] sm:$0xff] %v15700_v17  ;;  %12527 = vmatprep.subr.bf16.mxu1 %v15675_v45  ;;  %12389 = vmatpush1.bf16.msra.mxu0 %v12388_v30  ;;  %v12534_v30 = vpack.c.bf16 %v1475_v61, %v1468_v37  ;;  %v22341_v38 = vand.u32 4294901760, %v15662_v60  ;;  %v12396_v61 = vpack.c.bf16 %v15360_v31, %v15354_v54 }
  0xc9   : > { %v1481_v41 = vsub.f32 %v15632_v48, %v22336_v0  ;;  %v1488_v32 = vsub.f32 %v15637_v14, %v22337_v2  ;;  %v15718_v34 = vsub.f32 %v15521_v40, %v22338_v33  ;;  %12391 = vmatprep.subr.bf16.mxu0 %v12390_v15  ;;  %v12394_v0 = vpack.c.bf16 %v15345_v25, %v15343_v27 }
  0xca   : > { %728 = vmatmul.mubr.f32.gmra.mrb[6].mxu0 %v15579_v57  ;;  %v22339_v2 = vand.u32 4294901760, %v15524_v29  ;;  %v1495_v33 = vsub.f32 %v15662_v60, %v22341_v38  ;;  %v22342_v15 = vand.u32 4294901760, %v15667_v39  ;;  %v22344_v38 = vand.u32 4294901760, %v15687_v19 }
  0xcb   : > { %12529 = vmatpush3.bf16.msra.mxu1 %v15675_v45  ;;  %862 = vmatprep.mubr.f32.mxu0 %v22301_v28  ;;  %v1482_v1 = vand.u32 4294901760, %v1481_v41  ;;  %v1489_v57 = vand.u32 4294901760, %v1488_v32  ;;  %v12398_v32 = vpack.c.bf16 %v15375_v10, %v15373_v22  ;;  %v22347_v28 = vand.u32 4294901760, %v15718_v34 }
  0xcc   : > { %v15731_v40 = vsub.f32 %v15524_v29, %v22339_v2  ;;  %v1502_v16 = vsub.f32 %v15667_v39, %v22342_v15  ;;  %12531 = vmatprep.subr.bf16.mxu1 %v15700_v17  ;;  %v22343_v2 = vand.u32 4294901760, %v15533_v26  ;;  %12393 = vmatpush1.bf16.msra.mxu0 %v12392_v6  ;;  %v1509_v45 = vsub.f32 %v15687_v19, %v22344_v38 }
  0xcd   : > { %v22345_v15 = vand.u32 4294901760, %v15692_v13  ;;  %12395 = vmatprep.subr.bf16.mxu0 %v12394_v0  ;;  %v12538_v38 = vpack.c.bf16 %v1489_v57, %v1482_v1  ;;  %v1523_v0 = vsub.f32 %v15718_v34, %v22347_v28  ;;  %v12404_v28 = vpack.c.bf16 %v15424_v62, %v15414_v8 }
  0xce   : > { %22340 = vst [vmem:[#allocation83_spill] sm:$0xff] %v15731_v40  ;;  %v15746_v37 = vsub.f32 %v15533_v26, %v22343_v2  ;;  %v1529_v29 = vand.u32 4294901760, %v15731_v40  ;;  %v22346_v26 = vand.u32 4294901760, %v15535_v56  ;;  %v1496_v2 = vand.u32 4294901760, %v1495_v33 }
  0xcf   : > { %v1516_v41 = vsub.f32 %v15692_v13, %v22345_v15  ;;  %12533 = vmatpush3.bf16.msra.mxu1 %v15700_v17  ;;  %v1503_v46 = vand.u32 4294901760, %v1502_v16  ;;  %v12402_v16 = vpack.c.bf16 %v15405_v47, %v15403_v23  ;;  %v1510_v33 = vand.u32 4294901760, %v1509_v45 }
  0xd0   : > { %v15762_v6 = vsub.f32 %v15535_v56, %v22346_v26  ;;  %12535 = vmatprep.subr.bf16.mxu1 %v12534_v30  ;;  %v1536_v15 = vand.u32 4294901760, %v15746_v37  ;;  %12397 = vmatpush1.bf16.msra.mxu0 %v12396_v61  ;;  %v12400_v56 = vpack.c.bf16 %v15390_v18, %v15384_v55  ;;  %v1530_v1 = vsub.f32 %v15731_v40, %v1529_v29 }
  0xd1   : > { %v1517_v57 = vand.u32 4294901760, %v1516_v41  ;;  %12399 = vmatprep.subr.bf16.mxu0 %v12398_v32  ;;  %v15786_v61 = vsub.f32 %v15586_v59, %v22349_v7  ;;  %v12542_v26 = vpack.c.bf16 %v1503_v46, %v1496_v2  ;;  %v22350_v45 = vand.u32 4294901760, %v15617_v24 }
  0xd2   : > { %11659 = vmatmul.mubr.f32.vlgmr.msra.gmra.mrb[8].mxu1 %v15601_v3  ;;  %v1543_v58 = vand.u32 4294901760, %v15762_v6  ;;  %v22351_v41 = vand.u32 4294901760, %v15619_v9  ;;  %v1524_v17 = vand.u32 4294901760, %v1523_v0  ;;  %v1537_v40 = vsub.f32 %v15746_v37, %v1536_v15 }
  0xd3   : > { %12537 = vmatpush3.bf16.msra.mxu1 %v12534_v30  ;;  %11661 = vmatprep.mubr.f32.mxu1 %v15644_v42  ;;  %v15792_v3 = vsub.f32 %v15617_v24, %v22350_v45  ;;  %v1550_v59 = vand.u32 4294901760, %v15772_v20  ;;  %v22352_v46 = vand.u32 4294901760, %v15260_v43  ;;  %v22353_v42 = vand.u32 4294901760, %v15262_v44 }
  0xd4   : > { %v15797_v32 = vsub.f32 %v15619_v9, %v22351_v41  ;;  %12539 = vmatprep.subr.bf16.mxu1 %v12538_v38  ;;  %12401 = vmatpush1.bf16.msra.mxu0 %v12400_v56  ;;  %v12546_v24 = vpack.c.bf16 %v1517_v57, %v1510_v33  ;;  %v22354_v2 = vand.u32 4294901760, %v15280_v5  ;;  %v22355_v7 = vand.u32 4294901760, %v15284_v36 }
  0xd5   : > { %v15805_v30 = vpack.c.bf16 %v22353_v42, %v22352_v46  ;;  %v22356_v0 = vand.u32 4294901760, %v15298_v63  ;;  %v22357_v45 = vand.u32 4294901760, %v15300_v4  ;;  %v22358_v43 = vand.u32 4294901760, %v15313_v49  ;;  %12403 = vmatprep.subr.bf16.mxu0 %v12402_v16 }
  0xd6   : > { %v15811_v9 = vpack.c.bf16 %v22355_v7, %v22354_v2  ;;  %v22359_v44 = vand.u32 4294901760, %v15315_v51  ;;  %v1531_v56 = vand.u32 4294901760, %v1530_v1  ;;  %v1544_v5 = vsub.f32 %v15762_v6, %v1543_v58  ;;  %11662 = vmatmul.mubr.f32.gmra.mrb[10].mxu1 %v15677_v21 }
  0xd7   : > { %v15817_v41 = vpack.c.bf16 %v22357_v45, %v22356_v0  ;;  %v1557_v36 = vand.u32 4294901760, %v15786_v61  ;;  %v22360_v63 = vand.u32 4294901760, %v15324_v35  ;;  %v22361_v4 = vand.u32 4294901760, %v15330_v11  ;;  %12541 = vmatpush3.bf16.msra.mxu1 %v12538_v38  ;;  %11696 = vmatprep.mubr.f32.mxu1 %v15433_v50 }
  0xd8   : > { %v15823_v46 = vpack.c.bf16 %v22359_v44, %v22358_v43  ;;  %v1564_v49 = vand.u32 4294901760, %v15792_v3  ;;  %v1571_v51 = vand.u32 4294901760, %v15797_v32  ;;  %v22362_v16 = vand.u32 4294901760, %v15343_v27  ;;  %12543 = vmatprep.subr.bf16.mxu1 %v12542_v26  ;;  %12405 = vmatpush1.bf16.msra.mxu0 %v12404_v28 }
  0xd9   : > { %v15832_v33 = vpack.c.bf16 %v22361_v4, %v22360_v63  ;;  %v22363_v57 = vand.u32 4294901760, %v15345_v25  ;;  %v22364_v21 = vand.u32 4294901760, %v15354_v54  ;;  %v22365_v35 = vand.u32 4294901760, %v15360_v31  ;;  %12407 = vmatprep.subr.bf16.mxu0 %v15221_v52 }
  0xda   : > { %v22366_v38 = vand.u32 4294901760, %v15373_v22  ;;  %v22367_v42 = vand.u32 4294901760, %v15375_v10  ;;  %v22368_v7 = vand.u32 4294901760, %v15384_v55  ;;  %v22369_v27 = vand.u32 4294901760, %v15390_v18 }
  0xdb   : > { %v15841_v1 = vpack.c.bf16 %v22363_v57, %v22362_v16  ;;  %v15847_v11 = vpack.c.bf16 %v22365_v35, %v22364_v21  ;;  %v22370_v0 = vand.u32 4294901760, %v15403_v23  ;;  %v22371_v54 = vand.u32 4294901760, %v15405_v47  ;;  %12545 = vmatpush3.bf16.msra.mxu1 %v12542_v26 }
  0xdc   : > { %v15853_v2 = vpack.c.bf16 %v22367_v42, %v22366_v38  ;;  %v15859_v25 = vpack.c.bf16 %v22369_v27, %v22368_v7  ;;  %v22372_v45 = vand.u32 4294901760, %v15414_v8  ;;  %v22373_v22 = vand.u32 4294901760, %v15424_v62  ;;  %v22388_v27 = vld [vmem:[#allocation64_spill] sm:$0xff]  ;;  %12547 = vmatprep.subr.bf16.mxu1 %v12546_v24 }
  0xdd   : > { %v15865_v31 = vpack.c.bf16 %v22371_v54, %v22370_v0  ;;  %v22374_v10 = vand.u32 4294901760, %v15592_v12  ;;  %v22375_v55 = vand.u32 4294901760, %v15597_v53  ;;  %v22376_v44 = vand.u32 4294901760, %v15632_v48  ;;  %865 = vmatmul.mubr.f32.vlgmr.msra.gmra.mrb[0].mxu0 %v22388_v27 }
  0xde   : > { %v15871_v43 = vpack.c.bf16 %v22373_v22, %v22372_v45  ;;  %v22377_v23 = vand.u32 4294901760, %v15637_v14  ;;  %v22378_v63 = vand.u32 4294901760, %v15662_v60  ;;  %v22379_v8 = vand.u32 4294901760, %v15667_v39 }
  0xdf   : > { %v15877_v18 = vpack.c.bf16 %v22375_v55, %v22374_v10  ;;  %v22380_v28 = vand.u32 4294901760, %v15687_v19  ;;  %v22381_v4 = vand.u32 4294901760, %v15692_v13  ;;  %v22383_v57 = vand.u32 4294901760, %v15718_v34  ;;  %v22389_v10 = vld [vmem:[#allocation40_spill] sm:$0xff]  ;;  %12549 = vmatpush3.bf16.msra.mxu1 %v12546_v24 }
  0xe0   : > { %v15883_v47 = vpack.c.bf16 %v22377_v23, %v22376_v44  ;;  %v15889_v62 = vpack.c.bf16 %v22379_v8, %v22378_v63  ;;  %v15902_v35 = vpack.c.bf16 %v1543_v58, %v1536_v15  ;;  %v15904_v38 = vpack.c.bf16 %v1557_v36, %v1550_v59  ;;  %12409 = vmatpush1.bf16.msra.mxu0 %v22389_v10  ;;  %v22391_v15 = vld [vmem:[#allocation42_spill] sm:$0xff]  ;;  %v22396_v63 = vld [vmem:[#allocation53_spill] sm:$0xff]  ;;  %v22398_v8 = vld [vmem:[#allocation79_spill] sm:$0xff] }
  0xe1   : > { %v15895_v16 = vpack.c.bf16 %v22381_v4, %v22380_v28  ;;  %v15900_v21 = vpack.c.bf16 %v1529_v29, %v22383_v57  ;;  %v15906_v42 = vpack.c.bf16 %v1571_v51, %v1564_v49  ;;  %v1551_v7 = vsub.f32 %v15772_v20, %v1550_v59  ;;  %12411 = vmatprep.subr.bf16.mxu0 %v22391_v15  ;;  %v22395_v23 = vld [vmem:[#allocation74_spill] sm:$0xff]  ;;  %v22399_v28 = vld [vmem:[#allocation55_spill] sm:$0xff]  ;;  %v22400_v4 = vld [vmem:[#allocation56_spill] sm:$0xff] }
  0xe2   : > { %22385 = vst [vmem:[#allocation86_spill] sm:$0xff] %v15902_v35  ;;  %22386 = vst [vmem:[#allocation87_spill] sm:$0xff] %v15904_v38  ;;  %v12550_v0 = vpack.c.bf16 %v1531_v56, %v1524_v17  ;;  %v1538_v54 = vand.u32 4294901760, %v1537_v40  ;;  %v1545_v45 = vand.u32 4294901760, %v1544_v5  ;;  %v1558_v22 = vsub.f32 %v15786_v61, %v1557_v36  ;;  %v22392_v17 = vld [vmem:[#allocation71_spill] sm:$0xff]  ;;  %v22393_v40 = vld [vmem:[#allocation45_spill] sm:$0xff] }
  0xe3   : > { %22382 = vst [vmem:[#allocation84_spill] sm:$0xff] %v15895_v16  ;;  %22384 = vst [vmem:[#allocation85_spill] sm:$0xff] %v15900_v21  ;;  %v22390_v29 = vmov 0.0   ;;  %v1552_v58 = vand.u32 4294901760, %v1551_v7  ;;  %v1565_v59 = vsub.f32 %v15792_v3, %v1564_v49  ;;  %v1572_v44 = vsub.f32 %v15797_v32, %v1571_v51  ;;  %v22394_v56 = vld [vmem:[#allocation50_spill] sm:$0xff]  ;;  %v22401_v7 = vld [vmem:[#allocation57_spill] sm:$0xff] }
  0xe4   : > { %22387 = vst [vmem:[#allocation88_spill] sm:$0xff] %v15906_v42  ;;  %870 = vmatprep.mubr.f32.mxu0 %v22390_v29  ;;  %12551 = vmatprep.subr.bf16.mxu1 %v12550_v0  ;;  %v12554_v26 = vpack.c.bf16 %v1545_v45, %v1538_v54  ;;  %v1559_v55 = vand.u32 4294901760, %v1558_v22  ;;  %v22397_v49 = vld [vmem:[#allocation54_spill] sm:$0xff]  ;;  %v12566_v57 = vpack.c.bf16 %v15597_v53, %v15592_v12  ;;  %v22403_v45 = vld [vmem:[#allocation59_spill] sm:$0xff]  ;;  %v22404_v22 = vld [vmem:[#allocation60_spill] sm:$0xff] }
  0xe5   : > { %873 = vmatmul.mubr.f32.gmra.mrb[2].mxu0 %v22392_v17  ;;  %12553 = vmatpush3.bf16.msra.mxu1 %v12550_v0  ;;  %v1566_v24 = vand.u32 4294901760, %v1565_v59  ;;  %v1573_v36 = vand.u32 4294901760, %v1572_v44  ;;  %v22402_v0 = vld [vmem:[#allocation58_spill] sm:$0xff]  ;;  %v12570_v54 = vpack.c.bf16 %v15637_v14, %v15632_v48  ;;  %v12574_v53 = vpack.c.bf16 %v15667_v39, %v15662_v60  ;;  %v22407_v12 = vld [vmem:[#allocation61_spill] sm:$0xff]  ;;  %v22409_v59 = vld [vmem:[#allocation48_spill] sm:$0xff] }
  0xe6   : > { %12413 = vmatpush1.bf16.msra.mxu0 %v22393_v40  ;;  %878 = vmatprep.mubr.f32.mxu0 %v22390_v29  ;;  %v12558_v5 = vpack.c.bf16 %v1559_v55, %v1552_v58  ;;  %v22405_v58 = vld [vmem:[#allocation69_spill] sm:$0xff]  ;;  %v22408_v55 = vld [vmem:[#allocation62_spill] sm:$0xff]  ;;  %v22410_v44 = vand.u32 4294901760, %v22409_v59  ;;  %v22415_v39 = vld [vmem:[#allocation39_spill] sm:$0xff] }
  0xe7   : > { %12415 = vmatprep.subr.bf16.mxu0 %v22394_v56  ;;  %12555 = vmatprep.subr.bf16.mxu1 %v12554_v26  ;;  %v12562_v51 = vpack.c.bf16 %v1573_v36, %v1566_v24  ;;  %v22411_v48 = vld [vmem:[#allocation49_spill] sm:$0xff]  ;;  %v22413_v24 = vld [vmem:[#allocation76_spill] sm:$0xff]  ;;  %v12578_v36 = vpack.c.bf16 %v15692_v13, %v15687_v19  ;;  %v22416_v60 = vand.u32 4294901760, %v22415_v39  ;;  %v22419_v59 = vld [vmem:[#allocation43_spill] sm:$0xff] }
  0xe8   : > { %v22412_v14 = vand.u32 4294901760, %v22411_v48  ;;  %v22420_v48 = vand.u32 4294901760, %v22419_v59  ;;  %v22425_v13 = vld [vmem:[#allocation46_spill] sm:$0xff]  ;;  %v22427_v39 = vld [vmem:[#allocation47_spill] sm:$0xff] }
  0xe9   : > { %881 = vmatmul.mubr.f32.gmra.mrb[4].mxu0 %v22395_v23  ;;  %12557 = vmatpush3.bf16.msra.mxu1 %v12554_v26  ;;  %v22406_v26 = vld [vmem:[#allocation72_spill] sm:$0xff]  ;;  %v22426_v21 = vand.u32 4294901760, %v22425_v13  ;;  %v22428_v16 = vand.u32 4294901760, %v22427_v39 }
  0xea   : > { %12417 = vmatpush1.bf16.msra.mxu0 %v22396_v63  ;;  %886 = vmatprep.mubr.f32.mxu0 %v22390_v29 }
  0xeb   : > { %12419 = vmatprep.subr.bf16.mxu0 %v22397_v49  ;;  %12559 = vmatprep.subr.bf16.mxu1 %v12558_v5 }
  0xed   : > { %889 = vmatmul.mubr.f32.gmra.mrb[6].mxu0 %v22398_v8  ;;  %12561 = vmatpush3.bf16.msra.mxu1 %v12558_v5  ;;  %v12438_v5 = vpack.c.bf16 %v22412_v14, %v22410_v44  ;;  %v22421_v44 = vld [vmem:[#allocation44_spill] sm:$0xff] }
  0xee   : > { %12421 = vmatpush1.bf16.msra.mxu0 %v22399_v28  ;;  %991 = vmatprep.mubr.f32.mxu0 %v22390_v29  ;;  %v22422_v14 = vand.u32 4294901760, %v22421_v44 }
  0xef   : > { %12423 = vmatprep.subr.bf16.mxu0 %v22400_v4  ;;  %12563 = vmatprep.subr.bf16.mxu1 %v12562_v51 }
  0xf0   : > { %v12442_v35 = vpack.c.bf16 %v22422_v14, %v22420_v48  ;;  %v12586_v48 = vpack.c.bf16 %v15762_v6, %v15746_v37  ;;  %v12594_v37 = vpack.c.bf16 %v15797_v32, %v15792_v3  ;;  %v22435_v6 = vld [vmem:[#allocation80_spill] sm:$0xff]  ;;  %v22439_v32 = vld [vmem:[#allocation70_spill] sm:$0xff] }
  0xf1   : > { %12565 = vmatpush3.bf16.msra.mxu1 %v12562_v51  ;;  %v22414_v51 = vld [vmem:[#allocation63_spill] sm:$0xff]  ;;  %v22438_v3 = vld [vmem:[#allocation68_spill] sm:$0xff] }
  0xf2   : > { %12425 = vmatpush1.bf16.msra.mxu0 %v22401_v7  ;;  %12567 = vmatprep.subr.bf16.mxu1 %v12566_v57  ;;  %v2298_v14 = vld [vmem:[#allocation8 + $0x40] sm:$0xff] }
  0xf3   : > { %12427 = vmatprep.subr.bf16.mxu0 %v22402_v0 }
  0xf4   : > { %11697 = vmatmul.mubr.f32.vlgmr.msra.gmra.mrb[8].mxu1 %v22405_v58 }
  0xf5   : > { %12569 = vmatpush3.bf16.msra.mxu1 %v12566_v57  ;;  %11699 = vmatprep.mubr.f32.mxu1 %v22406_v26  ;;  %v22417_v57 = vld [vmem:[#allocation41_spill] sm:$0xff] }
  0xf6   : > { %12429 = vmatpush1.bf16.msra.mxu0 %v22403_v45  ;;  %12571 = vmatprep.subr.bf16.mxu1 %v12570_v54  ;;  %v22418_v42 = vand.u32 4294901760, %v22417_v57  ;;  %v12444_v57 = vpack.c.bf16 %v22428_v16, %v22426_v21  ;;  %v12590_v16 = vpack.c.bf16 %v15786_v61, %v15772_v20  ;;  %v22434_v21 = vld [vmem:[#allocation77_spill] sm:$0xff]  ;;  %v22437_v61 = vld [vmem:[#allocation67_spill] sm:$0xff] }
  0xf7   : > { %12431 = vmatprep.subr.bf16.mxu0 %v22404_v22  ;;  %v22436_v20 = vld [vmem:[#allocation65_spill] sm:$0xff] }
  0xf8   : > { %11700 = vmatmul.mubr.f32.gmra.mrb[10].mxu1 %v22413_v24  ;;  %v12440_v38 = vpack.c.bf16 %v22418_v42, %v22416_v60  ;;  %v22429_v42 = vld [vmem:[#allocation51_spill] sm:$0xff]  ;;  %v22431_v60 = vld [vmem:[#allocation52_spill] sm:$0xff] }
  0xf9   : > { %12573 = vmatpush3.bf16.msra.mxu1 %v12570_v54  ;;  %11734 = vmatprep.mubr.f32.mxu1 %v22388_v27  ;;  %v22423_v54 = vld [vmem:[#allocation66_spill] sm:$0xff]  ;;  %v22424_v27 = vld [vmem:[#allocation83_spill] sm:$0xff]  ;;  %v22432_v59 = vand.u32 4294901760, %v22431_v60 }
  0xfa   : > { %12433 = vmatpush1.bf16.msra.mxu0 %v22407_v12  ;;  %12575 = vmatprep.subr.bf16.mxu1 %v12574_v53  ;;  %v12582_v19 = vpack.c.bf16 %v22424_v27, %v15718_v34  ;;  %v22433_v34 = vld [vmem:[#allocation73_spill] sm:$0xff]  ;;  %v2340_v27 = vand.u32 4294901760, %v2298_v14 }
  0xfb   : > { %12435 = vmatprep.subr.bf16.mxu0 %v22408_v55 }
  0xfd   : > { %12577 = vmatpush3.bf16.msra.mxu1 %v12574_v53 }
  0xfe   : > { %12437 = vmatpush1.bf16.msra.mxu0 %v22414_v51  ;;  %12579 = vmatprep.subr.bf16.mxu1 %v12578_v36 }
  0xff   : > { %12439 = vmatprep.subr.bf16.mxu0 %v12438_v5  ;;  %v22430_v5 = vand.u32 4294901760, %v22429_v42  ;;  %v2305_v42 = vld [vmem:[#allocation8 + $0x78] sm:$0xff] }
 0x100   : > { %v2350_v60 = vand.u32 4294901760, %v2305_v42 }
 0x101   : > { %995 = vmatmul.mubr.f32.vlgmr.msra.gmra.mrb[0].mxu0 %v22423_v54  ;;  %v12446_v53 = vpack.c.bf16 %v22432_v59, %v22430_v5  ;;  %12581 = vmatpush3.bf16.msra.mxu1 %v12578_v36  ;;  %v2301_v36 = vld [vmem:[#allocation8 + $0x58] sm:$0xff] }
 0x102   : > { %12441 = vmatpush1.bf16.msra.mxu0 %v12440_v38  ;;  %1000 = vmatprep.mubr.f32.mxu0 %v22390_v29  ;;  %v16106_v38 = vld [vmem:[#allocation8 + $0x8] sm:$0xff]  ;;  %v2342_v44 = vand.u32 4294901760, %v2301_v36 }
 0x103   : > { %12443 = vmatprep.subr.bf16.mxu0 %v12442_v35  ;;  %12583 = vmatprep.subr.bf16.mxu1 %v12582_v19 }
 0x105   : > { %1004 = vmatmul.mubr.f32.gmra.mrb[2].mxu0 %v22433_v34  ;;  %12585 = vmatpush3.bf16.msra.mxu1 %v12582_v19 }
 0x106   : > { %12445 = vmatpush1.bf16.msra.mxu0 %v12444_v57  ;;  %1009 = vmatprep.mubr.f32.mxu0 %v22390_v29  ;;  %v2303_v57 = vld [vmem:[#allocation8 + $0x68] sm:$0xff] }
 0x107   : > { %12447 = vmatprep.subr.bf16.mxu0 %v12446_v53  ;;  %12587 = vmatprep.subr.bf16.mxu1 %v12586_v48  ;;  %v2346_v5 = vand.u32 4294901760, %v2303_v57 }
 0x109   : > { %1013 = vmatmul.mubr.f32.gmra.mrb[4].mxu0 %v22434_v21  ;;  %12589 = vmatpush3.bf16.msra.mxu1 %v12586_v48  ;;  %v2302_v48 = vld [vmem:[#allocation8 + $0x60] sm:$0xff] }
 0x10a   : > { %12449 = vmatpush1.bf16.msra.mxu0 %v15805_v30  ;;  %1018 = vmatprep.mubr.f32.mxu0 %v22390_v29  ;;  %v22440_v30 = vld [vmem:[#allocation75_spill] sm:$0xff] }
 0x10b   : > { %12451 = vmatprep.subr.bf16.mxu0 %v15811_v9  ;;  %12591 = vmatprep.subr.bf16.mxu1 %v12590_v16  ;;  %v22442_v9 = vld [vmem:[#allocation81_spill] sm:$0xff] }
 0x10d   : > { %1022 = vmatmul.mubr.f32.gmra.mrb[6].mxu0 %v22435_v6  ;;  %12593 = vmatpush3.bf16.msra.mxu1 %v12590_v16 }
 0x10e   : > { %12453 = vmatpush1.bf16.msra.mxu0 %v15817_v41  ;;  %1188 = vmatprep.mubr.f32.mxu0 %v22390_v29  ;;  %v22443_v41 = vld [vmem:[#allocation82_spill] sm:$0xff] }
 0x10f   : > { %12455 = vmatprep.subr.bf16.mxu0 %v15823_v46  ;;  %12595 = vmatprep.subr.bf16.mxu1 %v12594_v37  ;;  %v22444_v46 = vld [vmem:[#allocation84_spill] sm:$0xff] }
 0x111   : > { %12597 = vmatpush3.bf16.msra.mxu1 %v12594_v37 }
 0x112   : > { %12457 = vmatpush1.bf16.msra.mxu0 %v15832_v33  ;;  %12599 = vmatprep.subr.bf16.mxu1 %v22436_v20  ;;  %v22445_v33 = vld [vmem:[#allocation85_spill] sm:$0xff] }
 0x113   : > { %12459 = vmatprep.subr.bf16.mxu0 %v15841_v1  ;;  %v22446_v1 = vld [vmem:[#allocation86_spill] sm:$0xff] }
 0x114   : > { %11735 = vmatmul.mubr.f32.vlgmr.msra.gmra.mrb[8].mxu1 %v22392_v17 }
 0x115   : > { %12601 = vmatpush3.bf16.msra.mxu1 %v22436_v20  ;;  %11737 = vmatprep.mubr.f32.mxu1 %v22395_v23 }
 0x116   : > { %12461 = vmatpush1.bf16.msra.mxu0 %v15847_v11  ;;  %12603 = vmatprep.subr.bf16.mxu1 %v22437_v61  ;;  %v22447_v11 = vld [vmem:[#allocation87_spill] sm:$0xff] }
 0x117   : > { %12463 = vmatprep.subr.bf16.mxu0 %v15853_v2  ;;  %v22448_v2 = vld [vmem:[#allocation88_spill] sm:$0xff] }
 0x118   : > { %11738 = vmatmul.mubr.f32.gmra.mrb[10].mxu1 %v22398_v8 }
 0x119   : > { %12605 = vmatpush3.bf16.msra.mxu1 %v22437_v61  ;;  %11772 = vmatprep.mubr.f32.mxu1 %v22423_v54  ;;  %v2300_v54 = vld [vmem:[#allocation8 + $0x50] sm:$0xff] }
 0x11a   : > { %12465 = vmatpush1.bf16.msra.mxu0 %v15859_v25  ;;  %12607 = vmatprep.subr.bf16.mxu1 %v22438_v3  ;;  %v2344_v19 = vand.u32 4294901760, %v2300_v54 }
 0x11b   : > { %12467 = vmatprep.subr.bf16.mxu0 %v15865_v31 }
 0x11c   : > { %v16130_v39 = vpack.c.bf16 %v2344_v19, %v2340_v27 }
 0x11d   : > { %12609 = vmatpush3.bf16.msra.mxu1 %v22438_v3 }
 0x11e   : > { %12469 = vmatpush1.bf16.msra.mxu0 %v15871_v43  ;;  %12611 = vmatprep.subr.bf16.mxu1 %v22439_v32  ;;  %22454 = vst [vmem:[#allocation50_spill] sm:$0xff] %v16130_v39 }
 0x11f   : > { %12471 = vmatprep.subr.bf16.mxu0 %v15221_v52  ;;  %v22441_v52 = vld [vmem:[#allocation78_spill] sm:$0xff] }
 0x121   : > { %1190 = vmatmul.mubr.f32.vlgmr.msra.gmra.mrb[0].mxu0 %v15433_v50  ;;  %12613 = vmatpush3.bf16.msra.mxu1 %v22439_v32 }
 0x122   : > { %12473 = vmatpush1.bf16.msra.mxu0 %v22389_v10  ;;  %1195 = vmatprep.mubr.f32.mxu0 %v22390_v29  ;;  %v16108_v10 = vld [vmem:[#allocation8 + $0x18] sm:$0xff] }
 0x123   : > { %12475 = vmatprep.subr.bf16.mxu0 %v22391_v15  ;;  %12615 = vmatprep.subr.bf16.mxu1 %v22440_v30  ;;  %v2322_v15 = vand.u32 4294901760, %v16106_v38  ;;  %v2326_v17 = vand.u32 4294901760, %v16108_v10 }
 0x125   : > { %1197 = vmatmul.mubr.f32.gmra.mrb[2].mxu0 %v22405_v58  ;;  %12617 = vmatpush3.bf16.msra.mxu1 %v22440_v30 }
 0x126   : > { %12477 = vmatpush1.bf16.msra.mxu0 %v22393_v40  ;;  %1202 = vmatprep.mubr.f32.mxu0 %v22390_v29  ;;  %v2290_v40 = vld [vmem:[#allocation8] sm:$0xff] }
 0x127   : > { %12479 = vmatprep.subr.bf16.mxu0 %v22394_v56  ;;  %12619 = vmatprep.subr.bf16.mxu1 %v22441_v52  ;;  %v2292_v56 = vld [vmem:[#allocation8 + $0x10] sm:$0xff]  ;;  %v2324_v23 = vand.u32 4294901760, %v2290_v40 }
 0x129   : > { %1204 = vmatmul.mubr.f32.gmra.mrb[4].mxu0 %v22406_v26  ;;  %12621 = vmatpush3.bf16.msra.mxu1 %v22441_v52  ;;  %v16133_v59 = vsub.f32 %v2290_v40, %v2324_v23  ;;  %v2348_v40 = vand.u32 4294901760, %v2302_v48 }
 0x12a   : > { %12481 = vmatpush1.bf16.msra.mxu0 %v22396_v63  ;;  %1209 = vmatprep.mubr.f32.mxu0 %v22390_v29  ;;  %v2328_v63 = vand.u32 4294901760, %v2292_v56 }
 0x12b   : > { %12483 = vmatprep.subr.bf16.mxu0 %v22397_v49  ;;  %12623 = vmatprep.subr.bf16.mxu1 %v22442_v9  ;;  %v16116_v49 = vpack.c.bf16 %v2326_v17, %v2322_v15 }
 0x12c   : > { %v16118_v8 = vpack.c.bf16 %v2328_v63, %v2324_v23  ;;  %v16135_v53 = vsub.f32 %v2292_v56, %v2328_v63 }
 0x12d   : > { %1211 = vmatmul.mubr.f32.gmra.mrb[6].mxu0 %v22413_v24  ;;  %12625 = vmatpush3.bf16.msra.mxu1 %v22442_v9  ;;  %22449 = vst [vmem:[#allocation64_spill] sm:$0xff] %v16116_v49 }
 0x12e   : > { %12485 = vmatpush1.bf16.msra.mxu0 %v22399_v28  ;;  %1313 = vmatprep.mubr.f32.mxu0 %v22390_v29  ;;  %22450 = vst [vmem:[#allocation40_spill] sm:$0xff] %v16118_v8  ;;  %v2295_v28 = vld [vmem:[#allocation8 + $0x28] sm:$0xff] }
 0x12f   : > { %12487 = vmatprep.subr.bf16.mxu0 %v22400_v4  ;;  %12627 = vmatprep.subr.bf16.mxu1 %v22443_v41  ;;  %v2297_v4 = vld [vmem:[#allocation8 + $0x38] sm:$0xff] }
 0x131   : > { %12629 = vmatpush3.bf16.msra.mxu1 %v22443_v41 }
 0x132   : > { %12489 = vmatpush1.bf16.msra.mxu0 %v22401_v7  ;;  %12631 = vmatprep.subr.bf16.mxu1 %v15877_v18  ;;  %v2330_v7 = vand.u32 4294901760, %v2295_v28 }
 0x133   : > { %12491 = vmatprep.subr.bf16.mxu0 %v22402_v0  ;;  %v2334_v0 = vand.u32 4294901760, %v2297_v4 }
 0x134   : > { %11773 = vmatmul.mubr.f32.vlgmr.msra.gmra.mrb[8].mxu1 %v22433_v34  ;;  %v2304_v34 = vld [vmem:[#allocation8 + $0x70] sm:$0xff]  ;;  %v16138_v16 = vsub.f32 %v2295_v28, %v2330_v7 }
 0x135   : > { %12633 = vmatpush3.bf16.msra.mxu1 %v15877_v18  ;;  %11775 = vmatprep.mubr.f32.mxu1 %v22434_v21  ;;  %v16140_v21 = vsub.f32 %v2297_v4, %v2334_v0  ;;  %v2352_v56 = vand.u32 4294901760, %v2304_v34  ;;  %v16161_v4 = vsub.f32 %v2302_v48, %v2348_v40 }
 0x136   : > { %12493 = vmatpush1.bf16.msra.mxu0 %v22403_v45  ;;  %12635 = vmatprep.subr.bf16.mxu1 %v15883_v47  ;;  %v2294_v45 = vld [vmem:[#allocation8 + $0x20] sm:$0xff] }
 0x137   : > { %12495 = vmatprep.subr.bf16.mxu0 %v22404_v22  ;;  %v2296_v22 = vld [vmem:[#allocation8 + $0x30] sm:$0xff] }
 0x138   : > { %11776 = vmatmul.mubr.f32.gmra.mrb[10].mxu1 %v22435_v6 }
 0x139   : > { %12637 = vmatpush3.bf16.msra.mxu1 %v15883_v47  ;;  %11810 = vmatprep.mubr.f32.mxu1 %v15433_v50 }
 0x13a   : > { %12497 = vmatpush1.bf16.msra.mxu0 %v22407_v12  ;;  %12639 = vmatprep.subr.bf16.mxu1 %v15889_v62  ;;  %v16122_v12 = vpack.c.bf16 %v2334_v0, %v2330_v7 }
 0x13b   : > { %12499 = vmatprep.subr.bf16.mxu0 %v22408_v55 }
 0x13c   : > { %22451 = vst [vmem:[#allocation42_spill] sm:$0xff] %v16122_v12 }
 0x13d   : > { %12641 = vmatpush3.bf16.msra.mxu1 %v15889_v62 }
 0x13e   : > { %12501 = vmatpush1.bf16.msra.mxu0 %v22414_v51  ;;  %12643 = vmatprep.subr.bf16.mxu1 %v22444_v46 }
 0x13f   : > { %12695 = vmatprep.subr.bf16.mxu0 %v16116_v49 }
 0x141   : > { %1315 = vmatmul.mubr.f32.vlgmr.msra.gmra.mrb[0].mxu0 %v15433_v50  ;;  %12645 = vmatpush3.bf16.msra.mxu1 %v22444_v46  ;;  %v2311_v46 = vld [vmem:[#allocation8 + $0xa8] sm:$0xff] }
 0x142   : > { %1320 = vmatprep.mubr.f32.mxu0 %v22390_v29  ;;  %12647 = vmatprep.subr.bf16.mxu1 %v22445_v33  ;;  %v2362_v0 = vand.u32 4294901760, %v2311_v46 }
 0x143   : > { %12697 = vmatpush1.bf16.msra.mxu0 %v16118_v8 }
 0x144   : > { %12699 = vmatprep.subr.bf16.mxu0 %v16122_v12  ;;  %v16185_v48 = vsub.f32 %v2311_v46, %v2362_v0 }
 0x145   : > { %1322 = vmatmul.mubr.f32.gmra.mrb[2].mxu0 %v22405_v58  ;;  %12649 = vmatpush3.bf16.msra.mxu1 %v22445_v33  ;;  %v2313_v33 = vld [vmem:[#allocation8 + $0xb8] sm:$0xff] }
 0x146   : > { %1327 = vmatprep.mubr.f32.mxu0 %v22390_v29  ;;  %12651 = vmatprep.subr.bf16.mxu1 %v22446_v1 }
 0x149   : > { %1329 = vmatmul.mubr.f32.gmra.mrb[4].mxu0 %v22406_v26  ;;  %12653 = vmatpush3.bf16.msra.mxu1 %v22446_v1  ;;  %v16154_v1 = vpack.c.bf16 %v2350_v60, %v2346_v5 }
 0x14a   : > { %1334 = vmatprep.mubr.f32.mxu0 %v22390_v29  ;;  %12655 = vmatprep.subr.bf16.mxu1 %v22447_v11 }
 0x14b   : > { %22455 = vst [vmem:[#allocation74_spill] sm:$0xff] %v16154_v1 }
 0x14d   : > { %1336 = vmatmul.mubr.f32.gmra.mrb[6].mxu0 %v22413_v24  ;;  %12657 = vmatpush3.bf16.msra.mxu1 %v22447_v11  ;;  %v16156_v11 = vsub.f32 %v2303_v57, %v2346_v5  ;;  %v2316_v5 = vld [vmem:[#allocation8 + $0xd0] sm:$0xff] }
 0x14e   : > { %2418 = vmatprep.mubr.f32.mxu0 %v22390_v29  ;;  %12659 = vmatprep.subr.bf16.mxu1 %v22448_v2 }
 0x151   : > { %12661 = vmatpush3.bf16.msra.mxu1 %v22448_v2  ;;  %v16158_v2 = vsub.f32 %v2305_v42, %v2350_v60  ;;  %v2314_v42 = vld [vmem:[#allocation8 + $0xc0] sm:$0xff] }
 0x152   : > { %12663 = vmatprep.subr.bf16.mxu1 %v22436_v20  ;;  %v2372_v46 = vand.u32 4294901760, %v2314_v42 }
 0x154   : > { %11811 = vmatmul.mubr.f32.vlgmr.msra.gmra.mrb[8].mxu1 %v22405_v58 }
 0x155   : > { %12665 = vmatpush3.bf16.msra.mxu1 %v22436_v20  ;;  %11813 = vmatprep.mubr.f32.mxu1 %v22406_v26  ;;  %v2307_v20 = vld [vmem:[#allocation8 + $0x88] sm:$0xff] }
 0x156   : > { %12667 = vmatprep.subr.bf16.mxu1 %v22437_v61  ;;  %v2354_v23 = vand.u32 4294901760, %v2307_v20 }
 0x158   : > { %11814 = vmatmul.mubr.f32.gmra.mrb[10].mxu1 %v22413_v24 }
 0x159   : > { %12669 = vmatpush3.bf16.msra.mxu1 %v22437_v61  ;;  %11848 = vmatprep.mubr.f32.mxu1 %v15433_v50  ;;  %v2309_v61 = vld [vmem:[#allocation8 + $0x98] sm:$0xff] }
 0x15a   : > { %12671 = vmatprep.subr.bf16.mxu1 %v22438_v3  ;;  %v2358_v63 = vand.u32 4294901760, %v2309_v61 }
 0x15d   : > { %12673 = vmatpush3.bf16.msra.mxu1 %v22438_v3  ;;  %v2306_v3 = vld [vmem:[#allocation8 + $0x80] sm:$0xff] }
 0x15e   : > { %12675 = vmatprep.subr.bf16.mxu1 %v22439_v32  ;;  %v2356_v28 = vand.u32 4294901760, %v2306_v3 }
 0x161   : > { %12677 = vmatpush3.bf16.msra.mxu1 %v22439_v32 }
 0x162   : > { %12679 = vmatprep.subr.bf16.mxu1 %v22440_v30 }
 0x165   : > { %12681 = vmatpush3.bf16.msra.mxu1 %v22440_v30  ;;  %v16148_v30 = vsub.f32 %v2301_v36, %v2342_v44  ;;  %v16169_v36 = vsub.f32 %v2307_v20, %v2354_v23 }
 0x166   : > { %12683 = vmatprep.subr.bf16.mxu1 %v22441_v52 }
 0x169   : > { %12685 = vmatpush3.bf16.msra.mxu1 %v22441_v52  ;;  %v16150_v52 = vsub.f32 %v2298_v14, %v2340_v27  ;;  %v2317_v14 = vld [vmem:[#allocation8 + $0xd8] sm:$0xff]  ;;  %v16176_v27 = vsub.f32 %v2309_v61, %v2358_v63 }
 0x16a   : > { %12687 = vmatprep.subr.bf16.mxu1 %v22442_v9 }
 0x16d   : > { %12689 = vmatpush3.bf16.msra.mxu1 %v22442_v9  ;;  %v16152_v9 = vsub.f32 %v2300_v54, %v2344_v19  ;;  %v16174_v54 = vsub.f32 %v16106_v38, %v2322_v15  ;;  %v16178_v19 = vsub.f32 %v2306_v3, %v2356_v28  ;;  %v2321_v38 = vld [vmem:[#allocation8 + $0xf8] sm:$0xff] }
 0x16e   : > { %12691 = vmatprep.subr.bf16.mxu1 %v22443_v41 }
 0x16f   : > { %22458 = vst [vmem:[#allocation79_spill] sm:$0xff] %v16178_v19 }
 0x171   : > { %12693 = vmatpush3.bf16.msra.mxu1 %v22443_v41  ;;  %v2308_v41 = vld [vmem:[#allocation8 + $0x90] sm:$0xff] }
 0x172   : > { %v2360_v7 = vand.u32 4294901760, %v2308_v41 }
 0x174   : > { %11849 = vmatmul.mubr.f32.vlgmr.msra.gmra.mrb[8].mxu1 %v22405_v58  ;;  %v2332_v58 = vand.u32 4294901760, %v2294_v45  ;;  %v16180_v57 = vsub.f32 %v2308_v41, %v2360_v7  ;;  %v16183_v60 = vpack.c.bf16 %v2360_v7, %v2356_v28  ;;  %v2374_v41 = vand.u32 4294901760, %v2317_v14 }
 0x175   : > { %11851 = vmatprep.mubr.f32.mxu1 %v22406_v26  ;;  %v2336_v26 = vand.u32 4294901760, %v2296_v22 }
 0x176   : > { %v16142_v37 = vsub.f32 %v2294_v45, %v2332_v58  ;;  %v2366_v45 = vand.u32 4294901760, %v2313_v33  ;;  %22459 = vst [vmem:[#allocation55_spill] sm:$0xff] %v16183_v60 }
 0x177   : > { %v16124_v55 = vpack.c.bf16 %v2336_v26, %v2332_v58  ;;  %v16144_v6 = vsub.f32 %v2296_v22, %v2336_v26  ;;  %v2310_v22 = vld [vmem:[#allocation8 + $0xa0] sm:$0xff]  ;;  %v16163_v58 = vpack.c.bf16 %v2352_v56, %v2348_v40  ;;  %v16165_v26 = vsub.f32 %v2304_v34, %v2352_v56  ;;  %v2319_v40 = vld [vmem:[#allocation8 + $0xe8] sm:$0xff] }
 0x178   : > { %11852 = vmatmul.mubr.f32.gmra.mrb[10].mxu1 %v22413_v24  ;;  %v2299_v24 = vld [vmem:[#allocation8 + $0x48] sm:$0xff]  ;;  %v16187_v34 = vsub.f32 %v2313_v33, %v2366_v45  ;;  %v2364_v20 = vand.u32 4294901760, %v2310_v22  ;;  %v16190_v15 = vpack.c.bf16 %v2366_v45, %v2362_v0  ;;  %v16195_v56 = vsub.f32 %v16108_v10, %v2326_v17  ;;  %v2320_v45 = vld [vmem:[#allocation8 + $0xf0] sm:$0xff] }
 0x179   : > { %3553 = vmatprep.mubr.f32.mxu1 %v22390_v29  ;;  %22452 = vst [vmem:[#allocation71_spill] sm:$0xff] %v16124_v55  ;;  %v2338_v51 = vand.u32 4294901760, %v2299_v24  ;;  %12701 = vmatpush1.bf16.msra.mxu0 %v16124_v55  ;;  %22456 = vst [vmem:[#allocation53_spill] sm:$0xff] %v16163_v58  ;;  %v2376_v33 = vand.u32 4294901760, %v2316_v5  ;;  %v2382_v0 = vand.u32 4294901760, %v2321_v38  ;;  %v16208_v10 = vsub.f32 %v2314_v42, %v2372_v46 }
 0x17a   : > { %22460 = vst [vmem:[#allocation56_spill] sm:$0xff] %v16190_v15 }
 0x17b   : > { %v16128_v13 = vpack.c.bf16 %v2342_v44, %v2338_v51  ;;  %v16146_v32 = vsub.f32 %v2299_v24, %v2338_v51  ;;  %v16167_v24 = vpack.c.bf16 %v2358_v63, %v2354_v23  ;;  %v2312_v51 = vld [vmem:[#allocation8 + $0xb0] sm:$0xff]  ;;  %v2315_v44 = vld [vmem:[#allocation8 + $0xc8] sm:$0xff]  ;;  %v16197_v23 = vsub.f32 %v2310_v22, %v2364_v20  ;;  %v2318_v63 = vld [vmem:[#allocation8 + $0xe0] sm:$0xff] }
 0x17c   : > { %v2368_v61 = vand.u32 4294901760, %v2312_v51  ;;  %v2370_v3 = vand.u32 4294901760, %v2315_v44  ;;  %v16210_v17 = vsub.f32 %v2316_v5, %v2376_v33  ;;  %v16224_v42 = vpack.c.bf16 %v2376_v33, %v2372_v46 }
 0x17d   : > { %22453 = vst [vmem:[#allocation45_spill] sm:$0xff] %v16128_v13  ;;  %12703 = vmatprep.subr.bf16.mxu0 %v16128_v13  ;;  %22457 = vst [vmem:[#allocation54_spill] sm:$0xff] %v16167_v24  ;;  %v2384_v13 = vand.u32 4294901760, %v2320_v45 }
 0x17e   : > { %12705 = vmatpush1.bf16.msra.mxu0 %v16130_v39  ;;  %v16199_v28 = vsub.f32 %v2312_v51, %v2368_v61  ;;  %v16201_v7 = vsub.f32 %v2315_v44, %v2370_v3  ;;  %v16213_v22 = vpack.c.bf16 %v2374_v41, %v2370_v3  ;;  %v16217_v44 = vsub.f32 %v2321_v38, %v2382_v0 }
 0x17f   : > { %12707 = vmatprep.subr.bf16.mxu0 %v16154_v1  ;;  %v16206_v1 = vsub.f32 %v2317_v14, %v2374_v41  ;;  %v2380_v39 = vand.u32 4294901760, %v2318_v63  ;;  %22465 = vst [vmem:[#allocation69_spill] sm:$0xff] %v16224_v42  ;;  %v16226_v5 = vsub.f32 %v2320_v45, %v2384_v13  ;;  %v21431_v3 = vand.u32 4294901760, %v16133_v59 }
 0x180   : > { %22461 = vst [vmem:[#allocation57_spill] sm:$0xff] %v16201_v7  ;;  %22463 = vst [vmem:[#allocation59_spill] sm:$0xff] %v16213_v22  ;;  %v21434_v41 = vand.u32 4294901760, %v16135_v53 }
 0x181   : > { %v16221_v14 = vsub.f32 %v2318_v63, %v2380_v39  ;;  %v2472_v63 = vsub.f32 %v16133_v59, %v21431_v3 }
 0x182   : > { %12709 = vmatpush1.bf16.msra.mxu0 %v16163_v58  ;;  %v16204_v58 = vpack.c.bf16 %v2368_v61, %v2364_v20  ;;  %v21429_v20 = vand.u32 4294901760, %v16195_v56  ;;  %v2484_v45 = vsub.f32 %v16135_v53, %v21434_v41 }
 0x183   : > { %12711 = vmatprep.subr.bf16.mxu0 %v16167_v24  ;;  %v2378_v24 = vand.u32 4294901760, %v2319_v40  ;;  %22464 = vst [vmem:[#allocation60_spill] sm:$0xff] %v16221_v14  ;;  %v2473_v3 = vand.u32 4294901760, %v2472_v63 }
 0x184   : > { %22462 = vst [vmem:[#allocation58_spill] sm:$0xff] %v16204_v58  ;;  %v2478_v38 = vsub.f32 %v16195_v56, %v21429_v20  ;;  %v21437_v20 = vand.u32 4294901760, %v16138_v16 }
 0x185   : > { %v16090_v50 = vpop.f32.mrb[0].mxu1  ;;  %v16215_v51 = vsub.f32 %v2319_v40, %v2378_v24  ;;  %v16235_v61 = vpack.c.bf16 %v2382_v0, %v2378_v24  ;;  %v16248_v24 = vpack.c.bf16 %v2384_v13, %v2380_v39 }
 0x186   : > { %v16092_v25 = vpop.f32.mrb[1].mxu1  ;;  %12713 = vmatpush1.bf16.msra.mxu0 %v16183_v60  ;;  %v21430_v60 = vand.u32 4294901760, %v16174_v54  ;;  %v2479_v33 = vand.u32 4294901760, %v2478_v38  ;;  %v21445_v38 = vand.u32 4294901760, %v16144_v6  ;;  %v2490_v41 = vsub.f32 %v16138_v16, %v21437_v20 }
 0x187   : > { %12715 = vmatprep.subr.bf16.mxu0 %v16190_v15  ;;  %22466 = vst [vmem:[#allocation72_spill] sm:$0xff] %v16235_v61  ;;  %22467 = vst [vmem:[#allocation61_spill] sm:$0xff] %v16248_v24 }
 0x188   : > { %v2466_v40 = vsub.f32 %v16174_v54, %v21430_v60  ;;  %v21440_v60 = vand.u32 4294901760, %v16140_v21  ;;  %v2508_v39 = vsub.f32 %v16144_v6, %v21445_v38  ;;  %v21460_v38 = vand.u32 4294901760, %v16165_v26 }
 0x18a   : > { %12717 = vmatpush1.bf16.msra.mxu0 %v16204_v58  ;;  %v2467_v46 = vand.u32 4294901760, %v2466_v40  ;;  %v21443_v40 = vand.u32 4294901760, %v16142_v37  ;;  %v2502_v58 = vsub.f32 %v16140_v21, %v21440_v60  ;;  %v21446_v60 = vand.u32 4294901760, %v16148_v30 }
 0x18b   : > { %12719 = vmatprep.subr.bf16.mxu0 %v16213_v22  ;;  %v2485_v22 = vand.u32 4294901760, %v2484_v45  ;;  %v21444_v45 = vand.u32 4294901760, %v16146_v32 }
 0x18c   : > { %v12726_v0 = vpack.c.bf16 %v2479_v33, %v2467_v46  ;;  %v2496_v13 = vsub.f32 %v16142_v37, %v21443_v40  ;;  %v2491_v33 = vand.u32 4294901760, %v2490_v41  ;;  %v2503_v63 = vand.u32 4294901760, %v2502_v58 }
 0x18d   : > { %v16265_v46 = vpack.c.bf16 %v2485_v22, %v2473_v3  ;;  %v2514_v22 = vsub.f32 %v16146_v32, %v21444_v45  ;;  %v21448_v3 = vand.u32 4294901760, %v16152_v9  ;;  %v2526_v41 = vsub.f32 %v16148_v30, %v21446_v60 }
 0x18e   : > { %12721 = vmatpush1.bf16.msra.mxu0 %v16224_v42  ;;  %v2497_v20 = vand.u32 4294901760, %v2496_v13  ;;  %v21447_v42 = vand.u32 4294901760, %v16150_v52  ;;  %v16271_v40 = vpack.c.bf16 %v2503_v63, %v2491_v33  ;;  %v21453_v33 = vand.u32 4294901760, %v16156_v11 }
 0x18f   : > { %12723 = vmatprep.subr.bf16.mxu0 %v16235_v61  ;;  %v2509_v61 = vand.u32 4294901760, %v2508_v39  ;;  %v2515_v39 = vand.u32 4294901760, %v2514_v22  ;;  %v21458_v63 = vand.u32 4294901760, %v16158_v2  ;;  %v2527_v45 = vand.u32 4294901760, %v2526_v41 }
 0x190   : > { %v2520_v13 = vsub.f32 %v16150_v52, %v21447_v42  ;;  %v2538_v42 = vsub.f32 %v16156_v11, %v21453_v33  ;;  %v21461_v33 = vand.u32 4294901760, %v16169_v36 }
 0x191   : > { %v16094_v31 = vpop.f32.mrb[2].mxu1  ;;  %v16277_v58 = vpack.c.bf16 %v2509_v61, %v2497_v20  ;;  %v21459_v61 = vand.u32 4294901760, %v16161_v4  ;;  %v2550_v22 = vsub.f32 %v16158_v2, %v21458_v63  ;;  %v21462_v63 = vand.u32 4294901760, %v16176_v27 }
 0x192   : > { %v16096_v43 = vpop.f32.mrb[3].mxu1  ;;  %12725 = vmatpush1.bf16.msra.mxu0 %v16248_v24  ;;  %v2521_v20 = vand.u32 4294901760, %v2520_v13  ;;  %v2556_v13 = vsub.f32 %v16165_v26, %v21460_v38  ;;  %v21464_v38 = vand.u32 4294901760, %v16180_v57 }
 0x193   : > { %12727 = vmatprep.subr.bf16.mxu0 %v12726_v0  ;;  %v2532_v0 = vsub.f32 %v16152_v9, %v21448_v3  ;;  %v16298_v3 = vpack.c.bf16 %v2527_v45, %v2515_v39  ;;  %v2544_v41 = vsub.f32 %v16161_v4, %v21459_v61  ;;  %v2551_v15 = vand.u32 4294901760, %v2550_v22 }
 0x194   : > { %v2557_v12 = vand.u32 4294901760, %v2556_v13  ;;  %v21463_v45 = vand.u32 4294901760, %v16178_v19  ;;  %v2562_v61 = vsub.f32 %v16169_v36, %v21461_v33  ;;  %v21470_v13 = vand.u32 4294901760, %v16187_v34 }
 0x195   : > { %v16098_v18 = vpop.f32.mrb[4].mxu1  ;;  %v2533_v60 = vand.u32 4294901760, %v2532_v0  ;;  %v2539_v0 = vand.u32 4294901760, %v2538_v42  ;;  %v2545_v55 = vand.u32 4294901760, %v2544_v41  ;;  %v2574_v42 = vsub.f32 %v16176_v27, %v21462_v63 }
 0x196   : > { %v16100_v47 = vpop.f32.mrb[5].mxu1  ;;  %v2563_v22 = vand.u32 4294901760, %v2562_v61  ;;  %v21469_v41 = vand.u32 4294901760, %v16185_v48  ;;  %v21472_v33 = vand.u32 4294901760, %v16199_v28  ;;  %v2598_v61 = vsub.f32 %v16187_v34, %v21470_v13 }
 0x197   : > { %v16306_v24 = vpack.c.bf16 %v2533_v60, %v2521_v20  ;;  %v16311_v39 = vpack.c.bf16 %v2551_v15, %v2539_v0  ;;  %v16317_v60 = vpack.c.bf16 %v2557_v12, %v2545_v55  ;;  %v2568_v20 = vsub.f32 %v16178_v19, %v21463_v45 }
 0x198   : > { %v2580_v15 = vsub.f32 %v16180_v57, %v21464_v38  ;;  %v2575_v0 = vand.u32 4294901760, %v2574_v42  ;;  %v21471_v55 = vand.u32 4294901760, %v16197_v23  ;;  %v2586_v45 = vsub.f32 %v16185_v48, %v21469_v41 }
 0x199   : > { %v16102_v62 = vpop.f32.mrb[6].mxu1  ;;  %22468 = vst [vmem:[#allocation62_spill] sm:$0xff] %v16306_v24  ;;  %22469 = vst [vmem:[#allocation48_spill] sm:$0xff] %v16311_v39  ;;  %v2569_v12 = vand.u32 4294901760, %v2568_v20  ;;  %v2604_v20 = vsub.f32 %v16199_v28, %v21472_v33  ;;  %v2599_v49 = vand.u32 4294901760, %v2598_v61  ;;  %v21473_v41 = vand.u32 4294901760, %v16201_v7 }
 0x19a   : > { %v16104_v35 = vpop.f32.mrb[7].mxu1  ;;  %22470 = vst [vmem:[#allocation49_spill] sm:$0xff] %v16317_v60  ;;  %v2581_v63 = vand.u32 4294901760, %v2580_v15  ;;  %v16338_v38 = vpack.c.bf16 %v2575_v0, %v2563_v22  ;;  %v2592_v42 = vsub.f32 %v16197_v23, %v21471_v55  ;;  %v2587_v15 = vand.u32 4294901760, %v2586_v45 }
 0x19b   : > { %v2605_v39 = vand.u32 4294901760, %v2604_v20  ;;  %v21474_v13 = vand.u32 4294901760, %v16206_v1  ;;  %v21475_v22 = vand.u32 4294901760, %v16208_v10  ;;  %v2610_v55 = vsub.f32 %v16201_v7, %v21473_v41 }
 0x19c   : > { %22471 = vst [vmem:[#allocation76_spill] sm:$0xff] %v16338_v38  ;;  %v16346_v8 = vpack.c.bf16 %v2581_v63, %v2569_v12  ;;  %v2593_v60 = vand.u32 4294901760, %v2592_v42  ;;  %v16351_v0 = vpack.c.bf16 %v2599_v49, %v2587_v15  ;;  %v21476_v33 = vand.u32 4294901760, %v16210_v17 }
 0x19d   : > { %v2622_v45 = vsub.f32 %v16206_v1, %v21474_v13  ;;  %v2616_v12 = vsub.f32 %v16208_v10, %v21475_v22  ;;  %v2611_v61 = vand.u32 4294901760, %v2610_v55  ;;  %v21477_v42 = vand.u32 4294901760, %v16215_v51 }
 0x19e   : > { %22472 = vst [vmem:[#allocation63_spill] sm:$0xff] %v16346_v8  ;;  %22473 = vst [vmem:[#allocation39_spill] sm:$0xff] %v16351_v0  ;;  %v16357_v63 = vpack.c.bf16 %v2605_v39, %v2593_v60  ;;  %v2628_v49 = vsub.f32 %v16210_v17, %v21476_v33  ;;  %v21480_v20 = vand.u32 4294901760, %v16217_v44  ;;  %v21478_v60 = vand.u32 4294901760, %v16221_v14 }
 0x19f   : > { %v2623_v15 = vand.u32 4294901760, %v2622_v45  ;;  %v2617_v39 = vand.u32 4294901760, %v2616_v12  ;;  %v21479_v41 = vand.u32 4294901760, %v16226_v5  ;;  %v2634_v22 = vsub.f32 %v16215_v51, %v21477_v42 }
 0x1a0   : > { %22474 = vst [vmem:[#allocation41_spill] sm:$0xff] %v16357_v63  ;;  %v2629_v13 = vand.u32 4294901760, %v2628_v49  ;;  %v2646_v55 = vsub.f32 %v16217_v44, %v21480_v20  ;;  %v2640_v45 = vsub.f32 %v16221_v14, %v21478_v60  ;;  %v22475_v20 = vld [vmem:[#allocation23_spill] sm:$0xff] }
 0x1a1   : > { %v16378_v33 = vpack.c.bf16 %v2623_v15, %v2611_v61  ;;  %v2652_v12 = vsub.f32 %v16226_v5, %v21479_v41  ;;  %v2635_v49 = vand.u32 4294901760, %v2634_v22  ;;  %v21481_v22 = vmov 1.0  }
 0x1a2   : > { %v16386_v63 = vpack.c.bf16 %v2629_v13, %v2617_v39  ;;  %v2647_v0 = vand.u32 4294901760, %v2646_v55  ;;  %v2641_v8 = vand.u32 4294901760, %v2640_v45  ;;  %v16411_v13 = vrot.slane %v22475_v20, 7 }
 0x1a3   : > { %v2653_v42 = vand.u32 4294901760, %v2652_v12 }
 0x1a4   : > { %v16388_v38 = vpack.c.bf16 %v2647_v0, %v2635_v49  ;;  %22476 = vst [vmem:[#allocation43_spill] sm:$0xff] %v16411_v13  ;;  %v16414_v0 = vrot.slane %v21481_v22, 7  ;;  %v22478_v49 = vld [vmem:[#allocation24_spill] sm:$0xff] }
 0x1a5   : > { %v16390_v24 = vpack.c.bf16 %v2653_v42, %v2641_v8  ;;  %v2189_v45 = vrot.slane %v22478_v49, 7 }
 0x1a6   : > { %22477 = vst [vmem:[#allocation44_spill] sm:$0xff] %v16414_v0  ;;  %v16426_v15 = vsel %vm2185_vm12, %v16411_v13, %v16414_v0 }
 0x1a7   : > { %22479 = vst [vmem:[#allocation66_spill] sm:$0xff] %v16426_v15 }
 0x214   : > { %v1316_v8 = vpop.f32.mrb[0].mxu0 }
 0x215   : > { %v14422_v42 = vadd.f32 %v1316_v8, %v16090_v50  ;;  %v1318_v39 = vpop.f32.mrb[1].mxu0 }
 0x216   : > { %v14423_v55 = vadd.f32 %v1318_v39, %v16092_v25 }
 0x217   : > { %v2125_v12 = vrot.slane %v14422_v42, 6 }
 0x218   : > { %v1323_v41 = vpop.f32.mrb[2].mxu0 }
 0x219   : > { %2161 = vst [vmem:[#allocation2] sm:$0xfc] %v2125_v12  ;;  %v14424_v25 = vadd.f32 %v1323_v41, %v16094_v31  ;;  %v1325_v8 = vpop.f32.mrb[3].mxu0 }
 0x21a   : > { %v14425_v39 = vadd.f32 %v1325_v8, %v16096_v43  ;;  %v16437_v8 = vsel %vm2185_vm12, %v16414_v0, %v2189_v45 }
 0x21b   : > { %v2128_v20 = vrot.slane %v14424_v25, 6  ;;  %22480 = vst [vmem:[#allocation83_spill] sm:$0xff] %v16437_v8 }
 0x21c   : > { %v1330_v60 = vpop.f32.mrb[4].mxu0 }
 0x21d   : > { %v2129_v41 = vsel %vm2124_vm13, %v2125_v12, %v2128_v20  ;;  %v14426_v50 = vadd.f32 %v1330_v60, %v16098_v18  ;;  %v1332_v42 = vpop.f32.mrb[5].mxu0 }
 0x21e   : > { %v14427_v25 = vadd.f32 %v1332_v42, %v16100_v47  ;;  %v2199_v61 = vmul.f32 %v16426_v15, %v2129_v41  ;;  %v16451_v15 = vsel %vm2185_vm12, %v2189_v45, %v16414_v0 }
 0x21f   : > { %v2134_v49 = vrot.slane %v14426_v50, 6  ;;  %22481 = vst [vmem:[#allocation46_spill] sm:$0xff] %v16451_v15 }
 0x220   : > { %v1337_v22 = vpop.f32.mrb[6].mxu0  ;;  %v2176_v19 = vld [vmem:[#allocation2] sm:$0xfe] }
 0x221   : > { %v2135_v18 = vsel %vm2124_vm13, %v2128_v20, %v2134_v49  ;;  %v14428_v60 = vadd.f32 %v1337_v22, %v16102_v62  ;;  %v1339_v31 = vpop.f32.mrb[7].mxu0  ;;  %v2198_v43 = vmul.f32 %v16411_v13, %v2176_v19  ;;  %v2210_v20 = vrot.slane %v2199_v61, 1 }
 0x222   : > { %v14429_v50 = vadd.f32 %v1339_v31, %v16104_v35  ;;  %v2200_v42 = vmul.f32 %v16437_v8, %v2135_v18  ;;  %v22482_v8 = vmov 1.0  }
 0x223   : > { %v2140_v41 = vrot.slane %v14428_v60, 6  ;;  %v2209_v12 = vrot.slane %v2198_v43, 1  ;;  %v16465_v13 = vrot.slane %v22482_v8, 5 }
 0x224   : > { %v2212_v7 = vrot.slane %v2200_v42, 1 }
 0x225   : > { %v2141_v19 = vsel %vm2124_vm13, %v2134_v49, %v2140_v41  ;;  %2173 = vst [vmem:[#allocation2 + $0x60] sm:$0x3] %v2140_v41  ;;  %v2211_v22 = vsel %vm2208_vm14, %v2209_v12, %v2210_v20  ;;  %22483 = vst [vmem:[#allocation47_spill] sm:$0xff] %v16465_v13 }
 0x226   : > { %v2201_v31 = vmul.f32 %v16451_v15, %v2141_v19  ;;  %v2213_v18 = vsel %vm2208_vm14, %v2210_v20, %v2212_v7  ;;  %v2222_v45 = vadd.f32 %v14423_v55, %v2211_v22  ;;  %v22484_v19 = vld [vmem:[#allocation25_spill] sm:$0xff]  ;;  %v22485_v22 = vld [vmem:[#allocation26_spill] sm:$0xff] }
 0x227   : > { %v2223_v60 = vadd.f32 %v14425_v39, %v2213_v18  ;;  %v2237_v15 = vrot.slane %v22484_v19, 5 }
 0x228   : > { %v2214_v43 = vrot.slane %v2201_v31, 1 }
 0x22a   : > { %v2215_v61 = vsel %vm2208_vm14, %v2212_v7, %v2214_v43  ;;  %v16469_v7 = vrot.slane %v22485_v22, 5 }
 0x22b   : > { %v2224_v42 = vadd.f32 %v14427_v25, %v2215_v61 }
 0x22c   : > { %v2180_v47 = vld [vmem:[#allocation2 + $0x60] sm:$0x1]  ;;  %22486 = vst [vmem:[#allocation51_spill] sm:$0xff] %v16469_v7 }
 0x22d   : > { %v2202_v62 = vmul.f32 %v16414_v0, %v2180_v47 }
 0x22f   : > { %v2216_v49 = vrot.slane %v2202_v62, 1  ;;  %v16473_v62 = vsel %vm2235_vm15, %v16465_v13, %v2237_v15 }
 0x230   : > { %22487 = vst [vmem:[#allocation52_spill] sm:$0xff] %v16473_v62 }
 0x231   : > { %v2217_v41 = vsel %vm2208_vm14, %v2214_v43, %v2216_v49  ;;  %v16476_v43 = vsel %vm2235_vm15, %v2237_v15, %v16465_v13 }
 0x232   : > { %v2225_v12 = vadd.f32 %v14429_v50, %v2217_v41  ;;  %22488 = vst [vmem:[#allocation73_spill] sm:$0xff] %v16476_v43 }
 0x247   : > { %v11850_v35 = vpop.f32.mrb[8].mxu1 }
 0x248   : > { %v2132_v20 = vrot.slane %v11850_v35, 6  ;;  %v2090_v55 = vpop.f32.mrb[9].mxu1  ;;  %v16480_v35 = vsel %vm2235_vm15, %v16465_v13, %v16469_v7 }
 0x249   : > { %v2127_v39 = vrot.slane %v2090_v55, 6  ;;  %22489 = vst [vmem:[#allocation77_spill] sm:$0xff] %v16480_v35 }
 0x24b   : > { %v2133_v25 = vsel %vm2124_vm13, %v2127_v39, %v2132_v20  ;;  %2163 = vst [vmem:[#allocation2 + $0x10] sm:$0xfc] %v2127_v39  ;;  %v11853_v47 = vpop.f32.mrb[10].mxu1 }
 0x24c   : > { %v2144_v50 = vrot.slane %v11853_v47, 6  ;;  %v2102_v31 = vpop.f32.mrb[11].mxu1  ;;  %v2249_v61 = vmul.f32 %v16473_v62, %v2133_v25 }
 0x24d   : > { %v2138_v18 = vrot.slane %v2102_v31, 6 }
 0x24e   : > { %2175 = vst [vmem:[#allocation2 + $0x70] sm:$0x3] %v2144_v50  ;;  %v2260_v22 = vrot.slane %v2249_v61, 3 }
 0x24f   : > { %v2139_v49 = vsel %vm2124_vm13, %v2132_v20, %v2138_v18  ;;  %v2145_v41 = vsel %vm2124_vm13, %v2138_v18, %v2144_v50 }
 0x250   : > { %v2250_v19 = vmul.f32 %v16476_v43, %v2139_v49  ;;  %v2251_v55 = vmul.f32 %v16480_v35, %v2145_v41  ;;  %v22490_v49 = vld [vmem:[#allocation20_spill] sm:$0xff] }
 0x251   : > { %v22547_v43 = vld [vmem:[#allocation72_spill] sm:$0xff] }
 0x252   : > { %v2226_v39 = vld [vmem:[#allocation2 + $0x10] sm:$0xf8]  ;;  %v2262_v15 = vrot.slane %v2250_v19, 3  ;;  %v2264_v47 = vrot.slane %v2251_v55, 3 }
 0x253   : > { %v2248_v31 = vmul.f32 %v16465_v13, %v2226_v39 }
 0x254   : > { %v2263_v0 = vsel %vm2258_vm0, %v2260_v22, %v2262_v15  ;;  %v2265_v8 = vsel %vm2258_vm0, %v2262_v15, %v2264_v47 }
 0x255   : > { %v2259_v25 = vrot.slane %v2248_v31, 3  ;;  %v2273_v62 = vadd.f32 %v2263_v0, %v2223_v60  ;;  %v2274_v20 = vadd.f32 %v2265_v8, %v2224_v42  ;;  %v2230_v14 = vld [vmem:[#allocation2 + $0x70] sm:$0x7] }
 0x256   : > { %v2252_v50 = vmul.f32 %v16469_v7, %v2230_v14  ;;  %v22546_v7 = vld [vmem:[#allocation69_spill] sm:$0xff] }
 0x257   : > { %v2261_v18 = vsel %vm2258_vm0, %v2259_v25, %v2260_v22  ;;  %v2283_v41 = vadd.f32 %v22490_v49, %v2273_v62  ;;  %v2284_v61 = vadd.f32 %v22490_v49, %v2274_v20 }
 0x258   : > { %v2272_v19 = vadd.f32 %v2261_v18, %v2222_v45  ;;  %v2266_v55 = vrot.slane %v2252_v50, 3 }
 0x259   : > { %v2287_v35 = vmax.f32 %v2283_v41, 0.0  ;;  %v2288_v13 = vmax.f32 %v2284_v61, 0.0 }
 0x25a   : > { %v2282_v39 = vadd.f32 %v22490_v49, %v2272_v19  ;;  %v2267_v15 = vsel %vm2258_vm0, %v2264_v47, %v2266_v55 }
 0x25b   : > { %v16496_v31 = vand.u32 4294901760, %v2287_v35  ;;  %v2275_v0 = vadd.f32 %v2267_v15, %v2225_v12  ;;  %v16504_v62 = vand.u32 4294901760, %v2288_v13  ;;  %v22507_v15 = vld [vmem:[#allocation48_spill] sm:$0xff] }
 0x25c   : > { %v2286_v8 = vmax.f32 %v2282_v39, 0.0  ;;  %v22506_v39 = vld [vmem:[#allocation62_spill] sm:$0xff] }
 0x25d   : > { %22491 = vst [vmem:[#allocation80_spill] sm:$0xff] %v16496_v31  ;;  %v2285_v14 = vadd.f32 %v22490_v49, %v2275_v0  ;;  %v16502_v42 = vsub.f32 %v2287_v35, %v16496_v31  ;;  %22494 = vst [vmem:[#allocation68_spill] sm:$0xff] %v16504_v62  ;;  %v16516_v12 = vsub.f32 %v2288_v13, %v16504_v62  ;;  %v22545_v49 = vld [vmem:[#allocation59_spill] sm:$0xff] }
 0x25e   : > { %v16499_v60 = vand.u32 4294901760, %v2286_v8 }
 0x25f   : > { %22493 = vst [vmem:[#allocation67_spill] sm:$0xff] %v16502_v42  ;;  %v2289_v45 = vmax.f32 %v2285_v14, 0.0  ;;  %v16513_v47 = vand.u32 4294901760, %v16502_v42  ;;  %22498 = vst [vmem:[#allocation81_spill] sm:$0xff] %v16516_v12  ;;  %v16527_v41 = vand.u32 4294901760, %v16516_v12  ;;  %v22512_v14 = vld [vmem:[#allocation39_spill] sm:$0xff] }
 0x260   : > { %22492 = vst [vmem:[#allocation65_spill] sm:$0xff] %v16499_v60  ;;  %v16507_v22 = vsub.f32 %v2286_v8, %v16499_v60  ;;  %v22511_v8 = vld [vmem:[#allocation63_spill] sm:$0xff] }
 0x261   : > { %22497 = vst [vmem:[#allocation78_spill] sm:$0xff] %v16513_v47  ;;  %v16518_v20 = vand.u32 4294901760, %v2289_v45  ;;  %v2433_v18 = vsub.f32 %v16502_v42, %v16513_v47  ;;  %22501 = vst [vmem:[#allocation85_spill] sm:$0xff] %v16527_v41  ;;  %v2444_v19 = vsub.f32 %v16516_v12, %v16527_v41 }
 0x262   : > { %22495 = vst [vmem:[#allocation70_spill] sm:$0xff] %v16507_v22  ;;  %v16510_v25 = vand.u32 4294901760, %v16507_v22 }
 0x263   : > { %22499 = vst [vmem:[#allocation82_spill] sm:$0xff] %v16518_v20  ;;  %v16530_v61 = vsub.f32 %v2289_v45, %v16518_v20  ;;  %v16536_v13 = vand.u32 4294901760, %v2433_v18  ;;  %v22513_v45 = vld [vmem:[#allocation41_spill] sm:$0xff]  ;;  %v22515_v18 = vpack.c.bf16 %v16135_v53, %v16133_v59 }
 0x264   : > { %22496 = vst [vmem:[#allocation75_spill] sm:$0xff] %v16510_v25  ;;  %v2422_v35 = vsub.f32 %v16507_v22, %v16510_v25 }
 0x265   : > { %22502 = vst [vmem:[#allocation86_spill] sm:$0xff] %v16530_v61  ;;  %22503 = vst [vmem:[#allocation87_spill] sm:$0xff] %v16536_v13  ;;  %v16541_v55 = vand.u32 4294901760, %v16530_v61 }
 0x266   : > { %v16522_v50 = vand.u32 4294901760, %v2422_v35  ;;  %v22514_v35 = vpack.c.bf16 %v16195_v56, %v16174_v54 }
 0x267   : > { %22504 = vst [vmem:[#allocation88_spill] sm:$0xff] %v16541_v55 }
 0x268   : > { %22500 = vst [vmem:[#allocation84_spill] sm:$0xff] %v16522_v50  ;;  %2424 = vmatmul.mubr.f32.vlgmr.msra.gmra.mrb[8].mxu0 %v16522_v50  ;;  %v22553_v50 = vand.u32 4294901760, %v16138_v16 }
 0x269   : > { %12729 = vmatpush1.bf16.msra.mxu0 %v16265_v46  ;;  %2429 = vmatprep.mubr.f32.mxu0 %v22390_v29  ;;  %v16547_v46 = vand.u32 4294901760, %v2444_v19  ;;  %v22520_v19 = vpack.c.bf16 %v16158_v2, %v16156_v11 }
 0x26a   : > { %12731 = vmatprep.subr.bf16.mxu0 %v16271_v40  ;;  %v2455_v40 = vsub.f32 %v16530_v61, %v16541_v55 }
 0x26b   : > { %22505 = vst [vmem:[#allocation89_spill] sm:$0xff] %v16547_v46 }
 0x26c   : > { %2435 = vmatmul.mubr.f32.gmra.mrb[10].mxu0 %v16536_v13  ;;  %v16555_v0 = vand.u32 4294901760, %v2455_v40  ;;  %v22521_v40 = vpack.c.bf16 %v16165_v26, %v16161_v4 }
 0x26d   : > { %12733 = vmatpush1.bf16.msra.mxu0 %v16277_v58  ;;  %2440 = vmatprep.mubr.f32.mxu0 %v22390_v29  ;;  %v22509_v58 = vld [vmem:[#allocation49_spill] sm:$0xff] }
 0x26e   : > { %12735 = vmatprep.subr.bf16.mxu0 %v16298_v3  ;;  %22508 = vst [vmem:[#allocation62_spill] sm:$0xff] %v16555_v0  ;;  %v22510_v3 = vld [vmem:[#allocation76_spill] sm:$0xff] }
 0x270   : > { %2446 = vmatmul.mubr.f32.gmra.mrb[12].mxu0 %v16547_v46  ;;  %v22552_v46 = vand.u32 4294901760, %v16135_v53  ;;  %v22558_v53 = vand.u32 4294901760, %v16148_v30 }
 0x271   : > { %12737 = vmatpush1.bf16.msra.mxu0 %v22506_v39  ;;  %2451 = vmatprep.mubr.f32.mxu0 %v22390_v29  ;;  %v22522_v39 = vpack.c.bf16 %v16176_v27, %v16169_v36 }
 0x272   : > { %12739 = vmatprep.subr.bf16.mxu0 %v22507_v15  ;;  %v22523_v15 = vld [vmem:[#allocation79_spill] sm:$0xff] }
 0x274   : > { %2457 = vmatmul.mubr.f32.gmra.mrb[14].mxu0 %v16555_v0  ;;  %v22551_v0 = vand.u32 4294901760, %v16133_v59  ;;  %v22557_v59 = vand.u32 4294901760, %v16146_v32 }
 0x275   : > { %12741 = vmatpush1.bf16.msra.mxu0 %v22509_v58  ;;  %2687 = vmatprep.mubr.f32.mxu0 %v22390_v29  ;;  %v22524_v58 = vpack.c.bf16 %v16180_v57, %v22523_v15 }
 0x276   : > { %12743 = vmatprep.subr.bf16.mxu0 %v22510_v3  ;;  %v22525_v3 = vpack.c.bf16 %v16187_v34, %v16185_v48  ;;  %v12824_v13 = vpack.c.bf16 %v22552_v46, %v22551_v0 }
 0x279   : > { %12745 = vmatpush1.bf16.msra.mxu0 %v22511_v8  ;;  %v22526_v8 = vpack.c.bf16 %v16199_v28, %v16197_v23 }
 0x27a   : > { %12747 = vmatprep.subr.bf16.mxu0 %v22512_v14  ;;  %v22527_v14 = vld [vmem:[#allocation57_spill] sm:$0xff] }
 0x27d   : > { %12749 = vmatpush1.bf16.msra.mxu0 %v22513_v45  ;;  %v22528_v45 = vpack.c.bf16 %v16206_v1, %v22527_v14 }
 0x27e   : > { %12751 = vmatprep.subr.bf16.mxu0 %v16378_v33  ;;  %v22516_v33 = vpack.c.bf16 %v16140_v21, %v16138_v16  ;;  %v22559_v16 = vand.u32 4294901760, %v16150_v52 }
 0x281   : > { %12753 = vmatpush1.bf16.msra.mxu0 %v16386_v63  ;;  %v22519_v63 = vpack.c.bf16 %v16152_v9, %v16150_v52  ;;  %v22565_v52 = vand.u32 4294901760, %v16169_v36  ;;  %v22571_v36 = vand.u32 4294901760, %v16197_v23  ;;  %v22578_v23 = vand.u32 4294901760, %v16217_v44 }
 0x282   : > { %12755 = vmatprep.subr.bf16.mxu0 %v16388_v38  ;;  %v22518_v38 = vpack.c.bf16 %v16148_v30, %v16146_v32  ;;  %v22563_v32 = vand.u32 4294901760, %v16161_v4  ;;  %v22564_v30 = vand.u32 4294901760, %v16165_v26  ;;  %v22569_v4 = vand.u32 4294901760, %v16185_v48 }
 0x283   : > { %v22570_v26 = vand.u32 4294901760, %v16187_v34  ;;  %v22576_v48 = vand.u32 4294901760, %v16210_v17  ;;  %v22577_v34 = vand.u32 4294901760, %v16215_v51 }
 0x285   : > { %12757 = vmatpush1.bf16.msra.mxu0 %v16390_v24  ;;  %v22517_v24 = vpack.c.bf16 %v16144_v6, %v16142_v37  ;;  %v12842_v46 = vpack.c.bf16 %v22570_v26, %v22569_v4  ;;  %v16822_v4 = vld [vmem:[#allocation9 + $0x78] sm:$0xff]  ;;  %v16824_v26 = vld [vmem:[#allocation9 + $0x70] sm:$0xff] }
 0x286   : > { %12759 = vmatprep.subr.bf16.mxu0 %v22514_v35  ;;  %v22529_v35 = vpack.c.bf16 %v16210_v17, %v16208_v10  ;;  %v16751_v17 = vld [vmem:[#allocation9 + $0x8] sm:$0xff] }
 0x288   : > { %2689 = vmatmul.mubr.f32.vlgmr.msra.gmra.mrb[8].mxu0 %v16499_v60 }
 0x289   : > { %12761 = vmatpush1.bf16.msra.mxu0 %v22515_v18  ;;  %2694 = vmatprep.mubr.f32.mxu0 %v22390_v29  ;;  %v22530_v18 = vpack.c.bf16 %v16217_v44, %v16215_v51  ;;  %v16753_v51 = vld [vmem:[#allocation9 + $0x20] sm:$0xff]  ;;  %v21535_v44 = vand.u32 4294901760, %v16751_v17 }
 0x28a   : > { %12763 = vmatprep.subr.bf16.mxu0 %v22516_v33  ;;  %v22531_v33 = vld [vmem:[#allocation60_spill] sm:$0xff] }
 0x28c   : > { %2696 = vmatmul.mubr.f32.gmra.mrb[10].mxu0 %v16496_v31 }
 0x28d   : > { %12765 = vmatpush1.bf16.msra.mxu0 %v22517_v24  ;;  %2701 = vmatprep.mubr.f32.mxu0 %v22390_v29  ;;  %v22532_v24 = vpack.c.bf16 %v16226_v5, %v22531_v33 }
 0x28e   : > { %12767 = vmatprep.subr.bf16.mxu0 %v22518_v38  ;;  %v22533_v38 = vld [vmem:[#allocation64_spill] sm:$0xff] }
 0x290   : > { %2703 = vmatmul.mubr.f32.gmra.mrb[12].mxu0 %v16504_v62 }
 0x291   : > { %12769 = vmatpush1.bf16.msra.mxu0 %v22519_v63  ;;  %2708 = vmatprep.mubr.f32.mxu0 %v22390_v29  ;;  %v22534_v63 = vld [vmem:[#allocation40_spill] sm:$0xff] }
 0x292   : > { %12771 = vmatprep.subr.bf16.mxu0 %v22520_v19  ;;  %v22535_v19 = vld [vmem:[#allocation42_spill] sm:$0xff] }
 0x294   : > { %2710 = vmatmul.mubr.f32.gmra.mrb[14].mxu0 %v16518_v20 }
 0x295   : > { %12773 = vmatpush1.bf16.msra.mxu0 %v22521_v40  ;;  %2844 = vmatprep.mubr.f32.mxu0 %v22390_v29  ;;  %v22536_v40 = vld [vmem:[#allocation71_spill] sm:$0xff] }
 0x296   : > { %12775 = vmatprep.subr.bf16.mxu0 %v22522_v39  ;;  %v22537_v39 = vld [vmem:[#allocation45_spill] sm:$0xff] }
 0x299   : > { %12777 = vmatpush1.bf16.msra.mxu0 %v22524_v58  ;;  %v22538_v58 = vld [vmem:[#allocation50_spill] sm:$0xff] }
 0x29a   : > { %12779 = vmatprep.subr.bf16.mxu0 %v22525_v3  ;;  %v22539_v3 = vld [vmem:[#allocation74_spill] sm:$0xff] }
 0x29d   : > { %12781 = vmatpush1.bf16.msra.mxu0 %v22526_v8  ;;  %v22540_v8 = vld [vmem:[#allocation53_spill] sm:$0xff] }
 0x29e   : > { %12783 = vmatprep.subr.bf16.mxu0 %v22528_v45  ;;  %v22541_v45 = vld [vmem:[#allocation54_spill] sm:$0xff] }
 0x2a1   : > { %12785 = vmatpush1.bf16.msra.mxu0 %v22529_v35  ;;  %v22542_v35 = vld [vmem:[#allocation55_spill] sm:$0xff] }
 0x2a2   : > { %12787 = vmatprep.subr.bf16.mxu0 %v22530_v18  ;;  %v22543_v18 = vld [vmem:[#allocation56_spill] sm:$0xff] }
 0x2a5   : > { %12789 = vmatpush1.bf16.msra.mxu0 %v22532_v24  ;;  %v22544_v24 = vld [vmem:[#allocation58_spill] sm:$0xff] }
 0x2a6   : > { %12791 = vmatprep.subr.bf16.mxu0 %v22533_v38 }
 0x2a8   : > { %2847 = vmatmul.mubr.f32.vlgmr.msra.gmra.mrb[8].mxu0 %v16507_v22  ;;  %v22550_v22 = vld [vmem:[#allocation61_spill] sm:$0xff] }
 0x2a9   : > { %12793 = vmatpush1.bf16.msra.mxu0 %v22534_v63  ;;  %2852 = vmatprep.mubr.f32.mxu0 %v22390_v29 }
 0x2aa   : > { %12795 = vmatprep.subr.bf16.mxu0 %v22535_v19 }
 0x2ac   : > { %2855 = vmatmul.mubr.f32.gmra.mrb[10].mxu0 %v16502_v42 }
 0x2ad   : > { %12797 = vmatpush1.bf16.msra.mxu0 %v22536_v40  ;;  %2860 = vmatprep.mubr.f32.mxu0 %v22390_v29 }
 0x2ae   : > { %12799 = vmatprep.subr.bf16.mxu0 %v22537_v39 }
 0x2b0   : > { %2863 = vmatmul.mubr.f32.gmra.mrb[12].mxu0 %v16516_v12  ;;  %v22549_v12 = vand.u32 4294901760, %v16195_v56  ;;  %v22556_v56 = vand.u32 4294901760, %v16144_v6  ;;  %v22562_v6 = vand.u32 4294901760, %v16158_v2  ;;  %v22568_v2 = vand.u32 4294901760, %v16180_v57 }
 0x2b1   : > { %12801 = vmatpush1.bf16.msra.mxu0 %v22538_v58  ;;  %2868 = vmatprep.mubr.f32.mxu0 %v22390_v29  ;;  %v22574_v57 = vand.u32 4294901760, %v16206_v1  ;;  %v22581_v1 = vld [vmem:[#allocation59_spill] sm:$0xff] }
 0x2b2   : > { %12803 = vmatprep.subr.bf16.mxu0 %v22539_v3 }
 0x2b4   : > { %2871 = vmatmul.mubr.f32.gmra.mrb[14].mxu0 %v16530_v61  ;;  %v22548_v61 = vand.u32 4294901760, %v16174_v54  ;;  %v22555_v54 = vand.u32 4294901760, %v16142_v37  ;;  %v22561_v37 = vand.u32 4294901760, %v16156_v11  ;;  %v22567_v11 = vand.u32 4294901760, %v22523_v15 }
 0x2b5   : > { %12805 = vmatpush1.bf16.msra.mxu0 %v22540_v8  ;;  %2973 = vmatprep.mubr.f32.mxu0 %v22390_v29  ;;  %v22573_v15 = vand.u32 4294901760, %v22527_v14  ;;  %v22580_v14 = vand.u32 4294901760, %v16226_v5  ;;  %v21534_v5 = vand.u32 4294901760, %v16753_v51 }
 0x2b6   : > { %12807 = vmatprep.subr.bf16.mxu0 %v22541_v45  ;;  %v12822_v42 = vpack.c.bf16 %v22549_v12, %v22548_v61  ;;  %v12828_v12 = vpack.c.bf16 %v22556_v56, %v22555_v54  ;;  %v22575_v56 = vand.u32 4294901760, %v16208_v10  ;;  %v22582_v10 = vld [vmem:[#allocation69_spill] sm:$0xff] }
 0x2b7   : > { %v12846_v54 = vpack.c.bf16 %v22574_v57, %v22573_v15 }
 0x2b9   : > { %12809 = vmatpush1.bf16.msra.mxu0 %v22542_v35 }
 0x2ba   : > { %12811 = vmatprep.subr.bf16.mxu0 %v22543_v18 }
 0x2bd   : > { %12813 = vmatpush1.bf16.msra.mxu0 %v22544_v24 }
 0x2be   : > { %12815 = vmatprep.subr.bf16.mxu0 %v22545_v49  ;;  %v22554_v49 = vand.u32 4294901760, %v16140_v21  ;;  %v22560_v21 = vand.u32 4294901760, %v16152_v9  ;;  %v22566_v9 = vand.u32 4294901760, %v16176_v27  ;;  %v22572_v27 = vand.u32 4294901760, %v16199_v28 }
 0x2bf   : > { %v22579_v28 = vand.u32 4294901760, %v22531_v33  ;;  %v16757_v33 = vld [vmem:[#allocation9 + $0x10] sm:$0xff] }
 0x2c0   : > { %v12838_v61 = vpack.c.bf16 %v22566_v9, %v22565_v52  ;;  %v12844_v0 = vpack.c.bf16 %v22572_v27, %v22571_v36  ;;  %v16807_v52 = vld [vmem:[#allocation9 + $0x68] sm:$0xff]  ;;  %v16809_v9 = vld [vmem:[#allocation9 + $0x80] sm:$0xff]  ;;  %v21522_v36 = vand.u32 4294901760, %v16822_v4 }
 0x2c1   : > { %12817 = vmatpush1.bf16.msra.mxu0 %v22546_v7  ;;  %v12826_v7 = vpack.c.bf16 %v22554_v49, %v22553_v50  ;;  %v12832_v49 = vpack.c.bf16 %v22560_v21, %v22559_v16  ;;  %v12836_v50 = vpack.c.bf16 %v22564_v30, %v22563_v32  ;;  %v16786_v16 = vld [vmem:[#allocation9 + $0x48] sm:$0xff]  ;;  %v16788_v21 = vld [vmem:[#allocation9 + $0x40] sm:$0xff] }
 0x2c2   : > { %12819 = vmatprep.subr.bf16.mxu0 %v22547_v43  ;;  %v16829_v27 = vld [vmem:[#allocation9 + $0x88] sm:$0xff] }
 0x2c3   : > { %v21516_v57 = vand.u32 4294901760, %v16829_v27 }
 0x2c5   : > { %12821 = vmatpush1.bf16.msra.mxu0 %v22550_v22 }
 0x2c6   : > { %12823 = vmatprep.subr.bf16.mxu0 %v12822_v42  ;;  %v12830_v42 = vpack.c.bf16 %v22558_v53, %v22557_v59  ;;  %v12850_v59 = vpack.c.bf16 %v22578_v23, %v22577_v34  ;;  %v12852_v53 = vpack.c.bf16 %v22580_v14, %v22579_v28  ;;  %v16862_v28 = vld [vmem:[#allocation9 + $0xa8] sm:$0xff]  ;;  %v16864_v14 = vld [vmem:[#allocation9 + $0xa0] sm:$0xff] }
 0x2c8   : > { %2977 = vmatmul.mubr.f32.vlgmr.msra.gmra.mrb[8].mxu0 %v16510_v25 }
 0x2c9   : > { %12825 = vmatpush1.bf16.msra.mxu0 %v12824_v13  ;;  %2982 = vmatprep.mubr.f32.mxu0 %v22390_v29  ;;  %v12840_v13 = vpack.c.bf16 %v22568_v2, %v22567_v11  ;;  %v21524_v11 = vand.u32 4294901760, %v16809_v9 }
 0x2ca   : > { %12827 = vmatprep.subr.bf16.mxu0 %v12826_v7  ;;  %v12834_v7 = vpack.c.bf16 %v22562_v6, %v22561_v37  ;;  %v3471_v37 = vand.u32 4294901760, %v16786_v16  ;;  %v16793_v6 = vld [vmem:[#allocation9 + $0x58] sm:$0xff] }
 0x2cb   : > { %v21518_v30 = vand.u32 4294901760, %v16793_v6 }
 0x2cc   : > { %2986 = vmatmul.mubr.f32.gmra.mrb[10].mxu0 %v16513_v47 }
 0x2cd   : > { %12829 = vmatpush1.bf16.msra.mxu0 %v12828_v12  ;;  %2991 = vmatprep.mubr.f32.mxu0 %v22390_v29  ;;  %v12848_v12 = vpack.c.bf16 %v22576_v48, %v22575_v56  ;;  %v16847_v56 = vld [vmem:[#allocation9 + $0x98] sm:$0xff]  ;;  %v16849_v48 = vld [vmem:[#allocation9 + $0xb0] sm:$0xff] }
 0x2ce   : > { %12831 = vmatprep.subr.bf16.mxu0 %v12830_v42  ;;  %v16784_v42 = vld [vmem:[#allocation9 + $0x30] sm:$0xff]  ;;  %v21520_v34 = vand.u32 4294901760, %v16849_v48 }
 0x2d0   : > { %2995 = vmatmul.mubr.f32.gmra.mrb[12].mxu0 %v16527_v41 }
 0x2d1   : > { %12833 = vmatpush1.bf16.msra.mxu0 %v12832_v49  ;;  %3000 = vmatprep.mubr.f32.mxu0 %v22390_v29  ;;  %v3467_v49 = vand.u32 4294901760, %v16784_v42 }
 0x2d2   : > { %12835 = vmatprep.subr.bf16.mxu0 %v12834_v7  ;;  %v21519_v7 = vand.u32 4294901760, %v16788_v21 }
 0x2d4   : > { %3004 = vmatmul.mubr.f32.gmra.mrb[14].mxu0 %v16541_v55  ;;  %v16818_v2 = vpack.c.bf16 %v21518_v30, %v21519_v7  ;;  %v21526_v30 = vand.u32 4294901760, %v16862_v28 }
 0x2d5   : > { %12837 = vmatpush1.bf16.msra.mxu0 %v12836_v50  ;;  %3170 = vmatprep.mubr.f32.mxu0 %v22390_v29  ;;  %v16804_v50 = vpack.c.bf16 %v3471_v37, %v3467_v49 }
 0x2d6   : > { %12839 = vmatprep.subr.bf16.mxu0 %v12838_v61  ;;  %v21525_v61 = vand.u32 4294901760, %v16807_v52  ;;  %22588 = vst [vmem:[#allocation41_spill] sm:$0xff] %v16818_v2 }
 0x2d7   : > { %22587 = vst [vmem:[#allocation39_spill] sm:$0xff] %v16804_v50 }
 0x2d8   : > { %v16836_v15 = vpack.c.bf16 %v21524_v11, %v21525_v61  ;;  %v16902_v11 = vld [vmem:[#allocation9 + $0xd0] sm:$0xff] }
 0x2d9   : > { %12841 = vmatpush1.bf16.msra.mxu0 %v12840_v13  ;;  %v16820_v13 = vld [vmem:[#allocation9 + $0x60] sm:$0xff] }
 0x2da   : > { %12843 = vmatprep.subr.bf16.mxu0 %v12842_v46  ;;  %v21523_v46 = vand.u32 4294901760, %v16820_v13  ;;  %22589 = vst [vmem:[#allocation79_spill] sm:$0xff] %v16836_v15 }
 0x2dd   : > { %12845 = vmatpush1.bf16.msra.mxu0 %v12844_v0  ;;  %v21517_v0 = vand.u32 4294901760, %v16824_v26 }
 0x2de   : > { %12847 = vmatprep.subr.bf16.mxu0 %v12846_v54  ;;  %v16844_v54 = vpack.c.bf16 %v21522_v36, %v21523_v46  ;;  %v16898_v36 = vld [vmem:[#allocation9 + $0xc0] sm:$0xff]  ;;  %v16900_v46 = vld [vmem:[#allocation9 + $0xd8] sm:$0xff] }
 0x2df   : > { %v16858_v23 = vpack.c.bf16 %v21516_v57, %v21517_v0 }
 0x2e0   : > { %22590 = vst [vmem:[#allocation57_spill] sm:$0xff] %v16844_v54 }
 0x2e1   : > { %12849 = vmatpush1.bf16.msra.mxu0 %v12848_v12  ;;  %v21521_v12 = vand.u32 4294901760, %v16847_v56  ;;  %22591 = vst [vmem:[#allocation60_spill] sm:$0xff] %v16858_v23 }
 0x2e2   : > { %12851 = vmatprep.subr.bf16.mxu0 %v12850_v59  ;;  %v16860_v59 = vld [vmem:[#allocation9 + $0x90] sm:$0xff] }
 0x2e3   : > { %v16877_v57 = vpack.c.bf16 %v21520_v34, %v21521_v12  ;;  %v21527_v0 = vand.u32 4294901760, %v16860_v59 }
 0x2e5   : > { %12853 = vmatpush1.bf16.msra.mxu0 %v12852_v53  ;;  %22593 = vst [vmem:[#allocation40_spill] sm:$0xff] %v16877_v57  ;;  %v16894_v7 = vpack.c.bf16 %v21526_v30, %v21527_v0  ;;  %v16915_v0 = vsub.f32 %v16784_v42, %v3467_v49  ;;  %v16937_v42 = vld [vmem:[#allocation9 + $0xf8] sm:$0xff]  ;;  %v21549_v49 = vand.u32 4294901760, %v16902_v11 }
 0x2e6   : > { %12855 = vmatprep.subr.bf16.mxu0 %v22533_v38  ;;  %v22600_v41 = vand.u32 4294901760, %v16937_v42 }
 0x2e7   : > { %22594 = vst [vmem:[#allocation42_spill] sm:$0xff] %v16894_v7 }
 0x2e8   : > { %3172 = vmatmul.mubr.f32.vlgmr.msra.gmra.mrb[8].mxu0 %v16499_v60 }
 0x2e9   : > { %12857 = vmatpush1.bf16.msra.mxu0 %v22534_v63  ;;  %3177 = vmatprep.mubr.f32.mxu0 %v22390_v29 }
 0x2ea   : > { %12859 = vmatprep.subr.bf16.mxu0 %v22535_v19  ;;  %v16759_v19 = vld [vmem:[#allocation9 + $0x28] sm:$0xff] }
 0x2ec   : > { %3179 = vmatmul.mubr.f32.gmra.mrb[10].mxu0 %v16496_v31 }
 0x2ed   : > { %12861 = vmatpush1.bf16.msra.mxu0 %v22536_v40  ;;  %3184 = vmatprep.mubr.f32.mxu0 %v22390_v29  ;;  %v21529_v40 = vand.u32 4294901760, %v16757_v33 }
 0x2ee   : > { %12863 = vmatprep.subr.bf16.mxu0 %v22537_v39  ;;  %v16766_v39 = vpack.c.bf16 %v21534_v5, %v21535_v44  ;;  %v16955_v5 = vld [vmem:[#allocation9 + $0x108] sm:$0xff]  ;;  %v16957_v44 = vld [vmem:[#allocation9 + $0x100] sm:$0xff] }
 0x2f0   : > { %3186 = vmatmul.mubr.f32.gmra.mrb[12].mxu0 %v16504_v62  ;;  %22583 = vst [vmem:[#allocation48_spill] sm:$0xff] %v16766_v39  ;;  %12887 = vmatprep.subr.bf16.mxu1 %v16766_v39 }
 0x2f1   : > { %12865 = vmatpush1.bf16.msra.mxu0 %v22538_v58  ;;  %3191 = vmatprep.mubr.f32.mxu0 %v22390_v29  ;;  %v21528_v58 = vand.u32 4294901760, %v16759_v19 }
 0x2f2   : > { %12867 = vmatprep.subr.bf16.mxu0 %v22539_v3 }
 0x2f4   : > { %3193 = vmatmul.mubr.f32.gmra.mrb[14].mxu0 %v16518_v20 }
 0x2f5   : > { %12869 = vmatpush1.bf16.msra.mxu0 %v22540_v8  ;;  %3295 = vmatprep.mubr.f32.mxu0 %v22390_v29  ;;  %v16771_v8 = vld [vmem:[#allocation9 + $0x38] sm:$0xff] }
 0x2f6   : > { %12871 = vmatprep.subr.bf16.mxu0 %v22541_v45  ;;  %v16773_v45 = vld [vmem:[#allocation9 + $0x50] sm:$0xff] }
 0x2f9   : > { %12873 = vmatpush1.bf16.msra.mxu0 %v22542_v35  ;;  %v3465_v35 = vand.u32 4294901760, %v16771_v8 }
 0x2fa   : > { %12875 = vmatprep.subr.bf16.mxu0 %v22543_v18  ;;  %v3469_v18 = vand.u32 4294901760, %v16773_v45 }
 0x2fb   : > { %v16907_v61 = vsub.f32 %v16771_v8, %v3465_v35 }
 0x2fc   : > { %v16800_v32 = vpack.c.bf16 %v3469_v18, %v3465_v35  ;;  %v16912_v30 = vsub.f32 %v16773_v45, %v3469_v18  ;;  %v21539_v35 = vand.u32 4294901760, %v16898_v36  ;;  %v21538_v18 = vand.u32 4294901760, %v16900_v46 }
 0x2fd   : > { %12877 = vmatpush1.bf16.msra.mxu0 %v22544_v24  ;;  %v16782_v24 = vpack.c.bf16 %v21528_v58, %v21529_v40  ;;  %22595 = vst [vmem:[#allocation71_spill] sm:$0xff] %v16907_v61  ;;  %v16918_v58 = vsub.f32 %v16786_v16, %v3471_v37  ;;  %v16920_v40 = vld [vmem:[#allocation9 + $0xe8] sm:$0xff]  ;;  %v16939_v16 = vld [vmem:[#allocation9 + $0x110] sm:$0xff] }
 0x2fe   : > { %12879 = vmatprep.subr.bf16.mxu0 %v22581_v1  ;;  %22586 = vst [vmem:[#allocation63_spill] sm:$0xff] %v16800_v32  ;;  %v21548_v37 = vand.u32 4294901760, %v16920_v40  ;;  %v22601_v47 = vand.u32 4294901760, %v16939_v16 }
 0x2ff   : > { %22585 = vst [vmem:[#allocation76_spill] sm:$0xff] %v16782_v24 }
 0x300   : > { %v16964_v55 = vpack.c.bf16 %v21548_v37, %v21549_v49  ;;  %v16976_v25 = vpack.c.bf16 %v22601_v47, %v22600_v41  ;;  %v16986_v49 = vld [vmem:[#allocation9 + $0x128] sm:$0xff] }
 0x301   : > { %12881 = vmatpush1.bf16.msra.mxu0 %v22582_v10  ;;  %v16871_v10 = vld [vmem:[#allocation9 + $0xb8] sm:$0xff] }
 0x302   : > { %12883 = vmatprep.subr.bf16.mxu0 %v22547_v43  ;;  %v3409_v43 = vld [vmem:[#allocation9] sm:$0xff]  ;;  %22599 = vst [vmem:[#allocation53_spill] sm:$0xff] %v16964_v55  ;;  %22602 = vst [vmem:[#allocation54_spill] sm:$0xff] %v16976_v25 }
 0x303   : > { %v3459_v38 = vand.u32 4294901760, %v3409_v43 }
 0x305   : > { %12885 = vmatpush1.bf16.msra.mxu0 %v22550_v22  ;;  %v3412_v22 = vld [vmem:[#allocation9 + $0x18] sm:$0xff]  ;;  %v16866_v53 = vsub.f32 %v3409_v43, %v3459_v38  ;;  %v21531_v43 = vand.u32 4294901760, %v16864_v14 }
 0x306   : > { %v3463_v63 = vand.u32 4294901760, %v3412_v22  ;;  %13079 = vmatprep.subr.bf16.mxu0 %v16782_v24 }
 0x308   : > { %3297 = vmatmul.mubr.f32.vlgmr.msra.gmra.mrb[8].mxu0 %v16499_v60  ;;  %v16769_v3 = vpack.c.bf16 %v3463_v63, %v3459_v38  ;;  %v16868_v1 = vsub.f32 %v3412_v22, %v3463_v63  ;;  %v16884_v22 = vld [vmem:[#allocation9 + $0xc8] sm:$0xff]  ;;  %v16886_v38 = vld [vmem:[#allocation9 + $0xe0] sm:$0xff]  ;;  %v21530_v63 = vand.u32 4294901760, %v16871_v10 }
 0x309   : > { %3302 = vmatprep.mubr.f32.mxu0 %v22390_v29  ;;  %13081 = vmatpush3.bf16.msra.mxu0 %v16782_v24  ;;  %v21533_v34 = vand.u32 4294901760, %v16884_v22  ;;  %v21532_v12 = vand.u32 4294901760, %v16886_v38  ;;  %v17004_v60 = vld [vmem:[#allocation9 + $0x120] sm:$0xff] }
 0x30a   : > { %22584 = vst [vmem:[#allocation49_spill] sm:$0xff] %v16769_v3  ;;  %12889 = vmatpush1.bf16.msra.mxu1 %v16769_v3  ;;  %13083 = vmatprep.subr.bf16.mxu0 %v16818_v2  ;;  %22592 = vst [vmem:[#allocation64_spill] sm:$0xff] %v16868_v1  ;;  %v16933_v45 = vpack.c.bf16 %v21530_v63, %v21531_v43  ;;  %v16949_v63 = vpack.c.bf16 %v21538_v18, %v21539_v35  ;;  %v21554_v35 = vand.u32 4294901760, %v16955_v5  ;;  %v16968_v43 = vld [vmem:[#allocation9 + $0x118] sm:$0xff] }
 0x30b   : > { %12891 = vmatprep.subr.bf16.mxu1 %v16800_v32  ;;  %v16927_v8 = vpack.c.bf16 %v21532_v12, %v21533_v34  ;;  %v16953_v34 = vld [vmem:[#allocation9 + $0xf0] sm:$0xff]  ;;  %v16988_v12 = vld [vmem:[#allocation9 + $0x140] sm:$0xff]  ;;  %v21575_v41 = vand.u32 4294901760, %v17004_v60 }
 0x30c   : > { %3304 = vmatmul.mubr.f32.gmra.mrb[10].mxu0 %v16496_v31  ;;  %22597 = vst [vmem:[#allocation50_spill] sm:$0xff] %v16933_v45  ;;  %22598 = vst [vmem:[#allocation74_spill] sm:$0xff] %v16949_v63  ;;  %v21555_v18 = vand.u32 4294901760, %v16953_v34 }
 0x30d   : > { %3309 = vmatprep.mubr.f32.mxu0 %v22390_v29  ;;  %13085 = vmatpush3.bf16.msra.mxu0 %v16818_v2  ;;  %22596 = vst [vmem:[#allocation45_spill] sm:$0xff] %v16927_v8 }
 0x30e   : > { %12893 = vmatpush1.bf16.msra.mxu1 %v16804_v50  ;;  %13087 = vmatprep.subr.bf16.mxu0 %v16858_v23  ;;  %v16984_v37 = vpack.c.bf16 %v21554_v35, %v21555_v18  ;;  %v22607_v35 = vand.u32 4294901760, %v16968_v43 }
 0x30f   : > { %12895 = vmatprep.subr.bf16.mxu1 %v16836_v15  ;;  %v17059_v15 = vld [vmem:[#allocation9 + $0x150] sm:$0xff] }
 0x310   : > { %3311 = vmatmul.mubr.f32.gmra.mrb[12].mxu0 %v16504_v62  ;;  %22603 = vst [vmem:[#allocation55_spill] sm:$0xff] %v16984_v37  ;;  %v22604_v62 = vand.u32 4294901760, %v16751_v17 }
 0x311   : > { %3316 = vmatprep.mubr.f32.mxu0 %v22390_v29  ;;  %13089 = vmatpush3.bf16.msra.mxu0 %v16858_v23 }
 0x312   : > { %12897 = vmatpush1.bf16.msra.mxu1 %v16844_v54  ;;  %13091 = vmatprep.subr.bf16.mxu0 %v16933_v45  ;;  %v16993_v31 = vsub.f32 %v16751_v17, %v22604_v62  ;;  %v22609_v62 = vand.u32 4294901760, %v16753_v51 }
 0x313   : > { %12899 = vmatprep.subr.bf16.mxu1 %v16877_v57 }
 0x314   : > { %3318 = vmatmul.mubr.f32.gmra.mrb[14].mxu0 %v16518_v20  ;;  %22605 = vst [vmem:[#allocation56_spill] sm:$0xff] %v16993_v31  ;;  %v22606_v20 = vand.u32 4294901760, %v16957_v44  ;;  %v17013_v17 = vsub.f32 %v16753_v51, %v22609_v62 }
 0x315   : > { %13093 = vmatpush3.bf16.msra.mxu0 %v16933_v45 }
 0x316   : > { %12901 = vmatpush1.bf16.msra.mxu1 %v16894_v7  ;;  %13095 = vmatprep.subr.bf16.mxu0 %v16964_v55  ;;  %v17002_v18 = vpack.c.bf16 %v22607_v35, %v22606_v20  ;;  %22610 = vst [vmem:[#allocation72_spill] sm:$0xff] %v17013_v17  ;;  %v22611_v35 = vand.u32 4294901760, %v16986_v49  ;;  %v22612_v7 = vand.u32 4294901760, %v16988_v12  ;;  %v17038_v20 = vld [vmem:[#allocation9 + $0x170] sm:$0xff]  ;;  %v22629_v32 = vand.u32 4294901760, %v17013_v17 }
 0x317   : > { %12903 = vmatprep.subr.bf16.mxu1 %v16927_v8  ;;  %v17008_v8 = vld [vmem:[#allocation9 + $0x130] sm:$0xff] }
 0x318   : > { %22608 = vst [vmem:[#allocation58_spill] sm:$0xff] %v17002_v18  ;;  %v17026_v45 = vpack.c.bf16 %v22612_v7, %v22611_v35  ;;  %v22617_v7 = vand.u32 4294901760, %v16759_v19 }
 0x319   : > { %13097 = vmatpush3.bf16.msra.mxu0 %v16964_v55  ;;  %v17036_v55 = vld [vmem:[#allocation9 + $0x158] sm:$0xff] }
 0x31a   : > { %12905 = vmatpush1.bf16.msra.mxu1 %v16949_v63  ;;  %v17006_v63 = vld [vmem:[#allocation9 + $0x138] sm:$0xff]  ;;  %22613 = vst [vmem:[#allocation61_spill] sm:$0xff] %v17026_v45  ;;  %13099 = vmatprep.subr.bf16.mxu0 %v17002_v18  ;;  %v17048_v35 = vsub.f32 %v16759_v19, %v22617_v7  ;;  %v17064_v19 = vld [vmem:[#allocation9 + $0x160] sm:$0xff]  ;;  %v22625_v7 = vand.u32 4294901760, %v16993_v31 }
 0x31b   : > { %12907 = vmatprep.subr.bf16.mxu1 %v16976_v25  ;;  %v21574_v47 = vand.u32 4294901760, %v17006_v63  ;;  %v17018_v25 = vld [vmem:[#allocation9 + $0x148] sm:$0xff]  ;;  %v22630_v51 = vand.u32 4294901760, %v17064_v19 }
 0x31c   : > { %22618 = vst [vmem:[#allocation90_spill] sm:$0xff] %v17048_v35  ;;  %v22620_v54 = vand.u32 4294901760, %v17018_v25 }
 0x31d   : > { %v17034_v62 = vpack.c.bf16 %v21574_v47, %v21575_v41  ;;  %v22619_v41 = vand.u32 4294901760, %v17008_v8  ;;  %13101 = vmatpush3.bf16.msra.mxu0 %v17002_v18  ;;  %v3601_v47 = vsub.f32 %v16993_v31, %v22625_v7  ;;  %v22713_v31 = vld [vmem:[#allocation71_spill] sm:$0xff] }
 0x31e   : > { %12909 = vmatpush1.bf16.msra.mxu1 %v16984_v37  ;;  %v22615_v37 = vand.u32 4294901760, %v16757_v33 }
 0x31f   : > { %22614 = vst [vmem:[#allocation59_spill] sm:$0xff] %v17034_v62  ;;  %12911 = vmatprep.subr.bf16.mxu1 %v17026_v45  ;;  %v17057_v23 = vpack.c.bf16 %v22620_v54, %v22619_v41  ;;  %v17070_v45 = vld [vmem:[#allocation9 + $0x178] sm:$0xff]  ;;  %v22622_v41 = vand.u32 4294901760, %v17036_v55  ;;  %v22626_v54 = vand.u32 4294901760, %v17059_v15  ;;  %v3602_v7 = vand.u32 4294901760, %v3601_v47 }
 0x320   : > { %v17043_v57 = vsub.f32 %v16757_v33, %v22615_v37  ;;  %v17061_v33 = vld [vmem:[#allocation9 + $0x168] sm:$0xff]  ;;  %v22623_v37 = vand.u32 4294901760, %v17038_v20  ;;  %v22631_v18 = vand.u32 4294901760, %v17070_v45 }
 0x321   : > { %22621 = vst [vmem:[#allocation91_spill] sm:$0xff] %v17057_v23  ;;  %13103 = vmatprep.subr.bf16.mxu0 %v17057_v23 }
 0x322   : > { %22616 = vst [vmem:[#allocation69_spill] sm:$0xff] %v17043_v57  ;;  %12913 = vmatpush1.bf16.msra.mxu1 %v17034_v62  ;;  %v17078_v50 = vpack.c.bf16 %v22623_v37, %v22622_v41  ;;  %v22627_v62 = vand.u32 4294901760, %v17061_v33  ;;  %v3613_v37 = vsub.f32 %v17013_v17, %v22629_v32  ;;  %v21603_v41 = vand.u32 4294901760, %v16868_v1  ;;  %13105 = vmatpush3.bf16.msra.mxu0 %v17057_v23 }
 0x323   : > { %v17102_v24 = vpack.c.bf16 %v22631_v18, %v22630_v51  ;;  %v22635_v51 = vand.u32 4294901760, %v16807_v52 }
 0x324   : > { %22624 = vst [vmem:[#allocation92_spill] sm:$0xff] %v17078_v50  ;;  %v17090_v2 = vpack.c.bf16 %v22627_v62, %v22626_v54  ;;  %12915 = vmatprep.subr.bf16.mxu1 %v17078_v50  ;;  %v22633_v62 = vand.u32 4294901760, %v16866_v53  ;;  %v3614_v32 = vand.u32 4294901760, %v3613_v37  ;;  %v3619_v3 = vsub.f32 %v16868_v1, %v21603_v41 }
 0x325   : > { %22632 = vst [vmem:[#allocation94_spill] sm:$0xff] %v17102_v24  ;;  %v22634_v50 = vand.u32 4294901760, %v17043_v57  ;;  %v17119_v29 = vsub.f32 %v16807_v52, %v22635_v51  ;;  %13107 = vmatprep.subr.bf16.mxu0 %v17102_v24  ;;  %v22637_v41 = vand.u32 4294901760, %v16907_v61  ;;  %v22639_v52 = vand.u32 4294901760, %v16822_v4 }
 0x326   : > { %22628 = vst [vmem:[#allocation93_spill] sm:$0xff] %v17090_v2  ;;  %v3607_v54 = vsub.f32 %v16866_v53, %v22633_v62  ;;  %v22636_v62 = vand.u32 4294901760, %v16809_v9  ;;  %12917 = vmatpush1.bf16.msra.mxu1 %v17090_v2  ;;  %13109 = vmatpush3.bf16.msra.mxu0 %v17102_v24  ;;  %v22669_v24 = vand.u32 4294901760, %v16788_v21 }
 0x327   : > { %v4584_v18 = vsub.f32 %v17043_v57, %v22634_v50  ;;  %v3625_v47 = vsub.f32 %v16907_v61, %v22637_v41  ;;  %v22638_v50 = vand.u32 4294901760, %v16820_v13  ;;  %v17139_v51 = vsub.f32 %v16822_v4, %v22639_v52 }
 0x328   : > { %v17124_v39 = vsub.f32 %v16809_v9, %v22636_v62  ;;  %v3608_v37 = vand.u32 4294901760, %v3607_v54  ;;  %v12918_v9 = vpack.c.bf16 %v3614_v32, %v3602_v7  ;;  %v3620_v62 = vand.u32 4294901760, %v3619_v3 }
 0x329   : > { %v17134_v23 = vsub.f32 %v16820_v13, %v22638_v50  ;;  %v3626_v2 = vand.u32 4294901760, %v3625_v47  ;;  %v22640_v57 = vand.u32 4294901760, %v16912_v30  ;;  %v4585_v1 = vand.u32 4294901760, %v4584_v18  ;;  %v22714_v17 = vld [vmem:[#allocation69_spill] sm:$0xff] }
 0x32a   : > { %v21616_v41 = vand.u32 4294901760, %v17048_v35  ;;  %12919 = vmatprep.subr.bf16.mxu1 %v12918_v9  ;;  %v17145_v61 = vpack.c.bf16 %v3620_v62, %v3608_v37  ;;  %v21614_v13 = vand.u32 4294901760, %v16915_v0  ;;  %v21615_v4 = vand.u32 4294901760, %v16918_v58 }
 0x32b   : > { %v3637_v54 = vsub.f32 %v16912_v30, %v22640_v57  ;;  %v21621_v7 = vand.u32 4294901760, %v17119_v29  ;;  %v22642_v3 = vand.u32 4294901760, %v16847_v56  ;;  %v22643_v57 = vand.u32 4294901760, %v16849_v48 }
 0x32c   : > { %22641 = vst [vmem:[#allocation95_spill] sm:$0xff] %v17145_v61  ;;  %v4591_v37 = vsub.f32 %v17048_v35, %v21616_v41  ;;  %v22644_v50 = vand.u32 4294901760, %v16860_v59  ;;  %v22645_v9 = vand.u32 4294901760, %v16862_v28  ;;  %v3643_v62 = vsub.f32 %v16918_v58, %v21615_v4 }
 0x32d   : > { %v17154_v32 = vsub.f32 %v16847_v56, %v22642_v3  ;;  %v17159_v47 = vsub.f32 %v16849_v48, %v22643_v57  ;;  %v3638_v18 = vand.u32 4294901760, %v3637_v54  ;;  %v3631_v48 = vsub.f32 %v16915_v0, %v21614_v13 }
 0x32e   : > { %v17167_v52 = vsub.f32 %v16860_v59, %v22644_v50  ;;  %v17172_v56 = vsub.f32 %v16862_v28, %v22645_v9  ;;  %v22646_v54 = vand.u32 4294901760, %v16884_v22  ;;  %v22647_v59 = vand.u32 4294901760, %v16886_v38 }
 0x32f   : > { %v22648_v28 = vand.u32 4294901760, %v16898_v36  ;;  %v22649_v9 = vand.u32 4294901760, %v16900_v46  ;;  %v22650_v4 = vand.u32 4294901760, %v16937_v42  ;;  %v4592_v41 = vand.u32 4294901760, %v4591_v37 }
 0x330   : > { %v17183_v3 = vsub.f32 %v16884_v22, %v22646_v54  ;;  %v17188_v57 = vsub.f32 %v16886_v38, %v22647_v59  ;;  %v22651_v54 = vand.u32 4294901760, %v16939_v16  ;;  %v22652_v59 = vand.u32 4294901760, %v16953_v34 }
 0x331   : > { %v17193_v50 = vsub.f32 %v16898_v36, %v22648_v28  ;;  %v17198_v13 = vsub.f32 %v16900_v46, %v22649_v9  ;;  %v17203_v22 = vsub.f32 %v16937_v42, %v22650_v4  ;;  %v22653_v28 = vand.u32 4294901760, %v16955_v5 }
 0x332   : > { %v17208_v38 = vsub.f32 %v16939_v16, %v22651_v54  ;;  %v17213_v36 = vsub.f32 %v16953_v34, %v22652_v59  ;;  %v22654_v9 = vand.u32 4294901760, %v16986_v49  ;;  %v22655_v4 = vand.u32 4294901760, %v16988_v12 }
 0x333   : > { %v17218_v46 = vsub.f32 %v16955_v5, %v22653_v28  ;;  %v22656_v54 = vand.u32 4294901760, %v17004_v60  ;;  %v22658_v59 = vand.u32 4294901760, %v17006_v63  ;;  %v22660_v28 = vand.u32 4294901760, %v17036_v55 }
 0x334   : > { %v17223_v42 = vsub.f32 %v16986_v49, %v22654_v9  ;;  %v17228_v16 = vsub.f32 %v16988_v12, %v22655_v4  ;;  %v22662_v9 = vand.u32 4294901760, %v17038_v20  ;;  %v22664_v4 = vand.u32 4294901760, %v17059_v15 }
 0x335   : > { %v17233_v34 = vsub.f32 %v17004_v60, %v22656_v54  ;;  %v17238_v5 = vsub.f32 %v17006_v63, %v22658_v59  ;;  %v17243_v49 = vsub.f32 %v17036_v55, %v22660_v28  ;;  %v22666_v54 = vand.u32 4294901760, %v17061_v33 }
 0x336   : > { %v17248_v12 = vsub.f32 %v17038_v20, %v22662_v9  ;;  %v17253_v60 = vsub.f32 %v17059_v15, %v22664_v4  ;;  %v17260_v59 = vpack.c.bf16 %v3638_v18, %v3626_v2  ;;  %v3632_v55 = vand.u32 4294901760, %v3631_v48 }
 0x337   : > { %22657 = vst [vmem:[#allocation96_spill] sm:$0xff] %v17233_v34  ;;  %22659 = vst [vmem:[#allocation97_spill] sm:$0xff] %v17238_v5  ;;  %v17258_v63 = vsub.f32 %v17061_v33, %v22666_v54  ;;  %v3644_v28 = vand.u32 4294901760, %v3643_v62  ;;  %v3649_v20 = vsub.f32 %v17119_v29, %v21621_v7  ;;  %v21619_v9 = vand.u32 4294901760, %v17124_v39 }
 0x338   : > { %22661 = vst [vmem:[#allocation98_spill] sm:$0xff] %v17243_v49  ;;  %22663 = vst [vmem:[#allocation99_spill] sm:$0xff] %v17248_v12  ;;  %v17269_v15 = vsub.f32 %v16788_v21, %v22669_v24  ;;  %v22671_v4 = vand.u32 4294901760, %v16793_v6  ;;  %v17276_v2 = vpack.c.bf16 %v4592_v41, %v4585_v1  ;;  %v21620_v37 = vand.u32 4294901760, %v17134_v23 }
 0x339   : > { %22665 = vst [vmem:[#allocation100_spill] sm:$0xff] %v17253_v60  ;;  %22667 = vst [vmem:[#allocation101_spill] sm:$0xff] %v17258_v63  ;;  %v17278_v18 = vpack.c.bf16 %v3644_v28, %v3632_v55  ;;  %v21622_v48 = vand.u32 4294901760, %v17139_v51  ;;  %v3650_v62 = vand.u32 4294901760, %v3649_v20  ;;  %v3661_v54 = vsub.f32 %v17124_v39, %v21619_v9 }
 0x33a   : > { %22668 = vst [vmem:[#allocation102_spill] sm:$0xff] %v17260_v59  ;;  %22670 = vst [vmem:[#allocation103_spill] sm:$0xff] %v17269_v15  ;;  %v17274_v33 = vsub.f32 %v16793_v6, %v22671_v4  ;;  %v21623_v24 = vand.u32 4294901760, %v17269_v15  ;;  %13111 = vmatprep.subr.bf16.mxu0 %v17276_v2  ;;  %v3655_v6 = vsub.f32 %v17134_v23, %v21620_v37  ;;  %v21626_v41 = vand.u32 4294901760, %v17154_v32 }
 0x33b   : > { %22673 = vst [vmem:[#allocation105_spill] sm:$0xff] %v17276_v2  ;;  %22674 = vst [vmem:[#allocation106_spill] sm:$0xff] %v17278_v18  ;;  %v3667_v1 = vsub.f32 %v17139_v51, %v21622_v48  ;;  %v3662_v28 = vand.u32 4294901760, %v3661_v54  ;;  %v22675_v9 = vand.u32 4294901760, %v16824_v26  ;;  %v22677_v54 = vand.u32 4294901760, %v17159_v47 }
 0x33c   : > { %22672 = vst [vmem:[#allocation104_spill] sm:$0xff] %v17274_v33  ;;  %v21625_v21 = vand.u32 4294901760, %v17274_v33  ;;  %v4598_v20 = vsub.f32 %v17269_v15, %v21623_v24  ;;  %v3656_v7 = vand.u32 4294901760, %v3655_v6  ;;  %v3673_v55 = vsub.f32 %v17154_v32, %v21626_v41 }
 0x33d   : > { %v17305_v37 = vsub.f32 %v16824_v26, %v22675_v9  ;;  %v3668_v48 = vand.u32 4294901760, %v3667_v1  ;;  %v3685_v18 = vsub.f32 %v17159_v47, %v22677_v54  ;;  %v17313_v24 = vpack.c.bf16 %v3662_v28, %v3650_v62 }
 0x33e   : > { %v4605_v4 = vsub.f32 %v17274_v33, %v21625_v21  ;;  %v4599_v2 = vand.u32 4294901760, %v4598_v20  ;;  %v3674_v26 = vand.u32 4294901760, %v3673_v55  ;;  %v22680_v6 = vand.u32 4294901760, %v16829_v27 }
 0x33f   : > { %22676 = vst [vmem:[#allocation107_spill] sm:$0xff] %v17305_v37  ;;  %22678 = vst [vmem:[#allocation108_spill] sm:$0xff] %v17313_v24  ;;  %v21629_v21 = vand.u32 4294901760, %v17305_v37  ;;  %v17316_v61 = vpack.c.bf16 %v3668_v48, %v3656_v7  ;;  %v3686_v9 = vand.u32 4294901760, %v3685_v18  ;;  %v21628_v28 = vand.u32 4294901760, %v17167_v52 }
 0x340   : > { %v4606_v59 = vand.u32 4294901760, %v4605_v4  ;;  %v17321_v1 = vsub.f32 %v16829_v27, %v22680_v6  ;;  %v21627_v20 = vand.u32 4294901760, %v17172_v56  ;;  %v21631_v18 = vand.u32 4294901760, %v17183_v3 }
 0x341   : > { %22679 = vst [vmem:[#allocation109_spill] sm:$0xff] %v17316_v61  ;;  %v4612_v62 = vsub.f32 %v17305_v37, %v21629_v21  ;;  %v17330_v4 = vpack.c.bf16 %v3686_v9, %v3674_v26  ;;  %v21632_v48 = vand.u32 4294901760, %v17188_v57  ;;  %v22683_v55 = vand.u32 4294901760, %v16864_v14 }
 0x342   : > { %22681 = vst [vmem:[#allocation110_spill] sm:$0xff] %v17321_v1  ;;  %v17323_v41 = vpack.c.bf16 %v4606_v59, %v4599_v2  ;;  %v21630_v7 = vand.u32 4294901760, %v17321_v1  ;;  %v3679_v59 = vsub.f32 %v17167_v52, %v21628_v28  ;;  %v3691_v2 = vsub.f32 %v17172_v56, %v21627_v20 }
 0x343   : > { %22682 = vst [vmem:[#allocation111_spill] sm:$0xff] %v17330_v4  ;;  %v4613_v27 = vand.u32 4294901760, %v4612_v62  ;;  %v17344_v54 = vsub.f32 %v16864_v14, %v22683_v55  ;;  %v3697_v9 = vsub.f32 %v17183_v3, %v21631_v18  ;;  %v3709_v6 = vsub.f32 %v17188_v57, %v21632_v48 }
 0x344   : > { %v4619_v26 = vsub.f32 %v17321_v1, %v21630_v7  ;;  %v22685_v62 = vand.u32 4294901760, %v16871_v10  ;;  %v3680_v28 = vand.u32 4294901760, %v3679_v59  ;;  %v3692_v14 = vand.u32 4294901760, %v3691_v2 }
 0x345   : > { %22684 = vst [vmem:[#allocation112_spill] sm:$0xff] %v17344_v54  ;;  %v21634_v55 = vand.u32 4294901760, %v17344_v54  ;;  %v21633_v21 = vand.u32 4294901760, %v17193_v50  ;;  %v3698_v4 = vand.u32 4294901760, %v3697_v9  ;;  %v3710_v61 = vand.u32 4294901760, %v3709_v6 }
 0x346   : > { %v17358_v20 = vsub.f32 %v16871_v10, %v22685_v62  ;;  %v4620_v7 = vand.u32 4294901760, %v4619_v26  ;;  %v17363_v24 = vpack.c.bf16 %v3692_v14, %v3680_v28  ;;  %v21635_v59 = vand.u32 4294901760, %v17198_v13 }
 0x347   : > { %v4626_v48 = vsub.f32 %v17344_v54, %v21634_v55  ;;  %v3703_v10 = vsub.f32 %v17193_v50, %v21633_v21  ;;  %v17374_v62 = vpack.c.bf16 %v3710_v61, %v3698_v4  ;;  %v21637_v28 = vand.u32 4294901760, %v17203_v22 }
 0x348   : > { %22686 = vst [vmem:[#allocation113_spill] sm:$0xff] %v17358_v20  ;;  %v21636_v18 = vand.u32 4294901760, %v17358_v20  ;;  %22687 = vst [vmem:[#allocation114_spill] sm:$0xff] %v17363_v24  ;;  %v17372_v2 = vpack.c.bf16 %v4620_v7, %v4613_v27  ;;  %v3715_v14 = vsub.f32 %v17198_v13, %v21635_v59  ;;  %v21639_v21 = vand.u32 4294901760, %v17208_v38 }
 0x349   : > { %22689 = vst [vmem:[#allocation116_spill] sm:$0xff] %v17374_v62  ;;  %v4627_v9 = vand.u32 4294901760, %v4626_v48  ;;  %v3704_v6 = vand.u32 4294901760, %v3703_v10  ;;  %v3721_v61 = vsub.f32 %v17203_v22, %v21637_v28  ;;  %v22690_v4 = vand.u32 4294901760, %v16902_v11 }
 0x34a   : > { %22688 = vst [vmem:[#allocation115_spill] sm:$0xff] %v17372_v2  ;;  %v4633_v26 = vsub.f32 %v17358_v20, %v21636_v18  ;;  %v22692_v27 = vand.u32 4294901760, %v16920_v40  ;;  %v3716_v10 = vand.u32 4294901760, %v3715_v14  ;;  %v3733_v59 = vsub.f32 %v17208_v38, %v21639_v21 }
 0x34b   : > { %v17390_v7 = vsub.f32 %v16902_v11, %v22690_v4  ;;  %v21640_v18 = vand.u32 4294901760, %v17218_v46  ;;  %v3722_v62 = vand.u32 4294901760, %v3721_v61  ;;  %v22697_v21 = vand.u32 4294901760, %v16957_v44 }
 0x34c   : > { %v4634_v55 = vand.u32 4294901760, %v4633_v26  ;;  %v17395_v48 = vsub.f32 %v16920_v40, %v22692_v27  ;;  %v21638_v26 = vand.u32 4294901760, %v17213_v36  ;;  %v17406_v24 = vpack.c.bf16 %v3716_v10, %v3704_v6 }
 0x34d   : > { %22691 = vst [vmem:[#allocation117_spill] sm:$0xff] %v17390_v7  ;;  %v21642_v11 = vand.u32 4294901760, %v17390_v7  ;;  %v3734_v40 = vand.u32 4294901760, %v3733_v59  ;;  %v3739_v27 = vsub.f32 %v17218_v46, %v21640_v18  ;;  %v21646_v6 = vand.u32 4294901760, %v17223_v42 }
 0x34e   : > { %22693 = vst [vmem:[#allocation118_spill] sm:$0xff] %v17395_v48  ;;  %v17402_v28 = vpack.c.bf16 %v4634_v55, %v4627_v9  ;;  %v21643_v4 = vand.u32 4294901760, %v17395_v48  ;;  %22695 = vst [vmem:[#allocation120_spill] sm:$0xff] %v17406_v24  ;;  %v3727_v14 = vsub.f32 %v17213_v36, %v21638_v26  ;;  %v21645_v59 = vand.u32 4294901760, %v17228_v16 }
 0x34f   : > { %v4640_v55 = vsub.f32 %v17390_v7, %v21642_v11  ;;  %v17422_v61 = vpack.c.bf16 %v3734_v40, %v3722_v62  ;;  %v3740_v26 = vand.u32 4294901760, %v3739_v27  ;;  %v17427_v18 = vsub.f32 %v16957_v44, %v22697_v21 }
 0x350   : > { %22694 = vst [vmem:[#allocation119_spill] sm:$0xff] %v17402_v28  ;;  %v4647_v9 = vsub.f32 %v17395_v48, %v21643_v4  ;;  %v3728_v10 = vand.u32 4294901760, %v3727_v14  ;;  %v3745_v11 = vsub.f32 %v17223_v42, %v21646_v6  ;;  %v3757_v4 = vsub.f32 %v17228_v16, %v21645_v59 }
 0x351   : > { %22696 = vst [vmem:[#allocation121_spill] sm:$0xff] %v17422_v61  ;;  %22698 = vst [vmem:[#allocation122_spill] sm:$0xff] %v17427_v18  ;;  %v4641_v24 = vand.u32 4294901760, %v4640_v55  ;;  %v21648_v62 = vand.u32 4294901760, %v17427_v18  ;;  %v22700_v40 = vand.u32 4294901760, %v16968_v43  ;;  %v21647_v44 = vand.u32 4294901760, %v17233_v34 }
 0x352   : > { %v4648_v28 = vand.u32 4294901760, %v4647_v9  ;;  %v17435_v2 = vpack.c.bf16 %v3740_v26, %v3728_v10  ;;  %v3746_v27 = vand.u32 4294901760, %v3745_v11  ;;  %v3758_v55 = vand.u32 4294901760, %v3757_v4 }
 0x353   : > { %v17441_v14 = vsub.f32 %v16968_v43, %v22700_v40  ;;  %v21649_v9 = vand.u32 4294901760, %v17238_v5  ;;  %v4654_v26 = vsub.f32 %v17427_v18, %v21648_v62  ;;  %v3751_v59 = vsub.f32 %v17233_v34, %v21647_v44 }
 0x354   : > { %22699 = vst [vmem:[#allocation123_spill] sm:$0xff] %v17435_v2  ;;  %v17444_v21 = vpack.c.bf16 %v4648_v28, %v4641_v24  ;;  %v21652_v43 = vand.u32 4294901760, %v17243_v49  ;;  %v17455_v40 = vpack.c.bf16 %v3758_v55, %v3746_v27  ;;  %v21651_v28 = vand.u32 4294901760, %v17248_v12 }
 0x355   : > { %22701 = vst [vmem:[#allocation124_spill] sm:$0xff] %v17441_v14  ;;  %v21650_v10 = vand.u32 4294901760, %v17441_v14  ;;  %v3763_v24 = vsub.f32 %v17238_v5, %v21649_v9  ;;  %v22704_v11 = vand.u32 4294901760, %v17008_v8  ;;  %v4655_v6 = vand.u32 4294901760, %v4654_v26 }
 0x356   : > { %22702 = vst [vmem:[#allocation125_spill] sm:$0xff] %v17444_v21  ;;  %22703 = vst [vmem:[#allocation126_spill] sm:$0xff] %v17455_v40  ;;  %v3752_v62 = vand.u32 4294901760, %v3751_v59  ;;  %v3769_v27 = vsub.f32 %v17243_v49, %v21652_v43  ;;  %v3781_v9 = vsub.f32 %v17248_v12, %v21651_v28  ;;  %v21654_v59 = vand.u32 4294901760, %v17253_v60 }
 0x357   : > { %v17464_v4 = vsub.f32 %v17008_v8, %v22704_v11  ;;  %v4661_v44 = vsub.f32 %v17441_v14, %v21650_v10  ;;  %v3764_v55 = vand.u32 4294901760, %v3763_v24  ;;  %v22706_v8 = vand.u32 4294901760, %v17018_v25 }
 0x358   : > { %v3770_v2 = vand.u32 4294901760, %v3769_v27  ;;  %v21656_v10 = vand.u32 4294901760, %v17258_v63  ;;  %v3782_v24 = vand.u32 4294901760, %v3781_v9 }
 0x359   : > { %22705 = vst [vmem:[#allocation127_spill] sm:$0xff] %v17464_v4  ;;  %v21655_v40 = vand.u32 4294901760, %v17464_v4  ;;  %v17479_v26 = vsub.f32 %v17018_v25, %v22706_v8  ;;  %v4662_v11 = vand.u32 4294901760, %v4661_v44  ;;  %v17483_v61 = vpack.c.bf16 %v3764_v55, %v3752_v62 }
 0x35a   : > { %v3775_v25 = vsub.f32 %v17253_v60, %v21654_v59  ;;  %v3787_v44 = vsub.f32 %v17258_v63, %v21656_v10  ;;  %v17499_v9 = vpack.c.bf16 %v3782_v24, %v3770_v2  ;;  %v22712_v2 = vld [vmem:[#allocation64_spill] sm:$0xff] }
 0x35b   : > { %22707 = vst [vmem:[#allocation128_spill] sm:$0xff] %v17479_v26  ;;  %v4668_v28 = vsub.f32 %v17464_v4, %v21655_v40  ;;  %v21659_v43 = vand.u32 4294901760, %v17479_v26  ;;  %v17489_v21 = vpack.c.bf16 %v4662_v11, %v4655_v6  ;;  %v22708_v6 = vand.u32 4294901760, %v17064_v19 }
 0x35c   : > { %v3776_v11 = vand.u32 4294901760, %v3775_v25  ;;  %v3788_v59 = vand.u32 4294901760, %v3787_v44  ;;  %v22710_v40 = vand.u32 4294901760, %v17070_v45 }
 0x35d   : > { %v4669_v27 = vand.u32 4294901760, %v4668_v28  ;;  %v4675_v55 = vsub.f32 %v17479_v26, %v21659_v43  ;;  %v17507_v8 = vsub.f32 %v17064_v19, %v22708_v6  ;;  %v17521_v19 = vpack.c.bf16 %v17048_v35, %v22714_v17 }
 0x35e   : > { %v17512_v10 = vsub.f32 %v17070_v45, %v22710_v40  ;;  %v17523_v25 = vpack.c.bf16 %v3788_v59, %v3776_v11  ;;  %v17537_v43 = vpack.c.bf16 %v17274_v33, %v17269_v15  ;;  %v17556_v59 = vpack.c.bf16 %v17358_v20, %v17344_v54 }
 0x35f   : > { %22709 = vst [vmem:[#allocation129_spill] sm:$0xff] %v17507_v8  ;;  %v4676_v28 = vand.u32 4294901760, %v4675_v55  ;;  %v21662_v62 = vand.u32 4294901760, %v17507_v8  ;;  %v17572_v45 = vpack.c.bf16 %v17441_v14, %v17427_v18  ;;  %v17580_v40 = vpack.c.bf16 %v17479_v26, %v17464_v4 }
 0x360   : > { %22711 = vst [vmem:[#allocation130_spill] sm:$0xff] %v17512_v10  ;;  %v21663_v44 = vand.u32 4294901760, %v17512_v10 }
 0x361   : > { %v17530_v55 = vpack.c.bf16 %v4676_v28, %v4669_v27  ;;  %v4682_v6 = vsub.f32 %v17507_v8, %v21662_v62  ;;  %v17548_v27 = vpack.c.bf16 %v17321_v1, %v17305_v37  ;;  %v17564_v1 = vpack.c.bf16 %v17395_v48, %v17390_v7  ;;  %22715 = vst [vmem:[#allocation64_spill] sm:$0xff] %v17580_v40  ;;  %v22719_v40 = vld [vmem:[#allocation32_spill] sm:$0xff] }
 0x362   : > { %v4689_v11 = vsub.f32 %v17512_v10, %v21663_v44 }
 0x363   : > { %v4683_v62 = vand.u32 4294901760, %v4682_v6 }
 0x364   : > { %v4690_v24 = vand.u32 4294901760, %v4689_v11 }
 0x366   : > { %v17568_v28 = vpack.c.bf16 %v4690_v24, %v4683_v62  ;;  %v17588_v24 = vpack.c.bf16 %v17512_v10, %v17507_v8 }
 0x368   : > { %22716 = vst [vmem:[#allocation71_spill] sm:$0xff] %v17588_v24 }
 0x3db   : > { %v3298_v6 = vpop.f32.mrb[8].mxu0 }
 0x3dc   : > { %v3300_v14 = vpop.f32.mrb[9].mxu0 }
 0x3dd   : > { %v3324_v44 = vmax.f32 %v3298_v6, %v3300_v14 }
 0x3df   : > { %v3332_v18 = vrot.slane %v3324_v44, 6  ;;  %v3305_v7 = vpop.f32.mrb[10].mxu0 }
 0x3e0   : > { %v3307_v11 = vpop.f32.mrb[11].mxu0 }
 0x3e1   : > { %3344 = vst [vmem:[#allocation2] sm:$0xfc] %v3332_v18  ;;  %v3325_v20 = vmax.f32 %v3305_v7, %v3307_v11 }
 0x3e3   : > { %v3333_v26 = vrot.slane %v3325_v20, 6  ;;  %v3312_v4 = vpop.f32.mrb[12].mxu0 }
 0x3e4   : > { %v3314_v54 = vpop.f32.mrb[13].mxu0 }
 0x3e5   : > { %v3334_v48 = vsel %vm2124_vm13, %v3332_v18, %v3333_v26  ;;  %v3326_v37 = vmax.f32 %v3312_v4, %v3314_v54 }
 0x3e6   : > { %v3362_v15 = vrot.slane %v3334_v48, 3  ;;  %v3385_v17 = vrot.slane %v3334_v48, 1 }
 0x3e7   : > { %v3335_v33 = vrot.slane %v3326_v37, 6  ;;  %v3319_v62 = vpop.f32.mrb[14].mxu0 }
 0x3e8   : > { %v3321_v35 = vpop.f32.mrb[15].mxu0  ;;  %v3349_v10 = vld [vmem:[#allocation2] sm:$0xf8] }
 0x3e9   : > { %v3354_v8 = vld [vmem:[#allocation2] sm:$0xfe]  ;;  %v3336_v14 = vsel %vm2124_vm13, %v3333_v26, %v3335_v33  ;;  %v3327_v6 = vmax.f32 %v3319_v62, %v3321_v35  ;;  %v3361_v60 = vrot.slane %v3349_v10, 3  ;;  %v22717_v62 = vld [vmem:[#allocation31_spill] sm:$0xff] }
 0x3ea   : > { %v3384_v63 = vrot.slane %v3354_v8, 1  ;;  %v3364_v24 = vrot.slane %v3336_v14, 3  ;;  %v3387_v7 = vrot.slane %v3336_v14, 1  ;;  %v22718_v5 = vsub.f32 1.0, %v22717_v62 }
 0x3eb   : > { %v3337_v11 = vrot.slane %v3327_v6, 6  ;;  %v3363_v49 = vsel %vm2258_vm0, %v3361_v60, %v3362_v15 }
 0x3ec   : > { %v3386_v18 = vsel %vm2208_vm14, %v3384_v63, %v3385_v17  ;;  %v3374_v54 = vmax.f32 %v3324_v44, %v3363_v49  ;;  %v3365_v12 = vsel %vm2258_vm0, %v3362_v15, %v3364_v24  ;;  %v3388_v34 = vsel %vm2208_vm14, %v3385_v17, %v3387_v7 }
 0x3ed   : > { %v3397_v4 = vmax.f32 %v3324_v44, %v3386_v18  ;;  %v3338_v48 = vsel %vm2124_vm13, %v3335_v33, %v3337_v11  ;;  %3348 = vst [vmem:[#allocation2 + $0x60] sm:$0x3] %v3337_v11  ;;  %v3375_v26 = vmax.f32 %v3325_v20, %v3365_v12  ;;  %v3398_v35 = vmax.f32 %v3325_v20, %v3388_v34 }
 0x3ee   : > { %v3366_v10 = vrot.slane %v3338_v48, 3  ;;  %v3389_v8 = vrot.slane %v3338_v48, 1  ;;  %v3378_v14 = vmul.f32 %v3374_v54, %v22717_v62  ;;  %v22720_v49 = vsub.f32 1.0, %v22719_v40  ;;  %v22721_v54 = vld [vmem:[#allocation33_spill] sm:$0xff] }
 0x3ef   : > { %v3401_v60 = vmul.f32 %v3397_v4, %v22718_v5  ;;  %v3379_v63 = vmul.f32 %v3375_v26, %v22719_v40  ;;  %v22722_v5 = vsub.f32 1.0, %v22721_v54 }
 0x3f0   : > { %v3402_v44 = vmul.f32 %v3398_v35, %v22720_v49  ;;  %v3367_v15 = vsel %vm2258_vm0, %v3364_v24, %v3366_v10  ;;  %v3390_v17 = vsel %vm2208_vm14, %v3387_v7, %v3389_v8 }
 0x3f1   : > { %v3405_v33 = vadd.f32 %v3401_v60, %v3378_v14  ;;  %v3376_v11 = vmax.f32 %v3326_v37, %v3367_v15  ;;  %v3399_v12 = vmax.f32 %v3326_v37, %v3390_v17 }
 0x3f2   : > { %v3406_v34 = vadd.f32 %v3402_v44, %v3379_v63 }
 0x3f3   : > { %v17605_v20 = vand.u32 4294901760, %v3405_v33  ;;  %v3380_v48 = vmul.f32 %v3376_v11, %v22721_v54  ;;  %v3403_v4 = vmul.f32 %v3399_v12, %v22722_v5  ;;  %v22789_v54 = vld [vmem:[#allocation92_spill] sm:$0xff] }
 0x3f4   : > { %v17607_v18 = vand.u32 4294901760, %v3406_v34  ;;  %v3353_v26 = vld [vmem:[#allocation2 + $0x60] sm:$0x7] }
 0x3f5   : > { %v3355_v40 = vld [vmem:[#allocation2 + $0x60] sm:$0x1]  ;;  %v17613_v35 = vsub.f32 %v3405_v33, %v17605_v20  ;;  %v3368_v24 = vrot.slane %v3353_v26, 3  ;;  %v3407_v37 = vadd.f32 %v3403_v4, %v3380_v48 }
 0x3f6   : > { %v3391_v7 = vrot.slane %v3355_v40, 1  ;;  %v17616_v14 = vsub.f32 %v3406_v34, %v17607_v18  ;;  %v22723_v34 = vld [vmem:[#allocation34_spill] sm:$0xff] }
 0x3f7   : > { %v17619_v60 = vand.u32 4294901760, %v17613_v35  ;;  %v3369_v63 = vsel %vm2258_vm0, %v3366_v10, %v3368_v24  ;;  %v17626_v15 = vand.u32 4294901760, %v3407_v37  ;;  %v22725_v24 = vld [vmem:[#allocation95_spill] sm:$0xff] }
 0x3f8   : > { %v3392_v49 = vsel %vm2208_vm14, %v3389_v8, %v3391_v7  ;;  %v17624_v44 = vand.u32 4294901760, %v17616_v14  ;;  %v3377_v17 = vmax.f32 %v3327_v6, %v3369_v63  ;;  %v22724_v8 = vsub.f32 1.0, %v22723_v34 }
 0x3f9   : > { %v3400_v33 = vmax.f32 %v3327_v6, %v3392_v49  ;;  %v3557_v40 = vsub.f32 %v17613_v35, %v17619_v60  ;;  %v17633_v12 = vsub.f32 %v3407_v37, %v17626_v15  ;;  %v22726_v7 = vmov 0.0   ;;  %v22727_v49 = vld [vmem:[#allocation102_spill] sm:$0xff] }
 0x3fa   : > { %v3568_v11 = vsub.f32 %v17616_v14, %v17624_v44  ;;  %v3381_v10 = vmul.f32 %v3377_v17, %v22723_v34  ;;  %v22728_v17 = vld [vmem:[#allocation105_spill] sm:$0xff]  ;;  %v22788_v34 = vld [vmem:[#allocation59_spill] sm:$0xff] }
 0x3fb   : > { %v3404_v48 = vmul.f32 %v3400_v33, %v22724_v8  ;;  %v3558_v5 = vand.u32 4294901760, %v3557_v40  ;;  %v17639_v26 = vand.u32 4294901760, %v17633_v12 }
 0x3fc   : > { %v3569_v4 = vand.u32 4294901760, %v3568_v11  ;;  %v22729_v11 = vld [vmem:[#allocation106_spill] sm:$0xff] }
 0x3fd   : > { %v3408_v6 = vadd.f32 %v3404_v48, %v3381_v10  ;;  %3559 = vmatmul.mubr.f32.vlgmr.msra.gmra.mrb[12].mxu1 %v3558_v5  ;;  %11886 = vmatprep.mubr.f32.mxu0 %v3558_v5  ;;  %v3579_v37 = vsub.f32 %v17633_v12, %v17639_v26  ;;  %v22730_v10 = vld [vmem:[#allocation108_spill] sm:$0xff]  ;;  %v22731_v5 = vld [vmem:[#allocation115_spill] sm:$0xff] }
 0x3fe   : > { %12921 = vmatpush1.bf16.msra.mxu1 %v22725_v24  ;;  %3564 = vmatprep.mubr.f32.mxu1 %v22726_v7  ;;  %v22733_v24 = vld [vmem:[#allocation111_spill] sm:$0xff] }
 0x3ff   : > { %v17645_v63 = vand.u32 4294901760, %v3408_v6  ;;  %12923 = vmatprep.subr.bf16.mxu1 %v22727_v49  ;;  %11887 = vmatmul.mubr.f32.vlgmr.msra.gmra.mrb[16].mxu0 %v3569_v4  ;;  %v3580_v33 = vand.u32 4294901760, %v3579_v37  ;;  %v22735_v37 = vld [vmem:[#allocation116_spill] sm:$0xff]  ;;  %v22736_v49 = vld [vmem:[#allocation119_spill] sm:$0xff] }
 0x400   : > { %13113 = vmatpush3.bf16.msra.mxu0 %v22728_v17  ;;  %v22737_v17 = vld [vmem:[#allocation125_spill] sm:$0xff] }
 0x401   : > { %v17650_v40 = vsub.f32 %v3408_v6, %v17645_v63  ;;  %3570 = vmatmul.mubr.f32.gmra.mrb[14].mxu1 %v3569_v4  ;;  %13115 = vmatprep.subr.bf16.mxu0 %v17323_v41  ;;  %v22732_v4 = vld [vmem:[#allocation109_spill] sm:$0xff] }
 0x402   : > { %12925 = vmatpush1.bf16.msra.mxu1 %v22729_v11  ;;  %3575 = vmatprep.mubr.f32.mxu1 %v22726_v7  ;;  %v22739_v11 = vld [vmem:[#allocation121_spill] sm:$0xff] }
 0x403   : > { %12927 = vmatprep.subr.bf16.mxu1 %v22730_v10  ;;  %11889 = vmatprep.mubr.f32.mxu0 %v3580_v33  ;;  %v17657_v8 = vand.u32 4294901760, %v17650_v40  ;;  %v22740_v10 = vld [vmem:[#allocation123_spill] sm:$0xff] }
 0x404   : > { %13117 = vmatpush3.bf16.msra.mxu0 %v17323_v41  ;;  %v22734_v41 = vld [vmem:[#allocation114_spill] sm:$0xff] }
 0x405   : > { %3581 = vmatmul.mubr.f32.gmra.mrb[16].mxu1 %v3580_v33  ;;  %v3590_v48 = vsub.f32 %v17650_v40, %v17657_v8  ;;  %13119 = vmatprep.subr.bf16.mxu0 %v22731_v5  ;;  %v22738_v33 = vld [vmem:[#allocation120_spill] sm:$0xff] }
 0x406   : > { %12929 = vmatpush1.bf16.msra.mxu1 %v22732_v4  ;;  %3586 = vmatprep.mubr.f32.mxu1 %v22726_v7  ;;  %v22743_v4 = vld [vmem:[#allocation56_spill] sm:$0xff] }
 0x407   : > { %v3591_v6 = vand.u32 4294901760, %v3590_v48  ;;  %12931 = vmatprep.subr.bf16.mxu1 %v22733_v24  ;;  %v22741_v48 = vld [vmem:[#allocation126_spill] sm:$0xff]  ;;  %v22754_v24 = vpack.c.bf16 %v17208_v38, %v17203_v22  ;;  %v22790_v62 = vand.u32 4294901760, %v22743_v4 }
 0x408   : > { %13121 = vmatpush3.bf16.msra.mxu0 %v22731_v5  ;;  %v22742_v5 = vld [vmem:[#allocation72_spill] sm:$0xff] }
 0x409   : > { %11890 = vmatmul.mubr.f32.gmra.mrb[18].mxu0 %v3591_v6  ;;  %3592 = vmatmul.mubr.f32.gmra.mrb[18].mxu1 %v3591_v6  ;;  %v22744_v6 = vpack.c.bf16 %v22742_v5, %v22743_v4 }
 0x40a   : > { %11924 = vmatprep.mubr.f32.mxu0 %v17605_v20  ;;  %12933 = vmatpush1.bf16.msra.mxu1 %v22734_v41  ;;  %v22755_v41 = vpack.c.bf16 %v17218_v46, %v17213_v36 }
 0x40b   : > { %12935 = vmatprep.subr.bf16.mxu1 %v22735_v37  ;;  %13123 = vmatprep.subr.bf16.mxu0 %v22736_v49  ;;  %v22757_v37 = vld [vmem:[#allocation64_spill] sm:$0xff] }
 0x40c   : > { %13125 = vmatpush3.bf16.msra.mxu0 %v22736_v49  ;;  %3822 = vmatprep.mubr.f32.mxu1 %v22726_v7  ;;  %v22758_v49 = vld [vmem:[#allocation97_spill] sm:$0xff] }
 0x40d   : > { %13127 = vmatprep.subr.bf16.mxu0 %v22737_v17 }
 0x40e   : > { %12937 = vmatpush1.bf16.msra.mxu1 %v22738_v33 }
 0x40f   : > { %12939 = vmatprep.subr.bf16.mxu1 %v22739_v11  ;;  %v22761_v11 = vld [vmem:[#allocation99_spill] sm:$0xff] }
 0x410   : > { %13129 = vmatpush3.bf16.msra.mxu0 %v22737_v17  ;;  %v22759_v17 = vld [vmem:[#allocation96_spill] sm:$0xff] }
 0x411   : > { %13131 = vmatprep.subr.bf16.mxu0 %v17489_v21  ;;  %v22760_v33 = vpack.c.bf16 %v22758_v49, %v22759_v17 }
 0x412   : > { %12941 = vmatpush1.bf16.msra.mxu1 %v22740_v10 }
 0x413   : > { %12943 = vmatprep.subr.bf16.mxu1 %v22741_v48  ;;  %v22764_v48 = vld [vmem:[#allocation71_spill] sm:$0xff] }
 0x414   : > { %13133 = vmatpush3.bf16.msra.mxu0 %v17489_v21  ;;  %v22746_v21 = vpack.c.bf16 %v16912_v30, %v22713_v31 }
 0x415   : > { %13135 = vmatprep.subr.bf16.mxu0 %v17530_v55 }
 0x416   : > { %12945 = vmatpush1.bf16.msra.mxu1 %v17483_v61  ;;  %v22745_v61 = vpack.c.bf16 %v22712_v2, %v16866_v53 }
 0x417   : > { %12947 = vmatprep.subr.bf16.mxu1 %v17499_v9  ;;  %v22747_v9 = vpack.c.bf16 %v16918_v58, %v16915_v0 }
 0x418   : > { %13137 = vmatpush3.bf16.msra.mxu0 %v17530_v55  ;;  %v22750_v55 = vpack.c.bf16 %v17159_v47, %v17154_v32 }
 0x419   : > { %13139 = vmatprep.subr.bf16.mxu0 %v17568_v28 }
 0x41a   : > { %12949 = vmatpush1.bf16.msra.mxu1 %v17523_v25  ;;  %v22748_v25 = vpack.c.bf16 %v17124_v39, %v17119_v29 }
 0x41b   : > { %12951 = vmatprep.subr.bf16.mxu1 %v22744_v6  ;;  %v22765_v6 = vld [vmem:[#allocation101_spill] sm:$0xff] }
 0x41c   : > { %13141 = vmatpush3.bf16.msra.mxu0 %v17568_v28  ;;  %v22752_v28 = vpack.c.bf16 %v17188_v57, %v17183_v3 }
 0x41d   : > { %3824 = vmatmul.mubr.f32.vlgmr.msra.gmra.mrb[12].mxu1 %v17605_v20  ;;  %13143 = vmatprep.subr.bf16.mxu0 %v17521_v19 }
 0x41e   : > { %12953 = vmatpush1.bf16.msra.mxu1 %v22745_v61  ;;  %3829 = vmatprep.mubr.f32.mxu1 %v22726_v7  ;;  %v22766_v61 = vld [vmem:[#allocation100_spill] sm:$0xff] }
 0x41f   : > { %12955 = vmatprep.subr.bf16.mxu1 %v22746_v21  ;;  %11925 = vmatmul.mubr.f32.vlgmr.msra.gmra.mrb[16].mxu0 %v17607_v18  ;;  %v22767_v21 = vpack.c.bf16 %v22765_v6, %v22766_v61 }
 0x420   : > { %11927 = vmatprep.mubr.f32.mxu0 %v17626_v15  ;;  %13145 = vmatpush3.bf16.msra.mxu0 %v17521_v19  ;;  %v22749_v19 = vpack.c.bf16 %v17139_v51, %v17134_v23 }
 0x421   : > { %3831 = vmatmul.mubr.f32.gmra.mrb[14].mxu1 %v17607_v18  ;;  %13147 = vmatprep.subr.bf16.mxu0 %v17537_v43 }
 0x422   : > { %12957 = vmatpush1.bf16.msra.mxu1 %v22747_v9  ;;  %3836 = vmatprep.mubr.f32.mxu1 %v22726_v7  ;;  %v22768_v9 = vld [vmem:[#allocation48_spill] sm:$0xff] }
 0x423   : > { %12959 = vmatprep.subr.bf16.mxu1 %v22748_v25  ;;  %11928 = vmatmul.mubr.f32.gmra.mrb[18].mxu0 %v17645_v63  ;;  %v22770_v25 = vld [vmem:[#allocation49_spill] sm:$0xff] }
 0x424   : > { %13149 = vmatpush3.bf16.msra.mxu0 %v17537_v43  ;;  %11962 = vmatprep.mubr.f32.mxu0 %v17613_v35  ;;  %v22751_v43 = vpack.c.bf16 %v17172_v56, %v17167_v52 }
 0x425   : > { %3838 = vmatmul.mubr.f32.gmra.mrb[16].mxu1 %v17626_v15  ;;  %13151 = vmatprep.subr.bf16.mxu0 %v17548_v27 }
 0x426   : > { %12961 = vmatpush1.bf16.msra.mxu1 %v22749_v19  ;;  %3843 = vmatprep.mubr.f32.mxu1 %v22726_v7  ;;  %v22771_v19 = vld [vmem:[#allocation63_spill] sm:$0xff] }
 0x427   : > { %12963 = vmatprep.subr.bf16.mxu1 %v22750_v55  ;;  %v22772_v55 = vld [vmem:[#allocation41_spill] sm:$0xff] }
 0x428   : > { %13153 = vmatpush3.bf16.msra.mxu0 %v17548_v27  ;;  %v22753_v27 = vpack.c.bf16 %v17198_v13, %v17193_v50 }
 0x429   : > { %3845 = vmatmul.mubr.f32.gmra.mrb[18].mxu1 %v17645_v63  ;;  %13155 = vmatprep.subr.bf16.mxu0 %v17556_v59 }
 0x42a   : > { %12965 = vmatpush1.bf16.msra.mxu1 %v22751_v43  ;;  %3979 = vmatprep.mubr.f32.mxu1 %v22726_v7  ;;  %v22773_v43 = vld [vmem:[#allocation39_spill] sm:$0xff] }
 0x42b   : > { %12967 = vmatprep.subr.bf16.mxu1 %v22752_v28  ;;  %v22775_v28 = vld [vmem:[#allocation60_spill] sm:$0xff] }
 0x42c   : > { %13157 = vmatpush3.bf16.msra.mxu0 %v17556_v59  ;;  %v22756_v59 = vpack.c.bf16 %v17228_v16, %v17223_v42 }
 0x42d   : > { %13159 = vmatprep.subr.bf16.mxu0 %v17564_v1 }
 0x42e   : > { %12969 = vmatpush1.bf16.msra.mxu1 %v22753_v27  ;;  %v22776_v27 = vld [vmem:[#allocation57_spill] sm:$0xff] }
 0x42f   : > { %12971 = vmatprep.subr.bf16.mxu1 %v22754_v24  ;;  %v22778_v24 = vld [vmem:[#allocation50_spill] sm:$0xff] }
 0x430   : > { %13161 = vmatpush3.bf16.msra.mxu0 %v17564_v1  ;;  %v22762_v1 = vld [vmem:[#allocation98_spill] sm:$0xff] }
 0x431   : > { %13163 = vmatprep.subr.bf16.mxu0 %v17572_v45  ;;  %v22763_v10 = vpack.c.bf16 %v22761_v11, %v22762_v1 }
 0x432   : > { %12973 = vmatpush1.bf16.msra.mxu1 %v22755_v41  ;;  %v22779_v41 = vld [vmem:[#allocation42_spill] sm:$0xff] }
 0x433   : > { %12975 = vmatprep.subr.bf16.mxu1 %v22756_v59  ;;  %v22780_v59 = vld [vmem:[#allocation45_spill] sm:$0xff] }
 0x434   : > { %13165 = vmatpush3.bf16.msra.mxu0 %v17572_v45  ;;  %v22769_v45 = vld [vmem:[#allocation76_spill] sm:$0xff] }
 0x435   : > { %13167 = vmatprep.subr.bf16.mxu0 %v22757_v37 }
 0x436   : > { %12977 = vmatpush1.bf16.msra.mxu1 %v22760_v33  ;;  %v22783_v33 = vld [vmem:[#allocation54_spill] sm:$0xff] }
 0x437   : > { %12979 = vmatprep.subr.bf16.mxu1 %v22763_v10  ;;  %v22784_v10 = vld [vmem:[#allocation58_spill] sm:$0xff] }
 0x438   : > { %13169 = vmatpush3.bf16.msra.mxu0 %v22757_v37  ;;  %v22782_v37 = vld [vmem:[#allocation74_spill] sm:$0xff] }
 0x439   : > { %13171 = vmatprep.subr.bf16.mxu0 %v22764_v48 }
 0x43a   : > { %12981 = vmatpush1.bf16.msra.mxu1 %v22767_v21  ;;  %v22787_v21 = vld [vmem:[#allocation91_spill] sm:$0xff] }
 0x43b   : > { %12983 = vmatprep.subr.bf16.mxu1 %v22768_v9 }
 0x43c   : > { %13173 = vmatpush3.bf16.msra.mxu0 %v22764_v48  ;;  %v22786_v48 = vld [vmem:[#allocation61_spill] sm:$0xff] }
 0x43d   : > { %3982 = vmatmul.mubr.f32.vlgmr.msra.gmra.mrb[12].mxu1 %v17613_v35  ;;  %13175 = vmatprep.subr.bf16.mxu0 %v22769_v45  ;;  %v22774_v35 = vld [vmem:[#allocation79_spill] sm:$0xff] }
 0x43e   : > { %12985 = vmatpush1.bf16.msra.mxu1 %v22770_v25  ;;  %3987 = vmatprep.mubr.f32.mxu1 %v22726_v7 }
 0x43f   : > { %12987 = vmatprep.subr.bf16.mxu1 %v22771_v19  ;;  %11963 = vmatmul.mubr.f32.vlgmr.msra.gmra.mrb[16].mxu0 %v17616_v14 }
 0x440   : > { %11965 = vmatprep.mubr.f32.mxu0 %v17633_v12  ;;  %13177 = vmatpush3.bf16.msra.mxu0 %v22769_v45 }
 0x441   : > { %3990 = vmatmul.mubr.f32.gmra.mrb[14].mxu1 %v17616_v14  ;;  %13179 = vmatprep.subr.bf16.mxu0 %v22772_v55  ;;  %v22777_v14 = vld [vmem:[#allocation40_spill] sm:$0xff] }
 0x442   : > { %12989 = vmatpush1.bf16.msra.mxu1 %v22773_v43  ;;  %3995 = vmatprep.mubr.f32.mxu1 %v22726_v7 }
 0x443   : > { %12991 = vmatprep.subr.bf16.mxu1 %v22774_v35  ;;  %11966 = vmatmul.mubr.f32.gmra.mrb[18].mxu0 %v17650_v40 }
 0x444   : > { %13181 = vmatpush3.bf16.msra.mxu0 %v22772_v55  ;;  %12000 = vmatprep.mubr.f32.mxu0 %v17619_v60 }
 0x445   : > { %3998 = vmatmul.mubr.f32.gmra.mrb[16].mxu1 %v17633_v12  ;;  %13183 = vmatprep.subr.bf16.mxu0 %v22775_v28  ;;  %v22781_v12 = vld [vmem:[#allocation53_spill] sm:$0xff] }
 0x446   : > { %12993 = vmatpush1.bf16.msra.mxu1 %v22776_v27  ;;  %4003 = vmatprep.mubr.f32.mxu1 %v22726_v7 }
 0x447   : > { %12995 = vmatprep.subr.bf16.mxu1 %v22777_v14 }
 0x448   : > { %13185 = vmatpush3.bf16.msra.mxu0 %v22775_v28 }
 0x449   : > { %4006 = vmatmul.mubr.f32.gmra.mrb[18].mxu1 %v17650_v40  ;;  %13187 = vmatprep.subr.bf16.mxu0 %v22778_v24  ;;  %v22785_v40 = vld [vmem:[#allocation55_spill] sm:$0xff] }
 0x44a   : > { %12997 = vmatpush1.bf16.msra.mxu1 %v22779_v41  ;;  %4108 = vmatprep.mubr.f32.mxu1 %v22726_v7 }
 0x44b   : > { %12999 = vmatprep.subr.bf16.mxu1 %v22780_v59 }
 0x44c   : > { %13189 = vmatpush3.bf16.msra.mxu0 %v22778_v24  ;;  %v22797_v24 = vld [vmem:[#allocation93_spill] sm:$0xff] }
 0x44d   : > { %13191 = vmatprep.subr.bf16.mxu0 %v22781_v12 }
 0x44e   : > { %13001 = vmatpush1.bf16.msra.mxu1 %v22782_v37 }
 0x44f   : > { %13003 = vmatprep.subr.bf16.mxu1 %v22783_v33  ;;  %v22791_v33 = vand.u32 4294901760, %v22742_v5  ;;  %v22800_v5 = vand.u32 4294901760, %v22713_v31  ;;  %v22807_v31 = vand.u32 4294901760, %v16918_v58 }
 0x450   : > { %13193 = vmatpush3.bf16.msra.mxu0 %v22781_v12  ;;  %v22792_v12 = vld [vmem:[#allocation94_spill] sm:$0xff] }
 0x451   : > { %13195 = vmatprep.subr.bf16.mxu0 %v22784_v10  ;;  %v13014_v37 = vpack.c.bf16 %v22791_v33, %v22790_v62  ;;  %v22801_v62 = vand.u32 4294901760, %v16912_v30  ;;  %v22802_v33 = vld [vmem:[#allocation103_spill] sm:$0xff]  ;;  %v22808_v30 = vand.u32 4294901760, %v17119_v29  ;;  %v22815_v29 = vand.u32 4294901760, %v17139_v51 }
 0x452   : > { %13005 = vmatpush1.bf16.msra.mxu1 %v22785_v40  ;;  %v22793_v40 = vld [vmem:[#allocation69_spill] sm:$0xff] }
 0x453   : > { %13007 = vmatprep.subr.bf16.mxu1 %v22786_v48  ;;  %v22794_v59 = vand.u32 4294901760, %v22793_v40  ;;  %v22795_v48 = vld [vmem:[#allocation90_spill] sm:$0xff]  ;;  %v13018_v4 = vpack.c.bf16 %v22801_v62, %v22800_v5  ;;  %v22814_v5 = vand.u32 4294901760, %v17134_v23  ;;  %v22820_v23 = vld [vmem:[#allocation113_spill] sm:$0xff] }
 0x454   : > { %13197 = vmatpush3.bf16.msra.mxu0 %v22784_v10  ;;  %v22796_v41 = vand.u32 4294901760, %v22795_v48 }
 0x455   : > { %13199 = vmatprep.subr.bf16.mxu0 %v22787_v21 }
 0x456   : > { %13009 = vmatpush1.bf16.msra.mxu1 %v22788_v34  ;;  %v13206_v10 = vpack.c.bf16 %v22796_v41, %v22794_v59  ;;  %v22798_v34 = vand.u32 4294901760, %v16866_v53  ;;  %v22803_v41 = vand.u32 4294901760, %v22802_v33  ;;  %v22804_v59 = vld [vmem:[#allocation104_spill] sm:$0xff]  ;;  %v22806_v53 = vand.u32 4294901760, %v16915_v0  ;;  %v22812_v0 = vld [vmem:[#allocation110_spill] sm:$0xff] }
 0x457   : > { %13011 = vmatprep.subr.bf16.mxu1 %v22789_v54  ;;  %v22799_v54 = vand.u32 4294901760, %v22712_v2  ;;  %v22805_v40 = vand.u32 4294901760, %v22804_v59  ;;  %v22822_v59 = vand.u32 4294901760, %v17167_v52  ;;  %v22830_v52 = vand.u32 4294901760, %v17193_v50 }
 0x458   : > { %13201 = vmatpush3.bf16.msra.mxu0 %v22787_v21  ;;  %v13020_v2 = vpack.c.bf16 %v22807_v31, %v22806_v53  ;;  %v22826_v53 = vld [vmem:[#allocation117_spill] sm:$0xff]  ;;  %v22838_v50 = vand.u32 4294901760, %v17213_v36  ;;  %v22847_v36 = vand.u32 4294901760, %v22758_v49 }
 0x459   : > { %13203 = vmatprep.subr.bf16.mxu0 %v22792_v12  ;;  %v13016_v14 = vpack.c.bf16 %v22799_v54, %v22798_v34  ;;  %v13210_v48 = vpack.c.bf16 %v22805_v40, %v22803_v41  ;;  %v22809_v54 = vand.u32 4294901760, %v17124_v39  ;;  %v22810_v34 = vld [vmem:[#allocation107_spill] sm:$0xff]  ;;  %v13024_v39 = vpack.c.bf16 %v22815_v29, %v22814_v5 }
 0x45a   : > { %13013 = vmatpush1.bf16.msra.mxu1 %v22797_v24  ;;  %v22821_v41 = vand.u32 4294901760, %v22820_v23  ;;  %v22824_v40 = vand.u32 4294901760, %v17183_v3  ;;  %v22827_v31 = vand.u32 4294901760, %v22826_v53  ;;  %v22832_v3 = vand.u32 4294901760, %v17203_v22  ;;  %v5372_v53 = vld [vmem:[#allocation11 + $0x28] sm:$0xff] }
 0x45b   : > { %13015 = vmatprep.subr.bf16.mxu1 %v13014_v37  ;;  %v22813_v37 = vand.u32 4294901760, %v22812_v0  ;;  %v22836_v0 = vld [vmem:[#allocation124_spill] sm:$0xff]  ;;  %v22840_v29 = vand.u32 4294901760, %v17223_v42  ;;  %v22841_v22 = vand.u32 4294901760, %v17228_v16  ;;  %v22848_v23 = vand.u32 4294901760, %v22762_v1  ;;  %v22857_v1 = vld [vmem:[#allocation50_spill] sm:$0xff] }
 0x45c   : > { %13205 = vmatpush3.bf16.msra.mxu0 %v22792_v12  ;;  %v22849_v42 = vand.u32 4294901760, %v22761_v11  ;;  %v22856_v11 = vld [vmem:[#allocation40_spill] sm:$0xff] }
 0x45d   : > { %4112 = vmatmul.mubr.f32.vlgmr.msra.gmra.mrb[12].mxu1 %v17619_v60  ;;  %13207 = vmatprep.subr.bf16.mxu0 %v13206_v10  ;;  %v13022_v60 = vpack.c.bf16 %v22809_v54, %v22808_v30 }
 0x45e   : > { %13017 = vmatpush1.bf16.msra.mxu1 %v13016_v14  ;;  %4117 = vmatprep.mubr.f32.mxu1 %v22726_v7  ;;  %v22811_v14 = vand.u32 4294901760, %v22810_v34  ;;  %v22834_v34 = vld [vmem:[#allocation122_spill] sm:$0xff]  ;;  %v13042_v16 = vpack.c.bf16 %v22849_v42, %v22848_v23  ;;  %v18041_v42 = vld [vmem:[#allocation11 + $0x88] sm:$0xff] }
 0x45f   : > { %13019 = vmatprep.subr.bf16.mxu1 %v13018_v4  ;;  %12001 = vmatmul.mubr.f32.vlgmr.msra.gmra.mrb[16].mxu0 %v17624_v44  ;;  %v22818_v4 = vld [vmem:[#allocation112_spill] sm:$0xff] }
 0x460   : > { %12003 = vmatprep.mubr.f32.mxu0 %v17639_v26  ;;  %13209 = vmatpush3.bf16.msra.mxu0 %v13206_v10  ;;  %v13214_v58 = vpack.c.bf16 %v22813_v37, %v22811_v14  ;;  %v22816_v10 = vand.u32 4294901760, %v17154_v32  ;;  %v22819_v33 = vand.u32 4294901760, %v22818_v4  ;;  %v22823_v32 = vand.u32 4294901760, %v17172_v56 }
 0x461   : > { %4121 = vmatmul.mubr.f32.gmra.mrb[14].mxu1 %v17624_v44  ;;  %13211 = vmatprep.subr.bf16.mxu0 %v13210_v48  ;;  %v22817_v44 = vand.u32 4294901760, %v17159_v47  ;;  %v22831_v56 = vand.u32 4294901760, %v17198_v13  ;;  %v22835_v14 = vand.u32 4294901760, %v22834_v34  ;;  %v22837_v37 = vand.u32 4294901760, %v22836_v0  ;;  %v17993_v34 = vld [vmem:[#allocation11 + $0x58] sm:$0xff] }
 0x462   : > { %13021 = vmatpush1.bf16.msra.mxu1 %v13020_v2  ;;  %4126 = vmatprep.mubr.f32.mxu1 %v22726_v7  ;;  %v13218_v51 = vpack.c.bf16 %v22821_v41, %v22819_v33  ;;  %v13028_v47 = vpack.c.bf16 %v22823_v32, %v22822_v59  ;;  %v22828_v2 = vld [vmem:[#allocation118_spill] sm:$0xff]  ;;  %v22839_v13 = vand.u32 4294901760, %v17218_v46  ;;  %v22846_v33 = vand.u32 4294901760, %v22759_v17  ;;  %v22850_v41 = vld [vmem:[#allocation129_spill] sm:$0xff] }
 0x463   : > { %13023 = vmatprep.subr.bf16.mxu1 %v13022_v60  ;;  %12004 = vmatmul.mubr.f32.gmra.mrb[18].mxu0 %v17657_v8  ;;  %v13026_v62 = vpack.c.bf16 %v22817_v44, %v22816_v10  ;;  %v22829_v30 = vand.u32 4294901760, %v22828_v2  ;;  %v13032_v60 = vpack.c.bf16 %v22831_v56, %v22830_v52  ;;  %v22844_v44 = vld [vmem:[#allocation128_spill] sm:$0xff]  ;;  %v22852_v59 = vld [vmem:[#allocation130_spill] sm:$0xff]  ;;  %v22855_v17 = vand.u32 4294901760, %v22765_v6 }
 0x464   : > { %13213 = vmatpush3.bf16.msra.mxu0 %v13210_v48  ;;  %12038 = vmatprep.mubr.f32.mxu0 %v17605_v20  ;;  %v22825_v48 = vand.u32 4294901760, %v17188_v57  ;;  %v22833_v57 = vand.u32 4294901760, %v17208_v38  ;;  %v13036_v5 = vpack.c.bf16 %v22839_v13, %v22838_v50  ;;  %v13038_v38 = vpack.c.bf16 %v22841_v22, %v22840_v29  ;;  %v22858_v6 = vld [vmem:[#allocation42_spill] sm:$0xff]  ;;  %v18017_v22 = vld [vmem:[#allocation11 + $0x68] sm:$0xff] }
 0x465   : > { %4130 = vmatmul.mubr.f32.gmra.mrb[16].mxu1 %v17639_v26  ;;  %13215 = vmatprep.subr.bf16.mxu0 %v13214_v58  ;;  %v13222_v54 = vpack.c.bf16 %v22829_v30, %v22827_v31  ;;  %v13040_v46 = vpack.c.bf16 %v22847_v36, %v22846_v33  ;;  %v22853_v32 = vand.u32 4294901760, %v22852_v59  ;;  %v5374_v31 = vld [vmem:[#allocation11 + $0x38] sm:$0xff]  ;;  %v5407_v2 = vand.u32 4294901760, %v5372_v53  ;;  %v5373_v52 = vld [vmem:[#allocation11 + $0x30] sm:$0xff] }
 0x466   : > { %13025 = vmatpush1.bf16.msra.mxu1 %v13024_v39  ;;  %4135 = vmatprep.mubr.f32.mxu1 %v22726_v7  ;;  %v13030_v26 = vpack.c.bf16 %v22825_v48, %v22824_v40  ;;  %v22842_v39 = vld [vmem:[#allocation127_spill] sm:$0xff]  ;;  %v22854_v40 = vand.u32 4294901760, %v22766_v61  ;;  %v22859_v61 = vld [vmem:[#allocation45_spill] sm:$0xff]  ;;  %v5411_v30 = vand.u32 4294901760, %v5374_v31  ;;  %v21706_v0 = vand.u32 4294901760, %v17993_v34 }
 0x467   : > { %13027 = vmatprep.subr.bf16.mxu1 %v13026_v62  ;;  %v22843_v10 = vand.u32 4294901760, %v22842_v39  ;;  %v22845_v62 = vand.u32 4294901760, %v22844_v44  ;;  %v21703_v39 = vand.u32 4294901760, %v18017_v22  ;;  %v18024_v44 = vld [vmem:[#allocation11 + $0x60] sm:$0xff] }
 0x468   : > { %13217 = vmatpush3.bf16.msra.mxu0 %v13214_v58  ;;  %v13226_v58 = vpack.c.bf16 %v22837_v37, %v22835_v14  ;;  %v13044_v49 = vpack.c.bf16 %v22855_v17, %v22854_v40  ;;  %v17998_v37 = vld [vmem:[#allocation11 + $0x40] sm:$0xff]  ;;  %v18056_v40 = vld [vmem:[#allocation11 + $0x90] sm:$0xff] }
 0x469   : > { %4139 = vmatmul.mubr.f32.gmra.mrb[18].mxu1 %v17657_v8  ;;  %13219 = vmatprep.subr.bf16.mxu0 %v13218_v51  ;;  %v13034_v8 = vpack.c.bf16 %v22833_v57, %v22832_v3  ;;  %v13230_v4 = vpack.c.bf16 %v22845_v62, %v22843_v10  ;;  %v17987_v3 = vpack.c.bf16 %v5411_v30, %v5407_v2  ;;  %v21705_v50 = vand.u32 4294901760, %v17998_v37  ;;  %v18026_v62 = vld [vmem:[#allocation11 + $0x70] sm:$0xff] }
 0x46a   : > { %13029 = vmatpush1.bf16.msra.mxu1 %v13028_v47  ;;  %4305 = vmatprep.mubr.f32.mxu1 %v22726_v7  ;;  %v21700_v33 = vand.u32 4294901760, %v18026_v62 }
 0x46b   : > { %13031 = vmatprep.subr.bf16.mxu1 %v13030_v26  ;;  %22870 = vst [vmem:[#allocation105_spill] sm:$0xff] %v17987_v3 }
 0x46c   : > { %13221 = vmatpush3.bf16.msra.mxu0 %v13218_v51  ;;  %v22851_v51 = vand.u32 4294901760, %v22850_v41  ;;  %v18045_v41 = vsub.f32 %v5372_v53, %v5407_v2  ;;  %v5394_v53 = vld [vmem:[#allocation11 + $0xd8] sm:$0xff] }
 0x46d   : > { %13223 = vmatprep.subr.bf16.mxu0 %v13222_v54 }
 0x46e   : > { %13033 = vmatpush1.bf16.msra.mxu1 %v13032_v60  ;;  %v13234_v47 = vpack.c.bf16 %v22853_v32, %v22851_v51  ;;  %v5413_v60 = vand.u32 4294901760, %v5373_v52  ;;  %v18047_v51 = vsub.f32 %v5374_v31, %v5411_v30 }
 0x46f   : > { %13035 = vmatprep.subr.bf16.mxu1 %v13034_v8  ;;  %v17991_v8 = vld [vmem:[#allocation11 + $0x48] sm:$0xff] }
 0x470   : > { %13225 = vmatpush3.bf16.msra.mxu0 %v13222_v54  ;;  %v5371_v54 = vld [vmem:[#allocation11 + $0x20] sm:$0xff]  ;;  %v21707_v14 = vand.u32 4294901760, %v17991_v8  ;;  %v18051_v32 = vsub.f32 %v5373_v52, %v5413_v60 }
 0x471   : > { %13227 = vmatprep.subr.bf16.mxu0 %v13226_v58  ;;  %v5409_v56 = vand.u32 4294901760, %v5371_v54  ;;  %v5391_v52 = vld [vmem:[#allocation11 + $0xc0] sm:$0xff] }
 0x472   : > { %13037 = vmatpush1.bf16.msra.mxu1 %v13036_v5  ;;  %v18009_v5 = vpack.c.bf16 %v21706_v0, %v21707_v14 }
 0x473   : > { %13039 = vmatprep.subr.bf16.mxu1 %v13038_v38  ;;  %v17989_v57 = vpack.c.bf16 %v5413_v60, %v5409_v56  ;;  %v18019_v38 = vld [vmem:[#allocation11 + $0x78] sm:$0xff]  ;;  %v18049_v59 = vsub.f32 %v5371_v54, %v5409_v56  ;;  %v5451_v54 = vand.u32 4294901760, %v5394_v53  ;;  %v5393_v56 = vld [vmem:[#allocation11 + $0xd0] sm:$0xff]  ;;  %v5449_v60 = vand.u32 4294901760, %v5391_v52 }
 0x474   : > { %13229 = vmatpush3.bf16.msra.mxu0 %v13226_v58  ;;  %v18000_v58 = vld [vmem:[#allocation11 + $0x50] sm:$0xff]  ;;  %22872 = vst [vmem:[#allocation108_spill] sm:$0xff] %v18009_v5  ;;  %v21702_v10 = vand.u32 4294901760, %v18019_v38 }
 0x475   : > { %13231 = vmatprep.subr.bf16.mxu0 %v13230_v4  ;;  %22871 = vst [vmem:[#allocation106_spill] sm:$0xff] %v17989_v57  ;;  %v21704_v13 = vand.u32 4294901760, %v18000_v58 }
 0x476   : > { %13041 = vmatpush1.bf16.msra.mxu1 %v13040_v46  ;;  %v18035_v36 = vpack.c.bf16 %v21702_v10, %v21703_v39  ;;  %v5395_v39 = vld [vmem:[#allocation11 + $0xe0] sm:$0xff] }
 0x477   : > { %13043 = vmatprep.subr.bf16.mxu1 %v13042_v16  ;;  %v18015_v29 = vpack.c.bf16 %v21704_v13, %v21705_v50  ;;  %v18043_v16 = vld [vmem:[#allocation11 + $0x98] sm:$0xff]  ;;  %v5397_v13 = vld [vmem:[#allocation11 + $0xf0] sm:$0xff]  ;;  %v5457_v14 = vand.u32 4294901760, %v5395_v39 }
 0x478   : > { %13233 = vmatpush3.bf16.msra.mxu0 %v13230_v4  ;;  %v21701_v4 = vand.u32 4294901760, %v18024_v44  ;;  %22874 = vst [vmem:[#allocation109_spill] sm:$0xff] %v18035_v36 }
 0x479   : > { %13235 = vmatprep.subr.bf16.mxu0 %v13234_v47  ;;  %22873 = vst [vmem:[#allocation115_spill] sm:$0xff] %v18015_v29 }
 0x47a   : > { %13045 = vmatpush1.bf16.msra.mxu1 %v13044_v49  ;;  %v18062_v17 = vpack.c.bf16 %v21700_v33, %v21701_v4  ;;  %v5431_v49 = vand.u32 4294901760, %v18041_v42  ;;  %v5453_v33 = vand.u32 4294901760, %v5393_v56 }
 0x47b   : > { %13047 = vmatprep.subr.bf16.mxu1 %v22768_v9  ;;  %v22860_v9 = vld [vmem:[#allocation53_spill] sm:$0xff] }
 0x47c   : > { %13237 = vmatpush3.bf16.msra.mxu0 %v13234_v47  ;;  %v18054_v47 = vld [vmem:[#allocation11 + $0x80] sm:$0xff]  ;;  %22875 = vst [vmem:[#allocation111_spill] sm:$0xff] %v18062_v17  ;;  %v18093_v10 = vpack.c.bf16 %v5453_v33, %v5449_v60 }
 0x47d   : > { %4307 = vmatmul.mubr.f32.vlgmr.msra.gmra.mrb[12].mxu1 %v17605_v20  ;;  %13239 = vmatprep.subr.bf16.mxu0 %v22769_v45 }
 0x47e   : > { %13049 = vmatpush1.bf16.msra.mxu1 %v22770_v25  ;;  %4312 = vmatprep.mubr.f32.mxu1 %v22726_v7  ;;  %v22862_v25 = vld [vmem:[#allocation54_spill] sm:$0xff]  ;;  %22881 = vst [vmem:[#allocation121_spill] sm:$0xff] %v18093_v10 }
 0x47f   : > { %13051 = vmatprep.subr.bf16.mxu1 %v22771_v19  ;;  %12039 = vmatmul.mubr.f32.vlgmr.msra.gmra.mrb[16].mxu0 %v17607_v18  ;;  %v22863_v19 = vld [vmem:[#allocation58_spill] sm:$0xff] }
 0x480   : > { %12041 = vmatprep.mubr.f32.mxu0 %v17626_v15  ;;  %13241 = vmatpush3.bf16.msra.mxu0 %v22769_v45  ;;  %v22861_v45 = vld [vmem:[#allocation74_spill] sm:$0xff] }
 0x481   : > { %4314 = vmatmul.mubr.f32.gmra.mrb[14].mxu1 %v17607_v18  ;;  %13243 = vmatprep.subr.bf16.mxu0 %v22772_v55 }
 0x482   : > { %13053 = vmatpush1.bf16.msra.mxu1 %v22773_v43  ;;  %4319 = vmatprep.mubr.f32.mxu1 %v22726_v7  ;;  %v22865_v43 = vld [vmem:[#allocation61_spill] sm:$0xff] }
 0x483   : > { %13055 = vmatprep.subr.bf16.mxu1 %v22774_v35  ;;  %12042 = vmatmul.mubr.f32.gmra.mrb[18].mxu0 %v17645_v63  ;;  %v22866_v35 = vld [vmem:[#allocation59_spill] sm:$0xff] }
 0x484   : > { %13245 = vmatpush3.bf16.msra.mxu0 %v22772_v55  ;;  %12076 = vmatprep.mubr.f32.mxu0 %v17605_v20  ;;  %v22864_v55 = vld [vmem:[#allocation55_spill] sm:$0xff] }
 0x485   : > { %4321 = vmatmul.mubr.f32.gmra.mrb[16].mxu1 %v17626_v15  ;;  %13247 = vmatprep.subr.bf16.mxu0 %v22775_v28 }
 0x486   : > { %13057 = vmatpush1.bf16.msra.mxu1 %v22776_v27  ;;  %4326 = vmatprep.mubr.f32.mxu1 %v22726_v7  ;;  %v17973_v27 = vld [vmem:[#allocation11 + $0x18] sm:$0xff] }
 0x487   : > { %13059 = vmatprep.subr.bf16.mxu1 %v22856_v11  ;;  %v5435_v11 = vand.u32 4294901760, %v18043_v16 }
 0x488   : > { %13249 = vmatpush3.bf16.msra.mxu0 %v22775_v28  ;;  %v22867_v28 = vld [vmem:[#allocation92_spill] sm:$0xff] }
 0x489   : > { %4328 = vmatmul.mubr.f32.gmra.mrb[18].mxu1 %v17645_v63  ;;  %13251 = vmatprep.subr.bf16.mxu0 %v22857_v1 }
 0x48a   : > { %13061 = vmatpush1.bf16.msra.mxu1 %v22858_v6  ;;  %4430 = vmatprep.mubr.f32.mxu1 %v22726_v7  ;;  %v5437_v6 = vand.u32 4294901760, %v18056_v40 }
 0x48b   : > { %13063 = vmatprep.subr.bf16.mxu1 %v22859_v61  ;;  %v18069_v61 = vpack.c.bf16 %v5435_v11, %v5431_v49 }
 0x48c   : > { %13253 = vmatpush3.bf16.msra.mxu0 %v22857_v1  ;;  %v5433_v1 = vand.u32 4294901760, %v18054_v47 }
 0x48d   : > { %13255 = vmatprep.subr.bf16.mxu0 %v22860_v9  ;;  %22876 = vst [vmem:[#allocation114_spill] sm:$0xff] %v18069_v61 }
 0x48e   : > { %13065 = vmatpush1.bf16.msra.mxu1 %v22861_v45  ;;  %v5390_v45 = vld [vmem:[#allocation11 + $0xb8] sm:$0xff] }
 0x48f   : > { %13067 = vmatprep.subr.bf16.mxu1 %v22862_v25  ;;  %v18071_v25 = vpack.c.bf16 %v5437_v6, %v5433_v1 }
 0x490   : > { %13257 = vmatpush3.bf16.msra.mxu0 %v22860_v9  ;;  %v5388_v9 = vld [vmem:[#allocation11 + $0xa8] sm:$0xff] }
 0x491   : > { %13259 = vmatprep.subr.bf16.mxu0 %v22863_v19  ;;  %22877 = vst [vmem:[#allocation116_spill] sm:$0xff] %v18071_v25 }
 0x492   : > { %13069 = vmatpush1.bf16.msra.mxu1 %v22864_v55  ;;  %v5443_v55 = vand.u32 4294901760, %v5390_v45 }
 0x493   : > { %13071 = vmatprep.subr.bf16.mxu1 %v22865_v43  ;;  %v5387_v43 = vld [vmem:[#allocation11 + $0xa0] sm:$0xff] }
 0x494   : > { %13261 = vmatpush3.bf16.msra.mxu0 %v22863_v19  ;;  %v5439_v19 = vand.u32 4294901760, %v5388_v9 }
 0x495   : > { %13263 = vmatprep.subr.bf16.mxu0 %v22787_v21 }
 0x496   : > { %13073 = vmatpush1.bf16.msra.mxu1 %v22866_v35  ;;  %v5389_v35 = vld [vmem:[#allocation11 + $0xb0] sm:$0xff] }
 0x497   : > { %13075 = vmatprep.subr.bf16.mxu1 %v22867_v28  ;;  %v5441_v28 = vand.u32 4294901760, %v5387_v43 }
 0x498   : > { %13265 = vmatpush3.bf16.msra.mxu0 %v22787_v21  ;;  %v5369_v21 = vld [vmem:[#allocation11 + $0x10] sm:$0xff] }
 0x499   : > { %13267 = vmatprep.subr.bf16.mxu0 %v22792_v12  ;;  %v5405_v26 = vand.u32 4294901760, %v5369_v21 }
 0x49a   : > { %13077 = vmatpush1.bf16.msra.mxu1 %v22797_v24 }
 0x49b   : > { %v18039_v23 = vsub.f32 %v5369_v21, %v5405_v26  ;;  %v18074_v21 = vpack.c.bf16 %v5443_v55, %v5439_v19 }
 0x49c   : > { %13269 = vmatpush3.bf16.msra.mxu0 %v22792_v12  ;;  %v5367_v12 = vld [vmem:[#allocation11] sm:$0xff] }
 0x49d   : > { %4432 = vmatmul.mubr.f32.vlgmr.msra.gmra.mrb[12].mxu1 %v17605_v20  ;;  %v17971_v20 = vld [vmem:[#allocation11 + $0x8] sm:$0xff]  ;;  %v5401_v48 = vand.u32 4294901760, %v5367_v12  ;;  %22878 = vst [vmem:[#allocation119_spill] sm:$0xff] %v18074_v21 }
 0x49e   : > { %4437 = vmatprep.mubr.f32.mxu1 %v22726_v7  ;;  %v5399_v24 = vand.u32 4294901760, %v17971_v20 }
 0x49f   : > { %12077 = vmatmul.mubr.f32.vlgmr.msra.gmra.mrb[16].mxu0 %v17607_v18  ;;  %v18037_v46 = vsub.f32 %v5367_v12, %v5401_v48  ;;  %v5445_v12 = vand.u32 4294901760, %v5389_v35 }
 0x4a0   : > { %12079 = vmatprep.mubr.f32.mxu0 %v17626_v15  ;;  %v18082_v31 = vsub.f32 %v17971_v20, %v5399_v24  ;;  %v5396_v20 = vld [vmem:[#allocation11 + $0xe8] sm:$0xff] }
 0x4a1   : > { %4439 = vmatmul.mubr.f32.gmra.mrb[14].mxu1 %v17607_v18  ;;  %v5403_v18 = vand.u32 4294901760, %v17973_v27 }
 0x4a2   : > { %4444 = vmatprep.mubr.f32.mxu1 %v22726_v7  ;;  %v21728_v50 = vand.u32 4294901760, %v18082_v31 }
 0x4a3   : > { %12080 = vmatmul.mubr.f32.gmra.mrb[18].mxu0 %v17645_v63  ;;  %v18087_v2 = vsub.f32 %v17973_v27, %v5403_v18  ;;  %v5455_v27 = vand.u32 4294901760, %v5396_v20 }
 0x4a5   : > { %4446 = vmatmul.mubr.f32.gmra.mrb[16].mxu1 %v17626_v15  ;;  %v17981_v15 = vpack.c.bf16 %v5403_v18, %v5399_v24  ;;  %v5398_v24 = vld [vmem:[#allocation11 + $0xf8] sm:$0xff]  ;;  %v21733_v0 = vand.u32 4294901760, %v18087_v2 }
 0x4a6   : > { %4451 = vmatprep.mubr.f32.mxu1 %v22726_v7  ;;  %v5459_v18 = vand.u32 4294901760, %v5398_v24 }
 0x4a7   : > { %22868 = vst [vmem:[#allocation95_spill] sm:$0xff] %v17981_v15  ;;  %13271 = vmatprep.subr.bf16.mxu1 %v17981_v15 }
 0x4a9   : > { %4453 = vmatmul.mubr.f32.gmra.mrb[18].mxu1 %v17645_v63  ;;  %v17983_v63 = vpack.c.bf16 %v5405_v26, %v5401_v48  ;;  %v18077_v48 = vpack.c.bf16 %v5445_v12, %v5441_v28  ;;  %v5392_v26 = vld [vmem:[#allocation11 + $0xc8] sm:$0xff] }
 0x4aa   : > { %5495 = vmatprep.mubr.f32.mxu1 %v22726_v7  ;;  %v5447_v30 = vand.u32 4294901760, %v5392_v26 }
 0x4ab   : > { %22869 = vst [vmem:[#allocation102_spill] sm:$0xff] %v17983_v63  ;;  %13273 = vmatpush1.bf16.msra.mxu1 %v17983_v63  ;;  %22879 = vst [vmem:[#allocation125_spill] sm:$0xff] %v18077_v48 }
 0x4ac   : > { %13275 = vmatprep.subr.bf16.mxu1 %v17987_v3  ;;  %v18090_v4 = vpack.c.bf16 %v5451_v54, %v5447_v30 }
 0x4ae   : > { %22880 = vst [vmem:[#allocation120_spill] sm:$0xff] %v18090_v4 }
 0x4af   : > { %13277 = vmatpush1.bf16.msra.mxu1 %v17989_v57  ;;  %v22884_v57 = vand.u32 4294901760, %v17991_v8 }
 0x4b0   : > { %13279 = vmatprep.subr.bf16.mxu1 %v18009_v5 }
 0x4b3   : > { %13281 = vmatpush1.bf16.msra.mxu1 %v18015_v29 }
 0x4b4   : > { %13283 = vmatprep.subr.bf16.mxu1 %v18035_v36  ;;  %v5555_v36 = vsub.f32 %v18087_v2, %v21733_v0  ;;  %v22886_v0 = vand.u32 4294901760, %v17998_v37 }
 0x4b6   : > { %v18130_v63 = vsub.f32 %v17998_v37, %v22886_v0  ;;  %v22890_v0 = vand.u32 4294901760, %v18024_v44 }
 0x4b7   : > { %13285 = vmatpush1.bf16.msra.mxu1 %v18062_v17 }
 0x4b8   : > { %13287 = vmatprep.subr.bf16.mxu1 %v18069_v61  ;;  %v18100_v61 = vpack.c.bf16 %v5459_v18, %v5455_v27  ;;  %v18151_v37 = vsub.f32 %v18024_v44, %v22890_v0  ;;  %v18172_v44 = vsub.f32 %v5390_v45, %v5443_v55  ;;  %v18174_v0 = vsub.f32 %v5387_v43, %v5441_v28 }
 0x4b9   : > { %v5556_v45 = vand.u32 4294901760, %v5555_v36  ;;  %v21767_v43 = vand.u32 4294901760, %v18045_v41  ;;  %v21762_v28 = vand.u32 4294901760, %v18049_v59 }
 0x4ba   : > { %22882 = vst [vmem:[#allocation123_spill] sm:$0xff] %v18100_v61  ;;  %22897 = vst [vmem:[#allocation99_spill] sm:$0xff] %v18172_v44 }
 0x4bb   : > { %13289 = vmatpush1.bf16.msra.mxu1 %v18071_v25  ;;  %v21736_v25 = vand.u32 4294901760, %v18037_v46  ;;  %22898 = vst [vmem:[#allocation98_spill] sm:$0xff] %v18174_v0 }
 0x4bc   : > { %13291 = vmatprep.subr.bf16.mxu1 %v18074_v21  ;;  %v5461_v21 = vand.u32 4294901760, %v5397_v13 }
 0x4bd   : > { %v5549_v29 = vsub.f32 %v18037_v46, %v21736_v25  ;;  %v22887_v25 = vand.u32 4294901760, %v18000_v58 }
 0x4be   : > { %v18106_v17 = vpack.c.bf16 %v5461_v21, %v5457_v14 }
 0x4bf   : > { %13293 = vmatpush1.bf16.msra.mxu1 %v18077_v48  ;;  %v21739_v48 = vand.u32 4294901760, %v18039_v23  ;;  %v18135_v15 = vsub.f32 %v18000_v58, %v22887_v25  ;;  %v22891_v58 = vand.u32 4294901760, %v18026_v62 }
 0x4c0   : > { %13295 = vmatprep.subr.bf16.mxu1 %v18090_v4  ;;  %v5543_v4 = vsub.f32 %v18082_v31, %v21728_v50  ;;  %22883 = vst [vmem:[#allocation126_spill] sm:$0xff] %v18106_v17  ;;  %v18120_v50 = vsub.f32 %v17991_v8, %v22884_v57  ;;  %v22888_v57 = vand.u32 4294901760, %v18017_v22 }
 0x4c1   : > { %v5561_v5 = vsub.f32 %v18039_v23, %v21739_v48  ;;  %v18156_v25 = vsub.f32 %v18026_v62, %v22891_v58  ;;  %v18159_v48 = vsub.f32 %v18041_v42, %v5431_v49  ;;  %v18176_v62 = vsub.f32 %v5389_v35, %v5445_v12 }
 0x4c2   : > { %v18141_v8 = vsub.f32 %v18017_v22, %v22888_v57  ;;  %v18162_v22 = vsub.f32 %v18043_v16, %v5435_v11  ;;  %v18165_v57 = vsub.f32 %v18054_v47, %v5433_v1  ;;  %v18179_v42 = vsub.f32 %v5392_v26, %v5447_v30 }
 0x4c3   : > { %13297 = vmatpush1.bf16.msra.mxu1 %v18093_v10  ;;  %v22885_v10 = vand.u32 4294901760, %v17993_v34  ;;  %22892 = vst [vmem:[#allocation72_spill] sm:$0xff] %v18159_v48  ;;  %22899 = vst [vmem:[#allocation71_spill] sm:$0xff] %v18176_v62  ;;  %v18181_v16 = vsub.f32 %v5394_v53, %v5451_v54  ;;  %v18183_v49 = vsub.f32 %v5391_v52, %v5449_v60  ;;  %v5562_v55 = vand.u32 4294901760, %v5561_v5 }
 0x4c4   : > { %13299 = vmatprep.subr.bf16.mxu1 %v18100_v61  ;;  %22893 = vst [vmem:[#allocation56_spill] sm:$0xff] %v18162_v22  ;;  %22894 = vst [vmem:[#allocation64_spill] sm:$0xff] %v18165_v57  ;;  %v18185_v47 = vsub.f32 %v5393_v56, %v5453_v33  ;;  %v18189_v11 = vsub.f32 %v5398_v24, %v5459_v18  ;;  %v18191_v1 = vsub.f32 %v5395_v39, %v5457_v14 }
 0x4c5   : > { %v18125_v3 = vsub.f32 %v17993_v34, %v22885_v10  ;;  %v22889_v34 = vand.u32 4294901760, %v18019_v38  ;;  %22900 = vst [vmem:[#allocation101_spill] sm:$0xff] %v18179_v42  ;;  %22901 = vst [vmem:[#allocation100_spill] sm:$0xff] %v18181_v16  ;;  %v21763_v35 = vand.u32 4294901760, %v18047_v51  ;;  %v21756_v33 = vand.u32 4294901760, %v18051_v32 }
 0x4c6   : > { %22902 = vst [vmem:[#allocation48_spill] sm:$0xff] %v18183_v49  ;;  %22903 = vst [vmem:[#allocation76_spill] sm:$0xff] %v18185_v47  ;;  %v21754_v14 = vand.u32 4294901760, %v18120_v50  ;;  %v5573_v39 = vsub.f32 %v18049_v59, %v21762_v28  ;;  %v21745_v53 = vand.u32 4294901760, %v18130_v63  ;;  %v21744_v30 = vand.u32 4294901760, %v18135_v15 }
 0x4c7   : > { %v18146_v10 = vsub.f32 %v18019_v38, %v22889_v34  ;;  %v18168_v38 = vsub.f32 %v18056_v40, %v5437_v6  ;;  %v18170_v34 = vsub.f32 %v5388_v9, %v5439_v19  ;;  %13301 = vmatpush1.bf16.msra.mxu1 %v18106_v17  ;;  %v18187_v40 = vsub.f32 %v5396_v20, %v5455_v27 }
 0x4c8   : > { %22905 = vst [vmem:[#allocation63_spill] sm:$0xff] %v18189_v11  ;;  %22906 = vst [vmem:[#allocation41_spill] sm:$0xff] %v18191_v1  ;;  %v18193_v6 = vsub.f32 %v5397_v13, %v5461_v21  ;;  %v5544_v9 = vand.u32 4294901760, %v5543_v4  ;;  %v5550_v19 = vand.u32 4294901760, %v5549_v29  ;;  %v21752_v13 = vand.u32 4294901760, %v18125_v3 }
 0x4c9   : > { %22895 = vst [vmem:[#allocation97_spill] sm:$0xff] %v18168_v38  ;;  %22896 = vst [vmem:[#allocation96_spill] sm:$0xff] %v18170_v34  ;;  %v5567_v29 = vsub.f32 %v18045_v41, %v21767_v43  ;;  %v5579_v5 = vsub.f32 %v18047_v51, %v21763_v35  ;;  %v5585_v4 = vsub.f32 %v18051_v32, %v21756_v33  ;;  %v5574_v56 = vand.u32 4294901760, %v5573_v39 }
 0x4ca   : > { %22904 = vst [vmem:[#allocation49_spill] sm:$0xff] %v18187_v40  ;;  %22907 = vst [vmem:[#allocation39_spill] sm:$0xff] %v18193_v6  ;;  %v13302_v12 = vpack.c.bf16 %v5556_v45, %v5544_v9  ;;  %v18199_v26 = vpack.c.bf16 %v5562_v55, %v5550_v19  ;;  %v5591_v36 = vsub.f32 %v18120_v50, %v21754_v14  ;;  %v21742_v45 = vand.u32 4294901760, %v18141_v8 }
 0x4cb   : > { %v5603_v21 = vsub.f32 %v18125_v3, %v21752_v13  ;;  %v5568_v54 = vand.u32 4294901760, %v5567_v29  ;;  %v5580_v52 = vand.u32 4294901760, %v5579_v5  ;;  %v5586_v60 = vand.u32 4294901760, %v5585_v4 }
 0x4cc   : > { %13303 = vmatprep.subr.bf16.mxu1 %v13302_v12  ;;  %v5592_v20 = vand.u32 4294901760, %v5591_v36  ;;  %v5597_v27 = vsub.f32 %v18130_v63, %v21745_v53  ;;  %v5609_v18 = vsub.f32 %v18135_v15, %v21744_v30  ;;  %v21741_v19 = vand.u32 4294901760, %v18146_v10 }
 0x4cd   : > { %v5604_v24 = vand.u32 4294901760, %v5603_v21  ;;  %v18229_v58 = vpack.c.bf16 %v5580_v52, %v5568_v54  ;;  %v18231_v9 = vpack.c.bf16 %v5586_v60, %v5574_v56  ;;  %v21740_v5 = vand.u32 4294901760, %v18151_v37 }
 0x4ce   : > { %v5598_v12 = vand.u32 4294901760, %v5597_v27  ;;  %v5610_v29 = vand.u32 4294901760, %v5609_v18  ;;  %v5615_v39 = vsub.f32 %v18141_v8, %v21742_v45  ;;  %v5627_v4 = vsub.f32 %v18146_v10, %v21741_v19 }
 0x4cf   : > { %v18235_v55 = vpack.c.bf16 %v5604_v24, %v5592_v20  ;;  %v21743_v36 = vand.u32 4294901760, %v18156_v25  ;;  %v21747_v21 = vand.u32 4294901760, %v18159_v48  ;;  %v5621_v52 = vsub.f32 %v18151_v37, %v21740_v5 }
 0x4d0   : > { %v18246_v54 = vpack.c.bf16 %v5610_v29, %v5598_v12  ;;  %v21746_v56 = vand.u32 4294901760, %v18162_v22  ;;  %v21748_v60 = vand.u32 4294901760, %v18165_v57  ;;  %v5616_v20 = vand.u32 4294901760, %v5615_v39 }
 0x4d1   : > { %v5628_v24 = vand.u32 4294901760, %v5627_v4  ;;  %v5633_v27 = vsub.f32 %v18156_v25, %v21743_v36  ;;  %v5639_v18 = vsub.f32 %v18159_v48, %v21747_v21  ;;  %v5622_v12 = vand.u32 4294901760, %v5621_v52 }
 0x4d2   : > { %v5651_v29 = vsub.f32 %v18162_v22, %v21746_v56  ;;  %v5645_v5 = vsub.f32 %v18165_v57, %v21748_v60  ;;  %v21749_v39 = vand.u32 4294901760, %v18168_v38  ;;  %v21750_v36 = vand.u32 4294901760, %v18170_v34 }
 0x4d3   : > { %v18266_v4 = vpack.c.bf16 %v5628_v24, %v5616_v20  ;;  %v5634_v19 = vand.u32 4294901760, %v5633_v27  ;;  %v5640_v45 = vand.u32 4294901760, %v5639_v18  ;;  %v21751_v56 = vand.u32 4294901760, %v18172_v44 }
 0x4d4   : > { %v5652_v30 = vand.u32 4294901760, %v5651_v29  ;;  %v5646_v53 = vand.u32 4294901760, %v5645_v5  ;;  %v5657_v52 = vsub.f32 %v18168_v38, %v21749_v39  ;;  %v5663_v60 = vsub.f32 %v18170_v34, %v21750_v36 }
 0x4d5   : > { %v18273_v21 = vpack.c.bf16 %v5634_v19, %v5622_v12  ;;  %v21753_v20 = vand.u32 4294901760, %v18174_v0  ;;  %v21755_v24 = vand.u32 4294901760, %v18176_v62  ;;  %v5675_v5 = vsub.f32 %v18172_v44, %v21751_v56  ;;  %v22911_v44 = vld [vmem:[#allocation28_spill] sm:$0xff] }
 0x4d6   : > { %v18280_v27 = vpack.c.bf16 %v5652_v30, %v5640_v45  ;;  %v5658_v18 = vand.u32 4294901760, %v5657_v52  ;;  %v21757_v29 = vand.u32 4294901760, %v18179_v42  ;;  %v5664_v39 = vand.u32 4294901760, %v5663_v60 }
 0x4d7   : > { %v5669_v19 = vsub.f32 %v18174_v0, %v21753_v20  ;;  %v5681_v12 = vsub.f32 %v18176_v62, %v21755_v24  ;;  %v21758_v36 = vand.u32 4294901760, %v18181_v16  ;;  %v5676_v45 = vand.u32 4294901760, %v5675_v5 }
 0x4d8   : > { %v18293_v30 = vpack.c.bf16 %v5658_v18, %v5646_v53  ;;  %v5687_v52 = vsub.f32 %v18179_v42, %v21757_v29  ;;  %v21759_v56 = vand.u32 4294901760, %v18183_v49  ;;  %v21761_v14 = vand.u32 4294901760, %v18185_v47 }
 0x4d9   : > { %v5670_v60 = vand.u32 4294901760, %v5669_v19  ;;  %v5682_v13 = vand.u32 4294901760, %v5681_v12  ;;  %v5699_v20 = vsub.f32 %v18181_v16, %v21758_v36  ;;  %v18303_v24 = vpack.c.bf16 %v5676_v45, %v5664_v39 }
 0x4da   : > { %v5688_v33 = vand.u32 4294901760, %v5687_v52  ;;  %v5693_v53 = vsub.f32 %v18183_v49, %v21759_v56  ;;  %v21760_v18 = vand.u32 4294901760, %v18187_v40  ;;  %v5705_v19 = vsub.f32 %v18185_v47, %v21761_v14 }
 0x4db   : > { %v18309_v5 = vpack.c.bf16 %v5682_v13, %v5670_v60  ;;  %v5700_v29 = vand.u32 4294901760, %v5699_v20  ;;  %v21764_v12 = vand.u32 4294901760, %v18189_v11  ;;  %v21765_v45 = vand.u32 4294901760, %v18191_v1 }
 0x4dc   : > { %v5694_v36 = vand.u32 4294901760, %v5693_v53  ;;  %v5711_v39 = vsub.f32 %v18187_v40, %v21760_v18  ;;  %v21766_v52 = vand.u32 4294901760, %v18193_v6  ;;  %v5706_v13 = vand.u32 4294901760, %v5705_v19 }
 0x4dd   : > { %v18320_v56 = vpack.c.bf16 %v5700_v29, %v5688_v33  ;;  %v5723_v20 = vsub.f32 %v18189_v11, %v21764_v12  ;;  %v5717_v53 = vsub.f32 %v18191_v1, %v21765_v45 }
 0x4de   : > { %v5712_v60 = vand.u32 4294901760, %v5711_v39  ;;  %v5729_v18 = vsub.f32 %v18193_v6, %v21766_v52  ;;  %v18331_v14 = vpack.c.bf16 %v5706_v13, %v5694_v36  ;;  %v22908_v13 = vmov 1.0   ;;  %v22909_v36 = vld [vmem:[#allocation29_spill] sm:$0xff]  ;;  %v22910_v39 = vld [vmem:[#allocation30_spill] sm:$0xff] }
 0x4df   : > { %v5724_v28 = vand.u32 4294901760, %v5723_v20  ;;  %v5718_v35 = vand.u32 4294901760, %v5717_v53  ;;  %v5314_v53 = vrot.slane %v22908_v13, 4  ;;  %v5315_v45 = vrot.slane %v22909_v36, 4 }
 0x4e0   : > { %v5730_v33 = vand.u32 4294901760, %v5729_v18  ;;  %v5319_v43 = vrot.slane %v22910_v39, 4 }
 0x4e1   : > { %v18333_v29 = vpack.c.bf16 %v5724_v28, %v5712_v60  ;;  %v5316_v20 = vsel %vm5313_vm1, %v5314_v53, %v5315_v45 }
 0x4e2   : > { %v18335_v19 = vpack.c.bf16 %v5730_v33, %v5718_v35  ;;  %v5320_v40 = vsel %vm5313_vm1, %v5314_v53, %v5319_v43 }
 0x570   : > { %v4433_v35 = vpop.f32.mrb[12].mxu1 }
 0x571   : > { %v5241_v60 = vrot.slane %v4433_v35, 6  ;;  %v4435_v28 = vpop.f32.mrb[13].mxu1 }
 0x572   : > { %v12078_v33 = vpop.f32.mrb[16].mxu0 }
 0x573   : > { %5277 = vst [vmem:[#allocation2] sm:$0xfc] %v5241_v60  ;;  %v5248_v52 = vrot.slane %v12078_v33, 6  ;;  %v5207_v12 = vpop.f32.mrb[17].mxu0 }
 0x574   : > { %v4440_v17 = vpop.f32.mrb[14].mxu1  ;;  %v5243_v61 = vrot.slane %v5207_v12, 6  ;;  %v5318_v12 = vsel %vm5313_vm1, %v5315_v45, %v5314_v53 }
 0x575   : > { %v5244_v18 = vrot.slane %v4440_v17, 6  ;;  %v4442_v11 = vpop.f32.mrb[15].mxu1 }
 0x576   : > { %v5249_v35 = vsel %vm2124_vm13, %v5243_v61, %v5248_v52  ;;  %5279 = vst [vmem:[#allocation2 + $0x10] sm:$0xfc] %v5243_v61  ;;  %v12081_v6 = vpop.f32.mrb[18].mxu0 }
 0x577   : > { %v5245_v13 = vsel %vm2124_vm13, %v5241_v60, %v5244_v18  ;;  %v5260_v36 = vrot.slane %v12081_v6, 6  ;;  %v5219_v1 = vpop.f32.mrb[19].mxu0  ;;  %v5327_v39 = vmul.f32 %v5316_v20, %v5249_v35 }
 0x578   : > { %v5301_v33 = vadd.f32 %v5245_v13, %v4442_v11  ;;  %v4447_v47 = vpop.f32.mrb[16].mxu1  ;;  %v5254_v49 = vrot.slane %v5219_v1, 6  ;;  %v22912_v1 = vld [vmem:[#allocation27_spill] sm:$0xff] }
 0x579   : > { %v5250_v17 = vrot.slane %v4447_v47, 6  ;;  %5291 = vst [vmem:[#allocation2 + $0x70] sm:$0x3] %v5260_v36  ;;  %v4449_v16 = vpop.f32.mrb[17].mxu1  ;;  %v5337_v13 = vrot.slane %v5327_v39, 4 }
 0x57a   : > { %v5292_v42 = vld [vmem:[#allocation2] sm:$0xff]  ;;  %v5255_v62 = vsel %vm2124_vm13, %v5248_v52, %v5254_v49  ;;  %v5261_v61 = vsel %vm2124_vm13, %v5254_v49, %v5260_v36 }
 0x57b   : > { %v5251_v60 = vsel %vm2124_vm13, %v5244_v18, %v5250_v17  ;;  %v5329_v6 = vmul.f32 %v5320_v40, %v5261_v61  ;;  %v5328_v0 = vmul.f32 %v5318_v12, %v5255_v62  ;;  %v5296_v20 = vmul.f32 %v5292_v42, %v22912_v1 }
 0x57c   : > { %v5298_v34 = vmul.f32 %v5251_v60, %v22911_v44  ;;  %v4454_v11 = vpop.f32.mrb[18].mxu1  ;;  %v22913_v60 = vld [vmem:[#allocation21_spill] sm:$0xff] }
 0x57d   : > { %v5256_v35 = vrot.slane %v4454_v11, 6  ;;  %v4456_v45 = vpop.f32.mrb[19].mxu1  ;;  %v5341_v47 = vrot.slane %v5329_v6, 4  ;;  %v5304_v38 = vld [vmem:[#allocation2 + $0x10] sm:$0xf0]  ;;  %v5339_v57 = vrot.slane %v5328_v0, 4  ;;  %v5300_v42 = vadd.f32 %v5296_v20, %v4435_v28 }
 0x57e   : > { %v5302_v22 = vadd.f32 %v5298_v34, %v4449_v16  ;;  %v5326_v48 = vmul.f32 %v5314_v53, %v5304_v38 }
 0x57f   : > { %v5257_v52 = vsel %vm2124_vm13, %v5250_v17, %v5256_v35  ;;  %5289 = vst [vmem:[#allocation2 + $0x60] sm:$0x3] %v5256_v35  ;;  %v5340_v49 = vsel %vm5313_vm1, %v5337_v13, %v5339_v57  ;;  %v5342_v62 = vsel %vm5313_vm1, %v5339_v57, %v5341_v47 }
 0x580   : > { %v5303_v40 = vadd.f32 %v5257_v52, %v4456_v45  ;;  %v5308_v44 = vld [vmem:[#allocation2 + $0x70] sm:$0xf]  ;;  %v5336_v18 = vrot.slane %v5326_v48, 4  ;;  %v5350_v36 = vadd.f32 %v5340_v49, %v5301_v33  ;;  %v5351_v39 = vadd.f32 %v5342_v62, %v5302_v22 }
 0x581   : > { %v5330_v12 = vmul.f32 %v5319_v43, %v5308_v44 }
 0x582   : > { %v5338_v61 = vsel %vm5313_vm1, %v5336_v18, %v5337_v13  ;;  %v5360_v0 = vadd.f32 %v22913_v60, %v5350_v36  ;;  %v5361_v38 = vadd.f32 %v22913_v60, %v5351_v39 }
 0x583   : > { %v5343_v34 = vrot.slane %v5330_v12, 4  ;;  %v5349_v16 = vadd.f32 %v5338_v61, %v5300_v42  ;;  %v22925_v61 = vand.u32 4294901760, %v18045_v41 }
 0x584   : > { %v5364_v53 = vmax.f32 %v5360_v0, 0.0  ;;  %v5365_v6 = vmax.f32 %v5361_v38, 0.0  ;;  %v22926_v0 = vand.u32 4294901760, %v18047_v51 }
 0x585   : > { %v5344_v17 = vsel %vm5313_vm1, %v5341_v47, %v5343_v34  ;;  %v5359_v57 = vadd.f32 %v22913_v60, %v5349_v16 }
 0x586   : > { %v5352_v11 = vadd.f32 %v5344_v17, %v5303_v40  ;;  %v18390_v48 = vand.u32 4294901760, %v5364_v53  ;;  %v18398_v13 = vand.u32 4294901760, %v5365_v6  ;;  %v18489_v38 = vpack.c.bf16 %v22926_v0, %v22925_v61 }
 0x587   : > { %v5363_v22 = vmax.f32 %v5359_v57, 0.0 }
 0x588   : > { %v5362_v43 = vadd.f32 %v22913_v60, %v5352_v11  ;;  %v18396_v33 = vsub.f32 %v5364_v53, %v18390_v48  ;;  %v18408_v52 = vsub.f32 %v5365_v6, %v18398_v13  ;;  %v22931_v53 = vand.u32 4294901760, %v18130_v63  ;;  %v18659_v60 = vld [vmem:[#allocation12 + $0x68] sm:$0xff] }
 0x589   : > { %v18393_v28 = vand.u32 4294901760, %v5363_v22 }
 0x58a   : > { %v5366_v1 = vmax.f32 %v5362_v43, 0.0  ;;  %v21806_v47 = vand.u32 4294901760, %v18396_v33  ;;  %v21805_v18 = vand.u32 4294901760, %v18408_v52 }
 0x58b   : > { %v18401_v20 = vsub.f32 %v5363_v22, %v18393_v28  ;;  %v22939_v22 = vld [vmem:[#allocation56_spill] sm:$0xff] }
 0x58c   : > { %v18403_v35 = vand.u32 4294901760, %v5366_v1  ;;  %v5510_v44 = vsub.f32 %v18396_v33, %v21806_v47  ;;  %v5521_v39 = vsub.f32 %v18408_v52, %v21805_v18 }
 0x58d   : > { %v21807_v45 = vand.u32 4294901760, %v18401_v20 }
 0x58e   : > { %v18414_v62 = vsub.f32 %v5366_v1, %v18403_v35  ;;  %v5511_v36 = vand.u32 4294901760, %v5510_v44  ;;  %v5522_v12 = vand.u32 4294901760, %v5521_v39 }
 0x58f   : > { %v5499_v49 = vsub.f32 %v18401_v20, %v21807_v45 }
 0x590   : > { %v21804_v42 = vand.u32 4294901760, %v18414_v62 }
 0x591   : > { %v5500_v40 = vand.u32 4294901760, %v5499_v49  ;;  %v22943_v49 = vld [vmem:[#allocation97_spill] sm:$0xff] }
 0x593   : > { %5501 = vmatmul.mubr.f32.vlgmr.msra.gmra.mrb[20].mxu1 %v5500_v40 }
 0x594   : > { %13305 = vmatpush1.bf16.msra.mxu1 %v18199_v26  ;;  %5506 = vmatprep.mubr.f32.mxu1 %v22726_v7  ;;  %v5532_v26 = vsub.f32 %v18414_v62, %v21804_v42 }
 0x595   : > { %13307 = vmatprep.subr.bf16.mxu1 %v18229_v58 }
 0x596   : > { %v5533_v58 = vand.u32 4294901760, %v5532_v26  ;;  %v22949_v26 = vld [vmem:[#allocation98_spill] sm:$0xff] }
 0x597   : > { %5512 = vmatmul.mubr.f32.gmra.mrb[22].mxu1 %v5511_v36  ;;  %v22947_v36 = vld [vmem:[#allocation99_spill] sm:$0xff] }
 0x598   : > { %13309 = vmatpush1.bf16.msra.mxu1 %v18231_v9  ;;  %5517 = vmatprep.mubr.f32.mxu1 %v22726_v7  ;;  %v22914_v9 = vpack.c.bf16 %v18087_v2, %v18082_v31  ;;  %v22948_v39 = vand.u32 4294901760, %v22947_v36 }
 0x599   : > { %13311 = vmatprep.subr.bf16.mxu1 %v18235_v55  ;;  %v22915_v55 = vpack.c.bf16 %v18039_v23, %v18037_v46 }
 0x59b   : > { %5523 = vmatmul.mubr.f32.gmra.mrb[24].mxu1 %v5522_v12 }
 0x59c   : > { %13313 = vmatpush1.bf16.msra.mxu1 %v18246_v54  ;;  %5528 = vmatprep.mubr.f32.mxu1 %v22726_v7  ;;  %v22918_v54 = vpack.c.bf16 %v18125_v3, %v18120_v50 }
 0x59d   : > { %13315 = vmatprep.subr.bf16.mxu1 %v18266_v4  ;;  %v22920_v4 = vand.u32 4294901760, %v18082_v31  ;;  %v22927_v31 = vand.u32 4294901760, %v18049_v59 }
 0x59f   : > { %5534 = vmatmul.mubr.f32.gmra.mrb[26].mxu1 %v5533_v58  ;;  %v22950_v58 = vand.u32 4294901760, %v22949_v26 }
 0x5a0   : > { %13317 = vmatpush1.bf16.msra.mxu1 %v18273_v21  ;;  %5764 = vmatprep.mubr.f32.mxu1 %v22726_v7  ;;  %v22916_v21 = vpack.c.bf16 %v18047_v51, %v18045_v41  ;;  %v22932_v41 = vand.u32 4294901760, %v18135_v15  ;;  %v22933_v51 = vand.u32 4294901760, %v18141_v8 }
 0x5a1   : > { %13319 = vmatprep.subr.bf16.mxu1 %v18280_v27 }
 0x5a2   : > { %v18507_v17 = vpack.c.bf16 %v22932_v41, %v22931_v53  ;;  %v22962_v53 = vld [vmem:[#allocation49_spill] sm:$0xff] }
 0x5a3   : > { %v22963_v41 = vand.u32 4294901760, %v22962_v53 }
 0x5a4   : > { %13321 = vmatpush1.bf16.msra.mxu1 %v18293_v30  ;;  %v22922_v30 = vand.u32 4294901760, %v18037_v46  ;;  %v22929_v46 = vand.u32 4294901760, %v18120_v50  ;;  %v22936_v50 = vand.u32 4294901760, %v18156_v25 }
 0x5a5   : > { %13323 = vmatprep.subr.bf16.mxu1 %v18303_v24  ;;  %v22921_v24 = vand.u32 4294901760, %v18087_v2  ;;  %v22928_v2 = vand.u32 4294901760, %v18051_v32 }
 0x5a7   : > { %v18474_v27 = vpack.c.bf16 %v22921_v24, %v22920_v4  ;;  %v18495_v34 = vpack.c.bf16 %v22928_v2, %v22927_v31  ;;  %v6402_v31 = vld [vmem:[#allocation12 + $0x8] sm:$0xff]  ;;  %v6405_v2 = vld [vmem:[#allocation12 + $0x20] sm:$0xff] }
 0x5a8   : > { %13325 = vmatpush1.bf16.msra.mxu1 %v18309_v5  ;;  %v22923_v5 = vand.u32 4294901760, %v18039_v23  ;;  %v22930_v23 = vand.u32 4294901760, %v18125_v3  ;;  %v22937_v3 = vld [vmem:[#allocation72_spill] sm:$0xff] }
 0x5a9   : > { %13327 = vmatprep.subr.bf16.mxu1 %v18320_v56  ;;  %v22919_v56 = vpack.c.bf16 %v18135_v15, %v18130_v63  ;;  %v22938_v11 = vand.u32 4294901760, %v22937_v3  ;;  %v22940_v63 = vand.u32 4294901760, %v22939_v22  ;;  %v22941_v15 = vld [vmem:[#allocation64_spill] sm:$0xff] }
 0x5aa   : > { %v18501_v16 = vpack.c.bf16 %v22930_v23, %v22929_v46  ;;  %v22942_v1 = vand.u32 4294901760, %v22941_v15  ;;  %v18558_v46 = vld [vmem:[#allocation12] sm:$0xff]  ;;  %v22961_v23 = vpack.c.bf16 %v18156_v25, %v18151_v37  ;;  %v22967_v25 = vld [vmem:[#allocation41_spill] sm:$0xff]  ;;  %v22977_v42 = vpack.c.bf16 %v22943_v49, %v22941_v15 }
 0x5ab   : > { %v18525_v43 = vpack.c.bf16 %v22940_v63, %v22938_v11  ;;  %v6549_v11 = vand.u32 4294901760, %v6405_v2  ;;  %v18570_v63 = vld [vmem:[#allocation12 + $0x18] sm:$0xff] }
 0x5ac   : > { %13329 = vmatpush1.bf16.msra.mxu1 %v18331_v14  ;;  %v22917_v14 = vpack.c.bf16 %v18051_v32, %v18049_v59  ;;  %v22934_v59 = vand.u32 4294901760, %v18146_v10  ;;  %v22935_v32 = vand.u32 4294901760, %v18151_v37  ;;  %v22966_v37 = vpack.c.bf16 %v22939_v22, %v22937_v3 }
 0x5ad   : > { %13331 = vmatprep.subr.bf16.mxu1 %v18333_v29  ;;  %v18480_v29 = vpack.c.bf16 %v22923_v5, %v22922_v30  ;;  %v22957_v30 = vld [vmem:[#allocation48_spill] sm:$0xff]  ;;  %v18595_v3 = vsub.f32 %v6405_v2, %v6549_v11 }
 0x5ae   : > { %v18513_v57 = vpack.c.bf16 %v22934_v59, %v22933_v51  ;;  %v18519_v6 = vpack.c.bf16 %v22936_v50, %v22935_v32  ;;  %v22958_v5 = vand.u32 4294901760, %v22957_v30  ;;  %v22964_v51 = vld [vmem:[#allocation63_spill] sm:$0xff]  ;;  %v6545_v50 = vand.u32 4294901760, %v6402_v31 }
 0x5af   : > { %v22965_v59 = vand.u32 4294901760, %v22964_v51  ;;  %22972 = vst [vmem:[#allocation60_spill] sm:$0xff] %v18595_v3 }
 0x5b0   : > { %13333 = vmatpush1.bf16.msra.mxu1 %v18335_v19  ;;  %v22924_v19 = vpack.c.bf16 %v18146_v10, %v18141_v8  ;;  %v22944_v8 = vand.u32 4294901760, %v22943_v49  ;;  %v22945_v10 = vld [vmem:[#allocation96_spill] sm:$0xff] }
 0x5b1   : > { %13335 = vmatprep.subr.bf16.mxu1 %v22914_v9  ;;  %v22946_v44 = vand.u32 4294901760, %v22945_v10  ;;  %v22951_v9 = vld [vmem:[#allocation71_spill] sm:$0xff]  ;;  %v18568_v32 = vpack.c.bf16 %v22965_v59, %v22963_v41  ;;  %v18591_v41 = vld [vmem:[#allocation12 + $0x48] sm:$0xff]  ;;  %v18593_v59 = vsub.f32 %v6402_v31, %v6545_v50 }
 0x5b2   : > { %v18531_v40 = vpack.c.bf16 %v22944_v8, %v22942_v1  ;;  %v21811_v1 = vand.u32 4294901760, %v18558_v46  ;;  %v18573_v8 = vld [vmem:[#allocation12 + $0x38] sm:$0xff]  ;;  %v21812_v2 = vand.u32 4294901760, %v18591_v41 }
 0x5b3   : > { %5766 = vmatmul.mubr.f32.vlgmr.msra.gmra.mrb[20].mxu1 %v18393_v28  ;;  %v18538_v12 = vpack.c.bf16 %v22948_v39, %v22946_v44  ;;  %v18575_v44 = vld [vmem:[#allocation12 + $0x50] sm:$0xff]  ;;  %v22968_v39 = vand.u32 4294901760, %v22967_v25  ;;  %22971 = vst [vmem:[#allocation79_spill] sm:$0xff] %v18593_v59  ;;  %v21813_v18 = vand.u32 4294901760, %v18593_v59 }
 0x5b4   : > { %13337 = vmatpush1.bf16.msra.mxu1 %v22915_v55  ;;  %5771 = vmatprep.mubr.f32.mxu1 %v22726_v7  ;;  %v22952_v55 = vand.u32 4294901760, %v22951_v9  ;;  %v18600_v22 = vsub.f32 %v18558_v46, %v21811_v1  ;;  %v18637_v49 = vsub.f32 %v18591_v41, %v21812_v2 }
 0x5b5   : > { %13339 = vmatprep.subr.bf16.mxu1 %v22916_v21 }
 0x5b6   : > { %v18544_v21 = vpack.c.bf16 %v22952_v55, %v22950_v58  ;;  %v22969_v58 = vld [vmem:[#allocation39_spill] sm:$0xff]  ;;  %22973 = vst [vmem:[#allocation57_spill] sm:$0xff] %v18600_v22  ;;  %v21816_v47 = vand.u32 4294901760, %v18600_v22  ;;  %22980 = vst [vmem:[#allocation93_spill] sm:$0xff] %v18637_v49 }
 0x5b7   : > { %5773 = vmatmul.mubr.f32.gmra.mrb[22].mxu1 %v18390_v48  ;;  %v22970_v55 = vand.u32 4294901760, %v22969_v58 }
 0x5b8   : > { %13341 = vmatpush1.bf16.msra.mxu1 %v22917_v14  ;;  %5778 = vmatprep.mubr.f32.mxu1 %v22726_v7  ;;  %v22953_v14 = vld [vmem:[#allocation101_spill] sm:$0xff] }
 0x5b9   : > { %13343 = vmatprep.subr.bf16.mxu1 %v22918_v54  ;;  %v22954_v54 = vand.u32 4294901760, %v22953_v14 }
 0x5bb   : > { %5780 = vmatmul.mubr.f32.gmra.mrb[24].mxu1 %v18398_v13 }
 0x5bc   : > { %13345 = vmatpush1.bf16.msra.mxu1 %v22919_v56  ;;  %5785 = vmatprep.mubr.f32.mxu1 %v22726_v7  ;;  %v22955_v56 = vld [vmem:[#allocation100_spill] sm:$0xff] }
 0x5bd   : > { %13347 = vmatprep.subr.bf16.mxu1 %v22924_v19  ;;  %v22956_v4 = vand.u32 4294901760, %v22955_v56  ;;  %v22959_v19 = vld [vmem:[#allocation76_spill] sm:$0xff] }
 0x5be   : > { %v22960_v61 = vand.u32 4294901760, %v22959_v19 }
 0x5bf   : > { %5787 = vmatmul.mubr.f32.gmra.mrb[26].mxu1 %v18403_v35  ;;  %v18550_v24 = vpack.c.bf16 %v22956_v4, %v22954_v54  ;;  %v18584_v54 = vpack.c.bf16 %v22970_v55, %v22968_v39  ;;  %v6551_v4 = vand.u32 4294901760, %v18570_v63 }
 0x5c0   : > { %v18556_v0 = vpack.c.bf16 %v22960_v61, %v22958_v5  ;;  %13349 = vmatpush1.bf16.msra.mxu1 %v22961_v23  ;;  %5921 = vmatprep.mubr.f32.mxu1 %v22726_v7  ;;  %v21809_v5 = vand.u32 4294901760, %v18573_v8  ;;  %v21808_v61 = vand.u32 4294901760, %v18575_v44  ;;  %v18589_v23 = vld [vmem:[#allocation12 + $0x30] sm:$0xff] }
 0x5c1   : > { %13351 = vmatprep.subr.bf16.mxu1 %v22966_v37  ;;  %v21810_v37 = vand.u32 4294901760, %v18589_v23  ;;  %v18604_v39 = vsub.f32 %v18570_v63, %v6551_v4  ;;  %v21814_v63 = vand.u32 4294901760, %v18595_v3 }
 0x5c2   : > { %v18609_v55 = vsub.f32 %v18573_v8, %v21809_v5  ;;  %v18614_v31 = vsub.f32 %v18575_v44, %v21808_v61  ;;  %v22979_v61 = vpack.c.bf16 %v22947_v36, %v22945_v10  ;;  %v6747_v36 = vsub.f32 %v18600_v22, %v21816_v47 }
 0x5c3   : > { %22974 = vst [vmem:[#allocation91_spill] sm:$0xff] %v18604_v39  ;;  %v18626_v45 = vsub.f32 %v18589_v23, %v21810_v37  ;;  %v21821_v5 = vand.u32 4294901760, %v18604_v39  ;;  %v6741_v37 = vsub.f32 %v18593_v59, %v21813_v18  ;;  %v6753_v10 = vsub.f32 %v18595_v3, %v21814_v63 }
 0x5c4   : > { %22975 = vst [vmem:[#allocation94_spill] sm:$0xff] %v18609_v55  ;;  %22976 = vst [vmem:[#allocation69_spill] sm:$0xff] %v18614_v31  ;;  %13353 = vmatpush1.bf16.msra.mxu1 %v22977_v42  ;;  %v21824_v15 = vand.u32 4294901760, %v18609_v55  ;;  %v21825_v42 = vand.u32 4294901760, %v18614_v31  ;;  %v22981_v47 = vpack.c.bf16 %v22951_v9, %v22949_v26  ;;  %v6748_v3 = vand.u32 4294901760, %v6747_v36  ;;  %v18675_v26 = vld [vmem:[#allocation12 + $0x60] sm:$0xff] }
 0x5c5   : > { %22978 = vst [vmem:[#allocation90_spill] sm:$0xff] %v18626_v45  ;;  %13355 = vmatprep.subr.bf16.mxu1 %v22979_v61  ;;  %v6759_v1 = vsub.f32 %v18604_v39, %v21821_v5  ;;  %v6742_v61 = vand.u32 4294901760, %v6741_v37  ;;  %v6754_v22 = vand.u32 4294901760, %v6753_v10  ;;  %v22982_v5 = vand.u32 4294901760, %v18626_v45  ;;  %v18677_v9 = vld [vmem:[#allocation12 + $0x78] sm:$0xff] }
 0x5c6   : > { %v6765_v2 = vsub.f32 %v18609_v55, %v21824_v15  ;;  %v6777_v18 = vsub.f32 %v18614_v31, %v21825_v42  ;;  %v18667_v15 = vld [vmem:[#allocation12 + $0x80] sm:$0xff]  ;;  %v22983_v42 = vpack.c.bf16 %v22955_v56, %v22953_v14  ;;  %v22984_v59 = vand.u32 4294901760, %v18637_v49 }
 0x5c7   : > { %v6771_v39 = vsub.f32 %v18626_v45, %v22982_v5  ;;  %v6760_v63 = vand.u32 4294901760, %v6759_v1  ;;  %v13526_v37 = vpack.c.bf16 %v6754_v22, %v6742_v61  ;;  %v18679_v5 = vpack.c.bf16 %v6549_v11, %v6545_v50  ;;  %v18682_v45 = vld [vmem:[#allocation12 + $0x98] sm:$0xff] }
 0x5c8   : > { %13357 = vmatpush1.bf16.msra.mxu1 %v22981_v47  ;;  %v6766_v31 = vand.u32 4294901760, %v6765_v2  ;;  %v6778_v55 = vand.u32 4294901760, %v6777_v18  ;;  %v6783_v47 = vsub.f32 %v18637_v49, %v22984_v59  ;;  %v6561_v36 = vand.u32 4294901760, %v18659_v60  ;;  %v18685_v2 = vld [vmem:[#allocation12 + $0xb0] sm:$0xff] }
 0x5c9   : > { %13359 = vmatprep.subr.bf16.mxu1 %v22983_v42  ;;  %v6772_v10 = vand.u32 4294901760, %v6771_v39  ;;  %22985 = vst [vmem:[#allocation103_spill] sm:$0xff] %v18679_v5  ;;  %v13528_v14 = vpack.c.bf16 %v6760_v63, %v6748_v3  ;;  %v6565_v18 = vand.u32 4294901760, %v18667_v15  ;;  %v22986_v59 = vpack.c.bf16 %v22959_v19, %v22957_v30  ;;  %13527 = vmatprep.subr.bf16.mxu0 %v13526_v37 }
 0x5ca   : > { %v13530_v56 = vpack.c.bf16 %v6778_v55, %v6766_v31  ;;  %v6784_v1 = vand.u32 4294901760, %v6783_v47  ;;  %v18691_v22 = vsub.f32 %v18659_v60, %v6561_v36  ;;  %v22988_v50 = vand.u32 4294901760, %v18558_v46  ;;  %v18699_v55 = vld [vmem:[#allocation12 + $0x90] sm:$0xff] }
 0x5cb   : > { %v21842_v3 = vand.u32 4294901760, %v18675_v26  ;;  %v6567_v39 = vand.u32 4294901760, %v18677_v9  ;;  %v22990_v31 = vpack.c.bf16 %v22964_v51, %v22962_v53  ;;  %13529 = vmatpush1.bf16.msra.mxu0 %v13528_v14  ;;  %v18705_v19 = vsub.f32 %v18667_v15, %v6565_v18 }
 0x5cc   : > { %13361 = vmatpush1.bf16.msra.mxu1 %v22986_v59  ;;  %22987 = vst [vmem:[#allocation104_spill] sm:$0xff] %v18691_v22  ;;  %v18695_v11 = vpack.c.bf16 %v6551_v4, %v22988_v50  ;;  %v13532_v30 = vpack.c.bf16 %v6784_v1, %v6772_v10  ;;  %v22992_v60 = vand.u32 4294901760, %v18573_v8  ;;  %v22993_v46 = vand.u32 4294901760, %v18575_v44  ;;  %13531 = vmatprep.subr.bf16.mxu0 %v13530_v56  ;;  %v18724_v8 = vld [vmem:[#allocation12 + $0xa8] sm:$0xff] }
 0x5cd   : > { %13363 = vmatprep.subr.bf16.mxu1 %v22990_v31  ;;  %22991 = vst [vmem:[#allocation110_spill] sm:$0xff] %v18705_v19  ;;  %v21841_v63 = vand.u32 4294901760, %v18682_v45  ;;  %v21835_v42 = vand.u32 4294901760, %v18691_v22  ;;  %v18718_v53 = vsub.f32 %v18675_v26, %v21842_v3  ;;  %v18721_v51 = vsub.f32 %v18677_v9, %v6567_v39 }
 0x5ce   : > { %22989 = vst [vmem:[#allocation107_spill] sm:$0xff] %v18695_v11  ;;  %v18711_v4 = vpack.c.bf16 %v22993_v46, %v22992_v60  ;;  %v21839_v15 = vand.u32 4294901760, %v18685_v2  ;;  %v21834_v44 = vand.u32 4294901760, %v18705_v19  ;;  %v22998_v47 = vand.u32 4294901760, %v18589_v23  ;;  %v18906_v11 = vld [vmem:[#allocation12 + $0x138] sm:$0xff] }
 0x5cf   : > { %22995 = vst [vmem:[#allocation113_spill] sm:$0xff] %v18718_v53  ;;  %22996 = vst [vmem:[#allocation117_spill] sm:$0xff] %v18721_v51  ;;  %v18730_v61 = vsub.f32 %v18682_v45, %v21841_v63  ;;  %v22999_v37 = vand.u32 4294901760, %v18591_v41  ;;  %v21837_v9 = vand.u32 4294901760, %v18699_v55  ;;  %v23001_v14 = vpack.c.bf16 %v22969_v58, %v22967_v25  ;;  %v23003_v41 = vld [vmem:[#allocation95_spill] sm:$0xff]  ;;  %13533 = vmatpush1.bf16.msra.mxu0 %v13532_v30  ;;  %v18789_v63 = vld [vmem:[#allocation12 + $0xc0] sm:$0xff] }
 0x5d0   : > { %22994 = vst [vmem:[#allocation112_spill] sm:$0xff] %v18711_v4  ;;  %v6789_v56 = vsub.f32 %v18691_v22, %v21835_v42  ;;  %v21836_v1 = vand.u32 4294901760, %v18718_v53  ;;  %v21838_v59 = vand.u32 4294901760, %v18721_v51  ;;  %v18750_v23 = vsub.f32 %v18685_v2, %v21839_v15  ;;  %v18778_v42 = vld [vmem:[#allocation12 + $0xc8] sm:$0xff] }
 0x5d1   : > { %22997 = vst [vmem:[#allocation118_spill] sm:$0xff] %v18730_v61  ;;  %v18736_v10 = vpack.c.bf16 %v22999_v37, %v22998_v47  ;;  %13365 = vmatpush1.bf16.msra.mxu1 %v23001_v14  ;;  %v6801_v25 = vsub.f32 %v18705_v19, %v21834_v44  ;;  %v21840_v58 = vand.u32 4294901760, %v18730_v61  ;;  %v6575_v50 = vand.u32 4294901760, %v18724_v8  ;;  %v18843_v22 = vld [vmem:[#allocation12 + $0x108] sm:$0xff] }
 0x5d2   : > { %23002 = vst [vmem:[#allocation124_spill] sm:$0xff] %v18750_v23  ;;  %13367 = vmatprep.subr.bf16.mxu1 %v23003_v41  ;;  %v18761_v31 = vsub.f32 %v18699_v55, %v21837_v9  ;;  %v6790_v60 = vand.u32 4294901760, %v6789_v56  ;;  %v6795_v46 = vsub.f32 %v18718_v53, %v21836_v1  ;;  %v6807_v30 = vsub.f32 %v18721_v51, %v21838_v59  ;;  %v18780_v1 = vld [vmem:[#allocation12 + $0xe0] sm:$0xff]  ;;  %v23006_v9 = vld [vmem:[#allocation102_spill] sm:$0xff] }
 0x5d3   : > { %23000 = vst [vmem:[#allocation122_spill] sm:$0xff] %v18736_v10  ;;  %v21851_v47 = vand.u32 4294901760, %v18750_v23  ;;  %v6802_v37 = vand.u32 4294901760, %v6801_v25  ;;  %v6813_v14 = vsub.f32 %v18730_v61, %v21840_v58  ;;  %v18776_v56 = vsub.f32 %v18724_v8, %v6575_v50  ;;  %v23008_v8 = vld [vmem:[#allocation105_spill] sm:$0xff] }
 0x5d4   : > { %23004 = vst [vmem:[#allocation127_spill] sm:$0xff] %v18761_v31  ;;  %5924 = vmatmul.mubr.f32.vlgmr.msra.gmra.mrb[20].mxu1 %v18401_v20  ;;  %v6796_v59 = vand.u32 4294901760, %v6795_v46  ;;  %v6808_v15 = vand.u32 4294901760, %v6807_v30  ;;  %v18787_v58 = vpack.c.bf16 %v6565_v18, %v6561_v36  ;;  %v23009_v61 = vand.u32 4294901760, %v18761_v31  ;;  %v18796_v46 = vld [vmem:[#allocation12 + $0xd8] sm:$0xff] }
 0x5d5   : > { %23005 = vst [vmem:[#allocation128_spill] sm:$0xff] %v18776_v56  ;;  %13369 = vmatpush1.bf16.msra.mxu1 %v23006_v9  ;;  %5929 = vmatprep.mubr.f32.mxu1 %v22726_v7  ;;  %v6825_v25 = vsub.f32 %v18750_v23, %v21851_v47  ;;  %v13534_v3 = vpack.c.bf16 %v6802_v37, %v6790_v60  ;;  %v6814_v44 = vand.u32 4294901760, %v6813_v14  ;;  %v21854_v53 = vand.u32 4294901760, %v18776_v56  ;;  %v18800_v18 = vld [vmem:[#allocation12 + $0xf8] sm:$0xff] }
 0x5d6   : > { %23007 = vst [vmem:[#allocation129_spill] sm:$0xff] %v18787_v58  ;;  %13371 = vmatprep.subr.bf16.mxu1 %v23008_v8  ;;  %v6819_v51 = vsub.f32 %v18761_v31, %v23009_v61  ;;  %v13536_v30 = vpack.c.bf16 %v6808_v15, %v6796_v59  ;;  %v6577_v47 = vand.u32 4294901760, %v18778_v42  ;;  %v6581_v36 = vand.u32 4294901760, %v18780_v1  ;;  %v18811_v59 = vld [vmem:[#allocation12 + $0x110] sm:$0xff] }
 0x5d7   : > { %v6826_v19 = vand.u32 4294901760, %v6825_v25  ;;  %13535 = vmatprep.subr.bf16.mxu0 %v13534_v3  ;;  %v6831_v61 = vsub.f32 %v18776_v56, %v21854_v53  ;;  %v23010_v37 = vand.u32 4294901760, %v18675_v26  ;;  %v21859_v15 = vand.u32 4294901760, %v18789_v63  ;;  %v23012_v25 = vld [vmem:[#allocation106_spill] sm:$0xff]  ;;  %v23015_v26 = vld [vmem:[#allocation108_spill] sm:$0xff] }
 0x5d8   : > { %5932 = vmatmul.mubr.f32.gmra.mrb[22].mxu1 %v18396_v33  ;;  %v6820_v60 = vand.u32 4294901760, %v6819_v51  ;;  %v18816_v3 = vsub.f32 %v18778_v42, %v6577_v47  ;;  %v18819_v51 = vsub.f32 %v18780_v1, %v6581_v36  ;;  %v6583_v53 = vand.u32 4294901760, %v18796_v46  ;;  %13537 = vmatpush1.bf16.msra.mxu0 %v13536_v30 }
 0x5d9   : > { %v18808_v14 = vpack.c.bf16 %v6567_v39, %v23010_v37  ;;  %13373 = vmatpush1.bf16.msra.mxu1 %v23012_v25  ;;  %5937 = vmatprep.mubr.f32.mxu1 %v22726_v7  ;;  %v13538_v31 = vpack.c.bf16 %v6826_v19, %v6814_v44  ;;  %v6832_v39 = vand.u32 4294901760, %v6831_v61  ;;  %v18826_v37 = vsub.f32 %v18789_v63, %v21859_v15  ;;  %v18841_v15 = vld [vmem:[#allocation12 + $0xf0] sm:$0xff] }
 0x5da   : > { %23013 = vst [vmem:[#allocation40_spill] sm:$0xff] %v18816_v3  ;;  %23014 = vst [vmem:[#allocation50_spill] sm:$0xff] %v18819_v51  ;;  %13375 = vmatprep.subr.bf16.mxu1 %v23015_v26  ;;  %v23017_v56 = vand.u32 4294901760, %v18682_v45  ;;  %v23018_v19 = vand.u32 4294901760, %v18685_v2  ;;  %v21862_v44 = vand.u32 4294901760, %v18800_v18  ;;  %v21865_v1 = vand.u32 4294901760, %v18816_v3 }
 0x5db   : > { %23011 = vst [vmem:[#allocation130_spill] sm:$0xff] %v18808_v14  ;;  %23016 = vst [vmem:[#allocation42_spill] sm:$0xff] %v18826_v37  ;;  %13539 = vmatprep.subr.bf16.mxu0 %v13538_v31  ;;  %v18838_v30 = vsub.f32 %v18796_v46, %v6583_v53  ;;  %v6589_v61 = vand.u32 4294901760, %v18811_v59  ;;  %v13540_v45 = vpack.c.bf16 %v6832_v39, %v6820_v60  ;;  %v23025_v60 = vand.u32 4294901760, %v18819_v51 }
 0x5dc   : > { %v18832_v42 = vpack.c.bf16 %v23018_v19, %v23017_v56  ;;  %5940 = vmatmul.mubr.f32.gmra.mrb[24].mxu1 %v18408_v52  ;;  %v18850_v31 = vsub.f32 %v18800_v18, %v21862_v44  ;;  %v23022_v56 = vand.u32 4294901760, %v18699_v55  ;;  %v23024_v19 = vld [vmem:[#allocation115_spill] sm:$0xff]  ;;  %v6837_v23 = vsub.f32 %v18816_v3, %v21865_v1  ;;  %v23027_v55 = vld [vmem:[#allocation109_spill] sm:$0xff] }
 0x5dd   : > { %23020 = vst [vmem:[#allocation53_spill] sm:$0xff] %v18838_v30  ;;  %13377 = vmatpush1.bf16.msra.mxu1 %v23024_v19  ;;  %5945 = vmatprep.mubr.f32.mxu1 %v22726_v7  ;;  %v6849_v39 = vsub.f32 %v18819_v51, %v23025_v60  ;;  %v21874_v2 = vand.u32 4294901760, %v18838_v30  ;;  %v18866_v44 = vsub.f32 %v18811_v59, %v6589_v61  ;;  %v6587_v1 = vand.u32 4294901760, %v18841_v15 }
 0x5de   : > { %23019 = vst [vmem:[#allocation45_spill] sm:$0xff] %v18832_v42  ;;  %23021 = vst [vmem:[#allocation74_spill] sm:$0xff] %v18850_v31  ;;  %v18854_v46 = vpack.c.bf16 %v6575_v50, %v23022_v56  ;;  %13379 = vmatprep.subr.bf16.mxu1 %v23027_v55  ;;  %13541 = vmatpush1.bf16.msra.mxu0 %v13540_v45  ;;  %v23028_v50 = vand.u32 4294901760, %v18826_v37  ;;  %v21879_v49 = vand.u32 4294901760, %v18850_v31  ;;  %v6591_v3 = vand.u32 4294901760, %v18843_v22  ;;  %v18879_v42 = vld [vmem:[#allocation12 + $0x128] sm:$0xff] }
 0x5df   : > { %23026 = vst [vmem:[#allocation58_spill] sm:$0xff] %v18866_v44  ;;  %v6850_v60 = vand.u32 4294901760, %v6849_v39  ;;  %v6855_v59 = vsub.f32 %v18838_v30, %v21874_v2  ;;  %v18891_v39 = vld [vmem:[#allocation12 + $0x140] sm:$0xff]  ;;  %v23031_v2 = vld [vmem:[#allocation111_spill] sm:$0xff]  ;;  %v18898_v58 = vpack.c.bf16 %v6581_v36, %v6577_v47  ;;  %v6593_v4 = vand.u32 4294901760, %v18879_v42 }
 0x5e0   : > { %23023 = vst [vmem:[#allocation54_spill] sm:$0xff] %v18854_v46  ;;  %v6843_v56 = vsub.f32 %v18826_v37, %v23028_v50  ;;  %v6838_v46 = vand.u32 4294901760, %v6837_v23  ;;  %5948 = vmatmul.mubr.f32.gmra.mrb[26].mxu1 %v18414_v62  ;;  %v6861_v50 = vsub.f32 %v18850_v31, %v21879_v49  ;;  %v18886_v37 = vsub.f32 %v18841_v15, %v6587_v1  ;;  %v18900_v49 = vld [vmem:[#allocation12 + $0x120] sm:$0xff]  ;;  %v23034_v15 = vld [vmem:[#allocation114_spill] sm:$0xff] }
 0x5e1   : > { %v18889_v23 = vsub.f32 %v18843_v22, %v6591_v3  ;;  %13381 = vmatpush1.bf16.msra.mxu1 %v23031_v2  ;;  %6050 = vmatprep.mubr.f32.mxu1 %v22726_v7  ;;  %v6856_v30 = vand.u32 4294901760, %v6855_v59  ;;  %23033 = vst [vmem:[#allocation59_spill] sm:$0xff] %v18898_v58  ;;  %v6597_v59 = vand.u32 4294901760, %v18891_v39  ;;  %v23035_v47 = vand.u32 4294901760, %v18789_v63  ;;  %v23038_v63 = vld [vmem:[#allocation116_spill] sm:$0xff] }
 0x5e2   : > { %v6844_v45 = vand.u32 4294901760, %v6843_v56  ;;  %23029 = vst [vmem:[#allocation55_spill] sm:$0xff] %v18886_v37  ;;  %v13542_v51 = vpack.c.bf16 %v6850_v60, %v6838_v46  ;;  %v23032_v56 = vand.u32 4294901760, %v18866_v44  ;;  %13383 = vmatprep.subr.bf16.mxu1 %v23034_v15  ;;  %v6862_v22 = vand.u32 4294901760, %v6861_v50 }
 0x5e3   : > { %23030 = vst [vmem:[#allocation61_spill] sm:$0xff] %v18889_v23  ;;  %v21888_v31 = vand.u32 4294901760, %v18886_v37  ;;  %v21887_v10 = vand.u32 4294901760, %v18889_v23  ;;  %v18911_v36 = vpack.c.bf16 %v6583_v53, %v23035_v47  ;;  %v6599_v47 = vand.u32 4294901760, %v18906_v11 }
 0x5e4   : > { %v6873_v14 = vsub.f32 %v18866_v44, %v23032_v56  ;;  %13543 = vmatprep.subr.bf16.mxu0 %v13542_v51  ;;  %v13544_v46 = vpack.c.bf16 %v6856_v30, %v6844_v45  ;;  %v18920_v44 = vsub.f32 %v18879_v42, %v6593_v4  ;;  %v6595_v51 = vand.u32 4294901760, %v18900_v49  ;;  %v18925_v30 = vld [vmem:[#allocation12 + $0x170] sm:$0xff]  ;;  %v23042_v42 = vld [vmem:[#allocation119_spill] sm:$0xff] }
 0x5e5   : > { %23036 = vst [vmem:[#allocation92_spill] sm:$0xff] %v18911_v36  ;;  %v6867_v50 = vsub.f32 %v18886_v37, %v21888_v31  ;;  %v6879_v56 = vsub.f32 %v18889_v23, %v21887_v10  ;;  %13385 = vmatpush1.bf16.msra.mxu1 %v23038_v63  ;;  %v18929_v45 = vsub.f32 %v18891_v39, %v6597_v59  ;;  %v23040_v10 = vand.u32 4294901760, %v18800_v18  ;;  %v18947_v18 = vld [vmem:[#allocation12 + $0x150] sm:$0xff] }
 0x5e6   : > { %v6874_v60 = vand.u32 4294901760, %v6873_v14  ;;  %23037 = vst [vmem:[#allocation72_spill] sm:$0xff] %v18920_v44  ;;  %v18923_v14 = vld [vmem:[#allocation12 + $0x158] sm:$0xff]  ;;  %13545 = vmatpush1.bf16.msra.mxu0 %v13544_v46  ;;  %13387 = vmatprep.subr.bf16.mxu1 %v23042_v42  ;;  %v21897_v36 = vand.u32 4294901760, %v18920_v44  ;;  %v18939_v58 = vsub.f32 %v18900_v49, %v6595_v51  ;;  %v18943_v39 = vsub.f32 %v18906_v11, %v6599_v47 }
 0x5e7   : > { %23039 = vst [vmem:[#allocation56_spill] sm:$0xff] %v18929_v45  ;;  %v18934_v31 = vpack.c.bf16 %v6589_v61, %v23040_v10  ;;  %v6868_v23 = vand.u32 4294901760, %v6867_v50  ;;  %v6880_v37 = vand.u32 4294901760, %v6879_v56  ;;  %v6601_v46 = vand.u32 4294901760, %v18923_v14  ;;  %v18949_v61 = vld [vmem:[#allocation12 + $0x168] sm:$0xff]  ;;  %v23055_v42 = vld [vmem:[#allocation123_spill] sm:$0xff] }
 0x5e8   : > { %v13546_v53 = vpack.c.bf16 %v6874_v60, %v6862_v22  ;;  %23043 = vst [vmem:[#allocation97_spill] sm:$0xff] %v18939_v58  ;;  %v21898_v22 = vand.u32 4294901760, %v18929_v45  ;;  %23044 = vst [vmem:[#allocation96_spill] sm:$0xff] %v18943_v39  ;;  %v6605_v10 = vand.u32 4294901760, %v18925_v30  ;;  %v6885_v49 = vsub.f32 %v18920_v44, %v21897_v36 }
 0x5e9   : > { %23041 = vst [vmem:[#allocation64_spill] sm:$0xff] %v18934_v31  ;;  %v13548_v60 = vpack.c.bf16 %v6880_v37, %v6868_v23  ;;  %v21904_v50 = vand.u32 4294901760, %v18939_v58  ;;  %v18955_v56 = vpack.c.bf16 %v6591_v3, %v6587_v1  ;;  %v21907_v31 = vand.u32 4294901760, %v18943_v39  ;;  %v23049_v23 = vld [vmem:[#allocation120_spill] sm:$0xff] }
 0x5ea   : > { %13547 = vmatprep.subr.bf16.mxu0 %v13546_v53  ;;  %v23046_v53 = vld [vmem:[#allocation125_spill] sm:$0xff]  ;;  %v6897_v11 = vsub.f32 %v18929_v45, %v21898_v22  ;;  %v18963_v5 = vsub.f32 %v18923_v14, %v6601_v46  ;;  %v18966_v37 = vsub.f32 %v18925_v30, %v6605_v10  ;;  %v6886_v36 = vand.u32 4294901760, %v6885_v49 }
 0x5eb   : > { %23045 = vst [vmem:[#allocation99_spill] sm:$0xff] %v18955_v56  ;;  %13389 = vmatpush1.bf16.msra.mxu1 %v23046_v53  ;;  %13549 = vmatpush1.bf16.msra.mxu0 %v13548_v60  ;;  %v6891_v3 = vsub.f32 %v18939_v58, %v21904_v50  ;;  %v6603_v1 = vand.u32 4294901760, %v18947_v18  ;;  %v6607_v22 = vand.u32 4294901760, %v18949_v61  ;;  %v6903_v14 = vsub.f32 %v18943_v39, %v21907_v31  ;;  %v18979_v56 = vld [vmem:[#allocation12 + $0x188] sm:$0xff]  ;;  %v18981_v60 = vld [vmem:[#allocation12 + $0x1a0] sm:$0xff] }
 0x5ec   : > { %23047 = vst [vmem:[#allocation98_spill] sm:$0xff] %v18963_v5  ;;  %23048 = vst [vmem:[#allocation71_spill] sm:$0xff] %v18966_v37  ;;  %13391 = vmatprep.subr.bf16.mxu1 %v23049_v23  ;;  %v6898_v45 = vand.u32 4294901760, %v6897_v11  ;;  %v21910_v30 = vand.u32 4294901760, %v18963_v5  ;;  %v18989_v11 = vpack.c.bf16 %v6597_v59, %v6593_v4  ;;  %v23053_v23 = vld [vmem:[#allocation121_spill] sm:$0xff]  ;;  %v23054_v53 = vand.u32 4294901760, %v18966_v37 }
 0x5ed   : > { %v6892_v49 = vand.u32 4294901760, %v6891_v3  ;;  %v18984_v50 = vsub.f32 %v18947_v18, %v6603_v1  ;;  %v18987_v58 = vsub.f32 %v18949_v61, %v6607_v22  ;;  %v6904_v39 = vand.u32 4294901760, %v6903_v14 }
 0x5ee   : > { %23052 = vst [vmem:[#allocation48_spill] sm:$0xff] %v18989_v11  ;;  %v13550_v31 = vpack.c.bf16 %v6898_v45, %v6886_v36  ;;  %v6909_v44 = vsub.f32 %v18963_v5, %v21910_v30  ;;  %v6921_v3 = vsub.f32 %v18966_v37, %v23054_v53  ;;  %v6609_v4 = vand.u32 4294901760, %v18979_v56  ;;  %v19003_v36 = vld [vmem:[#allocation12 + $0x180] sm:$0xff]  ;;  %v19005_v45 = vld [vmem:[#allocation12 + $0x198] sm:$0xff] }
 0x5ef   : > { %23050 = vst [vmem:[#allocation101_spill] sm:$0xff] %v18984_v50  ;;  %23051 = vst [vmem:[#allocation100_spill] sm:$0xff] %v18987_v58  ;;  %13393 = vmatpush1.bf16.msra.mxu1 %v23053_v23  ;;  %v21917_v18 = vand.u32 4294901760, %v18984_v50  ;;  %v21916_v61 = vand.u32 4294901760, %v18987_v58  ;;  %v6613_v59 = vand.u32 4294901760, %v18981_v60  ;;  %v13552_v14 = vpack.c.bf16 %v6904_v39, %v6892_v49 }
 0x5f0   : > { %13395 = vmatprep.subr.bf16.mxu1 %v23055_v42  ;;  %13551 = vmatprep.subr.bf16.mxu0 %v13550_v31  ;;  %v6910_v30 = vand.u32 4294901760, %v6909_v44  ;;  %v6922_v5 = vand.u32 4294901760, %v6921_v3  ;;  %v19007_v11 = vpack.c.bf16 %v6599_v47, %v6595_v51  ;;  %v19016_v42 = vsub.f32 %v18979_v56, %v6609_v4  ;;  %v19021_v31 = vld [vmem:[#allocation12 + $0x1b8] sm:$0xff]  ;;  %v19023_v44 = vld [vmem:[#allocation12 + $0x1d0] sm:$0xff] }
 0x5f1   : > { %v6915_v53 = vsub.f32 %v18984_v50, %v21917_v18  ;;  %v6927_v37 = vsub.f32 %v18987_v58, %v21916_v61  ;;  %v19019_v23 = vsub.f32 %v18981_v60, %v6613_v59  ;;  %v23059_v51 = vld [vmem:[#allocation126_spill] sm:$0xff]  ;;  %13553 = vmatpush1.bf16.msra.mxu0 %v13552_v14  ;;  %v6611_v39 = vand.u32 4294901760, %v19003_v36 }
 0x5f2   : > { %23056 = vst [vmem:[#allocation76_spill] sm:$0xff] %v19007_v11  ;;  %23057 = vst [vmem:[#allocation49_spill] sm:$0xff] %v19016_v42  ;;  %v13554_v47 = vpack.c.bf16 %v6922_v5, %v6910_v30  ;;  %v6615_v49 = vand.u32 4294901760, %v19005_v45  ;;  %v19028_v3 = vpack.c.bf16 %v6605_v10, %v6601_v46  ;;  %v21921_v60 = vand.u32 4294901760, %v19016_v42  ;;  %v19041_v10 = vld [vmem:[#allocation12 + $0x1b0] sm:$0xff] }
 0x5f3   : > { %23058 = vst [vmem:[#allocation63_spill] sm:$0xff] %v19019_v23  ;;  %13397 = vmatpush1.bf16.msra.mxu1 %v23059_v51  ;;  %v6916_v56 = vand.u32 4294901760, %v6915_v53  ;;  %v6928_v61 = vand.u32 4294901760, %v6927_v37  ;;  %v21920_v18 = vand.u32 4294901760, %v19019_v23  ;;  %v19034_v58 = vsub.f32 %v19003_v36, %v6611_v39 }
 0x5f4   : > { %23060 = vst [vmem:[#allocation41_spill] sm:$0xff] %v19028_v3  ;;  %13399 = vmatprep.subr.bf16.mxu1 %v18474_v27  ;;  %13555 = vmatprep.subr.bf16.mxu0 %v13554_v47  ;;  %v19037_v5 = vsub.f32 %v19005_v45, %v6615_v49  ;;  %v6617_v30 = vand.u32 4294901760, %v19021_v31  ;;  %v6621_v46 = vand.u32 4294901760, %v19023_v44  ;;  %v19043_v27 = vld [vmem:[#allocation12 + $0x1c8] sm:$0xff]  ;;  %v23063_v37 = vand.u32 4294901760, %v18401_v20 }
 0x5f5   : > { %23061 = vst [vmem:[#allocation39_spill] sm:$0xff] %v19034_v58  ;;  %v13556_v14 = vpack.c.bf16 %v6928_v61, %v6916_v56  ;;  %v6933_v36 = vsub.f32 %v19016_v42, %v21921_v60  ;;  %v6945_v45 = vsub.f32 %v19019_v23, %v21920_v18  ;;  %v19053_v53 = vpack.c.bf16 %v6607_v22, %v6603_v1 }
 0x5f6   : > { %23062 = vst [vmem:[#allocation95_spill] sm:$0xff] %v19037_v5  ;;  %6054 = vmatmul.mubr.f32.vlgmr.msra.gmra.mrb[20].mxu1 %v23063_v37  ;;  %v21924_v47 = vand.u32 4294901760, %v19034_v58  ;;  %v21927_v20 = vand.u32 4294901760, %v19037_v5  ;;  %v19060_v61 = vsub.f32 %v19021_v31, %v6617_v30  ;;  %v19063_v56 = vsub.f32 %v19023_v44, %v6621_v46 }
 0x5f7   : > { %23064 = vst [vmem:[#allocation102_spill] sm:$0xff] %v19053_v53  ;;  %13401 = vmatpush1.bf16.msra.mxu1 %v18480_v29  ;;  %6059 = vmatprep.mubr.f32.mxu1 %v22726_v7  ;;  %v6934_v37 = vand.u32 4294901760, %v6933_v36  ;;  %v6946_v22 = vand.u32 4294901760, %v6945_v45  ;;  %v6619_v1 = vand.u32 4294901760, %v19041_v10  ;;  %v6623_v29 = vand.u32 4294901760, %v19043_v27 }
 0x5f8   : > { %23065 = vst [vmem:[#allocation105_spill] sm:$0xff] %v19060_v61  ;;  %23066 = vst [vmem:[#allocation106_spill] sm:$0xff] %v19063_v56  ;;  %13403 = vmatprep.subr.bf16.mxu1 %v18489_v38  ;;  %13557 = vmatpush1.bf16.msra.mxu0 %v13556_v14  ;;  %v6939_v18 = vsub.f32 %v19034_v58, %v21924_v47  ;;  %v6951_v31 = vsub.f32 %v19037_v5, %v21927_v20  ;;  %v21928_v44 = vand.u32 4294901760, %v19060_v61  ;;  %v19076_v38 = vld [vmem:[#allocation12 + $0x1e8] sm:$0xff]  ;;  %v19078_v14 = vld [vmem:[#allocation12 + $0x200] sm:$0xff] }
 0x5f9   : > { %v23067_v36 = vand.u32 4294901760, %v18396_v33  ;;  %v13558_v45 = vpack.c.bf16 %v6946_v22, %v6934_v37  ;;  %v19083_v23 = vsub.f32 %v19041_v10, %v6619_v1  ;;  %v19086_v47 = vsub.f32 %v19043_v27, %v6623_v29  ;;  %v19103_v27 = vld [vmem:[#allocation12 + $0x1e0] sm:$0xff]  ;;  %v19105_v22 = vld [vmem:[#allocation12 + $0x1f8] sm:$0xff] }
 0x5fa   : > { %v19088_v58 = vpack.c.bf16 %v6613_v59, %v6609_v4  ;;  %v6940_v20 = vand.u32 4294901760, %v6939_v18  ;;  %v6952_v60 = vand.u32 4294901760, %v6951_v31  ;;  %v6957_v33 = vsub.f32 %v19060_v61, %v21928_v44 }
 0x5fb   : > { %6063 = vmatmul.mubr.f32.gmra.mrb[22].mxu1 %v23067_v36  ;;  %23068 = vst [vmem:[#allocation108_spill] sm:$0xff] %v19083_v23  ;;  %23069 = vst [vmem:[#allocation115_spill] sm:$0xff] %v19086_v47  ;;  %v23071_v37 = vand.u32 4294901760, %v19063_v56  ;;  %13559 = vmatprep.subr.bf16.mxu0 %v13558_v45  ;;  %v21936_v4 = vand.u32 4294901760, %v19083_v23  ;;  %v21933_v59 = vand.u32 4294901760, %v19086_v47  ;;  %v6629_v18 = vand.u32 4294901760, %v19078_v14 }
 0x5fc   : > { %23070 = vst [vmem:[#allocation109_spill] sm:$0xff] %v19088_v58  ;;  %13405 = vmatpush1.bf16.msra.mxu1 %v18495_v34  ;;  %6068 = vmatprep.mubr.f32.mxu1 %v22726_v7  ;;  %v6625_v34 = vand.u32 4294901760, %v19076_v38  ;;  %v13560_v31 = vpack.c.bf16 %v6952_v60, %v6940_v20  ;;  %v6958_v36 = vand.u32 4294901760, %v6957_v33  ;;  %v19107_v61 = vpack.c.bf16 %v6615_v49, %v6611_v39  ;;  %v19123_v20 = vld [vmem:[#allocation12 + $0x218] sm:$0xff]  ;;  %v19125_v39 = vld [vmem:[#allocation12 + $0x230] sm:$0xff] }
 0x5fd   : > { %v6969_v10 = vsub.f32 %v19063_v56, %v23071_v37  ;;  %13407 = vmatprep.subr.bf16.mxu1 %v18501_v16  ;;  %v23073_v16 = vand.u32 4294901760, %v18408_v52  ;;  %v6963_v45 = vsub.f32 %v19083_v23, %v21936_v4  ;;  %v6975_v37 = vsub.f32 %v19086_v47, %v21933_v59 }
 0x5fe   : > { %23072 = vst [vmem:[#allocation111_spill] sm:$0xff] %v19107_v61  ;;  %v19118_v56 = vsub.f32 %v19076_v38, %v6625_v34  ;;  %v19121_v60 = vsub.f32 %v19078_v14, %v6629_v18  ;;  %v6627_v49 = vand.u32 4294901760, %v19103_v27  ;;  %v6631_v33 = vand.u32 4294901760, %v19105_v22  ;;  %13561 = vmatpush1.bf16.msra.mxu0 %v13560_v31 }
 0x5ff   : > { %v6970_v44 = vand.u32 4294901760, %v6969_v10  ;;  %6072 = vmatmul.mubr.f32.gmra.mrb[24].mxu1 %v23073_v16  ;;  %v19131_v10 = vpack.c.bf16 %v6621_v46, %v6617_v30  ;;  %v6964_v38 = vand.u32 4294901760, %v6963_v45  ;;  %v6976_v14 = vand.u32 4294901760, %v6975_v37  ;;  %v19144_v46 = vld [vmem:[#allocation12 + $0x210] sm:$0xff] }
 0x600   : > { %23074 = vst [vmem:[#allocation114_spill] sm:$0xff] %v19121_v60  ;;  %13409 = vmatpush1.bf16.msra.mxu1 %v18507_v17  ;;  %6077 = vmatprep.mubr.f32.mxu1 %v22726_v7  ;;  %v21935_v16 = vand.u32 4294901760, %v19118_v56  ;;  %v21934_v59 = vand.u32 4294901760, %v19121_v60  ;;  %v19137_v17 = vsub.f32 %v19103_v27, %v6627_v49  ;;  %v6637_v30 = vand.u32 4294901760, %v19125_v39 }
 0x601   : > { %v13562_v52 = vpack.c.bf16 %v6970_v44, %v6958_v36  ;;  %23075 = vst [vmem:[#allocation116_spill] sm:$0xff] %v19131_v10  ;;  %13411 = vmatprep.subr.bf16.mxu1 %v18513_v57  ;;  %v19140_v44 = vsub.f32 %v19105_v22, %v6631_v33  ;;  %v6633_v36 = vand.u32 4294901760, %v19123_v20  ;;  %v19146_v57 = vld [vmem:[#allocation12 + $0x228] sm:$0xff]  ;;  %v23078_v31 = vand.u32 4294901760, %v18414_v62 }
 0x602   : > { %23076 = vst [vmem:[#allocation126_spill] sm:$0xff] %v19137_v17  ;;  %v13564_v45 = vpack.c.bf16 %v6976_v14, %v6964_v38  ;;  %v6981_v27 = vsub.f32 %v19118_v56, %v21935_v16  ;;  %v6993_v22 = vsub.f32 %v19121_v60, %v21934_v59  ;;  %v19156_v37 = vpack.c.bf16 %v6623_v29, %v6619_v1  ;;  %v19221_v60 = vld [vmem:[#allocation12 + $0x278] sm:$0xff] }
 0x603   : > { %13563 = vmatprep.subr.bf16.mxu0 %v13562_v52  ;;  %23077 = vst [vmem:[#allocation131_spill] sm:$0xff] %v19140_v44  ;;  %6081 = vmatmul.mubr.f32.gmra.mrb[26].mxu1 %v23078_v31  ;;  %v21937_v52 = vand.u32 4294901760, %v19137_v17  ;;  %v21938_v62 = vand.u32 4294901760, %v19140_v44  ;;  %v19163_v38 = vsub.f32 %v19123_v20, %v6633_v36  ;;  %v19166_v14 = vsub.f32 %v19125_v39, %v6637_v30 }
 0x604   : > { %23079 = vst [vmem:[#allocation132_spill] sm:$0xff] %v19156_v37  ;;  %13413 = vmatpush1.bf16.msra.mxu1 %v18519_v6  ;;  %6247 = vmatprep.mubr.f32.mxu1 %v22726_v7  ;;  %v6982_v31 = vand.u32 4294901760, %v6981_v27  ;;  %v6994_v1 = vand.u32 4294901760, %v6993_v22  ;;  %v6635_v29 = vand.u32 4294901760, %v19144_v46  ;;  %v6639_v6 = vand.u32 4294901760, %v19146_v57 }
 0x605   : > { %23080 = vst [vmem:[#allocation133_spill] sm:$0xff] %v19163_v38  ;;  %23081 = vst [vmem:[#allocation134_spill] sm:$0xff] %v19166_v14  ;;  %13415 = vmatprep.subr.bf16.mxu1 %v18525_v43  ;;  %13565 = vmatpush1.bf16.msra.mxu0 %v13564_v45  ;;  %v6987_v59 = vsub.f32 %v19137_v17, %v21937_v52  ;;  %v6999_v20 = vsub.f32 %v19140_v44, %v21938_v62  ;;  %v21943_v39 = vand.u32 4294901760, %v19163_v38  ;;  %v19179_v43 = vld [vmem:[#allocation12 + $0x248] sm:$0xff]  ;;  %v19181_v45 = vld [vmem:[#allocation12 + $0x260] sm:$0xff] }
 0x606   : > { %v13566_v27 = vpack.c.bf16 %v6994_v1, %v6982_v31  ;;  %v19184_v22 = vsub.f32 %v19144_v46, %v6635_v29  ;;  %v19187_v4 = vsub.f32 %v19146_v57, %v6639_v6  ;;  %v19189_v52 = vpack.c.bf16 %v6629_v18, %v6625_v34  ;;  %v19205_v57 = vld [vmem:[#allocation12 + $0x258] sm:$0xff] }
 0x607   : > { %v6988_v62 = vand.u32 4294901760, %v6987_v59  ;;  %v7000_v44 = vand.u32 4294901760, %v6999_v20  ;;  %v7005_v16 = vsub.f32 %v19163_v38, %v21943_v39  ;;  %v23085_v17 = vand.u32 4294901760, %v19166_v14  ;;  %v19203_v59 = vld [vmem:[#allocation12 + $0x240] sm:$0xff] }
 0x608   : > { %23082 = vst [vmem:[#allocation135_spill] sm:$0xff] %v19184_v22  ;;  %23083 = vst [vmem:[#allocation136_spill] sm:$0xff] %v19187_v4  ;;  %13417 = vmatpush1.bf16.msra.mxu1 %v18531_v40  ;;  %13567 = vmatprep.subr.bf16.mxu0 %v13566_v27  ;;  %v21951_v46 = vand.u32 4294901760, %v19184_v22  ;;  %v21950_v34 = vand.u32 4294901760, %v19187_v4  ;;  %v6641_v18 = vand.u32 4294901760, %v19179_v43  ;;  %v6645_v40 = vand.u32 4294901760, %v19181_v45 }
 0x609   : > { %23084 = vst [vmem:[#allocation137_spill] sm:$0xff] %v19189_v52  ;;  %v7017_v31 = vsub.f32 %v19166_v14, %v23085_v17  ;;  %13419 = vmatprep.subr.bf16.mxu1 %v18538_v12  ;;  %v13568_v1 = vpack.c.bf16 %v7000_v44, %v6988_v62  ;;  %v7006_v20 = vand.u32 4294901760, %v7005_v16  ;;  %v19207_v38 = vpack.c.bf16 %v6631_v33, %v6627_v49  ;;  %v19223_v16 = vld [vmem:[#allocation12 + $0x290] sm:$0xff] }
 0x60a   : > { %v7011_v12 = vsub.f32 %v19184_v22, %v21951_v46  ;;  %v7023_v17 = vsub.f32 %v19187_v4, %v21950_v34  ;;  %v19216_v27 = vsub.f32 %v19179_v43, %v6641_v18  ;;  %v19219_v14 = vsub.f32 %v19181_v45, %v6645_v40 }
 0x60b   : > { %v7018_v39 = vand.u32 4294901760, %v7017_v31  ;;  %23086 = vst [vmem:[#allocation138_spill] sm:$0xff] %v19207_v38  ;;  %13569 = vmatpush1.bf16.msra.mxu0 %v13568_v1  ;;  %v6643_v33 = vand.u32 4294901760, %v19203_v59  ;;  %v6647_v44 = vand.u32 4294901760, %v19205_v57  ;;  %v19228_v62 = vpack.c.bf16 %v6637_v30, %v6633_v36  ;;  %v19241_v30 = vld [vmem:[#allocation12 + $0x270] sm:$0xff] }
 0x60c   : > { %23087 = vst [vmem:[#allocation139_spill] sm:$0xff] %v19216_v27  ;;  %23088 = vst [vmem:[#allocation140_spill] sm:$0xff] %v19219_v14  ;;  %13421 = vmatpush1.bf16.msra.mxu1 %v18544_v21  ;;  %v7012_v43 = vand.u32 4294901760, %v7011_v12  ;;  %v7024_v31 = vand.u32 4294901760, %v7023_v17  ;;  %v21952_v45 = vand.u32 4294901760, %v19216_v27  ;;  %v21953_v34 = vand.u32 4294901760, %v19219_v14 }
 0x60d   : > { %v13570_v49 = vpack.c.bf16 %v7018_v39, %v7006_v20  ;;  %23089 = vst [vmem:[#allocation141_spill] sm:$0xff] %v19228_v62  ;;  %13423 = vmatprep.subr.bf16.mxu1 %v18550_v24  ;;  %v19234_v46 = vsub.f32 %v19203_v59, %v6643_v33  ;;  %v19237_v21 = vsub.f32 %v19205_v57, %v6647_v44  ;;  %v6649_v39 = vand.u32 4294901760, %v19221_v60  ;;  %v19243_v24 = vld [vmem:[#allocation12 + $0x288] sm:$0xff] }
 0x60e   : > { %v6653_v36 = vand.u32 4294901760, %v19223_v16  ;;  %v13572_v1 = vpack.c.bf16 %v7024_v31, %v7012_v43  ;;  %v7029_v20 = vsub.f32 %v19216_v27, %v21952_v45  ;;  %v7041_v59 = vsub.f32 %v19219_v14, %v21953_v34 }
 0x60f   : > { %13571 = vmatprep.subr.bf16.mxu0 %v13570_v49  ;;  %23090 = vst [vmem:[#allocation142_spill] sm:$0xff] %v19234_v46  ;;  %23091 = vst [vmem:[#allocation143_spill] sm:$0xff] %v19237_v21  ;;  %v19251_v12 = vpack.c.bf16 %v6639_v6, %v6635_v29  ;;  %v21954_v57 = vand.u32 4294901760, %v19234_v46  ;;  %v21955_v17 = vand.u32 4294901760, %v19237_v21  ;;  %v19257_v49 = vsub.f32 %v19221_v60, %v6649_v39 }
 0x610   : > { %13425 = vmatpush1.bf16.msra.mxu1 %v18556_v0  ;;  %v19260_v43 = vsub.f32 %v19223_v16, %v6653_v36  ;;  %13573 = vmatpush1.bf16.msra.mxu0 %v13572_v1  ;;  %v7030_v31 = vand.u32 4294901760, %v7029_v20  ;;  %v7042_v45 = vand.u32 4294901760, %v7041_v59  ;;  %v21958_v29 = vand.u32 4294901760, %v19241_v30  ;;  %v19275_v1 = vld [vmem:[#allocation12 + $0x2c0] sm:$0xff] }
 0x611   : > { %23092 = vst [vmem:[#allocation144_spill] sm:$0xff] %v19251_v12  ;;  %23093 = vst [vmem:[#allocation145_spill] sm:$0xff] %v19257_v49  ;;  %13427 = vmatprep.subr.bf16.mxu1 %v18568_v32  ;;  %v21959_v6 = vand.u32 4294901760, %v19243_v24  ;;  %v7035_v0 = vsub.f32 %v19234_v46, %v21954_v57  ;;  %v7047_v60 = vsub.f32 %v19237_v21, %v21955_v17  ;;  %v19273_v32 = vld [vmem:[#allocation12 + $0x2a8] sm:$0xff]  ;;  %v23098_v21 = vand.u32 4294901760, %v19257_v49 }
 0x612   : > { %23094 = vst [vmem:[#allocation146_spill] sm:$0xff] %v19260_v43  ;;  %v13574_v20 = vpack.c.bf16 %v7042_v45, %v7030_v31  ;;  %v19280_v59 = vsub.f32 %v19241_v30, %v21958_v29  ;;  %v19287_v17 = vpack.c.bf16 %v6645_v40, %v6641_v18  ;;  %v23099_v31 = vand.u32 4294901760, %v19260_v43 }
 0x613   : > { %v19285_v57 = vsub.f32 %v19243_v24, %v21959_v6  ;;  %v7036_v34 = vand.u32 4294901760, %v7035_v0  ;;  %v7048_v16 = vand.u32 4294901760, %v7047_v60  ;;  %v7053_v45 = vsub.f32 %v19257_v49, %v23098_v21  ;;  %v19301_v0 = vld [vmem:[#allocation12 + $0x2a0] sm:$0xff]  ;;  %v19303_v60 = vld [vmem:[#allocation12 + $0x2b8] sm:$0xff] }
 0x614   : > { %23095 = vst [vmem:[#allocation147_spill] sm:$0xff] %v19280_v59  ;;  %23097 = vst [vmem:[#allocation149_spill] sm:$0xff] %v19287_v17  ;;  %13429 = vmatpush1.bf16.msra.mxu1 %v18584_v54  ;;  %v7065_v29 = vsub.f32 %v19260_v43, %v23099_v31  ;;  %13575 = vmatprep.subr.bf16.mxu0 %v13574_v20  ;;  %v21967_v6 = vand.u32 4294901760, %v19280_v59  ;;  %v21969_v40 = vand.u32 4294901760, %v19273_v32  ;;  %v21968_v54 = vand.u32 4294901760, %v19275_v1  ;;  %v6445_v43 = vld [vmem:[#allocation12 + $0x160] sm:$0xff] }
 0x615   : > { %23096 = vst [vmem:[#allocation148_spill] sm:$0xff] %v19285_v57  ;;  %13431 = vmatprep.subr.bf16.mxu1 %v23003_v41  ;;  %v21966_v18 = vand.u32 4294901760, %v19285_v57  ;;  %v13576_v21 = vpack.c.bf16 %v7048_v16, %v7036_v34  ;;  %v7054_v49 = vand.u32 4294901760, %v7053_v45  ;;  %v19305_v14 = vpack.c.bf16 %v6647_v44, %v6643_v33  ;;  %v19324_v33 = vld [vmem:[#allocation12 + $0x2d8] sm:$0xff]  ;;  %v19326_v44 = vld [vmem:[#allocation12 + $0x2f0] sm:$0xff] }
 0x616   : > { %v7066_v46 = vand.u32 4294901760, %v7065_v29  ;;  %v7059_v41 = vsub.f32 %v19280_v59, %v21967_v6  ;;  %v19317_v31 = vsub.f32 %v19273_v32, %v21969_v40  ;;  %v19322_v34 = vsub.f32 %v19275_v1, %v21968_v54 }
 0x617   : > { %23100 = vst [vmem:[#allocation150_spill] sm:$0xff] %v19305_v14  ;;  %6249 = vmatmul.mubr.f32.vlgmr.msra.gmra.mrb[20].mxu1 %v18393_v28  ;;  %v7071_v20 = vsub.f32 %v19285_v57, %v21966_v18  ;;  %v21981_v16 = vand.u32 4294901760, %v19301_v0  ;;  %v21975_v45 = vand.u32 4294901760, %v19303_v60  ;;  %v19332_v18 = vpack.c.bf16 %v6653_v36, %v6649_v39  ;;  %13577 = vmatpush1.bf16.msra.mxu0 %v13576_v21 }
 0x618   : > { %23101 = vst [vmem:[#allocation151_spill] sm:$0xff] %v19317_v31  ;;  %23102 = vst [vmem:[#allocation152_spill] sm:$0xff] %v19322_v34  ;;  %13433 = vmatpush1.bf16.msra.mxu1 %v23006_v9  ;;  %6254 = vmatprep.mubr.f32.mxu1 %v22726_v7  ;;  %v13578_v29 = vpack.c.bf16 %v7066_v46, %v7054_v49  ;;  %v7060_v6 = vand.u32 4294901760, %v7059_v41  ;;  %v21973_v40 = vand.u32 4294901760, %v19317_v31  ;;  %v21972_v57 = vand.u32 4294901760, %v19322_v34 }
 0x619   : > { %23103 = vst [vmem:[#allocation153_spill] sm:$0xff] %v19332_v18  ;;  %13435 = vmatprep.subr.bf16.mxu1 %v23008_v8  ;;  %v7072_v54 = vand.u32 4294901760, %v7071_v20  ;;  %v19340_v9 = vsub.f32 %v19301_v0, %v21981_v16  ;;  %v19345_v46 = vsub.f32 %v19303_v60, %v21975_v45  ;;  %v21974_v8 = vand.u32 4294901760, %v19324_v33 }
 0x61a   : > { %13579 = vmatprep.subr.bf16.mxu0 %v13578_v29  ;;  %v21976_v39 = vand.u32 4294901760, %v19326_v44  ;;  %v7077_v49 = vsub.f32 %v19317_v31, %v21973_v40  ;;  %v7089_v21 = vsub.f32 %v19322_v34, %v21972_v57  ;;  %v6490_v34 = vld [vmem:[#allocation12 + $0x2c8] sm:$0xff] }
 0x61b   : > { %23104 = vst [vmem:[#allocation154_spill] sm:$0xff] %v19340_v9  ;;  %23105 = vst [vmem:[#allocation155_spill] sm:$0xff] %v19345_v46  ;;  %6256 = vmatmul.mubr.f32.gmra.mrb[22].mxu1 %v18390_v48  ;;  %v13580_v36 = vpack.c.bf16 %v7072_v54, %v7060_v6  ;;  %v21978_v41 = vand.u32 4294901760, %v19340_v9  ;;  %v21977_v20 = vand.u32 4294901760, %v19345_v46  ;;  %v19363_v6 = vsub.f32 %v19324_v33, %v21974_v8  ;;  %v6442_v31 = vld [vmem:[#allocation12 + $0x148] sm:$0xff] }
 0x61c   : > { %13437 = vmatpush1.bf16.msra.mxu1 %v23012_v25  ;;  %6261 = vmatprep.mubr.f32.mxu1 %v22726_v7  ;;  %v19368_v54 = vsub.f32 %v19326_v44, %v21976_v39  ;;  %v7078_v25 = vand.u32 4294901760, %v7077_v49  ;;  %v7090_v29 = vand.u32 4294901760, %v7089_v21 }
 0x61d   : > { %23106 = vst [vmem:[#allocation156_spill] sm:$0xff] %v19363_v6  ;;  %13439 = vmatprep.subr.bf16.mxu1 %v23015_v26  ;;  %13581 = vmatpush1.bf16.msra.mxu0 %v13580_v36  ;;  %v7083_v57 = vsub.f32 %v19340_v9, %v21978_v41  ;;  %v7095_v40 = vsub.f32 %v19345_v46, %v21977_v20  ;;  %v21980_v8 = vand.u32 4294901760, %v19363_v6 }
 0x61e   : > { %23107 = vst [vmem:[#allocation157_spill] sm:$0xff] %v19368_v54  ;;  %v21979_v45 = vand.u32 4294901760, %v19368_v54  ;;  %v13582_v39 = vpack.c.bf16 %v7090_v29, %v7078_v25  ;;  %v23112_v29 = vld [vmem:[#allocation123_spill] sm:$0xff] }
 0x61f   : > { %6263 = vmatmul.mubr.f32.gmra.mrb[24].mxu1 %v18398_v13  ;;  %v7084_v26 = vand.u32 4294901760, %v7083_v57  ;;  %v7096_v36 = vand.u32 4294901760, %v7095_v40  ;;  %v7101_v49 = vsub.f32 %v19363_v6, %v21980_v8  ;;  %v23108_v57 = vld [vmem:[#allocation119_spill] sm:$0xff]  ;;  %v23110_v40 = vld [vmem:[#allocation120_spill] sm:$0xff] }
 0x620   : > { %13441 = vmatpush1.bf16.msra.mxu1 %v23024_v19  ;;  %6268 = vmatprep.mubr.f32.mxu1 %v22726_v7  ;;  %v7113_v21 = vsub.f32 %v19368_v54, %v21979_v45  ;;  %v6436_v6 = vld [vmem:[#allocation12 + $0x118] sm:$0xff] }
 0x621   : > { %13443 = vmatprep.subr.bf16.mxu1 %v23027_v55  ;;  %13583 = vmatprep.subr.bf16.mxu0 %v13582_v39  ;;  %v13584_v20 = vpack.c.bf16 %v7096_v36, %v7084_v26  ;;  %v7102_v41 = vand.u32 4294901760, %v7101_v49  ;;  %v23109_v55 = vld [vmem:[#allocation125_spill] sm:$0xff]  ;;  %v23120_v26 = vld [vmem:[#allocation54_spill] sm:$0xff]  ;;  %v23121_v36 = vld [vmem:[#allocation59_spill] sm:$0xff] }
 0x622   : > { %v7114_v25 = vand.u32 4294901760, %v7113_v21  ;;  %v23111_v39 = vld [vmem:[#allocation121_spill] sm:$0xff]  ;;  %v23123_v49 = vld [vmem:[#allocation64_spill] sm:$0xff]  ;;  %v23124_v21 = vld [vmem:[#allocation99_spill] sm:$0xff] }
 0x623   : > { %6270 = vmatmul.mubr.f32.gmra.mrb[26].mxu1 %v18403_v35  ;;  %13585 = vmatpush1.bf16.msra.mxu0 %v13584_v20  ;;  %v23117_v20 = vld [vmem:[#allocation129_spill] sm:$0xff] }
 0x624   : > { %13445 = vmatpush1.bf16.msra.mxu1 %v23031_v2  ;;  %6372 = vmatprep.mubr.f32.mxu1 %v22726_v7  ;;  %v13586_v19 = vpack.c.bf16 %v7114_v25, %v7102_v41  ;;  %v23113_v2 = vld [vmem:[#allocation103_spill] sm:$0xff]  ;;  %v23116_v41 = vld [vmem:[#allocation122_spill] sm:$0xff]  ;;  %v23125_v25 = vld [vmem:[#allocation48_spill] sm:$0xff] }
 0x625   : > { %13447 = vmatprep.subr.bf16.mxu1 %v23034_v15  ;;  %v23114_v15 = vld [vmem:[#allocation107_spill] sm:$0xff] }
 0x626   : > { %13587 = vmatprep.subr.bf16.mxu0 %v13586_v19 }
 0x628   : > { %13449 = vmatpush1.bf16.msra.mxu1 %v23038_v63  ;;  %v23115_v63 = vld [vmem:[#allocation112_spill] sm:$0xff] }
 0x629   : > { %13451 = vmatprep.subr.bf16.mxu1 %v23108_v57 }
 0x62c   : > { %13453 = vmatpush1.bf16.msra.mxu1 %v23109_v55 }
 0x62d   : > { %13455 = vmatprep.subr.bf16.mxu1 %v23110_v40 }
 0x630   : > { %13457 = vmatpush1.bf16.msra.mxu1 %v23111_v39 }
 0x631   : > { %13459 = vmatprep.subr.bf16.mxu1 %v23112_v29 }
 0x634   : > { %13461 = vmatpush1.bf16.msra.mxu1 %v23059_v51  ;;  %v23118_v51 = vld [vmem:[#allocation130_spill] sm:$0xff] }
 0x635   : > { %13463 = vmatprep.subr.bf16.mxu1 %v23113_v2 }
 0x637   : > { %6374 = vmatmul.mubr.f32.vlgmr.msra.gmra.mrb[20].mxu1 %v18393_v28  ;;  %v23119_v28 = vld [vmem:[#allocation45_spill] sm:$0xff] }
 0x638   : > { %6379 = vmatprep.mubr.f32.mxu1 %v22726_v7  ;;  %13465 = vmatpush1.bf16.msra.mxu1 %v23114_v15  ;;  %v6475_v15 = vld [vmem:[#allocation12 + $0x250] sm:$0xff] }
 0x639   : > { %13467 = vmatprep.subr.bf16.mxu1 %v23115_v63 }
 0x63b   : > { %6381 = vmatmul.mubr.f32.gmra.mrb[22].mxu1 %v18390_v48  ;;  %v23122_v48 = vld [vmem:[#allocation92_spill] sm:$0xff] }
 0x63c   : > { %6386 = vmatprep.mubr.f32.mxu1 %v22726_v7  ;;  %13469 = vmatpush1.bf16.msra.mxu1 %v23116_v41 }
 0x63d   : > { %13471 = vmatprep.subr.bf16.mxu1 %v23117_v20 }
 0x63f   : > { %6388 = vmatmul.mubr.f32.gmra.mrb[24].mxu1 %v18398_v13  ;;  %v6491_v13 = vld [vmem:[#allocation12 + $0x2d0] sm:$0xff] }
 0x640   : > { %6393 = vmatprep.mubr.f32.mxu1 %v22726_v7  ;;  %13473 = vmatpush1.bf16.msra.mxu1 %v23118_v51  ;;  %v6667_v19 = vand.u32 4294901760, %v6491_v13 }
 0x641   : > { %13475 = vmatprep.subr.bf16.mxu1 %v23119_v28  ;;  %v23172_v28 = vld [vmem:[#allocation127_spill] sm:$0xff] }
 0x642   : > { %v19434_v55 = vsub.f32 %v6491_v13, %v6667_v19  ;;  %v23129_v13 = vand.u32 4294901760, %v19243_v24 }
 0x643   : > { %6395 = vmatmul.mubr.f32.gmra.mrb[26].mxu1 %v18403_v35  ;;  %v6494_v35 = vld [vmem:[#allocation12 + $0x2e8] sm:$0xff] }
 0x644   : > { %13477 = vmatpush1.bf16.msra.mxu1 %v23120_v26  ;;  %v6671_v57 = vand.u32 4294901760, %v6494_v35  ;;  %23126 = vst [vmem:[#allocation119_spill] sm:$0xff] %v19434_v55  ;;  %v21989_v39 = vand.u32 4294901760, %v19434_v55 }
 0x645   : > { %13479 = vmatprep.subr.bf16.mxu1 %v23121_v36 }
 0x646   : > { %v19436_v40 = vsub.f32 %v6494_v35, %v6671_v57  ;;  %v7107_v45 = vsub.f32 %v19434_v55, %v21989_v39  ;;  %v23132_v39 = vand.u32 4294901760, %v19275_v1  ;;  %v6451_v1 = vld [vmem:[#allocation12 + $0x190] sm:$0xff]  ;;  %v6481_v55 = vld [vmem:[#allocation12 + $0x280] sm:$0xff] }
 0x648   : > { %13481 = vmatpush1.bf16.msra.mxu1 %v23122_v48  ;;  %23127 = vst [vmem:[#allocation125_spill] sm:$0xff] %v19436_v40  ;;  %v21994_v29 = vand.u32 4294901760, %v19436_v40  ;;  %v7108_v16 = vand.u32 4294901760, %v7107_v45  ;;  %v19538_v48 = vld [vmem:[#allocation12 + $0x208] sm:$0xff] }
 0x649   : > { %13483 = vmatprep.subr.bf16.mxu1 %v23123_v49  ;;  %v6463_v49 = vld [vmem:[#allocation12 + $0x1f0] sm:$0xff] }
 0x64a   : > { %v7119_v8 = vsub.f32 %v19436_v40, %v21994_v29  ;;  %v23135_v29 = vld [vmem:[#allocation60_spill] sm:$0xff] }
 0x64c   : > { %13485 = vmatpush1.bf16.msra.mxu1 %v23124_v21  ;;  %v7120_v7 = vand.u32 4294901760, %v7119_v8  ;;  %v23136_v8 = vand.u32 4294901760, %v19301_v0  ;;  %v9066_v0 = vand.u32 4294901760, %v6451_v1 }
 0x64d   : > { %13487 = vmatprep.subr.bf16.mxu1 %v23125_v25 }
 0x650   : > { %13489 = vmatpush1.bf16.msra.mxu1 %v19007_v11  ;;  %v23164_v11 = vld [vmem:[#allocation117_spill] sm:$0xff] }
 0x651   : > { %13491 = vmatprep.subr.bf16.mxu1 %v19028_v3  ;;  %v23163_v3 = vld [vmem:[#allocation113_spill] sm:$0xff] }
 0x654   : > { %13493 = vmatpush1.bf16.msra.mxu1 %v19053_v53 }
 0x655   : > { %13495 = vmatprep.subr.bf16.mxu1 %v19088_v58 }
 0x658   : > { %13497 = vmatpush1.bf16.msra.mxu1 %v19107_v61 }
 0x659   : > { %13499 = vmatprep.subr.bf16.mxu1 %v19131_v10  ;;  %v23160_v10 = vld [vmem:[#allocation110_spill] sm:$0xff] }
 0x65c   : > { %13501 = vmatpush1.bf16.msra.mxu1 %v19156_v37  ;;  %v23159_v37 = vld [vmem:[#allocation104_spill] sm:$0xff] }
 0x65d   : > { %13503 = vmatprep.subr.bf16.mxu1 %v19189_v52  ;;  %v13598_v61 = vpack.c.bf16 %v23160_v10, %v23159_v37  ;;  %v23166_v10 = vld [vmem:[#allocation118_spill] sm:$0xff]  ;;  %v23167_v37 = vld [vmem:[#allocation124_spill] sm:$0xff] }
 0x65e   : > { %v13602_v21 = vpack.c.bf16 %v23167_v37, %v23166_v10 }
 0x660   : > { %13505 = vmatpush1.bf16.msra.mxu1 %v19207_v38 }
 0x661   : > { %13507 = vmatprep.subr.bf16.mxu1 %v19228_v62  ;;  %v23134_v62 = vld [vmem:[#allocation79_spill] sm:$0xff] }
 0x662   : > { %v13590_v45 = vpack.c.bf16 %v23135_v29, %v23134_v62  ;;  %v6406_v29 = vld [vmem:[#allocation12 + $0x28] sm:$0xff]  ;;  %v23150_v62 = vld [vmem:[#allocation94_spill] sm:$0xff] }
 0x663   : > { %v9021_v38 = vand.u32 4294901760, %v6406_v29 }
 0x664   : > { %13509 = vmatpush1.bf16.msra.mxu1 %v19251_v12 }
 0x665   : > { %13511 = vmatprep.subr.bf16.mxu1 %v19287_v17  ;;  %v23131_v17 = vand.u32 4294901760, %v19273_v32  ;;  %v19475_v32 = vpack.c.bf16 %v6671_v57, %v6667_v19  ;;  %v19557_v10 = vsub.f32 %v6406_v29, %v9021_v38  ;;  %v19571_v29 = vld [vmem:[#allocation12 + $0x238] sm:$0xff] }
 0x667   : > { %v19457_v12 = vpack.c.bf16 %v23132_v39, %v23131_v17  ;;  %23142 = vst [vmem:[#allocation159_spill] sm:$0xff] %v19475_v32  ;;  %v19482_v39 = vsub.f32 %v6451_v1, %v9066_v0 }
 0x668   : > { %13513 = vmatpush1.bf16.msra.mxu1 %v19305_v14  ;;  %v13588_v14 = vpack.c.bf16 %v7120_v7, %v7108_v16  ;;  %v23139_v7 = vand.u32 4294901760, %v19324_v33 }
 0x669   : > { %13515 = vmatprep.subr.bf16.mxu1 %v19332_v18  ;;  %v23128_v18 = vand.u32 4294901760, %v19241_v30  ;;  %23133 = vst [vmem:[#allocation121_spill] sm:$0xff] %v19457_v12  ;;  %v23137_v30 = vand.u32 4294901760, %v19303_v60  ;;  %23144 = vst [vmem:[#allocation161_spill] sm:$0xff] %v19482_v39 }
 0x66a   : > { %13589 = vmatpush1.bf16.msra.mxu0 %v13588_v14  ;;  %v23140_v14 = vand.u32 4294901760, %v19326_v44  ;;  %v21997_v44 = vand.u32 4294901760, %v19482_v39 }
 0x66b   : > { %v19450_v35 = vpack.c.bf16 %v23129_v13, %v23128_v18  ;;  %v19465_v24 = vpack.c.bf16 %v23137_v30, %v23136_v8  ;;  %13591 = vmatprep.subr.bf16.mxu0 %v13590_v45  ;;  %v6454_v18 = vld [vmem:[#allocation12 + $0x1a8] sm:$0xff] }
 0x66c   : > { %v19473_v17 = vpack.c.bf16 %v23140_v14, %v23139_v7  ;;  %v9069_v60 = vand.u32 4294901760, %v6454_v18  ;;  %v9290_v57 = vsub.f32 %v19482_v39, %v21997_v44  ;;  %v6403_v44 = vld [vmem:[#allocation12 + $0x10] sm:$0xff]  ;;  %v19510_v7 = vld [vmem:[#allocation12 + $0x58] sm:$0xff] }
 0x66d   : > { %23130 = vst [vmem:[#allocation120_spill] sm:$0xff] %v19450_v35  ;;  %13517 = vmatpush1.bf16.msra.mxu1 %v19450_v35  ;;  %23138 = vst [vmem:[#allocation123_spill] sm:$0xff] %v19465_v24  ;;  %v9018_v35 = vand.u32 4294901760, %v6403_v44  ;;  %v9027_v53 = vand.u32 4294901760, %v19510_v7 }
 0x66e   : > { %13519 = vmatprep.subr.bf16.mxu1 %v19457_v12  ;;  %23141 = vst [vmem:[#allocation158_spill] sm:$0xff] %v19473_v17  ;;  %v19479_v16 = vpack.c.bf16 %v9069_v60, %v9066_v0  ;;  %v19484_v33 = vsub.f32 %v6454_v18, %v9069_v60  ;;  %v9291_v45 = vand.u32 4294901760, %v9290_v57  ;;  %v23148_v0 = vld [vmem:[#allocation57_spill] sm:$0xff]  ;;  %v23149_v60 = vld [vmem:[#allocation91_spill] sm:$0xff]  ;;  %v6457_v57 = vld [vmem:[#allocation12 + $0x1c0] sm:$0xff] }
 0x66f   : > { %v23154_v12 = vld [vmem:[#allocation90_spill] sm:$0xff]  ;;  %v19534_v25 = vpack.c.bf16 %v9021_v38, %v9018_v35  ;;  %v19555_v37 = vsub.f32 %v6403_v44, %v9018_v35  ;;  %v9081_v35 = vand.u32 4294901760, %v19538_v48  ;;  %v6469_v38 = vld [vmem:[#allocation12 + $0x220] sm:$0xff] }
 0x670   : > { %23143 = vst [vmem:[#allocation160_spill] sm:$0xff] %v19479_v16  ;;  %23145 = vst [vmem:[#allocation162_spill] sm:$0xff] %v19484_v33  ;;  %v22000_v19 = vand.u32 4294901760, %v19484_v33 }
 0x671   : > { %13521 = vmatpush1.bf16.msra.mxu1 %v19465_v24  ;;  %23165 = vst [vmem:[#allocation170_spill] sm:$0xff] %v19534_v25 }
 0x672   : > { %13523 = vmatprep.subr.bf16.mxu1 %v19473_v17  ;;  %v9297_v13 = vsub.f32 %v19484_v33, %v22000_v19  ;;  %v23151_v17 = vld [vmem:[#allocation69_spill] sm:$0xff] }
 0x673   : > { %v13594_v19 = vpack.c.bf16 %v23151_v17, %v23150_v62  ;;  %v9072_v62 = vand.u32 4294901760, %v6457_v57 }
 0x674   : > { %v9298_v8 = vand.u32 4294901760, %v9297_v13  ;;  %v6460_v13 = vld [vmem:[#allocation12 + $0x1d8] sm:$0xff] }
 0x675   : > { %13525 = vmatpush1.bf16.msra.mxu1 %v19475_v32  ;;  %v13592_v32 = vpack.c.bf16 %v23149_v60, %v23148_v0  ;;  %v23155_v60 = vld [vmem:[#allocation93_spill] sm:$0xff]  ;;  %v9075_v52 = vand.u32 4294901760, %v6460_v13 }
 0x676   : > { %14039 = vmatprep.subr.bf16.mxu1 %v19479_v16  ;;  %v19494_v30 = vpack.c.bf16 %v9298_v8, %v9291_v45  ;;  %v6409_v8 = vld [vmem:[#allocation12 + $0x40] sm:$0xff]  ;;  %v13596_v0 = vpack.c.bf16 %v23155_v60, %v23154_v12 }
 0x677   : > { %v9024_v58 = vand.u32 4294901760, %v6409_v8  ;;  %v23162_v12 = vld [vmem:[#allocation80_spill] sm:$0xff] }
 0x679   : > { %v19588_v41 = vsub.f32 %v6409_v8, %v9024_v58  ;;  %v23186_v8 = vld [vmem:[#allocation82_spill] sm:$0xff] }
 0x70a   : > { %v6375_v14 = vpop.f32.mrb[20].mxu1 }
 0x70b   : > { %v19498_v1 = vand.u32 4294901760, %v6375_v14  ;;  %v19500_v18 = vpop.f32.mrb[21].mxu1 }
 0x70c   : > { %23147 = vst [vmem:[#allocation164_spill] sm:$0xff] %v19500_v18  ;;  %v23153_v18 = vld [vmem:[#allocation65_spill] sm:$0xff] }
 0x70d   : > { %23146 = vst [vmem:[#allocation163_spill] sm:$0xff] %v19498_v1  ;;  %v19507_v45 = vsub.f32 %v6375_v14, %v19498_v1  ;;  %7123 = vmatprep.mubr.f32.mxu0 %v19498_v1 }
 0x70e   : > { %v6382_v24 = vpop.f32.mrb[22].mxu1  ;;  %7125 = vmatmul.mubr.f32.vlgmr.msra.gmra.mrb[20].mxu0 %v23153_v18  ;;  %v19577_v18 = vsub.f32 %v6460_v13, %v9075_v52  ;;  %v23182_v13 = vld [vmem:[#allocation50_spill] sm:$0xff] }
 0x70f   : > { %23152 = vst [vmem:[#allocation165_spill] sm:$0xff] %v19507_v45  ;;  %v19515_v16 = vand.u32 4294901760, %v6382_v24  ;;  %13593 = vmatpush1.bf16.msra.mxu0 %v13592_v32  ;;  %v19517_v17 = vpop.f32.mrb[23].mxu1  ;;  %v19520_v14 = vand.u32 4294901760, %v19507_v45 }
 0x710   : > { %23157 = vst [vmem:[#allocation167_spill] sm:$0xff] %v19517_v17  ;;  %13595 = vmatprep.subr.bf16.mxu0 %v13594_v19  ;;  %v13600_v19 = vpack.c.bf16 %v23164_v11, %v23163_v3  ;;  %v19551_v11 = vld [vmem:[#allocation12 + $0x70] sm:$0xff]  ;;  %v19553_v3 = vld [vmem:[#allocation12 + $0x88] sm:$0xff] }
 0x711   : > { %23156 = vst [vmem:[#allocation166_spill] sm:$0xff] %v19515_v16  ;;  %23158 = vst [vmem:[#allocation168_spill] sm:$0xff] %v19520_v14  ;;  %v19526_v60 = vsub.f32 %v6382_v24, %v19515_v16  ;;  %7131 = vmatprep.mubr.f32.mxu0 %v19515_v16  ;;  %v6676_v32 = vsub.f32 %v19507_v45, %v19520_v14  ;;  %v9033_v39 = vand.u32 4294901760, %v19553_v3 }
 0x712   : > { %v6389_v17 = vpop.f32.mrb[24].mxu1  ;;  %7133 = vmatmul.mubr.f32.gmra.mrb[22].mxu0 %v23162_v12  ;;  %v19549_v12 = vpack.c.bf16 %v9075_v52, %v9072_v62  ;;  %v19595_v52 = vsub.f32 %v19510_v7, %v9027_v53  ;;  %v23185_v7 = vld [vmem:[#allocation87_spill] sm:$0xff] }
 0x713   : > { %23161 = vst [vmem:[#allocation169_spill] sm:$0xff] %v19526_v60  ;;  %v19540_v24 = vand.u32 4294901760, %v6389_v17  ;;  %13597 = vmatpush1.bf16.msra.mxu0 %v13596_v0  ;;  %v19542_v36 = vpop.f32.mrb[25].mxu1  ;;  %v19544_v26 = vand.u32 4294901760, %v6676_v32  ;;  %v19547_v14 = vand.u32 4294901760, %v19526_v60  ;;  %v23173_v0 = vld [vmem:[#allocation128_spill] sm:$0xff] }
 0x714   : > { %23169 = vst [vmem:[#allocation172_spill] sm:$0xff] %v19542_v36  ;;  %23171 = vst [vmem:[#allocation174_spill] sm:$0xff] %v19549_v12  ;;  %13599 = vmatprep.subr.bf16.mxu0 %v13598_v61  ;;  %v13604_v16 = vpack.c.bf16 %v23173_v0, %v23172_v28  ;;  %v19561_v36 = vpack.c.bf16 %v9027_v53, %v9024_v58  ;;  %v9078_v61 = vand.u32 4294901760, %v6463_v49  ;;  %v23176_v0 = vld [vmem:[#allocation84_spill] sm:$0xff] }
 0x715   : > { %23168 = vst [vmem:[#allocation171_spill] sm:$0xff] %v19540_v24  ;;  %23170 = vst [vmem:[#allocation173_spill] sm:$0xff] %v19547_v14  ;;  %v19564_v32 = vsub.f32 %v6389_v17, %v19540_v24  ;;  %6678 = vmatprep.mubr.f32.mxu1 %v19544_v26  ;;  %7139 = vmatprep.mubr.f32.mxu0 %v19540_v24  ;;  %v6692_v51 = vsub.f32 %v19526_v60, %v19547_v14  ;;  %v23177_v28 = vld [vmem:[#allocation68_spill] sm:$0xff]  ;;  %v9030_v24 = vand.u32 4294901760, %v19551_v11  ;;  %v6478_v60 = vld [vmem:[#allocation12 + $0x268] sm:$0xff] }
 0x716   : > { %23174 = vst [vmem:[#allocation175_spill] sm:$0xff] %v19561_v36  ;;  %v6396_v44 = vpop.f32.mrb[26].mxu1  ;;  %6684 = vmatmul.mubr.f32.vlgmr.msra.gmra.mrb[28].mxu1 %v23176_v0  ;;  %7141 = vmatmul.mubr.f32.gmra.mrb[24].mxu0 %v23177_v28  ;;  %v19575_v17 = vsub.f32 %v6457_v57, %v9072_v62  ;;  %v23181_v57 = vld [vmem:[#allocation40_spill] sm:$0xff]  ;;  %v9084_v28 = vand.u32 4294901760, %v6469_v38  ;;  %v19607_v53 = vpack.c.bf16 %v9081_v35, %v9078_v61 }
 0x717   : > { %23175 = vst [vmem:[#allocation176_spill] sm:$0xff] %v19564_v32  ;;  %v19581_v14 = vand.u32 4294901760, %v6396_v44  ;;  %13601 = vmatpush1.bf16.msra.mxu0 %v13600_v19  ;;  %14041 = vmatpush3.bf16.msra.mxu1 %v19534_v25  ;;  %v19584_v33 = vpop.f32.mrb[27].mxu1  ;;  %v19586_v20 = vand.u32 4294901760, %v6692_v51  ;;  %v19591_v62 = vand.u32 4294901760, %v19564_v32  ;;  %v13606_v19 = vpack.c.bf16 %v23182_v13, %v23181_v57  ;;  %v6424_v51 = vld [vmem:[#allocation12 + $0xb8] sm:$0xff] }
 0x718   : > { %23179 = vst [vmem:[#allocation177_spill] sm:$0xff] %v19584_v33  ;;  %13603 = vmatprep.subr.bf16.mxu0 %v13602_v21  ;;  %14043 = vmatprep.subr.bf16.mxu1 %v19549_v12  ;;  %v9087_v25 = vand.u32 4294901760, %v19571_v29  ;;  %v6421_v33 = vld [vmem:[#allocation12 + $0xa0] sm:$0xff]  ;;  %23184 = vst [vmem:[#allocation180_spill] sm:$0xff] %v19607_v53  ;;  %v19611_v13 = vsub.f32 %v6463_v49, %v9078_v61  ;;  %v23187_v57 = vld [vmem:[#allocation42_spill] sm:$0xff]  ;;  %v9039_v2 = vand.u32 4294901760, %v6424_v51 }
 0x719   : > { %23178 = vst [vmem:[#allocation84_spill] sm:$0xff] %v19581_v14  ;;  %23180 = vst [vmem:[#allocation178_spill] sm:$0xff] %v19591_v62  ;;  %v19601_v58 = vsub.f32 %v6396_v44, %v19581_v14  ;;  %6694 = vmatprep.mubr.f32.mxu1 %v19586_v20  ;;  %7147 = vmatprep.mubr.f32.mxu0 %v19581_v14  ;;  %v6708_v21 = vsub.f32 %v19564_v32, %v19591_v62  ;;  %v23188_v12 = vld [vmem:[#allocation53_spill] sm:$0xff]  ;;  %v9036_v32 = vand.u32 4294901760, %v6421_v33 }
 0x71a   : > { %6700 = vmatmul.mubr.f32.gmra.mrb[30].mxu1 %v23185_v7  ;;  %7149 = vmatmul.mubr.f32.gmra.mrb[26].mxu0 %v23186_v8  ;;  %v13608_v63 = vpack.c.bf16 %v23188_v12, %v23187_v57  ;;  %v19615_v44 = vpack.c.bf16 %v9033_v39, %v9030_v24  ;;  %v6427_v8 = vld [vmem:[#allocation12 + $0xd0] sm:$0xff]  ;;  %v6430_v49 = vld [vmem:[#allocation12 + $0xe8] sm:$0xff]  ;;  %v19625_v61 = vsub.f32 %v19538_v48, %v9081_v35  ;;  %v6484_v48 = vld [vmem:[#allocation12 + $0x298] sm:$0xff] }
 0x71b   : > { %23183 = vst [vmem:[#allocation179_spill] sm:$0xff] %v19601_v58  ;;  %13605 = vmatpush1.bf16.msra.mxu0 %v13604_v16  ;;  %14045 = vmatpush3.bf16.msra.mxu1 %v19561_v36  ;;  %v19618_v14 = vand.u32 4294901760, %v6708_v21  ;;  %v19621_v62 = vand.u32 4294901760, %v19601_v58  ;;  %v23192_v12 = vld [vmem:[#allocation74_spill] sm:$0xff]  ;;  %v19629_v40 = vpack.c.bf16 %v9087_v25, %v9084_v28  ;;  %v19634_v21 = vsub.f32 %v19551_v11, %v9030_v24  ;;  %v23195_v35 = vld [vmem:[#allocation89_spill] sm:$0xff] }
 0x71c   : > { %23189 = vst [vmem:[#allocation87_spill] sm:$0xff] %v19615_v44  ;;  %7349 = vmatprep.mubr.f32.mxu0 %v19507_v45  ;;  %13607 = vmatprep.subr.bf16.mxu0 %v13606_v19  ;;  %v23193_v57 = vld [vmem:[#allocation58_spill] sm:$0xff]  ;;  %v9090_v45 = vand.u32 4294901760, %v6475_v15  ;;  %v9093_v19 = vand.u32 4294901760, %v6478_v60  ;;  %v9042_v1 = vand.u32 4294901760, %v6427_v8  ;;  %v9045_v54 = vand.u32 4294901760, %v6430_v49 }
 0x71d   : > { %23190 = vst [vmem:[#allocation181_spill] sm:$0xff] %v19618_v14  ;;  %23191 = vst [vmem:[#allocation182_spill] sm:$0xff] %v19621_v62  ;;  %v13610_v16 = vpack.c.bf16 %v23193_v57, %v23192_v12  ;;  %6710 = vmatprep.mubr.f32.mxu1 %v19618_v14  ;;  %14047 = vmatprep.subr.bf16.mxu1 %v19607_v53  ;;  %v6724_v36 = vsub.f32 %v19601_v58, %v19621_v62  ;;  %v6433_v53 = vld [vmem:[#allocation12 + $0x100] sm:$0xff]  ;;  %v23197_v62 = vld [vmem:[#allocation55_spill] sm:$0xff]  ;;  %v9105_v14 = vand.u32 4294901760, %v6490_v34 }
 0x71e   : > { %23194 = vst [vmem:[#allocation183_spill] sm:$0xff] %v19629_v40  ;;  %6716 = vmatmul.mubr.f32.gmra.mrb[32].mxu1 %v23195_v35  ;;  %v19640_v57 = vsub.f32 %v19553_v3, %v9033_v39  ;;  %v19642_v12 = vsub.f32 %v6469_v38, %v9084_v28  ;;  %v19648_v24 = vsub.f32 %v19571_v29, %v9087_v25  ;;  %v23198_v58 = vld [vmem:[#allocation61_spill] sm:$0xff]  ;;  %v23200_v28 = vld [vmem:[#allocation72_spill] sm:$0xff]  ;;  %v9096_v38 = vand.u32 4294901760, %v6481_v55 }
 0x71f   : > { %13609 = vmatpush1.bf16.msra.mxu0 %v13608_v63  ;;  %14049 = vmatpush3.bf16.msra.mxu1 %v19615_v44  ;;  %v19645_v11 = vand.u32 4294901760, %v6724_v36  ;;  %v13612_v46 = vpack.c.bf16 %v23198_v58, %v23197_v62  ;;  %v19652_v9 = vpack.c.bf16 %v9039_v2, %v9036_v32  ;;  %v19655_v3 = vsub.f32 %v6421_v33, %v9036_v32  ;;  %v23201_v39 = vld [vmem:[#allocation56_spill] sm:$0xff]  ;;  %v6487_v36 = vld [vmem:[#allocation12 + $0x2b0] sm:$0xff] }
 0x720   : > { %13611 = vmatprep.subr.bf16.mxu0 %v13610_v16  ;;  %14051 = vmatprep.subr.bf16.mxu1 %v19629_v40  ;;  %v13614_v63 = vpack.c.bf16 %v23201_v39, %v23200_v28  ;;  %v9099_v44 = vand.u32 4294901760, %v6484_v48  ;;  %v19660_v25 = vsub.f32 %v6424_v51, %v9039_v2  ;;  %v19662_v29 = vpack.c.bf16 %v9093_v19, %v9090_v45  ;;  %v6439_v16 = vld [vmem:[#allocation12 + $0x130] sm:$0xff]  ;;  %v23204_v39 = vld [vmem:[#allocation97_spill] sm:$0xff]  ;;  %v23205_v28 = vld [vmem:[#allocation96_spill] sm:$0xff] }
 0x721   : > { %23196 = vst [vmem:[#allocation184_spill] sm:$0xff] %v19645_v11  ;;  %23199 = vst [vmem:[#allocation185_spill] sm:$0xff] %v19652_v9  ;;  %6726 = vmatprep.mubr.f32.mxu1 %v19645_v11  ;;  %v9048_v58 = vand.u32 4294901760, %v6433_v53  ;;  %v9051_v62 = vand.u32 4294901760, %v6436_v6  ;;  %v23203_v40 = vld [vmem:[#allocation62_spill] sm:$0xff]  ;;  %v19665_v33 = vsub.f32 %v6475_v15, %v9090_v45  ;;  %v19667_v32 = vsub.f32 %v6478_v60, %v9093_v19  ;;  %v23208_v60 = vld [vmem:[#allocation71_spill] sm:$0xff] }
 0x722   : > { %23202 = vst [vmem:[#allocation186_spill] sm:$0xff] %v19662_v29  ;;  %6732 = vmatmul.mubr.f32.gmra.mrb[34].mxu1 %v23203_v40  ;;  %v13616_v59 = vpack.c.bf16 %v23205_v28, %v23204_v39  ;;  %v19671_v35 = vpack.c.bf16 %v9045_v54, %v9042_v1  ;;  %v19674_v2 = vsub.f32 %v6427_v8, %v9042_v1  ;;  %v9102_v11 = vand.u32 4294901760, %v6487_v36  ;;  %v23207_v15 = vld [vmem:[#allocation98_spill] sm:$0xff] }
 0x723   : > { %13613 = vmatpush1.bf16.msra.mxu0 %v13612_v46  ;;  %14053 = vmatpush3.bf16.msra.mxu1 %v19652_v9  ;;  %v19676_v51 = vsub.f32 %v6430_v49, %v9045_v54  ;;  %v13618_v45 = vpack.c.bf16 %v23208_v60, %v23207_v15  ;;  %v19681_v19 = vpack.c.bf16 %v9099_v44, %v9096_v38  ;;  %v9054_v28 = vand.u32 4294901760, %v6439_v16  ;;  %v23210_v54 = vld [vmem:[#allocation100_spill] sm:$0xff]  ;;  %v23212_v15 = vld [vmem:[#allocation63_spill] sm:$0xff] }
 0x724   : > { %23206 = vst [vmem:[#allocation187_spill] sm:$0xff] %v19671_v35  ;;  %9118 = vmatprep.mubr.f32.mxu1 %v19544_v26  ;;  %13615 = vmatprep.subr.bf16.mxu0 %v13614_v63  ;;  %v9057_v39 = vand.u32 4294901760, %v6442_v31  ;;  %v19684_v46 = vsub.f32 %v6481_v55, %v9096_v38  ;;  %v19686_v1 = vsub.f32 %v6484_v48, %v9099_v44  ;;  %v6493_v26 = vld [vmem:[#allocation12 + $0x2e0] sm:$0xff]  ;;  %v6496_v63 = vld [vmem:[#allocation12 + $0x2f8] sm:$0xff] }
 0x725   : > { %23209 = vst [vmem:[#allocation188_spill] sm:$0xff] %v19681_v19  ;;  %14055 = vmatprep.subr.bf16.mxu1 %v19662_v29  ;;  %v13620_v8 = vpack.c.bf16 %v23210_v54, %v18984_v50  ;;  %v19690_v49 = vpack.c.bf16 %v9051_v62, %v9048_v58  ;;  %v19692_v9 = vsub.f32 %v6433_v53, %v9048_v58  ;;  %v19706_v54 = vld [vmem:[#allocation12 + $0x178] sm:$0xff]  ;;  %v9111_v55 = vand.u32 4294901760, %v6496_v63 }
 0x726   : > { %v19694_v60 = vsub.f32 %v6436_v6, %v9051_v62  ;;  %v13622_v40 = vpack.c.bf16 %v23212_v15, %v19016_v42  ;;  %v19700_v44 = vpack.c.bf16 %v9105_v14, %v9102_v11  ;;  %v19702_v48 = vsub.f32 %v6487_v36, %v9102_v11  ;;  %v23214_v62 = vld [vmem:[#allocation39_spill] sm:$0xff]  ;;  %v23219_v42 = vld [vmem:[#allocation106_spill] sm:$0xff] }
 0x727   : > { %23211 = vst [vmem:[#allocation189_spill] sm:$0xff] %v19690_v49  ;;  %13617 = vmatpush1.bf16.msra.mxu0 %v13616_v59  ;;  %14057 = vmatpush3.bf16.msra.mxu1 %v19671_v35  ;;  %v19704_v38 = vsub.f32 %v6490_v34, %v9105_v14  ;;  %v13624_v58 = vpack.c.bf16 %v19037_v5, %v23214_v62  ;;  %v9108_v59 = vand.u32 4294901760, %v6493_v26  ;;  %v9060_v11 = vand.u32 4294901760, %v6445_v43 }
 0x728   : > { %23213 = vst [vmem:[#allocation190_spill] sm:$0xff] %v19700_v44  ;;  %13619 = vmatprep.subr.bf16.mxu0 %v13618_v45  ;;  %14059 = vmatprep.subr.bf16.mxu1 %v19681_v19  ;;  %v19712_v53 = vpack.c.bf16 %v9057_v39, %v9054_v28  ;;  %v19714_v15 = vsub.f32 %v6439_v16, %v9054_v28  ;;  %v23216_v45 = vand.u32 4294901760, %v19555_v37  ;;  %v23217_v16 = vand.u32 4294901760, %v19557_v10 }
 0x729   : > { %v19725_v28 = vsub.f32 %v6442_v31, %v9057_v39  ;;  %v19735_v5 = vpack.c.bf16 %v9111_v55, %v9108_v59  ;;  %v19739_v31 = vsub.f32 %v6496_v63, %v9111_v55  ;;  %v13628_v39 = vpack.c.bf16 %v19086_v47, %v19083_v23 }
 0x72a   : > { %23215 = vst [vmem:[#allocation191_spill] sm:$0xff] %v19712_v53  ;;  %v9178_v6 = vsub.f32 %v19555_v37, %v23216_v45  ;;  %v9185_v34 = vsub.f32 %v19557_v10, %v23217_v16  ;;  %v23218_v45 = vld [vmem:[#allocation105_spill] sm:$0xff]  ;;  %v23221_v16 = vand.u32 4294901760, %v19575_v17  ;;  %v23223_v50 = vand.u32 4294901760, %v19706_v54 }
 0x72b   : > { %13621 = vmatpush1.bf16.msra.mxu0 %v13620_v8  ;;  %14061 = vmatpush3.bf16.msra.mxu1 %v19690_v49  ;;  %v13626_v62 = vpack.c.bf16 %v23219_v42, %v23218_v45  ;;  %23220 = vst [vmem:[#allocation192_spill] sm:$0xff] %v19735_v5  ;;  %v19737_v8 = vsub.f32 %v6493_v26, %v9108_v59  ;;  %v23225_v26 = vand.u32 4294901760, %v19588_v41  ;;  %v23226_v55 = vand.u32 4294901760, %v19595_v52 }
 0x72c   : > { %13623 = vmatprep.subr.bf16.mxu0 %v13622_v40  ;;  %14063 = vmatprep.subr.bf16.mxu1 %v19700_v44  ;;  %v9304_v14 = vsub.f32 %v19575_v17, %v23221_v16  ;;  %v23222_v40 = vand.u32 4294901760, %v19577_v18  ;;  %v19751_v42 = vpack.c.bf16 %v23223_v50, %v9060_v11  ;;  %v9179_v45 = vand.u32 4294901760, %v9178_v6 }
 0x72d   : > { %v9192_v63 = vsub.f32 %v19588_v41, %v23225_v26  ;;  %v9199_v59 = vsub.f32 %v19595_v52, %v23226_v55  ;;  %v9186_v16 = vand.u32 4294901760, %v9185_v34  ;;  %v23227_v47 = vand.u32 4294901760, %v19611_v13  ;;  %v23231_v34 = vld [vmem:[#allocation131_spill] sm:$0xff] }
 0x72e   : > { %v9311_v36 = vsub.f32 %v19577_v18, %v23222_v40  ;;  %23224 = vst [vmem:[#allocation193_spill] sm:$0xff] %v19751_v42  ;;  %v23228_v50 = vand.u32 4294901760, %v19625_v61  ;;  %v19768_v26 = vsub.f32 %v6445_v43, %v9060_v11  ;;  %v22111_v35 = vand.u32 4294901760, %v19642_v12 }
 0x72f   : > { %13625 = vmatpush1.bf16.msra.mxu0 %v13624_v58  ;;  %14065 = vmatpush3.bf16.msra.mxu1 %v19712_v53  ;;  %v9318_v40 = vsub.f32 %v19611_v13, %v23227_v47  ;;  %v23229_v58 = vld [vmem:[#allocation114_spill] sm:$0xff]  ;;  %v9305_v47 = vand.u32 4294901760, %v9304_v14  ;;  %v9193_v23 = vand.u32 4294901760, %v9192_v63  ;;  %v14072_v11 = vpack.c.bf16 %v9186_v16, %v9179_v45 }
 0x730   : > { %v9325_v6 = vsub.f32 %v19625_v61, %v23228_v50  ;;  %13627 = vmatprep.subr.bf16.mxu0 %v13626_v62  ;;  %14067 = vmatprep.subr.bf16.mxu1 %v19735_v5  ;;  %v13630_v55 = vpack.c.bf16 %v23229_v58, %v19118_v56  ;;  %v23230_v53 = vld [vmem:[#allocation126_spill] sm:$0xff]  ;;  %v9312_v19 = vand.u32 4294901760, %v9311_v36  ;;  %v22112_v50 = vand.u32 4294901760, %v19648_v24  ;;  %v23233_v36 = vld [vmem:[#allocation133_spill] sm:$0xff] }
 0x731   : > { %v13632_v44 = vpack.c.bf16 %v23231_v34, %v23230_v53  ;;  %v9200_v62 = vand.u32 4294901760, %v9199_v59  ;;  %v9319_v58 = vand.u32 4294901760, %v9318_v40  ;;  %v23232_v49 = vand.u32 4294901760, %v19634_v21  ;;  %v23234_v63 = vld [vmem:[#allocation134_spill] sm:$0xff] }
 0x732   : > { %v9326_v34 = vand.u32 4294901760, %v9325_v6  ;;  %v13634_v59 = vpack.c.bf16 %v23234_v63, %v23233_v36  ;;  %v23235_v5 = vand.u32 4294901760, %v19640_v57  ;;  %v14074_v16 = vpack.c.bf16 %v9312_v19, %v9305_v47  ;;  %v23241_v45 = vld [vmem:[#allocation142_spill] sm:$0xff] }
 0x733   : > { %13629 = vmatpush1.bf16.msra.mxu0 %v13628_v39  ;;  %14069 = vmatpush3.bf16.msra.mxu1 %v19751_v42  ;;  %v9206_v14 = vsub.f32 %v19634_v21, %v23232_v49  ;;  %v13636_v40 = vpack.c.bf16 %v19187_v4, %v19184_v22  ;;  %v9332_v49 = vsub.f32 %v19642_v12, %v22111_v35  ;;  %v23237_v19 = vand.u32 4294901760, %v19660_v25  ;;  %v23238_v35 = vld [vmem:[#allocation140_spill] sm:$0xff] }
 0x734   : > { %13631 = vmatprep.subr.bf16.mxu0 %v13630_v55  ;;  %14071 = vmatprep.subr.bf16.mxu1 %v19494_v30  ;;  %v9213_v43 = vsub.f32 %v19640_v57, %v23235_v5  ;;  %v9339_v30 = vsub.f32 %v19648_v24, %v22112_v50  ;;  %v14076_v6 = vpack.c.bf16 %v9200_v62, %v9193_v23  ;;  %v23236_v5 = vand.u32 4294901760, %v19655_v3 }
 0x735   : > { %v9227_v47 = vsub.f32 %v19660_v25, %v23237_v19  ;;  %v13638_v39 = vpack.c.bf16 %v23238_v35, %v19216_v27  ;;  %v14078_v50 = vpack.c.bf16 %v9326_v34, %v9319_v58  ;;  %v9207_v4 = vand.u32 4294901760, %v9206_v14  ;;  %v23242_v35 = vld [vmem:[#allocation143_spill] sm:$0xff] }
 0x736   : > { %9124 = vmatmul.mubr.f32.vlgmr.msra.gmra.mrb[36].mxu1 %v23176_v0  ;;  %v9220_v55 = vsub.f32 %v19655_v3, %v23236_v5  ;;  %v9214_v0 = vand.u32 4294901760, %v9213_v43  ;;  %v23239_v62 = vand.u32 4294901760, %v19665_v33  ;;  %v23240_v19 = vand.u32 4294901760, %v19667_v32  ;;  %v23243_v43 = vld [vmem:[#allocation145_spill] sm:$0xff] }
 0x737   : > { %13633 = vmatpush1.bf16.msra.mxu0 %v13632_v44  ;;  %9133 = vmatprep.mubr.f32.mxu1 %v19586_v20  ;;  %v13640_v58 = vpack.c.bf16 %v23242_v35, %v23241_v45  ;;  %v9333_v34 = vand.u32 4294901760, %v9332_v49  ;;  %v9340_v14 = vand.u32 4294901760, %v9339_v30  ;;  %v9228_v27 = vand.u32 4294901760, %v9227_v47  ;;  %v23255_v30 = vld [vmem:[#allocation152_spill] sm:$0xff] }
 0x738   : > { %14073 = vmatpush3.bf16.msra.mxu1 %v14072_v11  ;;  %13635 = vmatprep.subr.bf16.mxu0 %v13634_v59  ;;  %v9346_v5 = vsub.f32 %v19665_v33, %v23239_v62  ;;  %v9353_v44 = vsub.f32 %v19667_v32, %v23240_v19  ;;  %v23244_v59 = vld [vmem:[#allocation146_spill] sm:$0xff]  ;;  %v9221_v62 = vand.u32 4294901760, %v9220_v55  ;;  %v23245_v22 = vand.u32 4294901760, %v19674_v2 }
 0x739   : > { %14075 = vmatprep.subr.bf16.mxu1 %v14074_v16  ;;  %v13642_v23 = vpack.c.bf16 %v23244_v59, %v23243_v43  ;;  %v23246_v16 = vld [vmem:[#allocation181_spill] sm:$0xff]  ;;  %v23247_v20 = vand.u32 4294901760, %v19676_v51  ;;  %v14080_v55 = vpack.c.bf16 %v9214_v0, %v9207_v4  ;;  %v23253_v0 = vld [vmem:[#allocation148_spill] sm:$0xff] }
 0x73a   : > { %9139 = vmatmul.mubr.f32.gmra.mrb[38].mxu1 %v23185_v7  ;;  %v9234_v19 = vsub.f32 %v19674_v2, %v23245_v22  ;;  %v9347_v47 = vand.u32 4294901760, %v9346_v5  ;;  %v9354_v59 = vand.u32 4294901760, %v9353_v44  ;;  %v23248_v22 = vand.u32 4294901760, %v19684_v46  ;;  %v23251_v4 = vld [vmem:[#allocation89_spill] sm:$0xff] }
 0x73b   : > { %13637 = vmatpush1.bf16.msra.mxu0 %v13636_v40  ;;  %9148 = vmatprep.mubr.f32.mxu1 %v23246_v16  ;;  %v9241_v49 = vsub.f32 %v19676_v51, %v23247_v20  ;;  %v23249_v16 = vand.u32 4294901760, %v19706_v54  ;;  %v14082_v20 = vpack.c.bf16 %v9340_v14, %v9333_v34  ;;  %v23250_v7 = vand.u32 4294901760, %v19686_v1 }
 0x73c   : > { %14077 = vmatpush3.bf16.msra.mxu1 %v14076_v6  ;;  %13639 = vmatprep.subr.bf16.mxu0 %v13638_v39  ;;  %v9360_v40 = vsub.f32 %v19684_v46, %v23248_v22  ;;  %v22116_v39 = vand.u32 4294901760, %v19704_v38  ;;  %v23252_v6 = vld [vmem:[#allocation147_spill] sm:$0xff]  ;;  %v14084_v44 = vpack.c.bf16 %v9228_v27, %v9221_v62  ;;  %v9235_v45 = vand.u32 4294901760, %v9234_v19 }
 0x73d   : > { %v19840_v43 = vsub.f32 %v19706_v54, %v23249_v16  ;;  %14079 = vmatprep.subr.bf16.mxu1 %v14078_v50  ;;  %v9367_v11 = vsub.f32 %v19686_v1, %v23250_v7  ;;  %v13644_v5 = vpack.c.bf16 %v23253_v0, %v23252_v6  ;;  %v23254_v22 = vld [vmem:[#allocation151_spill] sm:$0xff]  ;;  %v23256_v54 = vld [vmem:[#allocation184_spill] sm:$0xff]  ;;  %v9242_v50 = vand.u32 4294901760, %v9241_v49  ;;  %v23343_v6 = vld [vmem:[#allocation189_spill] sm:$0xff] }
 0x73e   : > { %9154 = vmatmul.mubr.f32.gmra.mrb[40].mxu1 %v23251_v4  ;;  %v13646_v35 = vpack.c.bf16 %v23255_v30, %v23254_v22  ;;  %v23257_v34 = vand.u32 4294901760, %v19692_v9  ;;  %v23258_v7 = vand.u32 4294901760, %v19694_v60  ;;  %v23259_v4 = vand.u32 4294901760, %v19702_v48  ;;  %v23260_v22 = vld [vmem:[#allocation62_spill] sm:$0xff]  ;;  %v23265_v49 = vld [vmem:[#allocation163_spill] sm:$0xff] }
 0x73f   : > { %13641 = vmatpush1.bf16.msra.mxu0 %v13640_v58  ;;  %9163 = vmatprep.mubr.f32.mxu1 %v23256_v54  ;;  %v14086_v62 = vpack.c.bf16 %v9354_v59, %v9347_v47  ;;  %v9361_v19 = vand.u32 4294901760, %v9360_v40  ;;  %v9368_v54 = vand.u32 4294901760, %v9367_v11  ;;  %v23263_v47 = vld [vmem:[#allocation156_spill] sm:$0xff]  ;;  %v23264_v40 = vld [vmem:[#allocation157_spill] sm:$0xff]  ;;  %v14088_v11 = vpack.c.bf16 %v9242_v50, %v9235_v45 }
 0x740   : > { %v9248_v14 = vsub.f32 %v19692_v9, %v23257_v34  ;;  %v9255_v16 = vsub.f32 %v19694_v60, %v23258_v7  ;;  %v9374_v27 = vsub.f32 %v19702_v48, %v23259_v4  ;;  %14081 = vmatpush3.bf16.msra.mxu1 %v14080_v55  ;;  %13643 = vmatprep.subr.bf16.mxu0 %v13642_v23  ;;  %v23261_v55 = vld [vmem:[#allocation154_spill] sm:$0xff]  ;;  %v23262_v23 = vld [vmem:[#allocation155_spill] sm:$0xff]  ;;  %v23268_v50 = vand.u32 4294901760, %v19737_v8 }
 0x741   : > { %14083 = vmatprep.subr.bf16.mxu1 %v14082_v20  ;;  %v9381_v34 = vsub.f32 %v19704_v38, %v22116_v39  ;;  %v13648_v59 = vpack.c.bf16 %v23262_v23, %v23261_v55  ;;  %v13650_v4 = vpack.c.bf16 %v23264_v40, %v23263_v47  ;;  %v23266_v39 = vand.u32 4294901760, %v19714_v15  ;;  %v23304_v47 = vld [vmem:[#allocation165_spill] sm:$0xff] }
 0x742   : > { %9169 = vmatmul.mubr.f32.gmra.mrb[42].mxu1 %v23260_v22  ;;  %v9249_v20 = vand.u32 4294901760, %v9248_v14  ;;  %v9256_v58 = vand.u32 4294901760, %v9255_v16  ;;  %v9375_v0 = vand.u32 4294901760, %v9374_v27  ;;  %v23267_v22 = vand.u32 4294901760, %v19725_v28  ;;  %v23271_v16 = vld [vmem:[#allocation125_spill] sm:$0xff] }
 0x743   : > { %13645 = vmatpush1.bf16.msra.mxu0 %v13644_v5  ;;  %9399 = vmatprep.mubr.f32.mxu1 %v23265_v49  ;;  %v9262_v30 = vsub.f32 %v19714_v15, %v23266_v39  ;;  %v14090_v40 = vpack.c.bf16 %v9368_v54, %v9361_v19  ;;  %v9382_v45 = vand.u32 4294901760, %v9381_v34  ;;  %v23270_v39 = vld [vmem:[#allocation119_spill] sm:$0xff]  ;;  %v23273_v54 = vand.u32 4294901760, %v19840_v43  ;;  %v23307_v55 = vld [vmem:[#allocation41_spill] sm:$0xff] }
 0x744   : > { %14085 = vmatpush3.bf16.msra.mxu1 %v14084_v44  ;;  %13647 = vmatprep.subr.bf16.mxu0 %v13646_v35  ;;  %v9269_v7 = vsub.f32 %v19725_v28, %v23267_v22  ;;  %v9388_v44 = vsub.f32 %v19737_v8, %v23268_v50  ;;  %v23269_v35 = vand.u32 4294901760, %v19739_v31  ;;  %v13652_v27 = vpack.c.bf16 %v23271_v16, %v23270_v39  ;;  %v23274_v16 = vld [vmem:[#allocation103_spill] sm:$0xff] }
 0x745   : > { %14087 = vmatprep.subr.bf16.mxu1 %v14086_v62  ;;  %v14092_v22 = vpack.c.bf16 %v9256_v58, %v9249_v20  ;;  %v9263_v23 = vand.u32 4294901760, %v9262_v30  ;;  %v23272_v62 = vand.u32 4294901760, %v19768_v26  ;;  %v9283_v34 = vsub.f32 %v19840_v43, %v23273_v54  ;;  %v23276_v20 = vld [vmem:[#allocation169_spill] sm:$0xff]  ;;  %v23303_v39 = vld [vmem:[#allocation99_spill] sm:$0xff] }
 0x746   : > { %v9395_v14 = vsub.f32 %v19739_v31, %v23269_v35  ;;  %v9270_v5 = vand.u32 4294901760, %v9269_v7  ;;  %v14094_v50 = vpack.c.bf16 %v9382_v45, %v9375_v0  ;;  %v9389_v35 = vand.u32 4294901760, %v9388_v44  ;;  %v23279_v45 = vld [vmem:[#allocation67_spill] sm:$0xff]  ;;  %v23280_v44 = vld [vmem:[#allocation176_spill] sm:$0xff]  ;;  %v23286_v54 = vld [vmem:[#allocation81_spill] sm:$0xff] }
 0x747   : > { %13649 = vmatpush1.bf16.msra.mxu0 %v13648_v59  ;;  %v9276_v19 = vsub.f32 %v19768_v26, %v23272_v62  ;;  %v9284_v30 = vand.u32 4294901760, %v9283_v34  ;;  %v23277_v62 = vld [vmem:[#allocation107_spill] sm:$0xff]  ;;  %v14106_v34 = vpack.c.bf16 %v19577_v18, %v19575_v17 }
 0x748   : > { %14089 = vmatpush3.bf16.msra.mxu1 %v14088_v11  ;;  %13651 = vmatprep.subr.bf16.mxu0 %v13650_v4  ;;  %v9396_v59 = vand.u32 4294901760, %v9395_v14  ;;  %v14096_v58 = vpack.c.bf16 %v9270_v5, %v9263_v23  ;;  %v23275_v11 = vld [vmem:[#allocation70_spill] sm:$0xff]  ;;  %v23282_v5 = vld [vmem:[#allocation129_spill] sm:$0xff] }
 0x749   : > { %14091 = vmatprep.subr.bf16.mxu1 %v14090_v40  ;;  %v9277_v4 = vand.u32 4294901760, %v9276_v19  ;;  %v23278_v40 = vld [vmem:[#allocation112_spill] sm:$0xff]  ;;  %v23281_v23 = vld [vmem:[#allocation122_spill] sm:$0xff]  ;;  %v14104_v19 = vpack.c.bf16 %v19557_v10, %v19555_v37 }
 0x74a   : > { %v14098_v7 = vpack.c.bf16 %v9396_v59, %v9389_v35  ;;  %v23283_v14 = vld [vmem:[#allocation162_spill] sm:$0xff]  ;;  %v23288_v35 = vld [vmem:[#allocation179_spill] sm:$0xff] }
 0x74b   : > { %13653 = vmatpush1.bf16.msra.mxu0 %v13652_v27  ;;  %v14100_v0 = vpack.c.bf16 %v9284_v30, %v9277_v4  ;;  %v23284_v27 = vld [vmem:[#allocation161_spill] sm:$0xff]  ;;  %v23289_v59 = vld [vmem:[#allocation130_spill] sm:$0xff]  ;;  %v14108_v30 = vpack.c.bf16 %v19595_v52, %v19588_v41 }
 0x74c   : > { %14093 = vmatpush3.bf16.msra.mxu1 %v14092_v22  ;;  %13655 = vmatprep.subr.bf16.mxu0 %v23274_v16  ;;  %v23285_v22 = vpack.c.bf16 %v23283_v14, %v23284_v27  ;;  %v23291_v4 = vld [vmem:[#allocation45_spill] sm:$0xff]  ;;  %v23300_v16 = vld [vmem:[#allocation84_spill] sm:$0xff] }
 0x74d   : > { %14095 = vmatprep.subr.bf16.mxu1 %v14094_v50  ;;  %v23287_v50 = vld [vmem:[#allocation65_spill] sm:$0xff] }
 0x74e   : > { %7352 = vmatmul.mubr.f32.vlgmr.msra.gmra.mrb[20].mxu0 %v23275_v11 }
 0x74f   : > { %7359 = vmatprep.mubr.f32.mxu0 %v23276_v20  ;;  %13657 = vmatpush1.bf16.msra.mxu0 %v23277_v62  ;;  %v23299_v62 = vld [vmem:[#allocation92_spill] sm:$0xff] }
 0x750   : > { %14097 = vmatpush3.bf16.msra.mxu1 %v14096_v58  ;;  %13659 = vmatprep.subr.bf16.mxu0 %v23278_v40  ;;  %v23290_v58 = vld [vmem:[#allocation166_spill] sm:$0xff]  ;;  %v23298_v40 = vld [vmem:[#allocation68_spill] sm:$0xff] }
 0x751   : > { %14099 = vmatprep.subr.bf16.mxu1 %v14098_v7  ;;  %v23292_v7 = vld [vmem:[#allocation86_spill] sm:$0xff] }
 0x752   : > { %7362 = vmatmul.mubr.f32.gmra.mrb[22].mxu0 %v23279_v45 }
 0x753   : > { %7369 = vmatprep.mubr.f32.mxu0 %v23280_v44  ;;  %13661 = vmatpush1.bf16.msra.mxu0 %v23281_v23  ;;  %v23295_v23 = vld [vmem:[#allocation54_spill] sm:$0xff] }
 0x754   : > { %14101 = vmatpush3.bf16.msra.mxu1 %v14100_v0  ;;  %13663 = vmatprep.subr.bf16.mxu0 %v23282_v5  ;;  %v14110_v0 = vpack.c.bf16 %v19625_v61, %v19611_v13  ;;  %v23294_v5 = vld [vmem:[#allocation168_spill] sm:$0xff] }
 0x755   : > { %14103 = vmatprep.subr.bf16.mxu1 %v23285_v22  ;;  %v23293_v22 = vld [vmem:[#allocation80_spill] sm:$0xff] }
 0x756   : > { %7372 = vmatmul.mubr.f32.gmra.mrb[24].mxu0 %v23286_v54 }
 0x757   : > { %9401 = vmatmul.mubr.f32.vlgmr.msra.gmra.mrb[44].mxu1 %v23287_v50  ;;  %7379 = vmatprep.mubr.f32.mxu0 %v23288_v35 }
 0x758   : > { %13665 = vmatpush1.bf16.msra.mxu0 %v23289_v59  ;;  %9406 = vmatprep.mubr.f32.mxu1 %v23290_v58  ;;  %v23296_v59 = vld [vmem:[#allocation171_spill] sm:$0xff] }
 0x759   : > { %14105 = vmatpush3.bf16.msra.mxu1 %v14104_v19  ;;  %13667 = vmatprep.subr.bf16.mxu0 %v23291_v4  ;;  %v23297_v19 = vld [vmem:[#allocation59_spill] sm:$0xff]  ;;  %v14112_v4 = vpack.c.bf16 %v19640_v57, %v19634_v21 }
 0x75a   : > { %7382 = vmatmul.mubr.f32.gmra.mrb[26].mxu0 %v23292_v7  ;;  %14107 = vmatprep.subr.bf16.mxu1 %v14106_v34  ;;  %v14114_v34 = vpack.c.bf16 %v19648_v24, %v19642_v12 }
 0x75b   : > { %9408 = vmatmul.mubr.f32.gmra.mrb[46].mxu1 %v23293_v22  ;;  %7519 = vmatprep.mubr.f32.mxu0 %v23294_v5 }
 0x75c   : > { %13669 = vmatpush1.bf16.msra.mxu0 %v23295_v23  ;;  %9413 = vmatprep.mubr.f32.mxu1 %v23296_v59  ;;  %v23301_v23 = vld [vmem:[#allocation64_spill] sm:$0xff] }
 0x75d   : > { %14109 = vmatpush3.bf16.msra.mxu1 %v14108_v30  ;;  %13671 = vmatprep.subr.bf16.mxu0 %v23297_v19  ;;  %v14116_v30 = vpack.c.bf16 %v19660_v25, %v19655_v3  ;;  %v14118_v19 = vpack.c.bf16 %v19667_v32, %v19665_v33 }
 0x75e   : > { %14111 = vmatprep.subr.bf16.mxu1 %v14110_v0  ;;  %v23302_v0 = vld [vmem:[#allocation82_spill] sm:$0xff] }
 0x75f   : > { %9415 = vmatmul.mubr.f32.gmra.mrb[48].mxu1 %v23298_v40 }
 0x760   : > { %13673 = vmatpush1.bf16.msra.mxu0 %v23299_v62  ;;  %9420 = vmatprep.mubr.f32.mxu1 %v23300_v16  ;;  %v23305_v62 = vld [vmem:[#allocation48_spill] sm:$0xff] }
 0x761   : > { %14113 = vmatpush3.bf16.msra.mxu1 %v14112_v4  ;;  %13675 = vmatprep.subr.bf16.mxu0 %v23301_v23  ;;  %v14120_v4 = vpack.c.bf16 %v19676_v51, %v19674_v2  ;;  %v14122_v23 = vpack.c.bf16 %v19686_v1, %v19684_v46 }
 0x762   : > { %14115 = vmatprep.subr.bf16.mxu1 %v14114_v34  ;;  %v23306_v34 = vld [vmem:[#allocation76_spill] sm:$0xff] }
 0x763   : > { %9422 = vmatmul.mubr.f32.gmra.mrb[50].mxu1 %v23302_v0  ;;  %v23335_v0 = vld [vmem:[#allocation60_spill] sm:$0xff] }
 0x764   : > { %13677 = vmatpush1.bf16.msra.mxu0 %v23303_v39  ;;  %9557 = vmatprep.mubr.f32.mxu1 %v23304_v47  ;;  %v14124_v39 = vpack.c.bf16 %v19694_v60, %v19692_v9  ;;  %v14126_v47 = vpack.c.bf16 %v19704_v38, %v19702_v48 }
 0x765   : > { %14117 = vmatpush3.bf16.msra.mxu1 %v14116_v30  ;;  %13679 = vmatprep.subr.bf16.mxu0 %v23305_v62  ;;  %v23308_v30 = vld [vmem:[#allocation102_spill] sm:$0xff]  ;;  %v23309_v62 = vld [vmem:[#allocation109_spill] sm:$0xff] }
 0x766   : > { %14119 = vmatprep.subr.bf16.mxu1 %v14118_v19  ;;  %v14128_v19 = vpack.c.bf16 %v19725_v28, %v19714_v15 }
 0x768   : > { %13681 = vmatpush1.bf16.msra.mxu0 %v23306_v34  ;;  %v23311_v34 = vld [vmem:[#allocation116_spill] sm:$0xff] }
 0x769   : > { %14121 = vmatpush3.bf16.msra.mxu1 %v14120_v4  ;;  %13683 = vmatprep.subr.bf16.mxu0 %v23307_v55  ;;  %v14130_v4 = vpack.c.bf16 %v19739_v31, %v19737_v8  ;;  %v23310_v55 = vld [vmem:[#allocation111_spill] sm:$0xff] }
 0x76a   : > { %14123 = vmatprep.subr.bf16.mxu1 %v14122_v23  ;;  %v14132_v23 = vpack.c.bf16 %v19840_v43, %v19768_v26 }
 0x76c   : > { %13685 = vmatpush1.bf16.msra.mxu0 %v23308_v30  ;;  %v23312_v30 = vld [vmem:[#allocation132_spill] sm:$0xff] }
 0x76d   : > { %14125 = vmatpush3.bf16.msra.mxu1 %v14124_v39  ;;  %13687 = vmatprep.subr.bf16.mxu0 %v23309_v62  ;;  %v23313_v39 = vld [vmem:[#allocation137_spill] sm:$0xff]  ;;  %v23314_v62 = vld [vmem:[#allocation160_spill] sm:$0xff] }
 0x76e   : > { %14127 = vmatprep.subr.bf16.mxu1 %v14126_v47  ;;  %v23315_v47 = vld [vmem:[#allocation138_spill] sm:$0xff] }
 0x770   : > { %13689 = vmatpush1.bf16.msra.mxu0 %v23310_v55  ;;  %v23318_v55 = vld [vmem:[#allocation174_spill] sm:$0xff] }
 0x771   : > { %14129 = vmatpush3.bf16.msra.mxu1 %v14128_v19  ;;  %13691 = vmatprep.subr.bf16.mxu0 %v23311_v34  ;;  %v23316_v19 = vld [vmem:[#allocation170_spill] sm:$0xff]  ;;  %v23317_v34 = vld [vmem:[#allocation141_spill] sm:$0xff] }
 0x772   : > { %14131 = vmatprep.subr.bf16.mxu1 %v14130_v4  ;;  %v23319_v4 = vld [vmem:[#allocation144_spill] sm:$0xff] }
 0x774   : > { %13693 = vmatpush1.bf16.msra.mxu0 %v23312_v30 }
 0x775   : > { %14133 = vmatpush3.bf16.msra.mxu1 %v14132_v23  ;;  %13695 = vmatprep.subr.bf16.mxu0 %v23313_v39  ;;  %v23320_v23 = vld [vmem:[#allocation175_spill] sm:$0xff]  ;;  %v23321_v39 = vld [vmem:[#allocation149_spill] sm:$0xff] }
 0x776   : > { %14135 = vmatprep.subr.bf16.mxu1 %v23314_v62 }
 0x778   : > { %9560 = vmatmul.mubr.f32.vlgmr.msra.gmra.mrb[52].mxu1 %v23275_v11  ;;  %13697 = vmatpush1.bf16.msra.mxu0 %v23315_v47  ;;  %v23322_v11 = vld [vmem:[#allocation180_spill] sm:$0xff]  ;;  %v23325_v47 = vld [vmem:[#allocation153_spill] sm:$0xff] }
 0x779   : > { %9566 = vmatprep.mubr.f32.mxu1 %v23276_v20  ;;  %14137 = vmatpush3.bf16.msra.mxu1 %v23316_v19  ;;  %v23323_v20 = vld [vmem:[#allocation150_spill] sm:$0xff] }
 0x77a   : > { %13699 = vmatprep.subr.bf16.mxu0 %v23317_v34  ;;  %14139 = vmatprep.subr.bf16.mxu1 %v23318_v55  ;;  %v23324_v34 = vld [vmem:[#allocation87_spill] sm:$0xff] }
 0x77c   : > { %9569 = vmatmul.mubr.f32.gmra.mrb[54].mxu1 %v23279_v45  ;;  %13701 = vmatpush1.bf16.msra.mxu0 %v23319_v4  ;;  %v23326_v45 = vld [vmem:[#allocation183_spill] sm:$0xff]  ;;  %v23328_v4 = vld [vmem:[#allocation185_spill] sm:$0xff] }
 0x77d   : > { %9575 = vmatprep.mubr.f32.mxu1 %v23280_v44  ;;  %14141 = vmatpush3.bf16.msra.mxu1 %v23320_v23  ;;  %v23327_v44 = vld [vmem:[#allocation120_spill] sm:$0xff]  ;;  %v23363_v23 = vld [vmem:[#allocation78_spill] sm:$0xff] }
 0x77e   : > { %13703 = vmatprep.subr.bf16.mxu0 %v23321_v39  ;;  %14143 = vmatprep.subr.bf16.mxu1 %v23322_v11  ;;  %v23329_v39 = vld [vmem:[#allocation121_spill] sm:$0xff]  ;;  %v23348_v11 = vld [vmem:[#allocation190_spill] sm:$0xff] }
 0x780   : > { %9578 = vmatmul.mubr.f32.gmra.mrb[56].mxu1 %v23286_v54  ;;  %13705 = vmatpush1.bf16.msra.mxu0 %v23323_v20  ;;  %v23330_v54 = vld [vmem:[#allocation123_spill] sm:$0xff]  ;;  %v23332_v20 = vld [vmem:[#allocation158_spill] sm:$0xff] }
 0x781   : > { %9584 = vmatprep.mubr.f32.mxu1 %v23288_v35  ;;  %14145 = vmatpush3.bf16.msra.mxu1 %v23324_v34  ;;  %v23331_v35 = vld [vmem:[#allocation187_spill] sm:$0xff] }
 0x782   : > { %13707 = vmatprep.subr.bf16.mxu0 %v23325_v47  ;;  %14147 = vmatprep.subr.bf16.mxu1 %v23326_v45  ;;  %v23333_v47 = vld [vmem:[#allocation79_spill] sm:$0xff] }
 0x783   : > { %v23334_v30 = vand.u32 4294901760, %v23333_v47 }
 0x784   : > { %9587 = vmatmul.mubr.f32.gmra.mrb[58].mxu1 %v23292_v7  ;;  %13709 = vmatpush1.bf16.msra.mxu0 %v23327_v44  ;;  %v23336_v7 = vand.u32 4294901760, %v23335_v0  ;;  %v23337_v44 = vld [vmem:[#allocation188_spill] sm:$0xff]  ;;  %v23349_v0 = vld [vmem:[#allocation75_spill] sm:$0xff] }
 0x785   : > { %14149 = vmatpush3.bf16.msra.mxu1 %v23328_v4  ;;  %9691 = vmatprep.mubr.f32.mxu1 %v23294_v5  ;;  %v23338_v4 = vld [vmem:[#allocation159_spill] sm:$0xff]  ;;  %v23339_v5 = vld [vmem:[#allocation57_spill] sm:$0xff] }
 0x786   : > { %13711 = vmatprep.subr.bf16.mxu0 %v23329_v39  ;;  %14151 = vmatprep.subr.bf16.mxu1 %v19662_v29  ;;  %v13718_v45 = vpack.c.bf16 %v23336_v7, %v23334_v30  ;;  %v23340_v34 = vand.u32 4294901760, %v23339_v5  ;;  %v23341_v39 = vld [vmem:[#allocation91_spill] sm:$0xff]  ;;  %v23350_v30 = vld [vmem:[#allocation173_spill] sm:$0xff]  ;;  %v23351_v7 = vld [vmem:[#allocation90_spill] sm:$0xff] }
 0x787   : > { %v23342_v16 = vand.u32 4294901760, %v23341_v39  ;;  %v23352_v5 = vand.u32 4294901760, %v23351_v7  ;;  %v23364_v7 = vld [vmem:[#allocation178_spill] sm:$0xff] }
 0x788   : > { %13713 = vmatpush1.bf16.msra.mxu0 %v23330_v54  ;;  %v23344_v54 = vld [vmem:[#allocation94_spill] sm:$0xff] }
 0x789   : > { %14153 = vmatpush3.bf16.msra.mxu1 %v23331_v35  ;;  %13715 = vmatprep.subr.bf16.mxu0 %v23332_v20  ;;  %v13720_v29 = vpack.c.bf16 %v23342_v16, %v23340_v34  ;;  %v23345_v35 = vand.u32 4294901760, %v23344_v54  ;;  %v23346_v20 = vld [vmem:[#allocation69_spill] sm:$0xff]  ;;  %v23355_v34 = vld [vmem:[#allocation191_spill] sm:$0xff] }
 0x78a   : > { %14155 = vmatprep.subr.bf16.mxu1 %v23337_v44  ;;  %v23347_v40 = vand.u32 4294901760, %v23346_v20  ;;  %v23362_v44 = vand.u32 4294901760, %v23283_v14 }
 0x78c   : > { %13717 = vmatpush1.bf16.msra.mxu0 %v23338_v4  ;;  %v13722_v47 = vpack.c.bf16 %v23347_v40, %v23345_v35  ;;  %v23353_v4 = vld [vmem:[#allocation93_spill] sm:$0xff]  ;;  %v23360_v35 = vld [vmem:[#allocation192_spill] sm:$0xff] }
 0x78d   : > { %14157 = vmatpush3.bf16.msra.mxu1 %v23343_v6  ;;  %13719 = vmatprep.subr.bf16.mxu0 %v13718_v45  ;;  %v23354_v39 = vand.u32 4294901760, %v23353_v4  ;;  %v23356_v45 = vld [vmem:[#allocation104_spill] sm:$0xff]  ;;  %v23358_v6 = vld [vmem:[#allocation110_spill] sm:$0xff]  ;;  %v23365_v4 = vld [vmem:[#allocation113_spill] sm:$0xff] }
 0x78e   : > { %14159 = vmatprep.subr.bf16.mxu1 %v23348_v11  ;;  %v23357_v54 = vand.u32 4294901760, %v23356_v45  ;;  %v23359_v20 = vand.u32 4294901760, %v23358_v6  ;;  %v23361_v11 = vand.u32 4294901760, %v23284_v27  ;;  %v23369_v45 = vand.u32 4294901760, %v19555_v37 }
 0x78f   : > { %7523 = vmatmul.mubr.f32.vlgmr.msra.gmra.mrb[20].mxu0 %v23349_v0  ;;  %v13724_v16 = vpack.c.bf16 %v23354_v39, %v23352_v5  ;;  %v23367_v5 = vld [vmem:[#allocation117_spill] sm:$0xff]  ;;  %v23370_v27 = vand.u32 4294901760, %v19557_v10  ;;  %v23379_v10 = vld [vmem:[#allocation127_spill] sm:$0xff] }
 0x790   : > { %7531 = vmatprep.mubr.f32.mxu0 %v23350_v30  ;;  %13721 = vmatpush1.bf16.msra.mxu0 %v13720_v29  ;;  %v13726_v40 = vpack.c.bf16 %v23359_v20, %v23357_v54  ;;  %v14166_v29 = vpack.c.bf16 %v23362_v44, %v23361_v11  ;;  %v23368_v6 = vand.u32 4294901760, %v23367_v5  ;;  %v23371_v11 = vld [vmem:[#allocation118_spill] sm:$0xff]  ;;  %v23373_v54 = vld [vmem:[#allocation124_spill] sm:$0xff]  ;;  %v23380_v37 = vand.u32 4294901760, %v23379_v10 }
 0x791   : > { %14161 = vmatpush3.bf16.msra.mxu1 %v23355_v34  ;;  %13723 = vmatprep.subr.bf16.mxu0 %v13722_v47  ;;  %v23366_v47 = vand.u32 4294901760, %v23365_v4  ;;  %v14168_v14 = vpack.c.bf16 %v23370_v27, %v23369_v45  ;;  %v23372_v44 = vand.u32 4294901760, %v23371_v11  ;;  %v23374_v20 = vand.u32 4294901760, %v23373_v54  ;;  %v23385_v27 = vld [vmem:[#allocation40_spill] sm:$0xff]  ;;  %v23398_v10 = vld [vmem:[#allocation74_spill] sm:$0xff] }
 0x792   : > { %14163 = vmatprep.subr.bf16.mxu1 %v23360_v35  ;;  %v23377_v4 = vand.u32 4294901760, %v19577_v18  ;;  %v23383_v45 = vand.u32 4294901760, %v19588_v41  ;;  %v23386_v11 = vand.u32 4294901760, %v23385_v27  ;;  %v23392_v41 = vld [vmem:[#allocation42_spill] sm:$0xff] }
 0x793   : > { %7535 = vmatmul.mubr.f32.gmra.mrb[22].mxu0 %v23363_v23  ;;  %v13728_v39 = vpack.c.bf16 %v23368_v6, %v23366_v47  ;;  %v13730_v35 = vpack.c.bf16 %v23374_v20, %v23372_v44  ;;  %v23381_v47 = vld [vmem:[#allocation128_spill] sm:$0xff]  ;;  %v23391_v20 = vand.u32 4294901760, %v19625_v61 }
 0x794   : > { %7543 = vmatprep.mubr.f32.mxu0 %v23364_v7  ;;  %13725 = vmatpush1.bf16.msra.mxu0 %v13724_v16  ;;  %v23375_v16 = vld [vmem:[#allocation85_spill] sm:$0xff]  ;;  %v23382_v5 = vand.u32 4294901760, %v23381_v47 }
 0x795   : > { %14165 = vmatpush3.bf16.msra.mxu1 %v19751_v42  ;;  %13727 = vmatprep.subr.bf16.mxu0 %v13726_v40  ;;  %v23376_v40 = vand.u32 4294901760, %v19575_v17  ;;  %v23384_v17 = vand.u32 4294901760, %v19595_v52  ;;  %v23393_v52 = vand.u32 4294901760, %v23392_v41 }
 0x796   : > { %14167 = vmatprep.subr.bf16.mxu1 %v14166_v29  ;;  %v23378_v29 = vld [vmem:[#allocation182_spill] sm:$0xff]  ;;  %v13732_v6 = vpack.c.bf16 %v23382_v5, %v23380_v37  ;;  %v23399_v37 = vand.u32 4294901760, %v23398_v10  ;;  %v23426_v10 = vand.u32 4294901760, %v19684_v46 }
 0x797   : > { %7547 = vmatmul.mubr.f32.gmra.mrb[24].mxu0 %v23375_v16  ;;  %v14170_v42 = vpack.c.bf16 %v23377_v4, %v23376_v40  ;;  %v14172_v18 = vpack.c.bf16 %v23384_v17, %v23383_v45 }
 0x798   : > { %9695 = vmatmul.mubr.f32.vlgmr.msra.gmra.mrb[60].mxu1 %v23349_v0  ;;  %7555 = vmatprep.mubr.f32.mxu0 %v23378_v29  ;;  %v23387_v0 = vld [vmem:[#allocation50_spill] sm:$0xff] }
 0x799   : > { %13729 = vmatpush1.bf16.msra.mxu0 %v13728_v39  ;;  %9702 = vmatprep.mubr.f32.mxu1 %v23350_v30  ;;  %v23388_v44 = vand.u32 4294901760, %v23387_v0  ;;  %v23389_v39 = vld [vmem:[#allocation88_spill] sm:$0xff]  ;;  %v23390_v30 = vand.u32 4294901760, %v19611_v13  ;;  %v23397_v13 = vand.u32 4294901760, %v19640_v57  ;;  %v23406_v57 = vld [vmem:[#allocation61_spill] sm:$0xff]  ;;  %v23409_v0 = vand.u32 4294901760, %v19660_v25 }
 0x79a   : > { %14169 = vmatpush3.bf16.msra.mxu1 %v14168_v14  ;;  %13731 = vmatprep.subr.bf16.mxu0 %v13730_v35  ;;  %v23394_v35 = vld [vmem:[#allocation53_spill] sm:$0xff]  ;;  %v23418_v25 = vld [vmem:[#allocation96_spill] sm:$0xff] }
 0x79b   : > { %v13734_v54 = vpack.c.bf16 %v23388_v44, %v23386_v11  ;;  %7559 = vmatmul.mubr.f32.gmra.mrb[26].mxu0 %v23389_v39  ;;  %14171 = vmatprep.subr.bf16.mxu1 %v14170_v42  ;;  %v14174_v40 = vpack.c.bf16 %v23391_v20, %v23390_v30  ;;  %v23395_v14 = vand.u32 4294901760, %v23394_v35  ;;  %v23396_v42 = vand.u32 4294901760, %v19634_v21  ;;  %v23404_v21 = vld [vmem:[#allocation55_spill] sm:$0xff]  ;;  %v23410_v44 = vld [vmem:[#allocation72_spill] sm:$0xff] }
 0x79c   : > { %9706 = vmatmul.mubr.f32.gmra.mrb[62].mxu1 %v23363_v23  ;;  %7822 = vmatprep.mubr.f32.mxu0 %v23265_v49  ;;  %v23400_v23 = vld [vmem:[#allocation58_spill] sm:$0xff]  ;;  %v23405_v17 = vand.u32 4294901760, %v23404_v21  ;;  %v23408_v11 = vand.u32 4294901760, %v19655_v3  ;;  %v23415_v20 = vand.u32 4294901760, %v19667_v32  ;;  %v23416_v3 = vld [vmem:[#allocation97_spill] sm:$0xff] }
 0x79d   : > { %13733 = vmatpush1.bf16.msra.mxu0 %v13732_v6  ;;  %9713 = vmatprep.mubr.f32.mxu1 %v23364_v7  ;;  %v13736_v4 = vpack.c.bf16 %v23395_v14, %v23393_v52  ;;  %v14176_v61 = vpack.c.bf16 %v23397_v13, %v23396_v42  ;;  %v23401_v47 = vand.u32 4294901760, %v23400_v23  ;;  %v23402_v7 = vand.u32 4294901760, %v19642_v12  ;;  %v23422_v42 = vld [vmem:[#allocation98_spill] sm:$0xff]  ;;  %v23424_v13 = vld [vmem:[#allocation71_spill] sm:$0xff] }
 0x79e   : > { %14173 = vmatpush3.bf16.msra.mxu1 %v14172_v18  ;;  %13735 = vmatprep.subr.bf16.mxu0 %v13734_v54  ;;  %v23403_v6 = vand.u32 4294901760, %v19648_v24  ;;  %v23407_v18 = vand.u32 4294901760, %v23406_v57  ;;  %v14180_v12 = vpack.c.bf16 %v23409_v0, %v23408_v11  ;;  %v23411_v24 = vand.u32 4294901760, %v23410_v44  ;;  %v23412_v54 = vld [vmem:[#allocation56_spill] sm:$0xff] }
 0x79f   : > { %v13738_v5 = vpack.c.bf16 %v23401_v47, %v23399_v37  ;;  %14175 = vmatprep.subr.bf16.mxu1 %v14174_v40  ;;  %v23413_v30 = vand.u32 4294901760, %v23412_v54  ;;  %v23417_v41 = vand.u32 4294901760, %v23416_v3  ;;  %v23419_v52 = vand.u32 4294901760, %v23418_v25  ;;  %v23428_v47 = vld [vmem:[#allocation101_spill] sm:$0xff] }
 0x7a0   : > { %v14178_v45 = vpack.c.bf16 %v23403_v6, %v23402_v7  ;;  %9717 = vmatmul.mubr.f32.gmra.mrb[64].mxu1 %v23375_v16  ;;  %v13740_v27 = vpack.c.bf16 %v23407_v18, %v23405_v17  ;;  %v23420_v14 = vand.u32 4294901760, %v19674_v2  ;;  %v23423_v32 = vand.u32 4294901760, %v23422_v42  ;;  %v23430_v7 = vld [vmem:[#allocation100_spill] sm:$0xff]  ;;  %v23434_v17 = vld [vmem:[#allocation49_spill] sm:$0xff]  ;;  %v23436_v18 = vld [vmem:[#allocation63_spill] sm:$0xff] }
 0x7a1   : > { %13737 = vmatpush1.bf16.msra.mxu0 %v13736_v4  ;;  %9724 = vmatprep.mubr.f32.mxu1 %v23378_v29  ;;  %v13742_v16 = vpack.c.bf16 %v23413_v30, %v23411_v24  ;;  %v23414_v29 = vand.u32 4294901760, %v19665_v33  ;;  %v13744_v35 = vpack.c.bf16 %v23419_v52, %v23417_v41  ;;  %v23421_v4 = vand.u32 4294901760, %v19676_v51  ;;  %v23442_v24 = vld [vmem:[#allocation95_spill] sm:$0xff]  ;;  %v23452_v52 = vld [vmem:[#allocation108_spill] sm:$0xff] }
 0x7a2   : > { %14177 = vmatpush3.bf16.msra.mxu1 %v14176_v61  ;;  %13739 = vmatprep.subr.bf16.mxu0 %v13738_v5  ;;  %v23425_v61 = vand.u32 4294901760, %v23424_v13  ;;  %v23427_v37 = vand.u32 4294901760, %v19686_v1  ;;  %v23429_v5 = vand.u32 4294901760, %v23428_v47  ;;  %v23431_v6 = vand.u32 4294901760, %v23430_v7  ;;  %v23459_v13 = vld [vmem:[#allocation114_spill] sm:$0xff] }
 0x7a3   : > { %14179 = vmatprep.subr.bf16.mxu1 %v14178_v45  ;;  %v14182_v40 = vpack.c.bf16 %v23415_v20, %v23414_v29  ;;  %v14184_v33 = vpack.c.bf16 %v23421_v4, %v23420_v14  ;;  %v23432_v51 = vand.u32 4294901760, %v19692_v9  ;;  %v23433_v45 = vand.u32 4294901760, %v19694_v60  ;;  %v23446_v29 = vld [vmem:[#allocation105_spill] sm:$0xff]  ;;  %v23454_v14 = vld [vmem:[#allocation115_spill] sm:$0xff] }
 0x7a4   : > { %9728 = vmatmul.mubr.f32.gmra.mrb[66].mxu1 %v23389_v39  ;;  %v13746_v39 = vpack.c.bf16 %v23425_v61, %v23423_v32  ;;  %v14186_v23 = vpack.c.bf16 %v23427_v37, %v23426_v10  ;;  %v13748_v2 = vpack.c.bf16 %v23431_v6, %v23429_v5  ;;  %v23435_v57 = vand.u32 4294901760, %v23434_v17  ;;  %v23468_v5 = vld [vmem:[#allocation136_spill] sm:$0xff] }
 0x7a5   : > { %13741 = vmatpush1.bf16.msra.mxu0 %v13740_v27  ;;  %9894 = vmatprep.mubr.f32.mxu1 %v23265_v49  ;;  %v14188_v21 = vpack.c.bf16 %v23433_v45, %v23432_v51  ;;  %v23437_v46 = vand.u32 4294901760, %v23436_v18  ;;  %v23438_v1 = vand.u32 4294901760, %v19702_v48  ;;  %v23439_v11 = vand.u32 4294901760, %v19704_v38  ;;  %v23472_v6 = vld [vmem:[#allocation140_spill] sm:$0xff]  ;;  %v23474_v51 = vld [vmem:[#allocation142_spill] sm:$0xff]  ;;  %v23478_v18 = vld [vmem:[#allocation175_spill] sm:$0xff] }
 0x7a6   : > { %14181 = vmatpush3.bf16.msra.mxu1 %v14180_v12  ;;  %13743 = vmatprep.subr.bf16.mxu0 %v13742_v16  ;;  %v23440_v12 = vld [vmem:[#allocation39_spill] sm:$0xff]  ;;  %v23443_v54 = vand.u32 4294901760, %v23442_v24  ;;  %v23444_v60 = vand.u32 4294901760, %v19714_v15  ;;  %v23445_v30 = vand.u32 4294901760, %v19725_v28  ;;  %v23447_v20 = vand.u32 4294901760, %v23446_v29  ;;  %v23487_v24 = vld [vmem:[#allocation148_spill] sm:$0xff] }
 0x7a7   : > { %14183 = vmatprep.subr.bf16.mxu1 %v14182_v40  ;;  %v13750_v27 = vpack.c.bf16 %v23437_v46, %v23435_v57  ;;  %v14190_v0 = vpack.c.bf16 %v23439_v11, %v23438_v1  ;;  %v23441_v44 = vand.u32 4294901760, %v23440_v12  ;;  %v23448_v40 = vld [vmem:[#allocation106_spill] sm:$0xff]  ;;  %v23450_v38 = vand.u32 4294901760, %v19737_v8  ;;  %v23485_v12 = vld [vmem:[#allocation147_spill] sm:$0xff] }
 0x7a8   : > { %v14192_v16 = vpack.c.bf16 %v23445_v30, %v23444_v60  ;;  %v23449_v48 = vand.u32 4294901760, %v23448_v40  ;;  %v23451_v41 = vand.u32 4294901760, %v19739_v31  ;;  %v23455_v4 = vand.u32 4294901760, %v23454_v14  ;;  %v23489_v60 = vld [vmem:[#allocation84_spill] sm:$0xff]  ;;  %v23490_v30 = vld [vmem:[#allocation87_spill] sm:$0xff] }
 0x7a9   : > { %13745 = vmatpush1.bf16.msra.mxu0 %v13744_v35  ;;  %v13752_v9 = vpack.c.bf16 %v23443_v54, %v23441_v44  ;;  %v23453_v35 = vand.u32 4294901760, %v23452_v52  ;;  %v23456_v28 = vand.u32 4294901760, %v19768_v26  ;;  %v23458_v32 = vand.u32 4294901760, %v19118_v56  ;;  %v23466_v56 = vld [vmem:[#allocation135_spill] sm:$0xff]  ;;  %v23494_v40 = vld [vmem:[#allocation152_spill] sm:$0xff] }
 0x7aa   : > { %14185 = vmatpush3.bf16.msra.mxu1 %v14184_v33  ;;  %13747 = vmatprep.subr.bf16.mxu0 %v13746_v39  ;;  %v13754_v3 = vpack.c.bf16 %v23449_v48, %v23447_v20  ;;  %v14194_v25 = vpack.c.bf16 %v23451_v41, %v23450_v38  ;;  %v23457_v33 = vand.u32 4294901760, %v19840_v43  ;;  %v23460_v8 = vand.u32 4294901760, %v23459_v13  ;;  %v23462_v39 = vld [vmem:[#allocation131_spill] sm:$0xff]  ;;  %v23496_v38 = vld [vmem:[#allocation82_spill] sm:$0xff] }
 0x7ab   : > { %14187 = vmatprep.subr.bf16.mxu1 %v14186_v23  ;;  %v13756_v15 = vpack.c.bf16 %v23455_v4, %v23453_v35  ;;  %v23461_v31 = vand.u32 4294901760, %v23230_v53  ;;  %v23463_v10 = vand.u32 4294901760, %v23462_v39  ;;  %v23464_v26 = vand.u32 4294901760, %v23233_v36  ;;  %v23492_v29 = vld [vmem:[#allocation151_spill] sm:$0xff]  ;;  %v23497_v41 = vld [vmem:[#allocation154_spill] sm:$0xff]  ;;  %v23501_v4 = vld [vmem:[#allocation185_spill] sm:$0xff] }
 0x7ac   : > { %v14196_v42 = vpack.c.bf16 %v23457_v33, %v23456_v28  ;;  %v13758_v61 = vpack.c.bf16 %v23460_v8, %v23458_v32  ;;  %v23465_v43 = vand.u32 4294901760, %v23234_v63  ;;  %v23467_v47 = vand.u32 4294901760, %v23466_v56  ;;  %v23499_v52 = vld [vmem:[#allocation155_spill] sm:$0xff]  ;;  %v23504_v33 = vld [vmem:[#allocation157_spill] sm:$0xff]  ;;  %v23506_v13 = vld [vmem:[#allocation186_spill] sm:$0xff] }
 0x7ad   : > { %13749 = vmatpush1.bf16.msra.mxu0 %v13748_v2  ;;  %v13760_v37 = vpack.c.bf16 %v23463_v10, %v23461_v31  ;;  %v23469_v7 = vand.u32 4294901760, %v23468_v5  ;;  %v23473_v63 = vand.u32 4294901760, %v23472_v6  ;;  %v23475_v45 = vand.u32 4294901760, %v23474_v51  ;;  %v23507_v8 = vld [vmem:[#allocation119_spill] sm:$0xff]  ;;  %v23509_v31 = vld [vmem:[#allocation125_spill] sm:$0xff]  ;;  %v23515_v5 = vld [vmem:[#allocation190_spill] sm:$0xff] }
 0x7ae   : > { %14189 = vmatpush3.bf16.msra.mxu1 %v14188_v21  ;;  %13751 = vmatprep.subr.bf16.mxu0 %v13750_v27  ;;  %v13762_v23 = vpack.c.bf16 %v23465_v43, %v23464_v26  ;;  %v23476_v21 = vld [vmem:[#allocation143_spill] sm:$0xff]  ;;  %v23482_v27 = vld [vmem:[#allocation146_spill] sm:$0xff]  ;;  %v23486_v44 = vand.u32 4294901760, %v23485_v12  ;;  %v23488_v54 = vand.u32 4294901760, %v23487_v24  ;;  %v23493_v20 = vand.u32 4294901760, %v23492_v29  ;;  %v23512_v26 = vld [vmem:[#allocation188_spill] sm:$0xff] }
 0x7af   : > { %14191 = vmatprep.subr.bf16.mxu1 %v14190_v0  ;;  %v13764_v53 = vpack.c.bf16 %v23469_v7, %v23467_v47  ;;  %v23477_v17 = vand.u32 4294901760, %v23476_v21  ;;  %v23483_v1 = vand.u32 4294901760, %v23482_v27  ;;  %v23484_v0 = vld [vmem:[#allocation68_spill] sm:$0xff]  ;;  %v23495_v48 = vand.u32 4294901760, %v23494_v40  ;;  %v20228_v43 = vld [vmem:[#allocation12 + $0x310] sm:$0xff]  ;;  %v23513_v56 = vld [vmem:[#allocation189_spill] sm:$0xff] }
 0x7b0   : > { %v23500_v35 = vand.u32 4294901760, %v23499_v52  ;;  %v23510_v39 = vand.u32 4294901760, %v23509_v31  ;;  %v23514_v47 = vld [vmem:[#allocation103_spill] sm:$0xff]  ;;  %v10048_v7 = vand.u32 4294901760, %v20228_v43  ;;  %v20306_v40 = vld [vmem:[#allocation12 + $0x3d0] sm:$0xff] }
 0x7b1   : > { %13753 = vmatpush1.bf16.msra.mxu0 %v13752_v9  ;;  %v13768_v57 = vpack.c.bf16 %v23477_v17, %v23475_v45  ;;  %v13772_v9 = vpack.c.bf16 %v23488_v54, %v23486_v44  ;;  %v20242_v6 = vld [vmem:[#allocation12 + $0x358] sm:$0xff]  ;;  %v23520_v45 = vld [vmem:[#allocation164_spill] sm:$0xff]  ;;  %v23527_v54 = vld [vmem:[#allocation130_spill] sm:$0xff]  ;;  %v10072_v52 = vand.u32 4294901760, %v20306_v40 }
 0x7b2   : > { %14193 = vmatpush3.bf16.msra.mxu1 %v14192_v16  ;;  %13755 = vmatprep.subr.bf16.mxu0 %v13754_v3  ;;  %v23491_v16 = vld [vmem:[#allocation183_spill] sm:$0xff]  ;;  %v13774_v3 = vpack.c.bf16 %v23495_v48, %v23493_v20  ;;  %v20254_v21 = vand.u32 4294901760, %v23520_v45  ;;  %v20283_v44 = vld [vmem:[#allocation12 + $0x3a0] sm:$0xff]  ;;  %v20308_v48 = vld [vmem:[#allocation12 + $0x3e8] sm:$0xff] }
 0x7b3   : > { %14195 = vmatprep.subr.bf16.mxu1 %v14194_v25  ;;  %v23498_v25 = vand.u32 4294901760, %v23497_v41  ;;  %v20285_v24 = vld [vmem:[#allocation12 + $0x3b8] sm:$0xff] }
 0x7b4   : > { %23521 = vst [vmem:[#allocation133_spill] sm:$0xff] %v20254_v21  ;;  %v20270_v27 = vsub.f32 %v23520_v45, %v20254_v21  ;;  %v10069_v29 = vand.u32 4294901760, %v20285_v24  ;;  %v23532_v41 = vld [vmem:[#allocation59_spill] sm:$0xff]  ;;  %v23547_v45 = vld [vmem:[#allocation172_spill] sm:$0xff] }
 0x7b5   : > { %13757 = vmatpush1.bf16.msra.mxu0 %v13756_v15  ;;  %v13776_v14 = vpack.c.bf16 %v23500_v35, %v23498_v25  ;;  %v23502_v15 = vld [vmem:[#allocation156_spill] sm:$0xff]  ;;  %v10075_v35 = vand.u32 4294901760, %v20308_v48 }
 0x7b6   : > { %14197 = vmatpush3.bf16.msra.mxu1 %v14196_v42  ;;  %13759 = vmatprep.subr.bf16.mxu0 %v13758_v61  ;;  %v23503_v28 = vand.u32 4294901760, %v23502_v15  ;;  %v23505_v42 = vand.u32 4294901760, %v23504_v33  ;;  %v23508_v61 = vand.u32 4294901760, %v23507_v8  ;;  %23525 = vst [vmem:[#allocation134_spill] sm:$0xff] %v20270_v27  ;;  %v20302_v20 = vand.u32 4294901760, %v20270_v27  ;;  %v23534_v15 = vld [vmem:[#allocation92_spill] sm:$0xff] }
 0x7b7   : > { %14199 = vmatprep.subr.bf16.mxu1 %v23314_v62  ;;  %v23470_v62 = vld [vmem:[#allocation139_spill] sm:$0xff]  ;;  %v20334_v33 = vld [vmem:[#allocation12 + $0x430] sm:$0xff] }
 0x7b8   : > { %v23471_v36 = vand.u32 4294901760, %v23470_v62  ;;  %v13778_v32 = vpack.c.bf16 %v23505_v42, %v23503_v28  ;;  %v13780_v10 = vpack.c.bf16 %v23510_v39, %v23508_v61  ;;  %v23516_v62 = vld [vmem:[#allocation107_spill] sm:$0xff]  ;;  %23530 = vst [vmem:[#allocation184_spill] sm:$0xff] %v20302_v20  ;;  %v23535_v28 = vld [vmem:[#allocation64_spill] sm:$0xff]  ;;  %v20336_v42 = vld [vmem:[#allocation12 + $0x448] sm:$0xff]  ;;  %v20355_v61 = vpack.c.bf16 %v10075_v35, %v10072_v52 }
 0x7b9   : > { %9896 = vmatmul.mubr.f32.vlgmr.msra.gmra.mrb[68].mxu1 %v23287_v50  ;;  %13761 = vmatpush1.bf16.msra.mxu0 %v13760_v37  ;;  %v23511_v37 = vld [vmem:[#allocation187_spill] sm:$0xff] }
 0x7ba   : > { %9901 = vmatprep.mubr.f32.mxu1 %v23290_v58  ;;  %14201 = vmatpush3.bf16.msra.mxu1 %v23316_v19  ;;  %v13766_v2 = vpack.c.bf16 %v23473_v63, %v23471_v36  ;;  %v23479_v19 = vld [vmem:[#allocation180_spill] sm:$0xff]  ;;  %23539 = vst [vmem:[#allocation67_spill] sm:$0xff] %v20355_v61 }
 0x7bb   : > { %13763 = vmatprep.subr.bf16.mxu0 %v13762_v23  ;;  %14203 = vmatprep.subr.bf16.mxu1 %v23318_v55  ;;  %v23480_v55 = vld [vmem:[#allocation145_spill] sm:$0xff]  ;;  %v20240_v36 = vld [vmem:[#allocation12 + $0x340] sm:$0xff] }
 0x7bc   : > { %v23481_v46 = vand.u32 4294901760, %v23480_v55  ;;  %v20230_v23 = vld [vmem:[#allocation12 + $0x328] sm:$0xff]  ;;  %v23517_v63 = vld [vmem:[#allocation112_spill] sm:$0xff]  ;;  %v10054_v17 = vand.u32 4294901760, %v20240_v36 }
 0x7bd   : > { %9903 = vmatmul.mubr.f32.gmra.mrb[70].mxu1 %v23293_v22  ;;  %13765 = vmatpush1.bf16.msra.mxu0 %v13764_v53  ;;  %v10051_v53 = vand.u32 4294901760, %v20230_v23  ;;  %v23523_v55 = vld [vmem:[#allocation193_spill] sm:$0xff] }
 0x7be   : > { %9908 = vmatprep.mubr.f32.mxu1 %v23296_v59  ;;  %14205 = vmatpush3.bf16.msra.mxu1 %v23478_v18  ;;  %v13770_v11 = vpack.c.bf16 %v23483_v1, %v23481_v46  ;;  %v20261_v18 = vld [vmem:[#allocation12 + $0x370] sm:$0xff]  ;;  %v23524_v46 = vld [vmem:[#allocation129_spill] sm:$0xff] }
 0x7bf   : > { %13767 = vmatprep.subr.bf16.mxu0 %v13766_v2  ;;  %14207 = vmatprep.subr.bf16.mxu1 %v23479_v19  ;;  %v23518_v2 = vld [vmem:[#allocation192_spill] sm:$0xff]  ;;  %v20251_v51 = vpack.c.bf16 %v10051_v53, %v10048_v7  ;;  %v20263_v19 = vld [vmem:[#allocation12 + $0x388] sm:$0xff] }
 0x7c0   : > { %v10063_v12 = vand.u32 4294901760, %v20263_v19 }
 0x7c1   : > { %9910 = vmatmul.mubr.f32.gmra.mrb[72].mxu1 %v23484_v0  ;;  %13769 = vmatpush1.bf16.msra.mxu0 %v13768_v57  ;;  %23519 = vst [vmem:[#allocation126_spill] sm:$0xff] %v20251_v51  ;;  %v10057_v57 = vand.u32 4294901760, %v20242_v6 }
 0x7c2   : > { %9915 = vmatprep.mubr.f32.mxu1 %v23489_v60  ;;  %14209 = vmatpush3.bf16.msra.mxu1 %v23490_v30 }
 0x7c3   : > { %13771 = vmatprep.subr.bf16.mxu0 %v13770_v11  ;;  %14211 = vmatprep.subr.bf16.mxu1 %v23491_v16  ;;  %v20277_v1 = vpack.c.bf16 %v10057_v57, %v10054_v17  ;;  %v10060_v11 = vand.u32 4294901760, %v20261_v18  ;;  %v10066_v16 = vand.u32 4294901760, %v20283_v44 }
 0x7c5   : > { %9917 = vmatmul.mubr.f32.gmra.mrb[74].mxu1 %v23496_v38  ;;  %13773 = vmatpush1.bf16.msra.mxu0 %v13772_v9  ;;  %23526 = vst [vmem:[#allocation181_spill] sm:$0xff] %v20277_v1  ;;  %v23528_v9 = vld [vmem:[#allocation45_spill] sm:$0xff]  ;;  %v20297_v30 = vpack.c.bf16 %v10063_v12, %v10060_v11  ;;  %v20319_v25 = vpack.c.bf16 %v10069_v29, %v10066_v16 }
 0x7c6   : > { %14213 = vmatpush3.bf16.msra.mxu1 %v23501_v4  ;;  %10019 = vmatprep.mubr.f32.mxu1 %v23265_v49  ;;  %v20328_v4 = vld [vmem:[#allocation12 + $0x418] sm:$0xff] }
 0x7c7   : > { %13775 = vmatprep.subr.bf16.mxu0 %v13774_v3  ;;  %14215 = vmatprep.subr.bf16.mxu1 %v23506_v13  ;;  %23529 = vst [vmem:[#allocation89_spill] sm:$0xff] %v20297_v30  ;;  %v23531_v3 = vld [vmem:[#allocation54_spill] sm:$0xff]  ;;  %23533 = vst [vmem:[#allocation62_spill] sm:$0xff] %v20319_v25  ;;  %v20346_v13 = vsub.f32 %v20230_v23, %v10051_v53  ;;  %v22127_v39 = vand.u32 4294901760, %v20328_v4  ;;  %v22121_v23 = vand.u32 4294901760, %v20336_v42  ;;  %v20378_v53 = vld [vmem:[#allocation12 + $0x460] sm:$0xff] }
 0x7c9   : > { %13777 = vmatpush1.bf16.msra.mxu0 %v13776_v14  ;;  %v20326_v14 = vld [vmem:[#allocation12 + $0x400] sm:$0xff]  ;;  %23537 = vst [vmem:[#allocation70_spill] sm:$0xff] %v20346_v13 }
 0x7ca   : > { %14217 = vmatpush3.bf16.msra.mxu1 %v23511_v37  ;;  %13779 = vmatprep.subr.bf16.mxu0 %v13778_v32  ;;  %v20341_v32 = vsub.f32 %v20228_v43, %v10048_v7  ;;  %v22128_v31 = vand.u32 4294901760, %v20326_v14  ;;  %v22126_v43 = vand.u32 4294901760, %v20334_v33 }
 0x7cb   : > { %14219 = vmatprep.subr.bf16.mxu1 %v23512_v26  ;;  %v23542_v26 = vld [vmem:[#allocation99_spill] sm:$0xff] }
 0x7cc   : > { %23536 = vst [vmem:[#allocation163_spill] sm:$0xff] %v20341_v32  ;;  %v20376_v7 = vpack.c.bf16 %v22127_v39, %v22128_v31 }
 0x7cd   : > { %13781 = vmatpush1.bf16.msra.mxu0 %v13780_v10  ;;  %v23540_v10 = vld [vmem:[#allocation167_spill] sm:$0xff] }
 0x7ce   : > { %14221 = vmatpush3.bf16.msra.mxu1 %v23513_v56  ;;  %13783 = vmatprep.subr.bf16.mxu0 %v23514_v47  ;;  %v20361_v37 = vand.u32 4294901760, %v23540_v10  ;;  %v23543_v56 = vld [vmem:[#allocation48_spill] sm:$0xff]  ;;  %v22120_v47 = vand.u32 4294901760, %v20341_v32  ;;  %23544 = vst [vmem:[#allocation162_spill] sm:$0xff] %v20376_v7 }
 0x7cf   : > { %14223 = vmatprep.subr.bf16.mxu1 %v23515_v5  ;;  %v22119_v5 = vand.u32 4294901760, %v20346_v13 }
 0x7d0   : > { %7824 = vmatmul.mubr.f32.vlgmr.msra.gmra.mrb[20].mxu0 %v23287_v50  ;;  %23541 = vst [vmem:[#allocation176_spill] sm:$0xff] %v20361_v37 }
 0x7d1   : > { %7830 = vmatprep.mubr.f32.mxu0 %v23290_v58  ;;  %13785 = vmatpush1.bf16.msra.mxu0 %v23516_v62  ;;  %v20380_v62 = vld [vmem:[#allocation12 + $0x478] sm:$0xff] }
 0x7d2   : > { %14225 = vmatpush3.bf16.msra.mxu1 %v23355_v34  ;;  %13787 = vmatprep.subr.bf16.mxu0 %v23517_v63  ;;  %v23522_v34 = vld [vmem:[#allocation122_spill] sm:$0xff]  ;;  %v20385_v63 = vsub.f32 %v20240_v36, %v10054_v17  ;;  %v23556_v17 = vld [vmem:[#allocation41_spill] sm:$0xff] }
 0x7d3   : > { %14227 = vmatprep.subr.bf16.mxu1 %v23518_v2  ;;  %v20390_v2 = vsub.f32 %v20242_v6, %v10057_v57  ;;  %v20411_v6 = vpack.c.bf16 %v22121_v23, %v22126_v43  ;;  %v22123_v57 = vand.u32 4294901760, %v20378_v53  ;;  %v23573_v43 = vld [vmem:[#allocation116_spill] sm:$0xff] }
 0x7d4   : > { %7832 = vmatmul.mubr.f32.gmra.mrb[22].mxu0 %v23293_v22  ;;  %23545 = vst [vmem:[#allocation161_spill] sm:$0xff] %v20385_v63 }
 0x7d5   : > { %7838 = vmatprep.mubr.f32.mxu0 %v23296_v59  ;;  %13789 = vmatpush1.bf16.msra.mxu0 %v23522_v34  ;;  %23546 = vst [vmem:[#allocation81_spill] sm:$0xff] %v20390_v2  ;;  %v20393_v34 = vand.u32 4294901760, %v23547_v45  ;;  %23555 = vst [vmem:[#allocation168_spill] sm:$0xff] %v20411_v6 }
 0x7d6   : > { %14229 = vmatpush3.bf16.msra.mxu1 %v23523_v55  ;;  %13791 = vmatprep.subr.bf16.mxu0 %v23524_v46  ;;  %v20399_v46 = vsub.f32 %v23540_v10, %v20361_v37  ;;  %v22125_v10 = vand.u32 4294901760, %v20390_v2 }
 0x7d7   : > { %14231 = vmatprep.subr.bf16.mxu1 %v20251_v51  ;;  %23548 = vst [vmem:[#allocation65_spill] sm:$0xff] %v20393_v34 }
 0x7d8   : > { %7840 = vmatmul.mubr.f32.gmra.mrb[24].mxu0 %v23484_v0  ;;  %23550 = vst [vmem:[#allocation166_spill] sm:$0xff] %v20399_v46 }
 0x7d9   : > { %10021 = vmatmul.mubr.f32.vlgmr.msra.gmra.mrb[76].mxu1 %v23287_v50  ;;  %7846 = vmatprep.mubr.f32.mxu0 %v23489_v60 }
 0x7da   : > { %13793 = vmatpush1.bf16.msra.mxu0 %v23527_v54  ;;  %10026 = vmatprep.mubr.f32.mxu1 %v23290_v58  ;;  %v23551_v54 = vld [vmem:[#allocation177_spill] sm:$0xff] }
 0x7db   : > { %14233 = vmatpush3.bf16.msra.mxu1 %v20251_v51  ;;  %13795 = vmatprep.subr.bf16.mxu0 %v23528_v9  ;;  %v20402_v9 = vand.u32 4294901760, %v23551_v54 }
 0x7dc   : > { %7848 = vmatmul.mubr.f32.gmra.mrb[26].mxu0 %v23496_v38  ;;  %14235 = vmatprep.subr.bf16.mxu1 %v20277_v1 }
 0x7dd   : > { %10028 = vmatmul.mubr.f32.gmra.mrb[78].mxu1 %v23293_v22  ;;  %7983 = vmatprep.mubr.f32.mxu0 %v23265_v49  ;;  %v8115_v49 = vsub.f32 %v20270_v27, %v20302_v20  ;;  %23552 = vst [vmem:[#allocation86_spill] sm:$0xff] %v20402_v9 }
 0x7de   : > { %13797 = vmatpush1.bf16.msra.mxu0 %v23531_v3  ;;  %10033 = vmatprep.mubr.f32.mxu1 %v23296_v59  ;;  %v23553_v3 = vld [vmem:[#allocation76_spill] sm:$0xff] }
 0x7df   : > { %14237 = vmatpush3.bf16.msra.mxu1 %v20277_v1  ;;  %13799 = vmatprep.subr.bf16.mxu0 %v23532_v41  ;;  %v20349_v8 = vand.u32 4294901760, %v8115_v49  ;;  %v22122_v41 = vand.u32 4294901760, %v20380_v62  ;;  %v10172_v49 = vsub.f32 %v20341_v32, %v22120_v47  ;;  %v23562_v47 = vld [vmem:[#allocation102_spill] sm:$0xff]  ;;  %v6510_v1 = vld [vmem:[#allocation12 + $0x368] sm:$0xff] }
 0x7e0   : > { %14239 = vmatprep.subr.bf16.mxu1 %v20297_v30 }
 0x7e1   : > { %10035 = vmatmul.mubr.f32.gmra.mrb[80].mxu1 %v23484_v0  ;;  %23538 = vst [vmem:[#allocation169_spill] sm:$0xff] %v20349_v8 }
 0x7e2   : > { %13801 = vmatpush1.bf16.msra.mxu0 %v23534_v15  ;;  %10040 = vmatprep.mubr.f32.mxu1 %v23489_v60  ;;  %v10179_v15 = vsub.f32 %v20346_v13, %v22119_v5  ;;  %v20443_v5 = vand.u32 4294901760, %v20399_v46 }
 0x7e3   : > { %14241 = vmatpush3.bf16.msra.mxu1 %v20297_v30  ;;  %13803 = vmatprep.subr.bf16.mxu0 %v23535_v28  ;;  %v22124_v28 = vand.u32 4294901760, %v20385_v63  ;;  %v6506_v30 = vld [vmem:[#allocation12 + $0x348] sm:$0xff] }
 0x7e4   : > { %14243 = vmatprep.subr.bf16.mxu1 %v20319_v25  ;;  %23561 = vst [vmem:[#allocation174_spill] sm:$0xff] %v20443_v5 }
 0x7e5   : > { %10042 = vmatmul.mubr.f32.gmra.mrb[82].mxu1 %v23496_v38 }
 0x7e6   : > { %13805 = vmatpush1.bf16.msra.mxu0 %v23542_v26  ;;  %12114 = vmatprep.mubr.f32.mxu1 %v20349_v8  ;;  %v20429_v26 = vsub.f32 %v20261_v18, %v10060_v11  ;;  %v20451_v18 = vsub.f32 %v20283_v44, %v10066_v16  ;;  %v20460_v11 = vsub.f32 %v23551_v54, %v20402_v9  ;;  %v10173_v44 = vand.u32 4294901760, %v10172_v49 }
 0x7e7   : > { %14245 = vmatpush3.bf16.msra.mxu1 %v20319_v25  ;;  %13807 = vmatprep.subr.bf16.mxu0 %v23543_v56  ;;  %v20434_v56 = vsub.f32 %v20263_v19, %v10063_v12  ;;  %v20456_v19 = vsub.f32 %v20285_v24, %v10069_v29  ;;  %v23567_v12 = vld [vmem:[#allocation109_spill] sm:$0xff]  ;;  %v10180_v16 = vand.u32 4294901760, %v10179_v15  ;;  %v10186_v24 = vsub.f32 %v20385_v63, %v22124_v28  ;;  %v23571_v15 = vld [vmem:[#allocation111_spill] sm:$0xff] }
 0x7e8   : > { %14247 = vmatprep.subr.bf16.mxu1 %v20355_v61  ;;  %23557 = vst [vmem:[#allocation171_spill] sm:$0xff] %v20429_v26  ;;  %23564 = vst [vmem:[#allocation60_spill] sm:$0xff] %v20451_v18  ;;  %v10193_v29 = vsub.f32 %v20390_v2, %v22125_v10  ;;  %v8126_v49 = vsub.f32 %v20399_v46, %v20443_v5  ;;  %v20494_v31 = vand.u32 4294901760, %v20460_v11 }
 0x7e9   : > { %v20395_v55 = vpop.f32.mrb[28].mxu1  ;;  %23558 = vst [vmem:[#allocation165_spill] sm:$0xff] %v20434_v56  ;;  %23565 = vst [vmem:[#allocation57_spill] sm:$0xff] %v20456_v19  ;;  %v14262_v39 = vpack.c.bf16 %v10180_v16, %v10173_v44  ;;  %v20499_v54 = vsub.f32 %v20306_v40, %v10072_v52  ;;  %v10187_v10 = vand.u32 4294901760, %v10186_v24  ;;  %v23577_v44 = vand.u32 4294901760, %v20434_v56 }
 0x7ea   : > { %23549 = vst [vmem:[#allocation179_spill] sm:$0xff] %v20395_v55  ;;  %13809 = vmatpush1.bf16.msra.mxu0 %v23553_v3  ;;  %v20405_v36 = vpop.f32.mrb[29].mxu1  ;;  %v20438_v3 = vsub.f32 %v23547_v45, %v20393_v34  ;;  %23566 = vst [vmem:[#allocation91_spill] sm:$0xff] %v20460_v11  ;;  %v22129_v45 = vand.u32 4294901760, %v20429_v26  ;;  %v10194_v28 = vand.u32 4294901760, %v10193_v29  ;;  %v20517_v52 = vand.u32 4294901760, %v8126_v49 }
 0x7eb   : > { %23554 = vst [vmem:[#allocation80_spill] sm:$0xff] %v20405_v36  ;;  %14249 = vmatpush3.bf16.msra.mxu1 %v20355_v61  ;;  %13811 = vmatprep.subr.bf16.mxu0 %v23556_v17  ;;  %23574 = vst [vmem:[#allocation90_spill] sm:$0xff] %v20494_v31  ;;  %v10207_v16 = vsub.f32 %v20434_v56, %v23577_v44  ;;  %v23582_v24 = vand.u32 4294901760, %v20451_v18  ;;  %v23584_v44 = vld [vmem:[#allocation137_spill] sm:$0xff]  ;;  %v23590_v49 = vld [vmem:[#allocation138_spill] sm:$0xff] }
 0x7ec   : > { %14251 = vmatprep.subr.bf16.mxu1 %v20376_v7  ;;  %23559 = vst [vmem:[#allocation160_spill] sm:$0xff] %v20438_v3  ;;  %23575 = vst [vmem:[#allocation93_spill] sm:$0xff] %v20499_v54 }
 0x7ed   : > { %v20440_v17 = vpop.f32.mrb[30].mxu1  ;;  %23579 = vst [vmem:[#allocation110_spill] sm:$0xff] %v20517_v52  ;;  %v10214_v29 = vsub.f32 %v20451_v18, %v23582_v24  ;;  %v10208_v36 = vand.u32 4294901760, %v10207_v16  ;;  %v23593_v16 = vld [vmem:[#allocation141_spill] sm:$0xff] }
 0x7ee   : > { %23560 = vst [vmem:[#allocation170_spill] sm:$0xff] %v20440_v17  ;;  %13813 = vmatpush1.bf16.msra.mxu0 %v23562_v47  ;;  %v20446_v23 = vpop.f32.mrb[31].mxu1  ;;  %v20468_v47 = vpack.c.bf16 %v22122_v41, %v22123_v57  ;;  %v20482_v41 = vand.u32 4294901760, %v20438_v3  ;;  %v14266_v17 = vpack.c.bf16 %v10194_v28, %v10187_v10 }
 0x7ef   : > { %23563 = vst [vmem:[#allocation79_spill] sm:$0xff] %v20446_v23  ;;  %14253 = vmatpush3.bf16.msra.mxu1 %v20376_v7  ;;  %13815 = vmatprep.subr.bf16.mxu0 %v23567_v12  ;;  %v23587_v23 = vand.u32 4294901760, %v20328_v4  ;;  %v23613_v7 = vld [vmem:[#allocation158_spill] sm:$0xff] }
 0x7f0   : > { %23568 = vst [vmem:[#allocation94_spill] sm:$0xff] %v20468_v47  ;;  %14255 = vmatprep.subr.bf16.mxu1 %v20411_v6  ;;  %23570 = vst [vmem:[#allocation75_spill] sm:$0xff] %v20482_v41  ;;  %v8137_v40 = vsub.f32 %v20438_v3, %v20482_v41  ;;  %v6500_v41 = vld [vmem:[#allocation12 + $0x318] sm:$0xff] }
 0x7f1   : > { %v20479_v12 = vpop.f32.mrb[32].mxu1  ;;  %v20540_v24 = vsub.f32 %v20328_v4, %v23587_v23  ;;  %v23591_v4 = vand.u32 4294901760, %v20499_v54  ;;  %v23616_v3 = vld [vmem:[#allocation159_spill] sm:$0xff] }
 0x7f2   : > { %23569 = vst [vmem:[#allocation69_spill] sm:$0xff] %v20479_v12  ;;  %13817 = vmatpush1.bf16.msra.mxu0 %v23571_v15  ;;  %v20487_v57 = vpop.f32.mrb[33].mxu1  ;;  %v20504_v15 = vsub.f32 %v20308_v48, %v10075_v35  ;;  %v23580_v48 = vld [vmem:[#allocation132_spill] sm:$0xff] }
 0x7f3   : > { %23572 = vst [vmem:[#allocation173_spill] sm:$0xff] %v20487_v57  ;;  %14257 = vmatpush3.bf16.msra.mxu1 %v20411_v6  ;;  %13819 = vmatprep.subr.bf16.mxu0 %v23573_v43  ;;  %v10200_v43 = vsub.f32 %v20429_v26, %v22129_v45  ;;  %v23583_v45 = vand.u32 4294901760, %v20456_v19  ;;  %23588 = vst [vmem:[#allocation113_spill] sm:$0xff] %v20540_v24  ;;  %v10228_v23 = vsub.f32 %v20499_v54, %v23591_v4 }
 0x7f4   : > { %23576 = vst [vmem:[#allocation191_spill] sm:$0xff] %v20504_v15  ;;  %14259 = vmatprep.subr.bf16.mxu1 %v20468_v47  ;;  %v23592_v55 = vand.u32 4294901760, %v20504_v15  ;;  %v8021_v6 = vand.u32 4294901760, %v6500_v41 }
 0x7f5   : > { %v20513_v57 = vpop.f32.mrb[34].mxu1  ;;  %v10221_v12 = vsub.f32 %v20456_v19, %v23583_v45  ;;  %v8148_v45 = vsub.f32 %v20460_v11, %v20494_v31 }
 0x7f6   : > { %23578 = vst [vmem:[#allocation104_spill] sm:$0xff] %v20513_v57  ;;  %13821 = vmatpush1.bf16.msra.mxu0 %v23580_v48  ;;  %v20520_v35 = vpop.f32.mrb[35].mxu1  ;;  %v23585_v48 = vand.u32 4294901760, %v20326_v14  ;;  %v20544_v57 = vand.u32 4294901760, %v8137_v40  ;;  %v10235_v28 = vsub.f32 %v20504_v15, %v23592_v55  ;;  %v23599_v55 = vld [vmem:[#allocation144_spill] sm:$0xff] }
 0x7f7   : > { %23581 = vst [vmem:[#allocation78_spill] sm:$0xff] %v20520_v35  ;;  %14261 = vmatpush3.bf16.msra.mxu1 %v20468_v47  ;;  %13823 = vmatprep.subr.bf16.mxu0 %v23584_v44  ;;  %v10201_v44 = vand.u32 4294901760, %v10200_v43  ;;  %v20558_v40 = vand.u32 4294901760, %v8148_v45  ;;  %v10229_v45 = vand.u32 4294901760, %v10228_v23  ;;  %v23604_v23 = vand.u32 4294901760, %v20380_v62  ;;  %v6504_v47 = vld [vmem:[#allocation12 + $0x338] sm:$0xff] }
 0x7f8   : > { %v20535_v35 = vsub.f32 %v20326_v14, %v23585_v48  ;;  %14263 = vmatprep.subr.bf16.mxu1 %v14262_v39  ;;  %23589 = vst [vmem:[#allocation117_spill] sm:$0xff] %v20544_v57  ;;  %v10215_v14 = vand.u32 4294901760, %v10214_v29  ;;  %v10222_v48 = vand.u32 4294901760, %v10221_v12  ;;  %v8023_v61 = vand.u32 4294901760, %v6504_v47 }
 0x7f9   : > { %23594 = vst [vmem:[#allocation118_spill] sm:$0xff] %v20558_v40  ;;  %v14270_v12 = vpack.c.bf16 %v10208_v36, %v10201_v44  ;;  %v10236_v36 = vand.u32 4294901760, %v10235_v28  ;;  %v23600_v44 = vand.u32 4294901760, %v20540_v24  ;;  %v20590_v28 = vsub.f32 %v20380_v62, %v23604_v23 }
 0x7fa   : > { %23586 = vst [vmem:[#allocation178_spill] sm:$0xff] %v20535_v35  ;;  %12115 = vmatmul.mubr.f32.vlgmr.msra.gmra.mrb[84].mxu1 %v20517_v52  ;;  %13825 = vmatpush1.bf16.msra.mxu0 %v23590_v49  ;;  %v22130_v10 = vand.u32 4294901760, %v20535_v35  ;;  %v23597_v49 = vand.u32 4294901760, %v20336_v42  ;;  %v14274_v43 = vpack.c.bf16 %v10222_v48, %v10215_v14  ;;  %v6498_v14 = vld [vmem:[#allocation12 + $0x308] sm:$0xff]  ;;  %v6519_v52 = vld [vmem:[#allocation12 + $0x3b0] sm:$0xff] }
 0x7fb   : > { %12117 = vmatprep.mubr.f32.mxu1 %v20544_v57  ;;  %14265 = vmatpush3.bf16.msra.mxu1 %v14262_v39  ;;  %v23595_v39 = vand.u32 4294901760, %v20334_v33  ;;  %23605 = vst [vmem:[#allocation127_spill] sm:$0xff] %v20590_v28  ;;  %v6512_v57 = vld [vmem:[#allocation12 + $0x378] sm:$0xff] }
 0x7fc   : > { %13827 = vmatprep.subr.bf16.mxu0 %v23593_v16  ;;  %14267 = vmatprep.subr.bf16.mxu1 %v14266_v17  ;;  %v20568_v4 = vsub.f32 %v20336_v42, %v23597_v49  ;;  %v10249_v16 = vsub.f32 %v20540_v24, %v23600_v44  ;;  %v23601_v42 = vld [vmem:[#allocation149_spill] sm:$0xff]  ;;  %v23606_v49 = vld [vmem:[#allocation150_spill] sm:$0xff]  ;;  %v14278_v44 = vpack.c.bf16 %v10236_v36, %v10229_v45 }
 0x7fd   : > { %v20563_v29 = vsub.f32 %v20334_v33, %v23595_v39  ;;  %v10242_v33 = vsub.f32 %v20535_v35, %v22130_v10  ;;  %v6501_v39 = vld [vmem:[#allocation12 + $0x320] sm:$0xff]  ;;  %v23611_v45 = vld [vmem:[#allocation121_spill] sm:$0xff] }
 0x7fe   : > { %23598 = vst [vmem:[#allocation85_spill] sm:$0xff] %v20568_v4  ;;  %12118 = vmatmul.mubr.f32.gmra.mrb[86].mxu1 %v20558_v40  ;;  %13829 = vmatpush1.bf16.msra.mxu0 %v23599_v55  ;;  %v23607_v55 = vld [vmem:[#allocation153_spill] sm:$0xff]  ;;  %v10250_v10 = vand.u32 4294901760, %v10249_v16  ;;  %v8019_v16 = vand.u32 4294901760, %v6501_v39 }
 0x7ff   : > { %23596 = vst [vmem:[#allocation124_spill] sm:$0xff] %v20563_v29  ;;  %14269 = vmatpush3.bf16.msra.mxu1 %v14266_v17  ;;  %12152 = vmatprep.mubr.f32.mxu1 %v20254_v21  ;;  %v23602_v17 = vand.u32 4294901760, %v20378_v53  ;;  %v23608_v31 = vand.u32 4294901760, %v20563_v29  ;;  %v6507_v21 = vld [vmem:[#allocation12 + $0x350] sm:$0xff] }
 0x800   : > { %13831 = vmatprep.subr.bf16.mxu0 %v23601_v42  ;;  %14271 = vmatprep.subr.bf16.mxu1 %v14270_v12  ;;  %v10243_v42 = vand.u32 4294901760, %v10242_v33  ;;  %v8015_v33 = vand.u32 4294901760, %v6498_v14  ;;  %v8027_v25 = vand.u32 4294901760, %v6507_v21 }
 0x801   : > { %v20585_v48 = vsub.f32 %v20378_v53, %v23602_v17  ;;  %v10256_v53 = vsub.f32 %v20563_v29, %v23608_v31  ;;  %v23609_v17 = vand.u32 4294901760, %v20568_v4 }
 0x802   : > { %13833 = vmatpush1.bf16.msra.mxu0 %v23606_v49  ;;  %v23610_v49 = vld [vmem:[#allocation120_spill] sm:$0xff]  ;;  %v14282_v36 = vpack.c.bf16 %v10250_v10, %v10243_v42  ;;  %v20624_v8 = vsub.f32 %v6498_v14, %v8015_v33 }
 0x803   : > { %23603 = vst [vmem:[#allocation182_spill] sm:$0xff] %v20585_v48  ;;  %14273 = vmatpush3.bf16.msra.mxu1 %v14270_v12  ;;  %13835 = vmatprep.subr.bf16.mxu0 %v23607_v55  ;;  %v10263_v62 = vsub.f32 %v20568_v4, %v23609_v17  ;;  %v22149_v23 = vand.u32 4294901760, %v20585_v48  ;;  %v22154_v12 = vand.u32 4294901760, %v20590_v28  ;;  %v6497_v55 = vld [vmem:[#allocation12 + $0x300] sm:$0xff]  ;;  %v10257_v31 = vand.u32 4294901760, %v10256_v53 }
 0x804   : > { %14275 = vmatprep.subr.bf16.mxu1 %v14274_v43  ;;  %v8017_v42 = vand.u32 4294901760, %v6497_v55 }
 0x805   : > { %v10264_v5 = vand.u32 4294901760, %v10263_v62  ;;  %v10270_v17 = vsub.f32 %v20585_v48, %v22149_v23  ;;  %v20614_v62 = vpack.c.bf16 %v8019_v16, %v8015_v33  ;;  %v6503_v23 = vld [vmem:[#allocation12 + $0x330] sm:$0xff] }
 0x806   : > { %13837 = vmatpush1.bf16.msra.mxu0 %v23610_v49  ;;  %v20617_v46 = vpack.c.bf16 %v8021_v6, %v8017_v42 }
 0x807   : > { %14277 = vmatpush3.bf16.msra.mxu1 %v14274_v43  ;;  %13839 = vmatprep.subr.bf16.mxu0 %v23611_v45  ;;  %v10277_v43 = vsub.f32 %v20590_v28, %v22154_v12  ;;  %v23612_v45 = vld [vmem:[#allocation123_spill] sm:$0xff]  ;;  %23615 = vst [vmem:[#allocation40_spill] sm:$0xff] %v20614_v62  ;;  %v14286_v20 = vpack.c.bf16 %v10264_v5, %v10257_v31  ;;  %v10271_v12 = vand.u32 4294901760, %v10270_v17  ;;  %v8031_v31 = vand.u32 4294901760, %v6510_v1 }
 0x808   : > { %14279 = vmatprep.subr.bf16.mxu1 %v14278_v44  ;;  %23617 = vst [vmem:[#allocation50_spill] sm:$0xff] %v20617_v46  ;;  %v20622_v5 = vpack.c.bf16 %v8027_v25, %v8023_v61  ;;  %v20629_v28 = vsub.f32 %v6497_v55, %v8017_v42  ;;  %v14294_v55 = vpack.c.bf16 %v20346_v13, %v20341_v32  ;;  %v6522_v42 = vld [vmem:[#allocation12 + $0x3c8] sm:$0xff]  ;;  %v6527_v32 = vld [vmem:[#allocation12 + $0x3f0] sm:$0xff] }
 0x809   : > { %v11274_v49 = vpop.f32.mrb[36].mxu1  ;;  %v10278_v11 = vand.u32 4294901760, %v10277_v43  ;;  %v6516_v43 = vld [vmem:[#allocation12 + $0x398] sm:$0xff]  ;;  %v8047_v13 = vand.u32 4294901760, %v6522_v42 }
 0x80a   : > { %13841 = vmatpush1.bf16.msra.mxu0 %v23612_v45  ;;  %v11275_v10 = vpop.f32.mrb[37].mxu1  ;;  %v6513_v45 = vld [vmem:[#allocation12 + $0x380] sm:$0xff]  ;;  %23619 = vst [vmem:[#allocation42_spill] sm:$0xff] %v20622_v5  ;;  %v8039_v33 = vand.u32 4294901760, %v6516_v43 }
 0x80b   : > { %14281 = vmatpush3.bf16.msra.mxu1 %v14278_v44  ;;  %13843 = vmatprep.subr.bf16.mxu0 %v23613_v7  ;;  %v20612_v53 = vadd.f32 %v11275_v10, %v11274_v49  ;;  %v8025_v7 = vand.u32 4294901760, %v6503_v23  ;;  %v8029_v49 = vand.u32 4294901760, %v6506_v30  ;;  %v6509_v10 = vld [vmem:[#allocation12 + $0x360] sm:$0xff]  ;;  %v8035_v17 = vand.u32 4294901760, %v6513_v45 }
 0x80c   : > { %14283 = vmatprep.subr.bf16.mxu1 %v14282_v36 }
 0x80d   : > { %23614 = vst [vmem:[#allocation128_spill] sm:$0xff] %v20612_v53  ;;  %v11277_v40 = vpop.f32.mrb[38].mxu1  ;;  %v14290_v53 = vpack.c.bf16 %v10278_v11, %v10271_v12  ;;  %v8043_v11 = vand.u32 4294901760, %v6519_v52  ;;  %v6515_v12 = vld [vmem:[#allocation12 + $0x390] sm:$0xff] }
 0x80e   : > { %13845 = vmatpush1.bf16.msra.mxu0 %v23616_v3  ;;  %v11278_v44 = vpop.f32.mrb[39].mxu1  ;;  %v20626_v3 = vsub.f32 %v6501_v39, %v8019_v16  ;;  %v20637_v39 = vpack.c.bf16 %v8029_v49, %v8025_v7  ;;  %v20644_v16 = vpack.c.bf16 %v8035_v17, %v8031_v31 }
 0x80f   : > { %14285 = vmatpush3.bf16.msra.mxu1 %v14282_v36  ;;  %13847 = vmatprep.subr.bf16.mxu0 %v20614_v62  ;;  %v20620_v51 = vadd.f32 %v11278_v44, %v11277_v40  ;;  %v20631_v36 = vsub.f32 %v6500_v41, %v8021_v6  ;;  %v8033_v44 = vand.u32 4294901760, %v6509_v10  ;;  %v8037_v62 = vand.u32 4294901760, %v6512_v57 }
 0x810   : > { %14287 = vmatprep.subr.bf16.mxu1 %v14286_v20  ;;  %23620 = vst [vmem:[#allocation53_spill] sm:$0xff] %v20637_v39  ;;  %v20640_v6 = vsub.f32 %v6507_v21, %v8027_v25  ;;  %23621 = vst [vmem:[#allocation74_spill] sm:$0xff] %v20644_v16  ;;  %v20655_v25 = vsub.f32 %v6513_v45, %v8035_v17  ;;  %v6531_v45 = vld [vmem:[#allocation12 + $0x410] sm:$0xff] }
 0x811   : > { %23618 = vst [vmem:[#allocation88_spill] sm:$0xff] %v20620_v51  ;;  %7985 = vmatmul.mubr.f32.vlgmr.msra.gmra.mrb[20].mxu0 %v23287_v50  ;;  %v11280_v40 = vpop.f32.mrb[40].mxu1  ;;  %v20635_v51 = vsub.f32 %v6504_v47, %v8023_v61  ;;  %v6518_v50 = vld [vmem:[#allocation12 + $0x3a8] sm:$0xff]  ;;  %v20648_v61 = vsub.f32 %v6506_v30, %v8029_v49  ;;  %v20650_v47 = vsub.f32 %v6510_v1, %v8031_v31 }
 0x812   : > { %7991 = vmatprep.mubr.f32.mxu0 %v23290_v58  ;;  %13849 = vmatpush1.bf16.msra.mxu0 %v20617_v46  ;;  %v11281_v14 = vpop.f32.mrb[41].mxu1  ;;  %v20646_v58 = vsub.f32 %v6503_v23, %v8025_v7  ;;  %v6521_v23 = vld [vmem:[#allocation12 + $0x3c0] sm:$0xff]  ;;  %v6524_v7 = vld [vmem:[#allocation12 + $0x3d8] sm:$0xff]  ;;  %v20661_v30 = vsub.f32 %v6509_v10, %v8033_v44  ;;  %v20663_v49 = vsub.f32 %v6512_v57, %v8037_v62 }
 0x813   : > { %14289 = vmatpush3.bf16.msra.mxu1 %v14286_v20  ;;  %13851 = vmatprep.subr.bf16.mxu0 %v20622_v5  ;;  %v20642_v41 = vadd.f32 %v11281_v14, %v11280_v40  ;;  %v6525_v20 = vld [vmem:[#allocation12 + $0x3e0] sm:$0xff]  ;;  %v20657_v40 = vpack.c.bf16 %v8037_v62, %v8033_v44  ;;  %v8041_v14 = vand.u32 4294901760, %v6515_v12  ;;  %v8045_v5 = vand.u32 4294901760, %v6518_v50 }
 0x814   : > { %14291 = vmatprep.subr.bf16.mxu1 %v14290_v53  ;;  %v20665_v31 = vpack.c.bf16 %v8043_v11, %v8039_v33  ;;  %v20670_v46 = vsub.f32 %v6516_v43, %v8039_v33  ;;  %v20672_v10 = vsub.f32 %v6519_v52, %v8043_v11  ;;  %v14298_v57 = vpack.c.bf16 %v20390_v2, %v20385_v63  ;;  %v6534_v2 = vld [vmem:[#allocation12 + $0x428] sm:$0xff]  ;;  %v6537_v63 = vld [vmem:[#allocation12 + $0x440] sm:$0xff] }
 0x815   : > { %7993 = vmatmul.mubr.f32.gmra.mrb[22].mxu0 %v23293_v22  ;;  %v11283_v21 = vpop.f32.mrb[42].mxu1  ;;  %23622 = vst [vmem:[#allocation58_spill] sm:$0xff] %v20657_v40  ;;  %v6528_v22 = vld [vmem:[#allocation12 + $0x3f8] sm:$0xff]  ;;  %v8049_v62 = vand.u32 4294901760, %v6521_v23  ;;  %v8053_v44 = vand.u32 4294901760, %v6524_v7  ;;  %v8059_v33 = vand.u32 4294901760, %v6531_v45  ;;  %v14302_v52 = vpack.c.bf16 %v20434_v56, %v20429_v26 }
 0x816   : > { %7999 = vmatprep.mubr.f32.mxu0 %v23296_v59  ;;  %13853 = vmatpush1.bf16.msra.mxu0 %v20637_v39  ;;  %v11284_v1 = vpop.f32.mrb[43].mxu1  ;;  %23623 = vst [vmem:[#allocation55_spill] sm:$0xff] %v20665_v31  ;;  %v8051_v59 = vand.u32 4294901760, %v6525_v20  ;;  %v6530_v39 = vld [vmem:[#allocation12 + $0x408] sm:$0xff]  ;;  %v8055_v43 = vand.u32 4294901760, %v6528_v22  ;;  %v8057_v11 = vand.u32 4294901760, %v6527_v32 }
 0x817   : > { %14293 = vmatpush3.bf16.msra.mxu1 %v14290_v53  ;;  %13855 = vmatprep.subr.bf16.mxu0 %v20644_v16  ;;  %v20668_v17 = vadd.f32 %v11284_v1, %v11283_v21  ;;  %v20677_v53 = vpack.c.bf16 %v8045_v5, %v8041_v14  ;;  %v20679_v21 = vsub.f32 %v6515_v12, %v8041_v14  ;;  %v8061_v16 = vand.u32 4294901760, %v6530_v39  ;;  %v6533_v56 = vld [vmem:[#allocation12 + $0x420] sm:$0xff]  ;;  %v6536_v26 = vld [vmem:[#allocation12 + $0x438] sm:$0xff] }
 0x818   : > { %14295 = vmatprep.subr.bf16.mxu1 %v14294_v55  ;;  %v20683_v1 = vsub.f32 %v6518_v50, %v8045_v5  ;;  %v20691_v12 = vsub.f32 %v6522_v42, %v8047_v13  ;;  %v20693_v14 = vsub.f32 %v6525_v20, %v8051_v59  ;;  %v20698_v5 = vsub.f32 %v6521_v23, %v8049_v62 }
 0x819   : > { %8001 = vmatmul.mubr.f32.gmra.mrb[24].mxu0 %v23484_v0  ;;  %23624 = vst [vmem:[#allocation61_spill] sm:$0xff] %v20677_v53  ;;  %v20689_v0 = vpack.c.bf16 %v8051_v59, %v8047_v13  ;;  %v20700_v50 = vsub.f32 %v6524_v7, %v8053_v44  ;;  %v14306_v13 = vpack.c.bf16 %v20456_v19, %v20451_v18  ;;  %v8063_v42 = vand.u32 4294901760, %v6534_v2 }
 0x81a   : > { %12153 = vmatmul.mubr.f32.vlgmr.msra.gmra.mrb[84].mxu1 %v20361_v37  ;;  %8007 = vmatprep.mubr.f32.mxu0 %v23489_v60  ;;  %23625 = vst [vmem:[#allocation72_spill] sm:$0xff] %v20683_v1  ;;  %23627 = vst [vmem:[#allocation97_spill] sm:$0xff] %v20691_v12  ;;  %v20696_v60 = vpack.c.bf16 %v8053_v44, %v8049_v62  ;;  %v20708_v20 = vsub.f32 %v6528_v22, %v8055_v43  ;;  %v23635_v59 = vmov 0.0   ;;  %v8069_v62 = vand.u32 4294901760, %v6536_v26  ;;  %v6540_v44 = vld [vmem:[#allocation12 + $0x458] sm:$0xff] }
 0x81b   : > { %13857 = vmatpush1.bf16.msra.mxu0 %v20657_v40  ;;  %12155 = vmatprep.mubr.f32.mxu1 %v20393_v34  ;;  %23626 = vst [vmem:[#allocation56_spill] sm:$0xff] %v20689_v0  ;;  %23628 = vst [vmem:[#allocation96_spill] sm:$0xff] %v20693_v14  ;;  %v20703_v40 = vpack.c.bf16 %v8059_v33, %v8055_v43  ;;  %v20710_v23 = vsub.f32 %v6531_v45, %v8059_v33  ;;  %v8071_v18 = vand.u32 4294901760, %v6540_v44 }
 0x81c   : > { %14297 = vmatpush3.bf16.msra.mxu1 %v14294_v55  ;;  %13859 = vmatprep.subr.bf16.mxu0 %v20665_v31  ;;  %23629 = vst [vmem:[#allocation98_spill] sm:$0xff] %v20696_v60  ;;  %23630 = vst [vmem:[#allocation71_spill] sm:$0xff] %v20700_v50  ;;  %v8067_v55 = vand.u32 4294901760, %v6537_v63  ;;  %v20712_v7 = vpack.c.bf16 %v8061_v16, %v8057_v11  ;;  %v6543_v31 = vld [vmem:[#allocation12 + $0x470] sm:$0xff]  ;;  %v20720_v22 = vsub.f32 %v6527_v32, %v8057_v11 }
 0x81d   : > { %8009 = vmatmul.mubr.f32.gmra.mrb[26].mxu0 %v23496_v38  ;;  %14299 = vmatprep.subr.bf16.mxu1 %v14298_v57  ;;  %23631 = vst [vmem:[#allocation101_spill] sm:$0xff] %v20703_v40  ;;  %23632 = vst [vmem:[#allocation100_spill] sm:$0xff] %v20708_v20  ;;  %v8065_v38 = vand.u32 4294901760, %v6533_v56  ;;  %v20722_v45 = vsub.f32 %v6530_v39, %v8061_v16  ;;  %v14310_v43 = vpack.c.bf16 %v20504_v15, %v20499_v54 }
 0x81e   : > { %12156 = vmatmul.mubr.f32.gmra.mrb[86].mxu1 %v20402_v9  ;;  %23633 = vst [vmem:[#allocation49_spill] sm:$0xff] %v20710_v23  ;;  %23634 = vst [vmem:[#allocation63_spill] sm:$0xff] %v20712_v7  ;;  %8111 = vmatprep.mubr.f32.mxu0 %v23635_v59  ;;  %v20726_v33 = vpack.c.bf16 %v8067_v55, %v8063_v42  ;;  %v6539_v9 = vld [vmem:[#allocation12 + $0x450] sm:$0xff]  ;;  %v20737_v16 = vsub.f32 %v6537_v63, %v8067_v55  ;;  %v23640_v19 = vand.u32 4294901760, %v20626_v3 }
 0x81f   : > { %13861 = vmatpush1.bf16.msra.mxu0 %v20677_v53  ;;  %12190 = vmatprep.mubr.f32.mxu1 %v20270_v27  ;;  %v20728_v53 = vsub.f32 %v6534_v2, %v8063_v42  ;;  %v20739_v11 = vpack.c.bf16 %v8069_v62, %v8065_v38  ;;  %v23639_v2 = vand.u32 4294901760, %v20624_v8  ;;  %v20748_v32 = vsub.f32 %v6533_v56, %v8065_v38 }
 0x820   : > { %14301 = vmatpush3.bf16.msra.mxu1 %v14298_v57  ;;  %13863 = vmatprep.subr.bf16.mxu0 %v20689_v0  ;;  %23636 = vst [vmem:[#allocation39_spill] sm:$0xff] %v20726_v33  ;;  %v8075_v57 = vand.u32 4294901760, %v6543_v31  ;;  %v20732_v0 = vld [vmem:[#allocation12 + $0x468] sm:$0xff]  ;;  %23637 = vst [vmem:[#allocation95_spill] sm:$0xff] %v20737_v16  ;;  %v8171_v27 = vsub.f32 %v20626_v3, %v23640_v19  ;;  %v20750_v39 = vsub.f32 %v6536_v26, %v8069_v62 }
 0x821   : > { %14303 = vmatprep.subr.bf16.mxu1 %v14302_v52  ;;  %23638 = vst [vmem:[#allocation105_spill] sm:$0xff] %v20739_v11  ;;  %v8159_v42 = vsub.f32 %v20624_v8, %v23639_v2  ;;  %v23641_v2 = vand.u32 4294901760, %v20629_v28  ;;  %v23642_v19 = vand.u32 4294901760, %v20631_v36  ;;  %v23644_v26 = vand.u32 4294901760, %v20635_v51 }
 0x822   : > { %v20761_v56 = vpack.c.bf16 %v8075_v57, %v8071_v18  ;;  %v23645_v62 = vand.u32 4294901760, %v20640_v6  ;;  %v20771_v63 = vsub.f32 %v6540_v44, %v8071_v18  ;;  %v23648_v34 = vand.u32 4294901760, %v20646_v58 }
 0x823   : > { %13865 = vmatpush1.bf16.msra.mxu0 %v20696_v60  ;;  %v8073_v60 = vand.u32 4294901760, %v6539_v9  ;;  %v8165_v54 = vsub.f32 %v20629_v28, %v23641_v2  ;;  %v8183_v38 = vsub.f32 %v20635_v51, %v23644_v26  ;;  %v20773_v2 = vsub.f32 %v6543_v31, %v8075_v57 }
 0x824   : > { %14305 = vmatpush3.bf16.msra.mxu1 %v14302_v52  ;;  %13867 = vmatprep.subr.bf16.mxu0 %v20703_v40  ;;  %v8177_v52 = vsub.f32 %v20631_v36, %v23642_v19  ;;  %23643 = vst [vmem:[#allocation106_spill] sm:$0xff] %v20761_v56  ;;  %v8195_v55 = vsub.f32 %v20640_v6, %v23645_v62  ;;  %23646 = vst [vmem:[#allocation108_spill] sm:$0xff] %v20771_v63  ;;  %v8160_v40 = vand.u32 4294901760, %v8159_v42 }
 0x825   : > { %14307 = vmatprep.subr.bf16.mxu1 %v14306_v13  ;;  %23647 = vst [vmem:[#allocation115_spill] sm:$0xff] %v20773_v2  ;;  %v8172_v19 = vand.u32 4294901760, %v8171_v27  ;;  %v14314_v26 = vpack.c.bf16 %v20540_v24, %v20535_v35  ;;  %v8189_v62 = vsub.f32 %v20646_v58, %v23648_v34  ;;  %v23649_v15 = vand.u32 4294901760, %v20648_v61 }
 0x826   : > { %v23650_v31 = vand.u32 4294901760, %v20732_v0  ;;  %v8178_v44 = vand.u32 4294901760, %v8177_v52  ;;  %v22220_v57 = vand.u32 4294901760, %v20661_v30  ;;  %v8184_v24 = vand.u32 4294901760, %v8183_v38  ;;  %v23655_v52 = vld [vmem:[#allocation128_spill] sm:$0xff] }
 0x827   : > { %13869 = vmatpush1.bf16.msra.mxu0 %v20712_v7  ;;  %v8201_v7 = vsub.f32 %v20648_v61, %v23649_v15  ;;  %v8196_v34 = vand.u32 4294901760, %v8195_v55  ;;  %v23652_v35 = vand.u32 4294901760, %v20650_v47  ;;  %v13878_v37 = vpack.c.bf16 %v8172_v19, %v8160_v40 }
 0x828   : > { %14309 = vmatpush3.bf16.msra.mxu1 %v14306_v13  ;;  %13871 = vmatprep.subr.bf16.mxu0 %v20726_v33  ;;  %v20787_v27 = vpack.c.bf16 %v23650_v31, %v8073_v60  ;;  %v8166_v13 = vand.u32 4294901760, %v8165_v54  ;;  %v20790_v33 = vsub.f32 %v6539_v9, %v8073_v60  ;;  %v8190_v60 = vand.u32 4294901760, %v8189_v62  ;;  %v23654_v31 = vld [vmem:[#allocation127_spill] sm:$0xff] }
 0x829   : > { %14311 = vmatprep.subr.bf16.mxu1 %v14310_v43  ;;  %v8207_v15 = vsub.f32 %v20650_v47, %v23652_v35  ;;  %v8202_v55 = vand.u32 4294901760, %v8201_v7  ;;  %v23653_v38 = vand.u32 4294901760, %v20655_v25  ;;  %v14318_v40 = vpack.c.bf16 %v20568_v4, %v20563_v29  ;;  %v23659_v4 = vld [vmem:[#allocation169_spill] sm:$0xff] }
 0x82a   : > { %23651 = vst [vmem:[#allocation114_spill] sm:$0xff] %v20787_v27  ;;  %v11318_v42 = vpop.f32.mrb[44].mxu1  ;;  %v13880_v19 = vpack.c.bf16 %v8178_v44, %v8166_v13  ;;  %v14322_v54 = vpack.c.bf16 %v23654_v31, %v20585_v48  ;;  %v13882_v62 = vpack.c.bf16 %v8196_v34, %v8184_v24  ;;  %v23656_v13 = vand.u32 4294901760, %v20663_v49 }
 0x82b   : > { %13873 = vmatpush1.bf16.msra.mxu0 %v20739_v11  ;;  %v11319_v18 = vpop.f32.mrb[45].mxu1  ;;  %v8219_v35 = vsub.f32 %v20655_v25, %v23653_v38  ;;  %v23657_v11 = vand.u32 4294901760, %v20670_v46  ;;  %v22229_v24 = vand.u32 4294901760, %v20683_v1  ;;  %v22228_v38 = vand.u32 4294901760, %v20691_v12 }
 0x82c   : > { %14313 = vmatpush3.bf16.msra.mxu1 %v14310_v43  ;;  %13875 = vmatprep.subr.bf16.mxu0 %v20761_v56  ;;  %v11320_v9 = vadd.f32 %v11319_v18, %v11318_v42  ;;  %v8213_v43 = vsub.f32 %v20661_v30, %v22220_v57  ;;  %v8208_v42 = vand.u32 4294901760, %v8207_v15  ;;  %v8225_v44 = vsub.f32 %v20663_v49, %v23656_v13 }
 0x82d   : > { %14315 = vmatprep.subr.bf16.mxu1 %v14314_v26  ;;  %v8231_v31 = vsub.f32 %v20670_v46, %v23657_v11  ;;  %v23658_v57 = vand.u32 4294901760, %v20672_v10  ;;  %v13884_v15 = vpack.c.bf16 %v8202_v55, %v8190_v60  ;;  %v22227_v13 = vand.u32 4294901760, %v20693_v14 }
 0x82e   : > { %v20811_v18 = vadd.f32 %v11320_v9, %v23655_v52  ;;  %v11321_v7 = vpop.f32.mrb[46].mxu1  ;;  %v8220_v9 = vand.u32 4294901760, %v8219_v35  ;;  %v22226_v48 = vand.u32 4294901760, %v20698_v5  ;;  %v22230_v60 = vand.u32 4294901760, %v20708_v20 }
 0x82f   : > { %13877 = vmatpush1.bf16.msra.mxu0 %v20787_v27  ;;  %v11322_v56 = vpop.f32.mrb[47].mxu1  ;;  %v8243_v52 = vsub.f32 %v20672_v10, %v23658_v57  ;;  %v8214_v27 = vand.u32 4294901760, %v8213_v43  ;;  %v23660_v57 = vld [vmem:[#allocation88_spill] sm:$0xff]  ;;  %v22233_v55 = vand.u32 4294901760, %v20710_v23  ;;  %v8226_v43 = vand.u32 4294901760, %v8225_v44 }
 0x830   : > { %14317 = vmatpush3.bf16.msra.mxu1 %v14314_v26  ;;  %13879 = vmatprep.subr.bf16.mxu0 %v13878_v37  ;;  %v11323_v34 = vadd.f32 %v11322_v56, %v11321_v7  ;;  %v23661_v37 = vand.u32 4294901760, %v20679_v21  ;;  %v8232_v7 = vand.u32 4294901760, %v8231_v31  ;;  %v8261_v31 = vsub.f32 %v20698_v5, %v22226_v48 }
 0x831   : > { %14319 = vmatprep.subr.bf16.mxu1 %v14318_v40  ;;  %v8244_v11 = vand.u32 4294901760, %v8243_v52  ;;  %v23662_v44 = vand.u32 4294901760, %v20700_v50 }
 0x832   : > { %8117 = vmatmul.mubr.f32.vlgmr.msra.gmra.mrb[20].mxu0 %v23659_v4  ;;  %v20831_v29 = vadd.f32 %v11323_v34, %v23660_v57  ;;  %v11324_v26 = vpop.f32.mrb[48].mxu1  ;;  %v8237_v56 = vsub.f32 %v20679_v21, %v23661_v37  ;;  %v8249_v4 = vsub.f32 %v20683_v1, %v22229_v24  ;;  %v13886_v57 = vpack.c.bf16 %v8220_v9, %v8208_v42  ;;  %v23663_v42 = vld [vmem:[#allocation110_spill] sm:$0xff] }
 0x833   : > { %13881 = vmatpush1.bf16.msra.mxu0 %v13880_v19  ;;  %8122 = vmatprep.mubr.f32.mxu0 %v23635_v59  ;;  %v11325_v35 = vpop.f32.mrb[49].mxu1  ;;  %v8255_v37 = vsub.f32 %v20691_v12, %v22228_v38  ;;  %v8267_v19 = vsub.f32 %v20693_v14, %v22227_v13  ;;  %v13888_v13 = vpack.c.bf16 %v8226_v43, %v8214_v27  ;;  %v8262_v48 = vand.u32 4294901760, %v8261_v31 }
 0x834   : > { %14321 = vmatpush3.bf16.msra.mxu1 %v14318_v40  ;;  %13883 = vmatprep.subr.bf16.mxu0 %v13882_v62  ;;  %v11326_v34 = vadd.f32 %v11325_v35, %v11324_v26  ;;  %v8273_v40 = vsub.f32 %v20700_v50, %v23662_v44  ;;  %v8279_v26 = vsub.f32 %v20708_v20, %v22230_v60  ;;  %v8238_v38 = vand.u32 4294901760, %v8237_v56  ;;  %v23664_v20 = vld [vmem:[#allocation126_spill] sm:$0xff] }
 0x835   : > { %14323 = vmatprep.subr.bf16.mxu1 %v14322_v54  ;;  %v8291_v35 = vsub.f32 %v20710_v23, %v22233_v55  ;;  %v8256_v24 = vand.u32 4294901760, %v8255_v37  ;;  %v22243_v60 = vand.u32 4294901760, %v20728_v53  ;;  %v22236_v62 = vand.u32 4294901760, %v20737_v16 }
 0x836   : > { %8128 = vmatmul.mubr.f32.gmra.mrb[22].mxu0 %v23663_v42  ;;  %v20857_v52 = vadd.f32 %v11326_v34, %v20642_v41  ;;  %v11327_v9 = vpop.f32.mrb[50].mxu1  ;;  %v13890_v42 = vpack.c.bf16 %v8244_v11, %v8232_v7  ;;  %v8250_v41 = vand.u32 4294901760, %v8249_v4  ;;  %v8268_v55 = vand.u32 4294901760, %v8267_v19  ;;  %v23666_v11 = vld [vmem:[#allocation117_spill] sm:$0xff]  ;;  %v23670_v19 = vld [vmem:[#allocation166_spill] sm:$0xff] }
 0x837   : > { %13885 = vmatpush1.bf16.msra.mxu0 %v13884_v15  ;;  %8133 = vmatprep.mubr.f32.mxu0 %v23635_v59  ;;  %v11328_v44 = vpop.f32.mrb[51].mxu1  ;;  %v8274_v15 = vand.u32 4294901760, %v8273_v40  ;;  %v23665_v23 = vand.u32 4294901760, %v20720_v22  ;;  %v8280_v56 = vand.u32 4294901760, %v8279_v26  ;;  %v8292_v43 = vand.u32 4294901760, %v8291_v35  ;;  %v23671_v40 = vld [vmem:[#allocation160_spill] sm:$0xff] }
 0x838   : > { %14325 = vmatpush3.bf16.msra.mxu1 %v14322_v54  ;;  %13887 = vmatprep.subr.bf16.mxu0 %v13886_v57  ;;  %v11329_v34 = vadd.f32 %v11328_v44, %v11327_v9  ;;  %v23667_v7 = vand.u32 4294901760, %v20722_v45  ;;  %v23668_v57 = vand.u32 4294901760, %v20732_v0  ;;  %v22242_v31 = vand.u32 4294901760, %v20748_v32  ;;  %v23672_v35 = vld [vmem:[#allocation118_spill] sm:$0xff]  ;;  %v23673_v44 = vld [vmem:[#allocation181_spill] sm:$0xff] }
 0x839   : > { %14327 = vmatprep.subr.bf16.mxu1 %v23664_v20  ;;  %v8285_v27 = vsub.f32 %v20720_v22, %v23665_v23  ;;  %v13892_v23 = vpack.c.bf16 %v8250_v41, %v8238_v38  ;;  %v8303_v9 = vsub.f32 %v20728_v53, %v22243_v60  ;;  %v22239_v26 = vand.u32 4294901760, %v20771_v63  ;;  %v23693_v60 = vld [vmem:[#allocation174_spill] sm:$0xff] }
 0x83a   : > { %8139 = vmatmul.mubr.f32.gmra.mrb[24].mxu0 %v23666_v11  ;;  %v20875_v54 = vadd.f32 %v11329_v34, %v20668_v17  ;;  %v8297_v4 = vsub.f32 %v20722_v45, %v23667_v7  ;;  %v20883_v37 = vsub.f32 %v20732_v0, %v23668_v57  ;;  %v22237_v17 = vand.u32 4294901760, %v20750_v39  ;;  %v23674_v57 = vld [vmem:[#allocation91_spill] sm:$0xff] }
 0x83b   : > { %12191 = vmatmul.mubr.f32.vlgmr.msra.gmra.mrb[84].mxu1 %v23670_v19  ;;  %13889 = vmatpush1.bf16.msra.mxu0 %v13888_v13  ;;  %v8315_v0 = vsub.f32 %v20737_v16, %v22236_v62  ;;  %v22238_v38 = vand.u32 4294901760, %v20773_v2  ;;  %v13894_v13 = vpack.c.bf16 %v8268_v55, %v8256_v24  ;;  %v13896_v41 = vpack.c.bf16 %v8274_v15, %v8262_v48  ;;  %v23675_v48 = vld [vmem:[#allocation184_spill] sm:$0xff] }
 0x83c   : > { %23669 = vst [vmem:[#allocation131_spill] sm:$0xff] %v20883_v37  ;;  %12193 = vmatprep.mubr.f32.mxu1 %v23671_v40  ;;  %14329 = vmatpush3.bf16.msra.mxu1 %v23664_v20  ;;  %v13898_v34 = vpack.c.bf16 %v8292_v43, %v8280_v56  ;;  %v8286_v11 = vand.u32 4294901760, %v8285_v27  ;;  %v8298_v7 = vand.u32 4294901760, %v8297_v4  ;;  %v8309_v62 = vsub.f32 %v20748_v32, %v22242_v31  ;;  %v23676_v4 = vld [vmem:[#allocation89_spill] sm:$0xff] }
 0x83d   : > { %8144 = vmatprep.mubr.f32.mxu0 %v23635_v59  ;;  %13891 = vmatprep.subr.bf16.mxu0 %v13890_v42  ;;  %v8321_v42 = vsub.f32 %v20750_v39, %v22237_v17  ;;  %v22240_v24 = vand.u32 4294901760, %v20790_v33  ;;  %v22241_v55 = vand.u32 4294901760, %v20883_v37  ;;  %v8304_v15 = vand.u32 4294901760, %v8303_v9 }
 0x83e   : > { %8150 = vmatmul.mubr.f32.gmra.mrb[26].mxu0 %v23672_v35  ;;  %14331 = vmatprep.subr.bf16.mxu1 %v23673_v44  ;;  %v8316_v27 = vand.u32 4294901760, %v8315_v0  ;;  %v8327_v56 = vsub.f32 %v20771_v63, %v22239_v26  ;;  %v8339_v43 = vsub.f32 %v20773_v2, %v22238_v38  ;;  %v8310_v35 = vand.u32 4294901760, %v8309_v62 }
 0x83f   : > { %12194 = vmatmul.mubr.f32.gmra.mrb[86].mxu1 %v23674_v57  ;;  %13893 = vmatpush1.bf16.msra.mxu0 %v13892_v23  ;;  %v13900_v23 = vpack.c.bf16 %v8298_v7, %v8286_v11  ;;  %v8322_v17 = vand.u32 4294901760, %v8321_v42  ;;  %v8333_v9 = vsub.f32 %v20790_v33, %v22240_v24  ;;  %v8345_v0 = vsub.f32 %v20883_v37, %v22241_v55  ;;  %v23677_v11 = vld [vmem:[#allocation62_spill] sm:$0xff]  ;;  %v23678_v24 = vld [vmem:[#allocation67_spill] sm:$0xff] }
 0x840   : > { %14333 = vmatpush3.bf16.msra.mxu1 %v23673_v44  ;;  %12228 = vmatprep.mubr.f32.mxu1 %v23675_v48  ;;  %v8328_v38 = vand.u32 4294901760, %v8327_v56  ;;  %v8340_v26 = vand.u32 4294901760, %v8339_v43 }
 0x841   : > { %13895 = vmatprep.subr.bf16.mxu0 %v13894_v13  ;;  %14335 = vmatprep.subr.bf16.mxu1 %v23676_v4  ;;  %v13902_v13 = vpack.c.bf16 %v8316_v27, %v8304_v15  ;;  %v8334_v62 = vand.u32 4294901760, %v8333_v9  ;;  %v8346_v7 = vand.u32 4294901760, %v8345_v0  ;;  %v13910_v15 = vpack.c.bf16 %v20626_v3, %v20624_v8  ;;  %v23680_v9 = vld [vmem:[#allocation168_spill] sm:$0xff] }
 0x842   : > { %8380 = vmatprep.mubr.f32.mxu0 %v23635_v59  ;;  %v13906_v42 = vpack.c.bf16 %v8340_v26, %v8328_v38  ;;  %v13912_v38 = vpack.c.bf16 %v20631_v36, %v20629_v28  ;;  %v13916_v0 = vpack.c.bf16 %v20648_v61, %v20646_v58 }
 0x843   : > { %13897 = vmatpush1.bf16.msra.mxu0 %v13896_v41  ;;  %v13904_v41 = vpack.c.bf16 %v8322_v17, %v8310_v35  ;;  %v13908_v31 = vpack.c.bf16 %v8346_v7, %v8334_v62  ;;  %v23679_v17 = vld [vmem:[#allocation162_spill] sm:$0xff] }
 0x844   : > { %14337 = vmatpush3.bf16.msra.mxu1 %v23676_v4  ;;  %13899 = vmatprep.subr.bf16.mxu0 %v13898_v34  ;;  %v23682_v7 = vld [vmem:[#allocation94_spill] sm:$0xff] }
 0x845   : > { %14339 = vmatprep.subr.bf16.mxu1 %v23677_v11 }
 0x847   : > { %13901 = vmatpush1.bf16.msra.mxu0 %v13900_v23  ;;  %v13914_v23 = vpack.c.bf16 %v20640_v6, %v20635_v51 }
 0x848   : > { %14341 = vmatpush3.bf16.msra.mxu1 %v23677_v11  ;;  %13903 = vmatprep.subr.bf16.mxu0 %v13902_v13 }
 0x849   : > { %14343 = vmatprep.subr.bf16.mxu1 %v23678_v24 }
 0x84b   : > { %13905 = vmatpush1.bf16.msra.mxu0 %v13904_v41  ;;  %v11362_v55 = vpop.f32.mrb[52].mxu1  ;;  %v13918_v41 = vpack.c.bf16 %v20655_v25, %v20650_v47 }
 0x84c   : > { %14345 = vmatpush3.bf16.msra.mxu1 %v23678_v24  ;;  %13907 = vmatprep.subr.bf16.mxu0 %v13906_v42  ;;  %v11363_v34 = vpop.f32.mrb[53].mxu1  ;;  %v23683_v42 = vld [vmem:[#allocation163_spill] sm:$0xff] }
 0x84d   : > { %v11364_v27 = vadd.f32 %v11363_v34, %v11362_v55  ;;  %14347 = vmatprep.subr.bf16.mxu1 %v23679_v17  ;;  %v23681_v55 = vld [vmem:[#allocation133_spill] sm:$0xff]  ;;  %v23685_v34 = vld [vmem:[#allocation70_spill] sm:$0xff] }
 0x84f   : > { %v20935_v56 = vadd.f32 %v11364_v27, %v20811_v18  ;;  %13909 = vmatpush1.bf16.msra.mxu0 %v13908_v31  ;;  %v11365_v26 = vpop.f32.mrb[54].mxu1 }
 0x850   : > { %14349 = vmatpush3.bf16.msra.mxu1 %v23679_v17  ;;  %13911 = vmatprep.subr.bf16.mxu0 %v13910_v15  ;;  %v11366_v43 = vpop.f32.mrb[55].mxu1  ;;  %v23686_v15 = vand.u32 4294901760, %v23685_v34 }
 0x851   : > { %v11367_v35 = vadd.f32 %v11366_v43, %v11365_v26  ;;  %14351 = vmatprep.subr.bf16.mxu1 %v23680_v9  ;;  %v23687_v26 = vld [vmem:[#allocation176_spill] sm:$0xff] }
 0x852   : > { %8382 = vmatmul.mubr.f32.vlgmr.msra.gmra.mrb[20].mxu0 %v23681_v55 }
 0x853   : > { %v20945_v18 = vadd.f32 %v11367_v35, %v20831_v29  ;;  %13913 = vmatpush1.bf16.msra.mxu0 %v13912_v38  ;;  %8387 = vmatprep.mubr.f32.mxu0 %v23635_v59  ;;  %v11368_v31 = vpop.f32.mrb[56].mxu1  ;;  %v23684_v29 = vand.u32 4294901760, %v23683_v42  ;;  %v23688_v42 = vld [vmem:[#allocation65_spill] sm:$0xff] }
 0x854   : > { %14353 = vmatpush3.bf16.msra.mxu1 %v23680_v9  ;;  %13915 = vmatprep.subr.bf16.mxu0 %v13914_v23  ;;  %v11369_v13 = vpop.f32.mrb[57].mxu1  ;;  %v13920_v23 = vpack.c.bf16 %v20663_v49, %v20661_v30 }
 0x855   : > { %v11370_v62 = vadd.f32 %v11369_v13, %v11368_v31  ;;  %14355 = vmatprep.subr.bf16.mxu1 %v23682_v7  ;;  %v14358_v27 = vpack.c.bf16 %v23686_v15, %v23684_v29  ;;  %v13922_v13 = vpack.c.bf16 %v20672_v10, %v20670_v46 }
 0x856   : > { %8389 = vmatmul.mubr.f32.gmra.mrb[22].mxu0 %v23687_v26 }
 0x857   : > { %v20960_v38 = vadd.f32 %v11370_v62, %v20857_v52  ;;  %13917 = vmatpush1.bf16.msra.mxu0 %v13916_v0  ;;  %8394 = vmatprep.mubr.f32.mxu0 %v23635_v59  ;;  %v11371_v43 = vpop.f32.mrb[58].mxu1  ;;  %v23689_v52 = vld [vmem:[#allocation161_spill] sm:$0xff] }
 0x858   : > { %14357 = vmatpush3.bf16.msra.mxu1 %v23682_v7  ;;  %13919 = vmatprep.subr.bf16.mxu0 %v13918_v41  ;;  %v11372_v35 = vpop.f32.mrb[59].mxu1  ;;  %v23690_v62 = vand.u32 4294901760, %v23689_v52  ;;  %v23691_v0 = vld [vmem:[#allocation81_spill] sm:$0xff]  ;;  %v13924_v41 = vpack.c.bf16 %v20683_v1, %v20679_v21  ;;  %v23695_v52 = vld [vmem:[#allocation171_spill] sm:$0xff] }
 0x859   : > { %v11373_v31 = vadd.f32 %v11372_v35, %v11371_v43  ;;  %14359 = vmatprep.subr.bf16.mxu1 %v14358_v27  ;;  %v23692_v29 = vand.u32 4294901760, %v23691_v0  ;;  %v23694_v43 = vld [vmem:[#allocation75_spill] sm:$0xff]  ;;  %v13926_v35 = vpack.c.bf16 %v20693_v14, %v20691_v12  ;;  %v23697_v0 = vld [vmem:[#allocation165_spill] sm:$0xff] }
 0x85a   : > { %8396 = vmatmul.mubr.f32.gmra.mrb[24].mxu0 %v23688_v42  ;;  %v23702_v1 = vld [vmem:[#allocation49_spill] sm:$0xff] }
 0x85b   : > { %v14362_v34 = vpack.c.bf16 %v23692_v29, %v23690_v62  ;;  %v20974_v15 = vadd.f32 %v11373_v31, %v20875_v54  ;;  %12229 = vmatmul.mubr.f32.vlgmr.msra.gmra.mrb[84].mxu1 %v23693_v60  ;;  %13921 = vmatpush1.bf16.msra.mxu0 %v13920_v23  ;;  %v23696_v62 = vand.u32 4294901760, %v23695_v52  ;;  %v23698_v54 = vand.u32 4294901760, %v23697_v0  ;;  %v23699_v29 = vld [vmem:[#allocation86_spill] sm:$0xff]  ;;  %v23703_v52 = vld [vmem:[#allocation60_spill] sm:$0xff] }
 0x85c   : > { %12231 = vmatprep.mubr.f32.mxu1 %v23694_v43  ;;  %14361 = vmatpush3.bf16.msra.mxu1 %v14358_v27  ;;  %v23700_v23 = vld [vmem:[#allocation90_spill] sm:$0xff]  ;;  %v13928_v27 = vpack.c.bf16 %v20700_v50, %v20698_v5  ;;  %v23704_v0 = vand.u32 4294901760, %v23703_v52 }
 0x85d   : > { %8401 = vmatprep.mubr.f32.mxu0 %v23635_v59  ;;  %13923 = vmatprep.subr.bf16.mxu0 %v13922_v13  ;;  %v14366_v31 = vpack.c.bf16 %v23698_v54, %v23696_v62  ;;  %v23701_v13 = vld [vmem:[#allocation100_spill] sm:$0xff]  ;;  %v23705_v62 = vld [vmem:[#allocation57_spill] sm:$0xff] }
 0x85e   : > { %8403 = vmatmul.mubr.f32.gmra.mrb[26].mxu0 %v23699_v29  ;;  %14363 = vmatprep.subr.bf16.mxu1 %v14362_v34  ;;  %v13930_v14 = vpack.c.bf16 %v23702_v1, %v23701_v13  ;;  %v23706_v54 = vand.u32 4294901760, %v23705_v62  ;;  %v23707_v1 = vld [vmem:[#allocation93_spill] sm:$0xff]  ;;  %v23709_v13 = vld [vmem:[#allocation191_spill] sm:$0xff] }
 0x85f   : > { %12232 = vmatmul.mubr.f32.gmra.mrb[86].mxu1 %v23700_v23  ;;  %13925 = vmatpush1.bf16.msra.mxu0 %v13924_v41  ;;  %v13932_v41 = vpack.c.bf16 %v20722_v45, %v20720_v22  ;;  %v23710_v50 = vand.u32 4294901760, %v23709_v13  ;;  %v23713_v62 = vld [vmem:[#allocation113_spill] sm:$0xff] }
 0x860   : > { %14365 = vmatpush3.bf16.msra.mxu1 %v14362_v34  ;;  %12266 = vmatprep.mubr.f32.mxu1 %v23681_v55  ;;  %v14370_v12 = vpack.c.bf16 %v23706_v54, %v23704_v0  ;;  %v13934_v34 = vpack.c.bf16 %v20737_v16, %v20728_v53  ;;  %v13936_v0 = vpack.c.bf16 %v20750_v39, %v20748_v32  ;;  %v23714_v54 = vand.u32 4294901760, %v23713_v62 }
 0x861   : > { %13927 = vmatprep.subr.bf16.mxu0 %v13926_v35  ;;  %14367 = vmatprep.subr.bf16.mxu1 %v14366_v31  ;;  %v23708_v35 = vand.u32 4294901760, %v23707_v1 }
 0x862   : > { %8537 = vmatprep.mubr.f32.mxu0 %v23635_v59 }
 0x863   : > { %13929 = vmatpush1.bf16.msra.mxu0 %v13928_v27  ;;  %v14374_v52 = vpack.c.bf16 %v23710_v50, %v23708_v35  ;;  %v13938_v27 = vpack.c.bf16 %v20773_v2, %v20771_v63  ;;  %v13940_v50 = vpack.c.bf16 %v20883_v37, %v20790_v33  ;;  %v23717_v35 = vld [vmem:[#allocation85_spill] sm:$0xff] }
 0x864   : > { %14369 = vmatpush3.bf16.msra.mxu1 %v14366_v31  ;;  %13931 = vmatprep.subr.bf16.mxu0 %v13930_v14  ;;  %v23711_v14 = vld [vmem:[#allocation178_spill] sm:$0xff]  ;;  %v23718_v2 = vand.u32 4294901760, %v23717_v35 }
 0x865   : > { %14371 = vmatprep.subr.bf16.mxu1 %v14370_v12  ;;  %v23712_v31 = vand.u32 4294901760, %v23711_v14 }
 0x867   : > { %13933 = vmatpush1.bf16.msra.mxu0 %v13932_v41  ;;  %v14378_v16 = vpack.c.bf16 %v23714_v54, %v23712_v31 }
 0x868   : > { %14373 = vmatpush3.bf16.msra.mxu1 %v14370_v12  ;;  %13935 = vmatprep.subr.bf16.mxu0 %v13934_v34  ;;  %v23715_v12 = vld [vmem:[#allocation124_spill] sm:$0xff] }
 0x869   : > { %14375 = vmatprep.subr.bf16.mxu1 %v14374_v52  ;;  %v23716_v34 = vand.u32 4294901760, %v23715_v12  ;;  %v23724_v12 = vld [vmem:[#allocation134_spill] sm:$0xff] }
 0x86b   : > { %13937 = vmatpush1.bf16.msra.mxu0 %v13936_v0  ;;  %v11406_v1 = vpop.f32.mrb[60].mxu1  ;;  %v14382_v63 = vpack.c.bf16 %v23718_v2, %v23716_v34  ;;  %v23719_v0 = vld [vmem:[#allocation40_spill] sm:$0xff] }
 0x86c   : > { %14377 = vmatpush3.bf16.msra.mxu1 %v14374_v52  ;;  %13939 = vmatprep.subr.bf16.mxu0 %v13938_v27  ;;  %v11407_v13 = vpop.f32.mrb[61].mxu1  ;;  %v23720_v52 = vld [vmem:[#allocation182_spill] sm:$0xff] }
 0x86d   : > { %v11408_v41 = vadd.f32 %v11407_v13, %v11406_v1  ;;  %14379 = vmatprep.subr.bf16.mxu1 %v14378_v16  ;;  %v23721_v27 = vand.u32 4294901760, %v23720_v52  ;;  %v23722_v1 = vld [vmem:[#allocation127_spill] sm:$0xff] }
 0x86e   : > { %v23723_v13 = vand.u32 4294901760, %v23722_v1 }
 0x86f   : > { %v21022_v14 = vadd.f32 %v11408_v41, %v20935_v56  ;;  %13941 = vmatpush1.bf16.msra.mxu0 %v13940_v50  ;;  %v11409_v31 = vpop.f32.mrb[62].mxu1  ;;  %v23725_v56 = vld [vmem:[#allocation50_spill] sm:$0xff] }
 0x870   : > { %14381 = vmatpush3.bf16.msra.mxu1 %v14378_v16  ;;  %13943 = vmatprep.subr.bf16.mxu0 %v23719_v0  ;;  %v11410_v62 = vpop.f32.mrb[63].mxu1  ;;  %v14386_v37 = vpack.c.bf16 %v23723_v13, %v23721_v27  ;;  %v23726_v50 = vld [vmem:[#allocation42_spill] sm:$0xff]  ;;  %v23737_v27 = vld [vmem:[#allocation105_spill] sm:$0xff] }
 0x871   : > { %v11411_v54 = vadd.f32 %v11410_v62, %v11409_v31  ;;  %14383 = vmatprep.subr.bf16.mxu1 %v14382_v63  ;;  %v23727_v31 = vld [vmem:[#allocation53_spill] sm:$0xff]  ;;  %v23728_v62 = vld [vmem:[#allocation74_spill] sm:$0xff] }
 0x872   : > { %8540 = vmatmul.mubr.f32.vlgmr.msra.gmra.mrb[20].mxu0 %v23724_v12  ;;  %v23738_v13 = vld [vmem:[#allocation106_spill] sm:$0xff]  ;;  %v23740_v12 = vand.u32 4294901760, %v20626_v3  ;;  %v23744_v3 = vand.u32 4294901760, %v20635_v51 }
 0x873   : > { %v21031_v2 = vadd.f32 %v11411_v54, %v20945_v18  ;;  %13945 = vmatpush1.bf16.msra.mxu0 %v23725_v56  ;;  %8545 = vmatprep.mubr.f32.mxu0 %v23635_v59  ;;  %v11412_v16 = vpop.f32.mrb[64].mxu1 }
 0x874   : > { %14385 = vmatpush3.bf16.msra.mxu1 %v14382_v63  ;;  %13947 = vmatprep.subr.bf16.mxu0 %v23726_v50  ;;  %v11413_v41 = vpop.f32.mrb[65].mxu1 }
 0x875   : > { %v11414_v34 = vadd.f32 %v11413_v41, %v11412_v16  ;;  %14387 = vmatprep.subr.bf16.mxu1 %v14386_v37 }
 0x876   : > { %8548 = vmatmul.mubr.f32.gmra.mrb[22].mxu0 %v23670_v19  ;;  %v23729_v19 = vld [vmem:[#allocation58_spill] sm:$0xff] }
 0x877   : > { %v21038_v35 = vadd.f32 %v11414_v34, %v20960_v38  ;;  %13949 = vmatpush1.bf16.msra.mxu0 %v23727_v31  ;;  %8553 = vmatprep.mubr.f32.mxu0 %v23635_v59  ;;  %v11415_v18 = vpop.f32.mrb[66].mxu1  ;;  %v23732_v38 = vld [vmem:[#allocation56_spill] sm:$0xff]  ;;  %v23741_v34 = vld [vmem:[#allocation114_spill] sm:$0xff] }
 0x878   : > { %14389 = vmatpush3.bf16.msra.mxu1 %v14386_v37  ;;  %13951 = vmatprep.subr.bf16.mxu0 %v23728_v62  ;;  %v11416_v54 = vpop.f32.mrb[67].mxu1  ;;  %v23730_v37 = vld [vmem:[#allocation55_spill] sm:$0xff] }
 0x879   : > { %v11417_v63 = vadd.f32 %v11416_v54, %v11415_v18  ;;  %14391 = vmatprep.subr.bf16.mxu1 %v23664_v20  ;;  %v23742_v18 = vand.u32 4294901760, %v20629_v28  ;;  %v23743_v54 = vand.u32 4294901760, %v20631_v36  ;;  %v23746_v36 = vand.u32 4294901760, %v20646_v58 }
 0x87a   : > { %8556 = vmatmul.mubr.f32.gmra.mrb[24].mxu0 %v23671_v40  ;;  %v23731_v40 = vld [vmem:[#allocation61_spill] sm:$0xff] }
 0x87b   : > { %v21046_v52 = vadd.f32 %v11417_v63, %v20974_v15  ;;  %12267 = vmatmul.mubr.f32.vlgmr.msra.gmra.mrb[84].mxu1 %v23687_v26  ;;  %13953 = vmatpush1.bf16.msra.mxu0 %v23729_v19  ;;  %v23735_v15 = vld [vmem:[#allocation63_spill] sm:$0xff]  ;;  %v13976_v63 = vpack.c.bf16 %v23743_v54, %v23742_v18  ;;  %v23752_v54 = vand.u32 4294901760, %v20670_v46  ;;  %v23757_v46 = vld [vmem:[#allocation97_spill] sm:$0xff] }
 0x87c   : > { %12269 = vmatprep.mubr.f32.mxu1 %v23688_v42  ;;  %14393 = vmatpush3.bf16.msra.mxu1 %v23664_v20  ;;  %v23733_v20 = vld [vmem:[#allocation98_spill] sm:$0xff] }
 0x87d   : > { %8561 = vmatprep.mubr.f32.mxu0 %v23635_v59  ;;  %13955 = vmatprep.subr.bf16.mxu0 %v23730_v37 }
 0x87e   : > { %8564 = vmatmul.mubr.f32.gmra.mrb[26].mxu0 %v23674_v57  ;;  %14395 = vmatprep.subr.bf16.mxu1 %v23673_v44  ;;  %v23734_v57 = vld [vmem:[#allocation101_spill] sm:$0xff] }
 0x87f   : > { %12270 = vmatmul.mubr.f32.gmra.mrb[86].mxu1 %v23699_v29  ;;  %13957 = vmatpush1.bf16.msra.mxu0 %v23731_v40 }
 0x880   : > { %14397 = vmatpush3.bf16.msra.mxu1 %v23673_v44  ;;  %12304 = vmatprep.mubr.f32.mxu1 %v23681_v55  ;;  %v23736_v44 = vld [vmem:[#allocation39_spill] sm:$0xff] }
 0x881   : > { %13959 = vmatprep.subr.bf16.mxu0 %v23732_v38  ;;  %14399 = vmatprep.subr.bf16.mxu1 %v23676_v4 }
 0x882   : > { %8666 = vmatprep.mubr.f32.mxu0 %v23635_v59 }
 0x883   : > { %13961 = vmatpush1.bf16.msra.mxu0 %v23733_v20 }
 0x884   : > { %14401 = vmatpush3.bf16.msra.mxu1 %v23676_v4  ;;  %13963 = vmatprep.subr.bf16.mxu0 %v23734_v57  ;;  %v23739_v4 = vand.u32 4294901760, %v20624_v8 }
 0x885   : > { %14403 = vmatprep.subr.bf16.mxu1 %v23677_v11 }
 0x886   : > { %v13974_v16 = vpack.c.bf16 %v23740_v12, %v23739_v4  ;;  %v23745_v4 = vand.u32 4294901760, %v20640_v6  ;;  %v23748_v6 = vand.u32 4294901760, %v20650_v47 }
 0x887   : > { %13965 = vmatpush1.bf16.msra.mxu0 %v23735_v15 }
 0x888   : > { %14405 = vmatpush3.bf16.msra.mxu1 %v23677_v11  ;;  %13967 = vmatprep.subr.bf16.mxu0 %v23736_v44  ;;  %v13978_v12 = vpack.c.bf16 %v23745_v4, %v23744_v3  ;;  %v23759_v4 = vld [vmem:[#allocation96_spill] sm:$0xff] }
 0x889   : > { %14407 = vmatprep.subr.bf16.mxu1 %v23678_v24 }
 0x88b   : > { %13969 = vmatpush1.bf16.msra.mxu0 %v23737_v27 }
 0x88c   : > { %14409 = vmatpush3.bf16.msra.mxu1 %v23678_v24  ;;  %v11450_v1 = vpop.f32.mrb[68].mxu1  ;;  %13971 = vmatprep.subr.bf16.mxu0 %v23738_v13 }
 0x88d   : > { %v11451_v41 = vpop.f32.mrb[69].mxu1  ;;  %14411 = vmatprep.subr.bf16.mxu1 %v23679_v17 }
 0x88e   : > { %v11452_v11 = vadd.f32 %v11451_v41, %v11450_v1  ;;  %v23749_v41 = vand.u32 4294901760, %v20655_v25 }
 0x88f   : > { %13973 = vmatpush1.bf16.msra.mxu0 %v23741_v34 }
 0x890   : > { %v21085_v24 = vadd.f32 %v11452_v11, %v21022_v14  ;;  %14413 = vmatpush3.bf16.msra.mxu1 %v23679_v17  ;;  %v11453_v8 = vpop.f32.mrb[70].mxu1  ;;  %13975 = vmatprep.subr.bf16.mxu0 %v13974_v16  ;;  %v23747_v17 = vand.u32 4294901760, %v20648_v61  ;;  %v23750_v61 = vand.u32 4294901760, %v20661_v30  ;;  %v23754_v30 = vand.u32 4294901760, %v20679_v21 }
 0x891   : > { %v11454_v1 = vpop.f32.mrb[71].mxu1  ;;  %14415 = vmatprep.subr.bf16.mxu1 %v23680_v9  ;;  %v23761_v21 = vand.u32 4294901760, %v20698_v5  ;;  %v23770_v5 = vand.u32 4294901760, %v20728_v53 }
 0x892   : > { %8670 = vmatmul.mubr.f32.vlgmr.msra.gmra.mrb[20].mxu0 %v23675_v48  ;;  %v11455_v28 = vadd.f32 %v11454_v1, %v11453_v8  ;;  %v13980_v14 = vpack.c.bf16 %v23747_v17, %v23746_v36  ;;  %v13982_v48 = vpack.c.bf16 %v23749_v41, %v23748_v6  ;;  %v23762_v1 = vld [vmem:[#allocation71_spill] sm:$0xff]  ;;  %v23764_v36 = vld [vmem:[#allocation100_spill] sm:$0xff]  ;;  %v23768_v41 = vand.u32 4294901760, %v20720_v22 }
 0x893   : > { %13977 = vmatpush1.bf16.msra.mxu0 %v13976_v63  ;;  %8675 = vmatprep.mubr.f32.mxu0 %v23635_v59  ;;  %v23765_v17 = vand.u32 4294901760, %v23764_v36 }
 0x894   : > { %v9905_v16 = vadd.f32 %v11455_v28, %v21031_v2  ;;  %14417 = vmatpush3.bf16.msra.mxu1 %v23680_v9  ;;  %v11456_v51 = vpop.f32.mrb[72].mxu1  ;;  %13979 = vmatprep.subr.bf16.mxu0 %v13978_v12  ;;  %v23751_v9 = vand.u32 4294901760, %v20663_v49  ;;  %v23755_v49 = vld [vmem:[#allocation72_spill] sm:$0xff]  ;;  %v23760_v12 = vand.u32 4294901760, %v23759_v4  ;;  %v23763_v28 = vand.u32 4294901760, %v23762_v1 }
 0x895   : > { %v11457_v11 = vpop.f32.mrb[73].mxu1  ;;  %14419 = vmatprep.subr.bf16.mxu1 %v23682_v7 }
 0x896   : > { %8679 = vmatmul.mubr.f32.gmra.mrb[22].mxu0 %v23693_v60  ;;  %v11458_v58 = vadd.f32 %v11457_v11, %v11456_v51  ;;  %v13984_v2 = vpack.c.bf16 %v23751_v9, %v23750_v61  ;;  %v23753_v60 = vand.u32 4294901760, %v20672_v10  ;;  %v23758_v10 = vand.u32 4294901760, %v23757_v46  ;;  %v23771_v11 = vld [vmem:[#allocation95_spill] sm:$0xff] }
 0x897   : > { %13981 = vmatpush1.bf16.msra.mxu0 %v13980_v14  ;;  %8684 = vmatprep.mubr.f32.mxu0 %v23635_v59  ;;  %v23766_v14 = vld [vmem:[#allocation49_spill] sm:$0xff]  ;;  %v23773_v9 = vand.u32 4294901760, %v20748_v32 }
 0x898   : > { %v9912_v18 = vadd.f32 %v11458_v58, %v21038_v35  ;;  %14421 = vmatpush3.bf16.msra.mxu1 %v23682_v7  ;;  %v11459_v47 = vpop.f32.mrb[74].mxu1  ;;  %13983 = vmatprep.subr.bf16.mxu0 %v13982_v48  ;;  %v13986_v63 = vpack.c.bf16 %v23753_v60, %v23752_v54  ;;  %v23756_v35 = vand.u32 4294901760, %v23755_v49  ;;  %v23767_v51 = vand.u32 4294901760, %v23766_v14  ;;  %v23777_v60 = vld [vmem:[#allocation115_spill] sm:$0xff] }
 0x899   : > { %v11460_v25 = vpop.f32.mrb[75].mxu1  ;;  %v23772_v58 = vand.u32 4294901760, %v23771_v11  ;;  %v23778_v22 = vand.u32 4294901760, %v23777_v60 }
 0x89a   : > { %8688 = vmatmul.mubr.f32.gmra.mrb[24].mxu0 %v23694_v43  ;;  %v11461_v8 = vadd.f32 %v11460_v25, %v11459_v47  ;;  %v13988_v3 = vpack.c.bf16 %v23756_v35, %v23754_v30  ;;  %v13990_v43 = vpack.c.bf16 %v23760_v12, %v23758_v10  ;;  %v13994_v6 = vpack.c.bf16 %v23767_v51, %v23765_v17  ;;  %v23775_v25 = vld [vmem:[#allocation108_spill] sm:$0xff]  ;;  %v23785_v51 = vld [vmem:[#allocation179_spill] sm:$0xff] }
 0x89b   : > { %12305 = vmatmul.mubr.f32.vlgmr.msra.gmra.mrb[84].mxu1 %v23687_v26  ;;  %13985 = vmatpush1.bf16.msra.mxu0 %v13984_v2  ;;  %v13998_v61 = vpack.c.bf16 %v23772_v58, %v23770_v5  ;;  %v23774_v2 = vand.u32 4294901760, %v20750_v39  ;;  %v23776_v54 = vand.u32 4294901760, %v23775_v25  ;;  %v23787_v58 = vld [vmem:[#allocation170_spill] sm:$0xff] }
 0x89c   : > { %v9919_v7 = vadd.f32 %v11461_v8, %v21046_v52  ;;  %12307 = vmatprep.mubr.f32.mxu1 %v23688_v42  ;;  %8693 = vmatprep.mubr.f32.mxu0 %v23635_v59  ;;  %v13992_v52 = vpack.c.bf16 %v23763_v28, %v23761_v21  ;;  %v23780_v8 = vld [vmem:[#allocation131_spill] sm:$0xff] }
 0x89d   : > { %13987 = vmatprep.subr.bf16.mxu0 %v13986_v63  ;;  %v14000_v47 = vpack.c.bf16 %v23774_v2, %v23773_v9  ;;  %v14002_v63 = vpack.c.bf16 %v23778_v22, %v23776_v54  ;;  %v23781_v53 = vand.u32 4294901760, %v23780_v8  ;;  %v23788_v2 = vld [vmem:[#allocation79_spill] sm:$0xff] }
 0x89e   : > { %8697 = vmatmul.mubr.f32.gmra.mrb[26].mxu0 %v23700_v23  ;;  %v23769_v23 = vand.u32 4294901760, %v20722_v45  ;;  %v23779_v45 = vand.u32 4294901760, %v20790_v33 }
 0x89f   : > { %12308 = vmatmul.mubr.f32.gmra.mrb[86].mxu1 %v23699_v29  ;;  %13989 = vmatpush1.bf16.msra.mxu0 %v13988_v3 }
 0x8a0   : > { %13991 = vmatprep.subr.bf16.mxu0 %v13990_v43  ;;  %8863 = vmatprep.mubr.f32.mxu0 %v23635_v59  ;;  %v13996_v48 = vpack.c.bf16 %v23769_v23, %v23768_v41  ;;  %v14004_v30 = vpack.c.bf16 %v23781_v53, %v23779_v45  ;;  %v23786_v23 = vld [vmem:[#allocation80_spill] sm:$0xff]  ;;  %v23790_v53 = vld [vmem:[#allocation173_spill] sm:$0xff] }
 0x8a3   : > { %13993 = vmatpush1.bf16.msra.mxu0 %v13992_v52 }
 0x8a4   : > { %13995 = vmatprep.subr.bf16.mxu0 %v13994_v6 }
 0x8a7   : > { %13997 = vmatpush1.bf16.msra.mxu0 %v13996_v48 }
 0x8a8   : > { %13999 = vmatprep.subr.bf16.mxu0 %v13998_v61 }
 0x8ab   : > { %14001 = vmatpush1.bf16.msra.mxu0 %v14000_v47 }
 0x8ac   : > { %v11494_v49 = vpop.f32.mrb[76].mxu1  ;;  %14003 = vmatprep.subr.bf16.mxu0 %v14002_v63  ;;  %v23789_v63 = vld [vmem:[#allocation69_spill] sm:$0xff] }
 0x8ad   : > { %v11495_v35 = vpop.f32.mrb[77].mxu1 }
 0x8ae   : > { %v11496_v3 = vadd.f32 %v11495_v35, %v11494_v49  ;;  %v23791_v35 = vld [vmem:[#allocation66_spill] sm:$0xff] }
 0x8af   : > { %14005 = vmatpush1.bf16.msra.mxu0 %v14004_v30 }
 0x8b0   : > { %v11497_v32 = vpop.f32.mrb[78].mxu1  ;;  %14007 = vmatprep.subr.bf16.mxu0 %v23719_v0  ;;  %v10023_v39 = vadd.f32 %v11496_v3, %v21085_v24 }
 0x8b1   : > { %v11498_v46 = vpop.f32.mrb[79].mxu1 }
 0x8b2   : > { %8865 = vmatmul.mubr.f32.vlgmr.msra.gmra.mrb[20].mxu0 %v23681_v55  ;;  %v11499_v10 = vadd.f32 %v11498_v46, %v11497_v32  ;;  %v23792_v32 = vld [vmem:[#allocation47_spill] sm:$0xff] }
 0x8b3   : > { %14009 = vmatpush1.bf16.msra.mxu0 %v23725_v56  ;;  %8870 = vmatprep.mubr.f32.mxu0 %v23635_v59 }
 0x8b4   : > { %v11500_v33 = vpop.f32.mrb[80].mxu1  ;;  %14011 = vmatprep.subr.bf16.mxu0 %v23726_v50  ;;  %v10030_v4 = vadd.f32 %v11499_v10, %v9905_v16 }
 0x8b5   : > { %v11501_v12 = vpop.f32.mrb[81].mxu1 }
 0x8b6   : > { %8872 = vmatmul.mubr.f32.gmra.mrb[22].mxu0 %v23687_v26  ;;  %v11502_v43 = vadd.f32 %v11501_v12, %v11500_v33 }
 0x8b7   : > { %14013 = vmatpush1.bf16.msra.mxu0 %v23727_v31  ;;  %8877 = vmatprep.mubr.f32.mxu0 %v23635_v59 }
 0x8b8   : > { %v11503_v0 = vpop.f32.mrb[82].mxu1  ;;  %14015 = vmatprep.subr.bf16.mxu0 %v23728_v62  ;;  %v10037_v24 = vadd.f32 %v11502_v43, %v9912_v18  ;;  %v23784_v18 = vld [vmem:[#allocation77_spill] sm:$0xff] }
 0x8b9   : > { %v11504_v21 = vpop.f32.mrb[83].mxu1 }
 0x8ba   : > { %8879 = vmatmul.mubr.f32.gmra.mrb[24].mxu0 %v23688_v42  ;;  %v11505_v56 = vadd.f32 %v11504_v21, %v11503_v0  ;;  %v23794_v0 = vld [vmem:[#allocation43_spill] sm:$0xff]  ;;  %v23795_v21 = vld [vmem:[#allocation78_spill] sm:$0xff] }
 0x8bb   : > { %14017 = vmatpush1.bf16.msra.mxu0 %v23729_v19  ;;  %8884 = vmatprep.mubr.f32.mxu0 %v23635_v59 }
 0x8bc   : > { %14019 = vmatprep.subr.bf16.mxu0 %v23730_v37  ;;  %v10044_v50 = vadd.f32 %v11505_v56, %v9919_v7 }
 0x8be   : > { %8886 = vmatmul.mubr.f32.gmra.mrb[26].mxu0 %v23699_v29 }
 0x8bf   : > { %14021 = vmatpush1.bf16.msra.mxu0 %v23731_v40  ;;  %8988 = vmatprep.mubr.f32.mxu0 %v23635_v59 }
 0x8c0   : > { %14023 = vmatprep.subr.bf16.mxu0 %v23732_v38 }
 0x8c3   : > { %14025 = vmatpush1.bf16.msra.mxu0 %v23733_v20 }
 0x8c4   : > { %14027 = vmatprep.subr.bf16.mxu0 %v23734_v57 }
 0x8c7   : > { %14029 = vmatpush1.bf16.msra.mxu0 %v23735_v15 }
 0x8c8   : > { %14031 = vmatprep.subr.bf16.mxu0 %v23736_v44 }
 0x8cb   : > { %14033 = vmatpush1.bf16.msra.mxu0 %v23737_v27 }
 0x8cc   : > { %14035 = vmatprep.subr.bf16.mxu0 %v23738_v13 }
 0x8cf   : > { %14037 = vmatpush1.bf16.msra.mxu0 %v23741_v34  ;;  %v23783_v34 = vld [vmem:[#allocation73_spill] sm:$0xff] }
 0x8d2   : > { %8990 = vmatmul.mubr.f32.vlgmr.msra.gmra.mrb[20].mxu0 %v23681_v55 }
 0x8d3   : > { %8995 = vmatprep.mubr.f32.mxu0 %v23635_v59 }
 0x8d6   : > { %8997 = vmatmul.mubr.f32.gmra.mrb[22].mxu0 %v23687_v26 }
 0x8d7   : > { %9002 = vmatprep.mubr.f32.mxu0 %v23635_v59 }
 0x8da   : > { %9004 = vmatmul.mubr.f32.gmra.mrb[24].mxu0 %v23688_v42  ;;  %v23782_v42 = vld [vmem:[#allocation52_spill] sm:$0xff] }
 0x8db   : > { %9009 = vmatprep.mubr.f32.mxu0 %v23635_v59 }
 0x8de   : > { %9011 = vmatmul.mubr.f32.gmra.mrb[26].mxu0 %v23699_v29 }
 0x96e   : > { %v12306_v31 = vpop.f32.mrb[84].mxu1 }
 0x96f   : > { %v14438_v62 = vadd.f32 %v12306_v31, %v10030_v4  ;;  %v10795_v19 = vpop.f32.mrb[85].mxu1  ;;  %v23793_v4 = vld [vmem:[#allocation104_spill] sm:$0xff] }
 0x970   : > { %v14439_v37 = vadd.f32 %v10795_v19, %v10023_v39 }
 0x971   : > { %v10836_v40 = vrot.slane %v14438_v62, 6 }
 0x972   : > { %v10831_v38 = vrot.slane %v14439_v37, 6  ;;  %v12309_v20 = vpop.f32.mrb[86].mxu1 }
 0x973   : > { %v14440_v55 = vadd.f32 %v12309_v20, %v10044_v50  ;;  %v10807_v57 = vpop.f32.mrb[87].mxu1  ;;  %v23796_v50 = vld [vmem:[#allocation83_spill] sm:$0xff] }
 0x974   : > { %v10837_v15 = vsel %vm2124_vm13, %v10831_v38, %v10836_v40  ;;  %10867 = vst [vmem:[#allocation2 + $0x10] sm:$0xfc] %v10831_v38  ;;  %v14441_v26 = vadd.f32 %v10807_v57, %v10037_v24  ;;  %v23797_v57 = vld [vmem:[#allocation46_spill] sm:$0xff] }
 0x975   : > { %v10848_v44 = vrot.slane %v14440_v55, 6  ;;  %v10918_v59 = vmul.f32 %v10837_v15, %v23782_v42 }
 0x976   : > { %v10842_v27 = vrot.slane %v14441_v26, 6 }
 0x977   : > { %10879 = vst [vmem:[#allocation2 + $0x70] sm:$0x3] %v10848_v44  ;;  %v10928_v1 = vrot.slane %v10918_v59, 3 }
 0x978   : > { %v10843_v29 = vsel %vm2124_vm13, %v10836_v40, %v10842_v27  ;;  %v10849_v13 = vsel %vm2124_vm13, %v10842_v27, %v10848_v44 }
 0x979   : > { %v10919_v16 = vmul.f32 %v10843_v29, %v23783_v34  ;;  %v21200_v7 = vmul.f32 %v10849_v13, %v23784_v18  ;;  %v23798_v18 = vld [vmem:[#allocation22_spill] sm:$0xff] }
 0x97b   : > { %v10930_v28 = vrot.slane %v10919_v16, 3  ;;  %v10932_v52 = vrot.slane %v21200_v7, 3  ;;  %v10912_v60 = vld [vmem:[#allocation2 + $0x10] sm:$0xf8] }
 0x97c   : > { %v10917_v39 = vmul.f32 %v10912_v60, %v23792_v32 }
 0x97d   : > { %v10931_v36 = vsel %vm2258_vm0, %v10928_v1, %v10930_v28  ;;  %v10933_v17 = vsel %vm2258_vm0, %v10930_v28, %v10932_v52 }
 0x97e   : > { %v10927_v40 = vrot.slane %v10917_v39, 3  ;;  %v10916_v29 = vld [vmem:[#allocation2 + $0x70] sm:$0x7] }
 0x980   : > { %v10929_v42 = vsel %vm2258_vm0, %v10927_v40, %v10928_v1  ;;  %v23802_v1 = vld [vmem:[#allocation37_spill] sm:$0xff] }
 0x9a5   : > { %v8991_v14 = vpop.f32.mrb[20].mxu0 }
 0x9a6   : > { %v14430_v6 = vadd.f32 %v8991_v14, %v23785_v51  ;;  %v8993_v41 = vpop.f32.mrb[21].mxu0  ;;  %v23799_v51 = vld [vmem:[#allocation51_spill] sm:$0xff] }
 0x9a7   : > { %v14431_v48 = vadd.f32 %v8993_v41, %v23786_v23 }
 0x9a8   : > { %v10829_v5 = vrot.slane %v14430_v6, 6  ;;  %v10921_v6 = vmul.f32 %v10916_v29, %v23799_v51 }
 0x9a9   : > { %v8998_v11 = vpop.f32.mrb[22].mxu0 }
 0x9aa   : > { %10865 = vst [vmem:[#allocation2] sm:$0xfc] %v10829_v5  ;;  %v14432_v61 = vadd.f32 %v8998_v11, %v23787_v58  ;;  %v9000_v9 = vpop.f32.mrb[23].mxu0 }
 0x9ab   : > { %v14433_v47 = vadd.f32 %v9000_v9, %v23788_v2 }
 0x9ac   : > { %v10832_v25 = vrot.slane %v14432_v61, 6 }
 0x9ad   : > { %v9005_v54 = vpop.f32.mrb[24].mxu0 }
 0x9ae   : > { %v10833_v22 = vsel %vm2124_vm13, %v10829_v5, %v10832_v25  ;;  %v14434_v45 = vadd.f32 %v9005_v54, %v23789_v63  ;;  %v9007_v8 = vpop.f32.mrb[25].mxu0  ;;  %v23800_v5 = vld [vmem:[#allocation38_spill] sm:$0xff]  ;;  %v23803_v54 = vld [vmem:[#allocation36_spill] sm:$0xff] }
 0x9af   : > { %v14435_v30 = vadd.f32 %v9007_v8, %v23790_v53  ;;  %v10886_v3 = vmul.f32 %v10833_v22, %v23791_v35  ;;  %v23804_v53 = vld [vmem:[#allocation35_spill] sm:$0xff] }
 0x9b0   : > { %v10838_v49 = vrot.slane %v14434_v45, 6 }
 0x9b1   : > { %v9012_v46 = vpop.f32.mrb[26].mxu0  ;;  %v10880_v10 = vld [vmem:[#allocation2] sm:$0xfe]  ;;  %v10896_v37 = vrot.slane %v10886_v3, 1 }
 0x9b2   : > { %v10839_v33 = vsel %vm2124_vm13, %v10832_v25, %v10838_v49  ;;  %v14436_v12 = vadd.f32 %v9012_v46, %v23793_v4  ;;  %v9014_v43 = vpop.f32.mrb[27].mxu0  ;;  %v10885_v24 = vmul.f32 %v10880_v10, %v23794_v0 }
 0x9b3   : > { %v14437_v56 = vadd.f32 %v9014_v43, %v23795_v21  ;;  %v10887_v31 = vmul.f32 %v10839_v33, %v23796_v50 }
 0x9b4   : > { %v10844_v62 = vrot.slane %v14436_v12, 6  ;;  %v10895_v19 = vrot.slane %v10885_v24, 1 }
 0x9b5   : > { %v10898_v38 = vrot.slane %v10887_v31, 1 }
 0x9b6   : > { %v10845_v20 = vsel %vm2124_vm13, %v10838_v49, %v10844_v62  ;;  %10877 = vst [vmem:[#allocation2 + $0x60] sm:$0x3] %v10844_v62  ;;  %v10897_v55 = vsel %vm2208_vm14, %v10895_v19, %v10896_v37 }
 0x9b7   : > { %v10888_v15 = vmul.f32 %v10845_v20, %v23797_v57  ;;  %v10899_v26 = vsel %vm2208_vm14, %v10896_v37, %v10898_v38  ;;  %v10908_v44 = vadd.f32 %v14431_v48, %v10897_v55  ;;  %v23801_v48 = vld [vmem:[#allocation44_spill] sm:$0xff] }
 0x9b8   : > { %v10909_v27 = vadd.f32 %v14433_v47, %v10899_v26  ;;  %v10934_v47 = vrot.slane %v10921_v6, 3 }
 0x9b9   : > { %v10900_v59 = vrot.slane %v10888_v15, 1  ;;  %v10940_v13 = vadd.f32 %v10929_v42, %v10908_v44 }
 0x9ba   : > { %v10941_v34 = vadd.f32 %v10931_v36, %v10909_v27  ;;  %v10935_v63 = vsel %vm2258_vm0, %v10932_v52, %v10934_v47 }
 0x9bb   : > { %v10901_v16 = vsel %vm2208_vm14, %v10898_v38, %v10900_v59  ;;  %v10950_v28 = vadd.f32 %v23798_v18, %v10940_v13 }
 0x9bc   : > { %v10910_v14 = vadd.f32 %v14435_v30, %v10901_v16  ;;  %v10951_v41 = vadd.f32 %v23798_v18, %v10941_v34 }
 0x9bd   : > { %v10884_v23 = vld [vmem:[#allocation2 + $0x60] sm:$0x1]  ;;  %v10954_v11 = vadd.f32 %v23800_v5, %v10950_v28  }
 0x9be   : > { %v10889_v58 = vmul.f32 %v10884_v23, %v23801_v48  ;;  %v10942_v61 = vadd.f32 %v10933_v17, %v10910_v14  ;;  %v10955_v9 = vadd.f32 %v23802_v1, %v10951_v41  }
 0x9bf   : > { %v23808_v13 = vmov %v10954_v11  ;;  %10958 = vst [vmem:[#allocation14] sm:$0xff] (%p284_p6), %v10954_v11 }
 0x9c0   : > { %v10902_v2 = vrot.slane %v10889_v58, 1  ;;  %v10952_v36 = vadd.f32 %v23798_v18, %v10942_v61  ;;  %v23807_v14 = vmov %v10955_v9  ;;  %10959 = vst [vmem:[#allocation14 + $0x8] sm:$0xff] (%p284_p6), %v10955_v9 }
 0x9c2   : > { %v10903_v25 = vsel %vm2208_vm14, %v10900_v59, %v10902_v2  ;;  %v10956_v60 = vadd.f32 %v23803_v54, %v10952_v36  }
 0x9c3   : > { %v10911_v22 = vadd.f32 %v14437_v56, %v10903_v25 }
 0x9c4   : > { %v23806_v15 = vmov %v10956_v60  ;;  %10960 = vst [vmem:[#allocation14 + $0x10] sm:$0xff] (%p284_p6), %v10956_v60 }
 0x9c5   : > { %v10943_v45 = vadd.f32 %v10935_v63, %v10911_v22  ;;  %286 = sbr.rel (!%p284_p6) target bundleno = 126 (0x7e), region = 87 }
 0x9c7   : > { %v10953_v8 = vadd.f32 %v23798_v18, %v10943_v45 }
 0x9c9   : > { %v10957_v30 = vadd.f32 %v23804_v53, %v10953_v8  }
 0x9cb   : > { %v23805_v17 = vmov %v10957_v30  ;;  %10961 = vst [vmem:[#allocation14 + $0x18] sm:$0xff] (%p284_p6), %v10957_v30 }
 0x9cc   :  { %14933 = shalt.err (!%p14930_p11)
}
 0x9cd   :  { %s14934_s12 = scalar_lea.hbm %s21276_s9, 512 }
 0x9ce   :  { %p14935_p12 = scmp.ne.s32.totalorder %s21276_s9, %s14934_s12  ;;  %p14938_p13 = scmp.lt.u32.totalorder %s14934_s12, %s21276_s9 }
 0x9d0   :  { %p14940_p0 = pnand %p14938_p13, %p14935_p12 }
 0x9d2   :  { %14943 = shalt.err (!%p14940_p0)
}
 0x9d3   :  { %10973 = dma.vmem_to_hbm [thread:$0]  %s10968_s8, 512, %s21276_s9, [#allocation5], %s14999_s3, %s14999_s3, %s15000_s24  }
 0x9d4   :  { %14972 = dma.done.wait [#allocation5], 512  }
 0x9d5   :  { %14973 = vsyncadd [#allocation5], 4294966784 }
 0x9d6   :  { %10977 = vsyncpa [#allocation4], 1 }
 0x9d7   :  { %10978 = vsyncpa [#allocation7], 1 }
 0x9d8   :  { %10979 = vsyncpa [#allocation10], 1 }
 0x9d9   :  { %10980 = vsyncpa [#allocation13], 1 }
 0x9da   :  { %10981 = vsyncpa [#allocation5], 1 }

</bundles_post_ra>
